<compile_context>
chip_gen: v7x
topology: tpu7x:2x2x1
jax: 0.10.0
libtpu: 0.0.40
codegen_flags: <defaults>
</compile_context>

<pallas_src>
import jax
import jax.numpy as jnp
from jax.experimental import pallas as pl
from jax.experimental.pallas import tpu as pltpu


# ----------------------------- Pallas kernels ------------------------------

def _make_conv_kernel(M, W_in, H_out, W_out, Cin, Cout, fuse_pre_bn):
    """Conv3d(3x3x3, valid) for one output depth plane.

    The three consecutive input depth planes arrive as (H_in*W_in, Cin)
    channels-last tiles.  im2col slab row r (r = h*W_in + w), column block
    (kd, kh, kw) holds plane[kd][r + kh*W_in + kw]; a single
    (M, 27*Cin) @ (27*Cin, Cout) MXU matmul (bf16 operands, f32 accumulation)
    produces every output row at once.  Bias is added to the value, the valid
    (H_out, W_out) corner is extracted densely, and BN partial statistics are
    taken from the same value before the single store.
    """

    def kernel(*refs):
        if fuse_pre_bn:
            (p0_ref, p1_ref, p2_ref, w_ref, b_ref, ps_ref, psh_ref,
             y_ref, s_ref, slab_ref) = refs
        else:
            p0_ref, p1_ref, p2_ref, w_ref, b_ref, y_ref, s_ref, slab_ref = refs
            ps_ref = psh_ref = None

        planes = []
        for p_ref in (p0_ref, p1_ref, p2_ref):
            p = p_ref[0, 0].astype(jnp.float32)               # (H_in*W_in, Cin)
            if fuse_pre_bn:
                # Previous layer's BN affine + ReLU fused into this layer's
                # input path (the stored y1 is that layer's raw conv output).
                p = jnp.maximum(p * ps_ref[...] + psh_ref[...], 0.0)
            planes.append(p)

        # Build the im2col slab in VMEM scratch: 27 row-shifted column blocks.
        for kd in range(3):
            for kh in range(3):
                for kw in range(3):
                    t = (kd * 3 + kh) * 3 + kw
                    off = kh * W_in + kw
                    slab_ref[:, t * Cin:(t + 1) * Cin] = planes[kd][off:off + M, :]

        # One K-folded MXU matmul; bias folded into the accumulator value.
        acc = jnp.dot(slab_ref[...].astype(jnp.bfloat16), w_ref[...],
                      preferred_element_type=jnp.float32)       # (M, Cout) f32
        acc = acc + b_ref[...]

        # Dense valid-corner extraction: output row h*W_out + w <- acc row h*W_in + w.
        dense = jnp.concatenate(
            [acc[h * W_in:h * W_in + W_out, :] for h in range(H_out)], axis=0)

        y_ref[0, 0] = dense.astype(y_ref.dtype)                 # single store
        # Per-step BatchNorm partials (exact: only valid voxels are present).
        s_ref[0, 0, 0:1, :] = jnp.sum(dense, axis=0, keepdims=True)
        s_ref[0, 0, 1:2, :] = jnp.sum(dense * dense, axis=0, keepdims=True)

    return kernel


def _bn_relu_kernel(y_ref, scale_ref, shift_ref, o_ref):
    # Lane-dense elementwise: y_ref (tr, 128), scale/shift (1, 128).
    o_ref[...] = jnp.maximum(y_ref[...] * scale_ref[...] + shift_ref[...], 0.0)


# ----------------------------- Pallas wrappers ------------------------------

def _conv3d_bias_stats(x_planes, hw_in, w, b, pre_scale=None, pre_shift=None,
                       out_dtype=jnp.float32):
    """One conv layer.  x_planes: (N, D_in, H_in*W_in, Cin) channels-last planes.
    w: PyTorch layout (Cout, Cin, 3, 3, 3); b: (Cout,).
    Returns dense y: (N, D_out, H_out*W_out, Cout) and stats (2, Cout)."""
    N, D_in, HW_in, Cin = x_planes.shape
    H_in, W_in = hw_in
    assert HW_in == H_in * W_in
    D_out, H_out, W_out = D_in - 2, H_in - 2, W_in - 2
    Cout = w.shape[0]
    K = 27 * Cin
    M = HW_in - (2 * W_in + 2)        # last row that can ever be valid + 1

    # (Cout, Cin, kd, kh, kw) -> (kd, kh, kw, Cin, Cout) -> one 2-D weight slab.
    w2d = jnp.transpose(w, (2, 3, 4, 1, 0)).reshape(K, Cout).astype(jnp.bfloat16)
    b_row = b.reshape(1, Cout).astype(jnp.float32)

    fuse = pre_scale is not None
    # Depth halo expressed as three BlockSpecs over the same array (d, d+1, d+2).
    # TODO(synk): for very large H*W, reuse overlapping planes via manual
    # make_async_copy double-buffering instead of re-fetching the 2-plane halo.
    inputs = [x_planes, x_planes, x_planes]
    in_specs = [pl.BlockSpec((1, 1, HW_in, Cin),
                             lambda n, d, kd=kd: (n, d + kd, 0, 0))
                for kd in range(3)]
    inputs += [w2d, b_row]
    in_specs += [pl.BlockSpec((K, Cout), lambda n, d: (0, 0)),
                 pl.BlockSpec((1, Cout), lambda n, d: (0, 0))]
    if fuse:
        inputs += [pre_scale.reshape(1, Cin).astype(jnp.float32),
                   pre_shift.reshape(1, Cin).astype(jnp.float32)]
        in_specs += [pl.BlockSpec((1, Cin), lambda n, d: (0, 0)),
                     pl.BlockSpec((1, Cin), lambda n, d: (0, 0))]

    y, s = pl.pallas_call(
        _make_conv_kernel(M, W_in, H_out, W_out, Cin, Cout, fuse),
        out_shape=(jax.ShapeDtypeStruct((N, D_out, H_out * W_out, Cout), out_dtype),
                   jax.ShapeDtypeStruct((N, D_out, 2, Cout), jnp.float32)),
        grid=(N, D_out),
        in_specs=in_specs,
        out_specs=(pl.BlockSpec((1, 1, H_out * W_out, Cout),
                                lambda n, d: (n, d, 0, 0)),
                   pl.BlockSpec((1, 1, 2, Cout), lambda n, d: (n, d, 0, 0))),
        scratch_shapes=[pltpu.VMEM((M, K), jnp.float32)],     # im2col slab
        compiler_params=pltpu.CompilerParams(
            dimension_semantics=("parallel", "parallel")),
    )(*inputs)
    return y, jnp.sum(s, axis=(0, 1))


def _bn_relu_lane_dense(y2d, scale, shift):
    """Fused BN affine + ReLU on a dense (M, C) activation, computed on a packed
    (M*C/128, 128) view so every VPU op and store uses all 128 lanes."""
    M, C = y2d.shape
    assert (M * C) % 128 == 0 and 128 % C == 0
    L = 128
    rows = (M * C) // L
    reps = L // C
    y_v = y2d.astype(jnp.float32).reshape(rows, L)
    scale_row = jnp.tile(scale.astype(jnp.float32), reps).reshape(1, L)
    shift_row = jnp.tile(shift.astype(jnp.float32), reps).reshape(1, L)

    tr = rows
    for cand in range(min(rows, 1024), 7, -1):     # biggest divisor, mult of 8
        if rows % cand == 0 and cand % 8 == 0:
            tr = cand
            break

    out = pl.pallas_call(
        _bn_relu_kernel,
        out_shape=jax.ShapeDtypeStruct((rows, L), jnp.float32),
        grid=(rows // tr,),
        in_specs=[pl.BlockSpec((tr, L), lambda i: (i, 0)),
                  pl.BlockSpec((1, L), lambda i: (0, 0)),
                  pl.BlockSpec((1, L), lambda i: (0, 0))],
        out_specs=pl.BlockSpec((tr, L), lambda i: (i, 0)),
        compiler_params=pltpu.CompilerParams(dimension_semantics=("parallel",)),
    )(y_v, scale_row, shift_row)
    return out.reshape(M, C)


# ------------------------------ glue (plain JAX) ----------------------------

def _bn_scale_shift(stats, count, gamma, beta, eps):
    # TODO(synk): switch to centered/Welford partials before production voxel
    # counts (E[y^2]-E[y]^2 cancels catastrophically for large means).
    mean = stats[0] / count
    var = stats[1] / count - mean * mean          # biased var (PyTorch BN train)
    scale = gamma.astype(jnp.float32) / jnp.sqrt(var + eps)
    shift = beta.astype(jnp.float32) - mean * scale
    return scale, shift


def double_convolution(x_ncdhw, params, eps=1e-5):
    """Forward pass of DoubleConvolution. Input/output are NCDHW (PyTorch)."""
    N, Cin, D, H, W = x_ncdhw.shape
    C2 = params["w2"].shape[0]
    D1, H1, W1 = D - 2, H - 2, W - 2
    D2, H2, W2 = D - 4, H - 4, W - 4

    # NCDHW -> (N, D, H*W, C) channels-last depth planes.
    x = jnp.transpose(x_ncdhw, (0, 2, 3, 4, 1)).reshape(N, D, H * W, Cin)
    x = x.astype(jnp.float32)

    # Layer 1: conv + bias + BN partial stats; dense bf16 output (half HBM traffic).
    y1, s1 = _conv3d_bias_stats(x, (H, W), params["w1"], params["b1"],
                                out_dtype=jnp.bfloat16)
    scale1, shift1 = _bn_scale_shift(s1, N * D1 * H1 * W1,
                                     params["g1"], params["be1"], eps)

    # Layer 2: layer-1's BN affine + ReLU fused into the conv kernel's input
    # path, so the intermediate activation makes exactly one HBM round trip.
    y2, s2 = _conv3d_bias_stats(y1, (H1, W1), params["w2"], params["b2"],
                                pre_scale=scale1, pre_shift=shift1,
                                out_dtype=jnp.float32)
    scale2, shift2 = _bn_scale_shift(s2, N * D2 * H2 * W2,
                                     params["g2"], params["be2"], eps)

    # Final BN affine + ReLU, lane-dense (conv-2 output is already dense/valid).
    out = _bn_relu_lane_dense(y2.reshape(N * D2 * H2 * W2, C2), scale2, shift2)
    out = out.reshape(N, D2, H2, W2, C2)
    # TODO(synk): at production sizes fold this NDHWC->NCDHW into the BN+ReLU
    # kernel's out_spec instead of an XLA transpose (64 KB here, negligible).
    return jnp.transpose(out, (0, 4, 1, 2, 3))


# ------------------------------ pure-JAX reference ---------------------------

def _ref_layer(x, w, b, gamma, beta, eps=1e-5):
    wk = jnp.transpose(w, (2, 3, 4, 1, 0))          # DHWIO
    y = jax.lax.conv_general_dilated(
        x, wk, window_strides=(1, 1, 1), padding="VALID",
        dimension_numbers=("NDHWC", "DHWIO", "NDHWC"))
    y = y + b
    mean = jnp.mean(y, axis=(0, 1, 2, 3))
    var = jnp.mean((y - mean) ** 2, axis=(0, 1, 2, 3))
    y = (y - mean) / jnp.sqrt(var + eps) * gamma + beta
    return jnp.maximum(y, 0.0)


# ----------------------------------- main ------------------------------------

if __name__ == "__main__":
    key = jax.random.PRNGKey(0)
    N, Cin, D, H, W = 2, 4, 12, 12, 12
    Cmid, Cout = 8, 16
    ks = jax.random.split(key, 5)

    x = jax.random.normal(ks[0], (N, Cin, D, H, W), jnp.float32)
    params = dict(
        w1=jax.random.normal(ks[1], (Cmid, Cin, 3, 3, 3), jnp.float32) * 0.1,
        b1=jax.random.normal(ks[2], (Cmid,), jnp.float32) * 0.1,
        g1=jnp.ones((Cmid,), jnp.float32),            # BatchNorm3d default init
        be1=jnp.zeros((Cmid,), jnp.float32),
        w2=jax.random.normal(ks[3], (Cout, Cmid, 3, 3, 3), jnp.float32) * 0.1,
        b2=jax.random.normal(ks[4], (Cout,), jnp.float32) * 0.1,
        g2=jnp.ones((Cout,), jnp.float32),
        be2=jnp.zeros((Cout,), jnp.float32),
    )

    out = jax.jit(double_convolution)(x, params)
    jax.block_until_ready(out)

    # Correctness check against a pure-f32 JAX reference of the same forward.
    # Tolerance reflects bf16 MXU operands / bf16 intermediate storage in the
    # Pallas path (f32 accumulation and f32 BN statistics throughout).
    xr = jnp.transpose(x, (0, 2, 3, 4, 1))
    r = _ref_layer(xr, params["w1"], params["b1"], params["g1"], params["be1"])
    r = _ref_layer(r, params["w2"], params["b2"], params["g2"], params["be2"])
    r = jnp.transpose(r, (0, 4, 1, 2, 3))

    assert out.shape == (N, Cout, D - 4, H - 4, W - 4), out.shape
    max_diff = float(jnp.max(jnp.abs(out - r)))
    assert jnp.allclose(out, r, rtol=5e-2, atol=5e-2), max_diff
    print("KERNEL_OK")
</pallas_src>

<mosaic_0001>
module attributes {stable_mosaic.version = 11 : i64} {
  func.func @kernel(%arg0: i32, %arg1: i32, %arg2: memref<1x1x100x8xbf16, #tpu.memory_space<vmem>>, %arg3: memref<1x1x100x8xbf16, #tpu.memory_space<vmem>>, %arg4: memref<1x1x100x8xbf16, #tpu.memory_space<vmem>>, %arg5: memref<216x16xbf16, #tpu.memory_space<vmem>>, %arg6: memref<1x16xf32, #tpu.memory_space<vmem>>, %arg7: memref<1x8xf32, #tpu.memory_space<vmem>>, %arg8: memref<1x8xf32, #tpu.memory_space<vmem>>, %arg9: memref<1x1x64x16xf32, #tpu.memory_space<vmem>>, %arg10: memref<1x1x2x16xf32, #tpu.memory_space<vmem>>, %arg11: memref<78x216xf32, #tpu.memory_space<vmem>>) attributes {dimension_semantics = [#tpu.dimension_semantics<parallel>, #tpu.dimension_semantics<parallel>], iteration_bounds = array<i64: 2, 8>, scalar_prefetch = 0 : i64, scratch_operands = 1 : i64, tpu.core_type = #tpu.core_type<tc>, window_params = [{transform_indices = @transform_0, window_bounds = array<i64: 1, 1, 100, 8>}, {transform_indices = @transform_1, window_bounds = array<i64: 1, 1, 100, 8>}, {transform_indices = @transform_2, window_bounds = array<i64: 1, 1, 100, 8>}, {pipeline_mode = #tpu.pipeline_mode<synchronous>, transform_indices = @transform_3, window_bounds = array<i64: 216, 16>}, {pipeline_mode = #tpu.pipeline_mode<synchronous>, transform_indices = @transform_4, window_bounds = array<i64: 1, 16>}, {pipeline_mode = #tpu.pipeline_mode<synchronous>, transform_indices = @transform_5, window_bounds = array<i64: 1, 8>}, {pipeline_mode = #tpu.pipeline_mode<synchronous>, transform_indices = @transform_6, window_bounds = array<i64: 1, 8>}, {transform_indices = @transform_7, window_bounds = array<i64: 1, 1, 64, 16>}, {transform_indices = @transform_8, window_bounds = array<i64: 1, 1, 2, 16>}]} {
    %c0 = arith.constant 0 : index
    %c0_0 = arith.constant 0 : index
    %c0_1 = arith.constant 0 : index
    %c0_2 = arith.constant 0 : index
    %0 = vector.load %arg2[%c0, %c0_0, %c0_1, %c0_2] : memref<1x1x100x8xbf16, #tpu.memory_space<vmem>>, vector<1x1x100x8xbf16>
    %1 = vector.shape_cast %0 : vector<1x1x100x8xbf16> to vector<100x8xbf16>
    %2 = arith.extf %1 : vector<100x8xbf16> to vector<100x8xf32>
    %c0_3 = arith.constant 0 : index
    %c0_4 = arith.constant 0 : index
    %3 = vector.load %arg7[%c0_3, %c0_4] : memref<1x8xf32, #tpu.memory_space<vmem>>, vector<1x8xf32>
    %4 = vector.broadcast %3 : vector<1x8xf32> to vector<100x8xf32>
    %5 = arith.mulf %2, %4 : vector<100x8xf32>
    %c0_5 = arith.constant 0 : index
    %c0_6 = arith.constant 0 : index
    %6 = vector.load %arg8[%c0_5, %c0_6] : memref<1x8xf32, #tpu.memory_space<vmem>>, vector<1x8xf32>
    %7 = vector.broadcast %6 : vector<1x8xf32> to vector<100x8xf32>
    %8 = arith.addf %5, %7 : vector<100x8xf32>
    %cst = arith.constant 0.000000e+00 : f32
    %9 = vector.broadcast %cst : f32 to vector<100x8xf32>
    %10 = arith.maximumf %8, %9 : vector<100x8xf32>
    %c0_7 = arith.constant 0 : index
    %c0_8 = arith.constant 0 : index
    %c0_9 = arith.constant 0 : index
    %c0_10 = arith.constant 0 : index
    %11 = vector.load %arg3[%c0_7, %c0_8, %c0_9, %c0_10] : memref<1x1x100x8xbf16, #tpu.memory_space<vmem>>, vector<1x1x100x8xbf16>
    %12 = vector.shape_cast %11 : vector<1x1x100x8xbf16> to vector<100x8xbf16>
    %13 = arith.extf %12 : vector<100x8xbf16> to vector<100x8xf32>
    %c0_11 = arith.constant 0 : index
    %c0_12 = arith.constant 0 : index
    %14 = vector.load %arg7[%c0_11, %c0_12] : memref<1x8xf32, #tpu.memory_space<vmem>>, vector<1x8xf32>
    %15 = vector.broadcast %14 : vector<1x8xf32> to vector<100x8xf32>
    %16 = arith.mulf %13, %15 : vector<100x8xf32>
    %c0_13 = arith.constant 0 : index
    %c0_14 = arith.constant 0 : index
    %17 = vector.load %arg8[%c0_13, %c0_14] : memref<1x8xf32, #tpu.memory_space<vmem>>, vector<1x8xf32>
    %18 = vector.broadcast %17 : vector<1x8xf32> to vector<100x8xf32>
    %19 = arith.addf %16, %18 : vector<100x8xf32>
    %cst_15 = arith.constant 0.000000e+00 : f32
    %20 = vector.broadcast %cst_15 : f32 to vector<100x8xf32>
    %21 = arith.maximumf %19, %20 : vector<100x8xf32>
    %c0_16 = arith.constant 0 : index
    %c0_17 = arith.constant 0 : index
    %c0_18 = arith.constant 0 : index
    %c0_19 = arith.constant 0 : index
    %22 = vector.load %arg4[%c0_16, %c0_17, %c0_18, %c0_19] : memref<1x1x100x8xbf16, #tpu.memory_space<vmem>>, vector<1x1x100x8xbf16>
    %23 = vector.shape_cast %22 : vector<1x1x100x8xbf16> to vector<100x8xbf16>
    %24 = arith.extf %23 : vector<100x8xbf16> to vector<100x8xf32>
    %c0_20 = arith.constant 0 : index
    %c0_21 = arith.constant 0 : index
    %25 = vector.load %arg7[%c0_20, %c0_21] : memref<1x8xf32, #tpu.memory_space<vmem>>, vector<1x8xf32>
    %26 = vector.broadcast %25 : vector<1x8xf32> to vector<100x8xf32>
    %27 = arith.mulf %24, %26 : vector<100x8xf32>
    %c0_22 = arith.constant 0 : index
    %c0_23 = arith.constant 0 : index
    %28 = vector.load %arg8[%c0_22, %c0_23] : memref<1x8xf32, #tpu.memory_space<vmem>>, vector<1x8xf32>
    %29 = vector.broadcast %28 : vector<1x8xf32> to vector<100x8xf32>
    %30 = arith.addf %27, %29 : vector<100x8xf32>
    %cst_24 = arith.constant 0.000000e+00 : f32
    %31 = vector.broadcast %cst_24 : f32 to vector<100x8xf32>
    %32 = arith.maximumf %30, %31 : vector<100x8xf32>
    %33 = vector.extract_strided_slice %10 {offsets = [0, 0], sizes = [78, 8], strides = [1, 1]} : vector<100x8xf32> to vector<78x8xf32>
    %c0_25 = arith.constant 0 : index
    %c0_26 = arith.constant 0 : index
    %34 = vector.load %arg11[%c0_25, %c0_26] : memref<78x216xf32, #tpu.memory_space<vmem>>, vector<78x8xf32>
    tpu.vector_store %arg11[%c0_25, %c0_26], %33 {strides = array<i32>} : memref<78x216xf32, #tpu.memory_space<vmem>>, vector<78x8xf32>,
    %35 = vector.extract_strided_slice %10 {offsets = [1, 0], sizes = [78, 8], strides = [1, 1]} : vector<100x8xf32> to vector<78x8xf32>
    %c0_27 = arith.constant 0 : index
    %c8 = arith.constant 8 : index
    %36 = vector.load %arg11[%c0_27, %c8] : memref<78x216xf32, #tpu.memory_space<vmem>>, vector<78x8xf32>
    tpu.vector_store %arg11[%c0_27, %c8], %35 {strides = array<i32>} : memref<78x216xf32, #tpu.memory_space<vmem>>, vector<78x8xf32>,
    %37 = vector.extract_strided_slice %10 {offsets = [2, 0], sizes = [78, 8], strides = [1, 1]} : vector<100x8xf32> to vector<78x8xf32>
    %c0_28 = arith.constant 0 : index
    %c16 = arith.constant 16 : index
    %38 = vector.load %arg11[%c0_28, %c16] : memref<78x216xf32, #tpu.memory_space<vmem>>, vector<78x8xf32>
    tpu.vector_store %arg11[%c0_28, %c16], %37 {strides = array<i32>} : memref<78x216xf32, #tpu.memory_space<vmem>>, vector<78x8xf32>,
    %39 = vector.extract_strided_slice %10 {offsets = [10, 0], sizes = [78, 8], strides = [1, 1]} : vector<100x8xf32> to vector<78x8xf32>
    %c0_29 = arith.constant 0 : index
    %c24 = arith.constant 24 : index
    %40 = vector.load %arg11[%c0_29, %c24] : memref<78x216xf32, #tpu.memory_space<vmem>>, vector<78x8xf32>
    tpu.vector_store %arg11[%c0_29, %c24], %39 {strides = array<i32>} : memref<78x216xf32, #tpu.memory_space<vmem>>, vector<78x8xf32>,
    %41 = vector.extract_strided_slice %10 {offsets = [11, 0], sizes = [78, 8], strides = [1, 1]} : vector<100x8xf32> to vector<78x8xf32>
    %c0_30 = arith.constant 0 : index
    %c32 = arith.constant 32 : index
    %42 = vector.load %arg11[%c0_30, %c32] : memref<78x216xf32, #tpu.memory_space<vmem>>, vector<78x8xf32>
    tpu.vector_store %arg11[%c0_30, %c32], %41 {strides = array<i32>} : memref<78x216xf32, #tpu.memory_space<vmem>>, vector<78x8xf32>,
    %43 = vector.extract_strided_slice %10 {offsets = [12, 0], sizes = [78, 8], strides = [1, 1]} : vector<100x8xf32> to vector<78x8xf32>
    %c0_31 = arith.constant 0 : index
    %c40 = arith.constant 40 : index
    %44 = vector.load %arg11[%c0_31, %c40] : memref<78x216xf32, #tpu.memory_space<vmem>>, vector<78x8xf32>
    tpu.vector_store %arg11[%c0_31, %c40], %43 {strides = array<i32>} : memref<78x216xf32, #tpu.memory_space<vmem>>, vector<78x8xf32>,
    %45 = vector.extract_strided_slice %10 {offsets = [20, 0], sizes = [78, 8], strides = [1, 1]} : vector<100x8xf32> to vector<78x8xf32>
    %c0_32 = arith.constant 0 : index
    %c48 = arith.constant 48 : index
    %46 = vector.load %arg11[%c0_32, %c48] : memref<78x216xf32, #tpu.memory_space<vmem>>, vector<78x8xf32>
    tpu.vector_store %arg11[%c0_32, %c48], %45 {strides = array<i32>} : memref<78x216xf32, #tpu.memory_space<vmem>>, vector<78x8xf32>,
    %47 = vector.extract_strided_slice %10 {offsets = [21, 0], sizes = [78, 8], strides = [1, 1]} : vector<100x8xf32> to vector<78x8xf32>
    %c0_33 = arith.constant 0 : index
    %c56 = arith.constant 56 : index
    %48 = vector.load %arg11[%c0_33, %c56] : memref<78x216xf32, #tpu.memory_space<vmem>>, vector<78x8xf32>
    tpu.vector_store %arg11[%c0_33, %c56], %47 {strides = array<i32>} : memref<78x216xf32, #tpu.memory_space<vmem>>, vector<78x8xf32>,
    %49 = vector.extract_strided_slice %10 {offsets = [22, 0], sizes = [78, 8], strides = [1, 1]} : vector<100x8xf32> to vector<78x8xf32>
    %c0_34 = arith.constant 0 : index
    %c64 = arith.constant 64 : index
    %50 = vector.load %arg11[%c0_34, %c64] : memref<78x216xf32, #tpu.memory_space<vmem>>, vector<78x8xf32>
    tpu.vector_store %arg11[%c0_34, %c64], %49 {strides = array<i32>} : memref<78x216xf32, #tpu.memory_space<vmem>>, vector<78x8xf32>,
    %51 = vector.extract_strided_slice %21 {offsets = [0, 0], sizes = [78, 8], strides = [1, 1]} : vector<100x8xf32> to vector<78x8xf32>
    %c0_35 = arith.constant 0 : index
    %c72 = arith.constant 72 : index
    %52 = vector.load %arg11[%c0_35, %c72] : memref<78x216xf32, #tpu.memory_space<vmem>>, vector<78x8xf32>
    tpu.vector_store %arg11[%c0_35, %c72], %51 {strides = array<i32>} : memref<78x216xf32, #tpu.memory_space<vmem>>, vector<78x8xf32>,
    %53 = vector.extract_strided_slice %21 {offsets = [1, 0], sizes = [78, 8], strides = [1, 1]} : vector<100x8xf32> to vector<78x8xf32>
    %c0_36 = arith.constant 0 : index
    %c80 = arith.constant 80 : index
    %54 = vector.load %arg11[%c0_36, %c80] : memref<78x216xf32, #tpu.memory_space<vmem>>, vector<78x8xf32>
    tpu.vector_store %arg11[%c0_36, %c80], %53 {strides = array<i32>} : memref<78x216xf32, #tpu.memory_space<vmem>>, vector<78x8xf32>,
    %55 = vector.extract_strided_slice %21 {offsets = [2, 0], sizes = [78, 8], strides = [1, 1]} : vector<100x8xf32> to vector<78x8xf32>
    %c0_37 = arith.constant 0 : index
    %c88 = arith.constant 88 : index
    %56 = vector.load %arg11[%c0_37, %c88] : memref<78x216xf32, #tpu.memory_space<vmem>>, vector<78x8xf32>
    tpu.vector_store %arg11[%c0_37, %c88], %55 {strides = array<i32>} : memref<78x216xf32, #tpu.memory_space<vmem>>, vector<78x8xf32>,
    %57 = vector.extract_strided_slice %21 {offsets = [10, 0], sizes = [78, 8], strides = [1, 1]} : vector<100x8xf32> to vector<78x8xf32>
    %c0_38 = arith.constant 0 : index
    %c96 = arith.constant 96 : index
    %58 = vector.load %arg11[%c0_38, %c96] : memref<78x216xf32, #tpu.memory_space<vmem>>, vector<78x8xf32>
    tpu.vector_store %arg11[%c0_38, %c96], %57 {strides = array<i32>} : memref<78x216xf32, #tpu.memory_space<vmem>>, vector<78x8xf32>,
    %59 = vector.extract_strided_slice %21 {offsets = [11, 0], sizes = [78, 8], strides = [1, 1]} : vector<100x8xf32> to vector<78x8xf32>
    %c0_39 = arith.constant 0 : index
    %c104 = arith.constant 104 : index
    %60 = vector.load %arg11[%c0_39, %c104] : memref<78x216xf32, #tpu.memory_space<vmem>>, vector<78x8xf32>
    tpu.vector_store %arg11[%c0_39, %c104], %59 {strides = array<i32>} : memref<78x216xf32, #tpu.memory_space<vmem>>, vector<78x8xf32>,
    %61 = vector.extract_strided_slice %21 {offsets = [12, 0], sizes = [78, 8], strides = [1, 1]} : vector<100x8xf32> to vector<78x8xf32>
    %c0_40 = arith.constant 0 : index
    %c112 = arith.constant 112 : index
    %62 = vector.load %arg11[%c0_40, %c112] : memref<78x216xf32, #tpu.memory_space<vmem>>, vector<78x8xf32>
    tpu.vector_store %arg11[%c0_40, %c112], %61 {strides = array<i32>} : memref<78x216xf32, #tpu.memory_space<vmem>>, vector<78x8xf32>,
    %63 = vector.extract_strided_slice %21 {offsets = [20, 0], sizes = [78, 8], strides = [1, 1]} : vector<100x8xf32> to vector<78x8xf32>
    %c0_41 = arith.constant 0 : index
    %c120 = arith.constant 120 : index
    %64 = vector.load %arg11[%c0_41, %c120] : memref<78x216xf32, #tpu.memory_space<vmem>>, vector<78x8xf32>
    tpu.vector_store %arg11[%c0_41, %c120], %63 {strides = array<i32>} : memref<78x216xf32, #tpu.memory_space<vmem>>, vector<78x8xf32>,
    %65 = vector.extract_strided_slice %21 {offsets = [21, 0], sizes = [78, 8], strides = [1, 1]} : vector<100x8xf32> to vector<78x8xf32>
    %c0_42 = arith.constant 0 : index
    %c128 = arith.constant 128 : index
    %66 = vector.load %arg11[%c0_42, %c128] : memref<78x216xf32, #tpu.memory_space<vmem>>, vector<78x8xf32>
    tpu.vector_store %arg11[%c0_42, %c128], %65 {strides = array<i32>} : memref<78x216xf32, #tpu.memory_space<vmem>>, vector<78x8xf32>,
    %67 = vector.extract_strided_slice %21 {offsets = [22, 0], sizes = [78, 8], strides = [1, 1]} : vector<100x8xf32> to vector<78x8xf32>
    %c0_43 = arith.constant 0 : index
    %c136 = arith.constant 136 : index
    %68 = vector.load %arg11[%c0_43, %c136] : memref<78x216xf32, #tpu.memory_space<vmem>>, vector<78x8xf32>
    tpu.vector_store %arg11[%c0_43, %c136], %67 {strides = array<i32>} : memref<78x216xf32, #tpu.memory_space<vmem>>, vector<78x8xf32>,
    %69 = vector.extract_strided_slice %32 {offsets = [0, 0], sizes = [78, 8], strides = [1, 1]} : vector<100x8xf32> to vector<78x8xf32>
    %c0_44 = arith.constant 0 : index
    %c144 = arith.constant 144 : index
    %70 = vector.load %arg11[%c0_44, %c144] : memref<78x216xf32, #tpu.memory_space<vmem>>, vector<78x8xf32>
    tpu.vector_store %arg11[%c0_44, %c144], %69 {strides = array<i32>} : memref<78x216xf32, #tpu.memory_space<vmem>>, vector<78x8xf32>,
    %71 = vector.extract_strided_slice %32 {offsets = [1, 0], sizes = [78, 8], strides = [1, 1]} : vector<100x8xf32> to vector<78x8xf32>
    %c0_45 = arith.constant 0 : index
    %c152 = arith.constant 152 : index
    %72 = vector.load %arg11[%c0_45, %c152] : memref<78x216xf32, #tpu.memory_space<vmem>>, vector<78x8xf32>
    tpu.vector_store %arg11[%c0_45, %c152], %71 {strides = array<i32>} : memref<78x216xf32, #tpu.memory_space<vmem>>, vector<78x8xf32>,
    %73 = vector.extract_strided_slice %32 {offsets = [2, 0], sizes = [78, 8], strides = [1, 1]} : vector<100x8xf32> to vector<78x8xf32>
    %c0_46 = arith.constant 0 : index
    %c160 = arith.constant 160 : index
    %74 = vector.load %arg11[%c0_46, %c160] : memref<78x216xf32, #tpu.memory_space<vmem>>, vector<78x8xf32>
    tpu.vector_store %arg11[%c0_46, %c160], %73 {strides = array<i32>} : memref<78x216xf32, #tpu.memory_space<vmem>>, vector<78x8xf32>,
    %75 = vector.extract_strided_slice %32 {offsets = [10, 0], sizes = [78, 8], strides = [1, 1]} : vector<100x8xf32> to vector<78x8xf32>
    %c0_47 = arith.constant 0 : index
    %c168 = arith.constant 168 : index
    %76 = vector.load %arg11[%c0_47, %c168] : memref<78x216xf32, #tpu.memory_space<vmem>>, vector<78x8xf32>
    tpu.vector_store %arg11[%c0_47, %c168], %75 {strides = array<i32>} : memref<78x216xf32, #tpu.memory_space<vmem>>, vector<78x8xf32>,
    %77 = vector.extract_strided_slice %32 {offsets = [11, 0], sizes = [78, 8], strides = [1, 1]} : vector<100x8xf32> to vector<78x8xf32>
    %c0_48 = arith.constant 0 : index
    %c176 = arith.constant 176 : index
    %78 = vector.load %arg11[%c0_48, %c176] : memref<78x216xf32, #tpu.memory_space<vmem>>, vector<78x8xf32>
    tpu.vector_store %arg11[%c0_48, %c176], %77 {strides = array<i32>} : memref<78x216xf32, #tpu.memory_space<vmem>>, vector<78x8xf32>,
    %79 = vector.extract_strided_slice %32 {offsets = [12, 0], sizes = [78, 8], strides = [1, 1]} : vector<100x8xf32> to vector<78x8xf32>
    %c0_49 = arith.constant 0 : index
    %c184 = arith.constant 184 : index
    %80 = vector.load %arg11[%c0_49, %c184] : memref<78x216xf32, #tpu.memory_space<vmem>>, vector<78x8xf32>
    tpu.vector_store %arg11[%c0_49, %c184], %79 {strides = array<i32>} : memref<78x216xf32, #tpu.memory_space<vmem>>, vector<78x8xf32>,
    %81 = vector.extract_strided_slice %32 {offsets = [20, 0], sizes = [78, 8], strides = [1, 1]} : vector<100x8xf32> to vector<78x8xf32>
    %c0_50 = arith.constant 0 : index
    %c192 = arith.constant 192 : index
    %82 = vector.load %arg11[%c0_50, %c192] : memref<78x216xf32, #tpu.memory_space<vmem>>, vector<78x8xf32>
    tpu.vector_store %arg11[%c0_50, %c192], %81 {strides = array<i32>} : memref<78x216xf32, #tpu.memory_space<vmem>>, vector<78x8xf32>,
    %83 = vector.extract_strided_slice %32 {offsets = [21, 0], sizes = [78, 8], strides = [1, 1]} : vector<100x8xf32> to vector<78x8xf32>
    %c0_51 = arith.constant 0 : index
    %c200 = arith.constant 200 : index
    %84 = vector.load %arg11[%c0_51, %c200] : memref<78x216xf32, #tpu.memory_space<vmem>>, vector<78x8xf32>
    tpu.vector_store %arg11[%c0_51, %c200], %83 {strides = array<i32>} : memref<78x216xf32, #tpu.memory_space<vmem>>, vector<78x8xf32>,
    %85 = vector.extract_strided_slice %32 {offsets = [22, 0], sizes = [78, 8], strides = [1, 1]} : vector<100x8xf32> to vector<78x8xf32>
    %c0_52 = arith.constant 0 : index
    %c208 = arith.constant 208 : index
    %86 = vector.load %arg11[%c0_52, %c208] : memref<78x216xf32, #tpu.memory_space<vmem>>, vector<78x8xf32>
    tpu.vector_store %arg11[%c0_52, %c208], %85 {strides = array<i32>} : memref<78x216xf32, #tpu.memory_space<vmem>>, vector<78x8xf32>,
    %c0_53 = arith.constant 0 : index
    %c0_54 = arith.constant 0 : index
    %87 = vector.load %arg11[%c0_53, %c0_54] : memref<78x216xf32, #tpu.memory_space<vmem>>, vector<78x216xf32>
    %88 = arith.truncf %87 : vector<78x216xf32> to vector<78x216xbf16>
    %c0_55 = arith.constant 0 : index
    %c0_56 = arith.constant 0 : index
    %89 = vector.load %arg5[%c0_55, %c0_56] : memref<216x16xbf16, #tpu.memory_space<vmem>>, vector<216x16xbf16>
    %cst_57 = arith.constant dense<0.000000e+00> : vector<78x16xf32>
    %90 = tpu.matmul %88, %89, %cst_57 {dimension_numbers = #tpu.dot_dimension_numbers<[1], [0], [0], [1], [0, 0, 1, 1], [], []>} : vector<78x216xbf16>, vector<216x16xbf16>, vector<78x16xf32> -> vector<78x16xf32>
    %c0_58 = arith.constant 0 : index
    %c0_59 = arith.constant 0 : index
    %91 = vector.load %arg6[%c0_58, %c0_59] : memref<1x16xf32, #tpu.memory_space<vmem>>, vector<1x16xf32>
    %92 = vector.broadcast %91 : vector<1x16xf32> to vector<78x16xf32>
    %93 = arith.addf %90, %92 : vector<78x16xf32>
    %94 = vector.extract_strided_slice %93 {offsets = [0, 0], sizes = [8, 16], strides = [1, 1]} : vector<78x16xf32> to vector<8x16xf32>
    %95 = vector.extract_strided_slice %93 {offsets = [10, 0], sizes = [8, 16], strides = [1, 1]} : vector<78x16xf32> to vector<8x16xf32>
    %96 = vector.extract_strided_slice %93 {offsets = [20, 0], sizes = [8, 16], strides = [1, 1]} : vector<78x16xf32> to vector<8x16xf32>
    %97 = vector.extract_strided_slice %93 {offsets = [30, 0], sizes = [8, 16], strides = [1, 1]} : vector<78x16xf32> to vector<8x16xf32>
    %98 = vector.extract_strided_slice %93 {offsets = [40, 0], sizes = [8, 16], strides = [1, 1]} : vector<78x16xf32> to vector<8x16xf32>
    %99 = vector.extract_strided_slice %93 {offsets = [50, 0], sizes = [8, 16], strides = [1, 1]} : vector<78x16xf32> to vector<8x16xf32>
    %100 = vector.extract_strided_slice %93 {offsets = [60, 0], sizes = [8, 16], strides = [1, 1]} : vector<78x16xf32> to vector<8x16xf32>
    %101 = vector.extract_strided_slice %93 {offsets = [70, 0], sizes = [8, 16], strides = [1, 1]} : vector<78x16xf32> to vector<8x16xf32>
    %102 = tpu.concatenate %94, %95, %96, %97, %98, %99, %100, %101 in 0 : vector<8x16xf32>, vector<8x16xf32>, vector<8x16xf32>, vector<8x16xf32>, vector<8x16xf32>, vector<8x16xf32>, vector<8x16xf32>, vector<8x16xf32> -> vector<64x16xf32>
    %c0_60 = arith.constant 0 : index
    %c0_61 = arith.constant 0 : index
    %c0_62 = arith.constant 0 : index
    %c0_63 = arith.constant 0 : index
    %103 = vector.load %arg9[%c0_60, %c0_61, %c0_62, %c0_63] : memref<1x1x64x16xf32, #tpu.memory_space<vmem>>, vector<1x1x64x16xf32>
    %104 = vector.shape_cast %103 : vector<1x1x64x16xf32> to vector<64x16xf32>
    %105 = vector.shape_cast %102 : vector<64x16xf32> to vector<1x1x64x16xf32>
    tpu.vector_store %arg9[%c0_60, %c0_61, %c0_62, %c0_63], %105 {strides = array<i32>} : memref<1x1x64x16xf32, #tpu.memory_space<vmem>>, vector<1x1x64x16xf32>,
    %cst_64 = arith.constant dense<0.000000e+00> : vector<16xf32>
    %106 = vector.multi_reduction <add>, %102, %cst_64 [0] : vector<64x16xf32> to vector<16xf32>
    %107 = vector.shape_cast %106 : vector<16xf32> to vector<1x16xf32>
    %c0_65 = arith.constant 0 : index
    %c0_66 = arith.constant 0 : index
    %c0_67 = arith.constant 0 : index
    %c0_68 = arith.constant 0 : index
    %108 = vector.load %arg10[%c0_65, %c0_66, %c0_67, %c0_68] : memref<1x1x2x16xf32, #tpu.memory_space<vmem>>, vector<1x1x1x16xf32>
    %109 = vector.shape_cast %108 : vector<1x1x1x16xf32> to vector<1x16xf32>
    %110 = vector.shape_cast %107 : vector<1x16xf32> to vector<1x1x1x16xf32>
    tpu.vector_store %arg10[%c0_65, %c0_66, %c0_67, %c0_68], %110 {strides = array<i32>} : memref<1x1x2x16xf32, #tpu.memory_space<vmem>>, vector<1x1x1x16xf32>,
    %111 = arith.mulf %102, %102 : vector<64x16xf32>
    %cst_69 = arith.constant dense<0.000000e+00> : vector<16xf32>
    %112 = vector.multi_reduction <add>, %111, %cst_69 [0] : vector<64x16xf32> to vector<16xf32>
    %113 = vector.shape_cast %112 : vector<16xf32> to vector<1x16xf32>
    %c0_70 = arith.constant 0 : index
    %c0_71 = arith.constant 0 : index
    %c1 = arith.constant 1 : index
    %c0_72 = arith.constant 0 : index
    %114 = vector.load %arg10[%c0_70, %c0_71, %c1, %c0_72] : memref<1x1x2x16xf32, #tpu.memory_space<vmem>>, vector<1x1x1x16xf32>
    %115 = vector.shape_cast %114 : vector<1x1x1x16xf32> to vector<1x16xf32>
    %116 = vector.shape_cast %113 : vector<1x16xf32> to vector<1x1x1x16xf32>
    tpu.vector_store %arg10[%c0_70, %c0_71, %c1, %c0_72], %116 {strides = array<i32>} : memref<1x1x2x16xf32, #tpu.memory_space<vmem>>, vector<1x1x1x16xf32>,
    return
  }
  func.func @transform_0(%arg0: i32, %arg1: i32) -> (i32, i32, i32, i32) {
    %c0_i32 = arith.constant 0 : i32
    %0 = arith.addi %arg1, %c0_i32 : i32
    %c0_i32_0 = arith.constant 0 : i32
    %c0_i32_1 = arith.constant 0 : i32
    %c0_i32_2 = arith.constant 0 : i32
    return %arg0, %0, %c0_i32_0, %c0_i32_1 : i32, i32, i32, i32
  }
  func.func @transform_1(%arg0: i32, %arg1: i32) -> (i32, i32, i32, i32) {
    %c1_i32 = arith.constant 1 : i32
    %0 = arith.addi %arg1, %c1_i32 : i32
    %c0_i32 = arith.constant 0 : i32
    %c0_i32_0 = arith.constant 0 : i32
    %c0_i32_1 = arith.constant 0 : i32
    return %arg0, %0, %c0_i32, %c0_i32_0 : i32, i32, i32, i32
  }
  func.func @transform_2(%arg0: i32, %arg1: i32) -> (i32, i32, i32, i32) {
    %c2_i32 = arith.constant 2 : i32
    %0 = arith.addi %arg1, %c2_i32 : i32
    %c0_i32 = arith.constant 0 : i32
    %c0_i32_0 = arith.constant 0 : i32
    %c0_i32_1 = arith.constant 0 : i32
    return %arg0, %0, %c0_i32, %c0_i32_0 : i32, i32, i32, i32
  }
  func.func @transform_3(%arg0: i32, %arg1: i32) -> (i32, i32) {
    %c0_i32 = arith.constant 0 : i32
    %c0_i32_0 = arith.constant 0 : i32
    %c0_i32_1 = arith.constant 0 : i32
    return %c0_i32, %c0_i32_0 : i32, i32
  }
  func.func @transform_4(%arg0: i32, %arg1: i32) -> (i32, i32) {
    %c0_i32 = arith.constant 0 : i32
    %c0_i32_0 = arith.constant 0 : i32
    %c0_i32_1 = arith.constant 0 : i32
    return %c0_i32, %c0_i32_0 : i32, i32
  }
  func.func @transform_5(%arg0: i32, %arg1: i32) -> (i32, i32) {
    %c0_i32 = arith.constant 0 : i32
    %c0_i32_0 = arith.constant 0 : i32
    %c0_i32_1 = arith.constant 0 : i32
    return %c0_i32, %c0_i32_0 : i32, i32
  }
  func.func @transform_6(%arg0: i32, %arg1: i32) -> (i32, i32) {
    %c0_i32 = arith.constant 0 : i32
    %c0_i32_0 = arith.constant 0 : i32
    %c0_i32_1 = arith.constant 0 : i32
    return %c0_i32, %c0_i32_0 : i32, i32
  }
  func.func @transform_7(%arg0: i32, %arg1: i32) -> (i32, i32, i32, i32) {
    %c0_i32 = arith.constant 0 : i32
    %c0_i32_0 = arith.constant 0 : i32
    %c0_i32_1 = arith.constant 0 : i32
    return %arg0, %arg1, %c0_i32, %c0_i32_0 : i32, i32, i32, i32
  }
  func.func @transform_8(%arg0: i32, %arg1: i32) -> (i32, i32, i32, i32) {
    %c0_i32 = arith.constant 0 : i32
    %c0_i32_0 = arith.constant 0 : i32
    %c0_i32_1 = arith.constant 0 : i32
    return %arg0, %arg1, %c0_i32, %c0_i32_0 : i32, i32, i32, i32
  }
}

module attributes {stable_mosaic.version = 11 : i64} {
  func.func @kernel(%arg0: i32, %arg1: i32, %arg2: memref<1x1x144x4xf32, #tpu.memory_space<vmem>>, %arg3: memref<1x1x144x4xf32, #tpu.memory_space<vmem>>, %arg4: memref<1x1x144x4xf32, #tpu.memory_space<vmem>>, %arg5: memref<108x8xbf16, #tpu.memory_space<vmem>>, %arg6: memref<1x8xf32, #tpu.memory_space<vmem>>, %arg7: memref<1x1x100x8xbf16, #tpu.memory_space<vmem>>, %arg8: memref<1x1x2x8xf32, #tpu.memory_space<vmem>>, %arg9: memref<118x108xf32, #tpu.memory_space<vmem>>) attributes {dimension_semantics = [#tpu.dimension_semantics<parallel>, #tpu.dimension_semantics<parallel>], iteration_bounds = array<i64: 2, 10>, scalar_prefetch = 0 : i64, scratch_operands = 1 : i64, tpu.core_type = #tpu.core_type<tc>, window_params = [{transform_indices = @transform_0, window_bounds = array<i64: 1, 1, 144, 4>}, {transform_indices = @transform_1, window_bounds = array<i64: 1, 1, 144, 4>}, {transform_indices = @transform_2, window_bounds = array<i64: 1, 1, 144, 4>}, {pipeline_mode = #tpu.pipeline_mode<synchronous>, transform_indices = @transform_3, window_bounds = array<i64: 108, 8>}, {pipeline_mode = #tpu.pipeline_mode<synchronous>, transform_indices = @transform_4, window_bounds = array<i64: 1, 8>}, {transform_indices = @transform_5, window_bounds = array<i64: 1, 1, 100, 8>}, {transform_indices = @transform_6, window_bounds = array<i64: 1, 1, 2, 8>}]} {
    %c0 = arith.constant 0 : index
    %c0_0 = arith.constant 0 : index
    %c0_1 = arith.constant 0 : index
    %c0_2 = arith.constant 0 : index
    %0 = vector.load %arg2[%c0, %c0_0, %c0_1, %c0_2] : memref<1x1x144x4xf32, #tpu.memory_space<vmem>>, vector<1x1x144x4xf32>
    %1 = vector.shape_cast %0 : vector<1x1x144x4xf32> to vector<144x4xf32>
    %c0_3 = arith.constant 0 : index
    %c0_4 = arith.constant 0 : index
    %c0_5 = arith.constant 0 : index
    %c0_6 = arith.constant 0 : index
    %2 = vector.load %arg3[%c0_3, %c0_4, %c0_5, %c0_6] : memref<1x1x144x4xf32, #tpu.memory_space<vmem>>, vector<1x1x144x4xf32>
    %3 = vector.shape_cast %2 : vector<1x1x144x4xf32> to vector<144x4xf32>
    %c0_7 = arith.constant 0 : index
    %c0_8 = arith.constant 0 : index
    %c0_9 = arith.constant 0 : index
    %c0_10 = arith.constant 0 : index
    %4 = vector.load %arg4[%c0_7, %c0_8, %c0_9, %c0_10] : memref<1x1x144x4xf32, #tpu.memory_space<vmem>>, vector<1x1x144x4xf32>
    %5 = vector.shape_cast %4 : vector<1x1x144x4xf32> to vector<144x4xf32>
    %6 = vector.extract_strided_slice %1 {offsets = [0, 0], sizes = [118, 4], strides = [1, 1]} : vector<144x4xf32> to vector<118x4xf32>
    %c0_11 = arith.constant 0 : index
    %c0_12 = arith.constant 0 : index
    %7 = vector.load %arg9[%c0_11, %c0_12] : memref<118x108xf32, #tpu.memory_space<vmem>>, vector<118x4xf32>
    tpu.vector_store %arg9[%c0_11, %c0_12], %6 {strides = array<i32>} : memref<118x108xf32, #tpu.memory_space<vmem>>, vector<118x4xf32>,
    %8 = vector.extract_strided_slice %1 {offsets = [1, 0], sizes = [118, 4], strides = [1, 1]} : vector<144x4xf32> to vector<118x4xf32>
    %c0_13 = arith.constant 0 : index
    %c4 = arith.constant 4 : index
    %9 = vector.load %arg9[%c0_13, %c4] : memref<118x108xf32, #tpu.memory_space<vmem>>, vector<118x4xf32>
    tpu.vector_store %arg9[%c0_13, %c4], %8 {strides = array<i32>} : memref<118x108xf32, #tpu.memory_space<vmem>>, vector<118x4xf32>,
    %10 = vector.extract_strided_slice %1 {offsets = [2, 0], sizes = [118, 4], strides = [1, 1]} : vector<144x4xf32> to vector<118x4xf32>
    %c0_14 = arith.constant 0 : index
    %c8 = arith.constant 8 : index
    %11 = vector.load %arg9[%c0_14, %c8] : memref<118x108xf32, #tpu.memory_space<vmem>>, vector<118x4xf32>
    tpu.vector_store %arg9[%c0_14, %c8], %10 {strides = array<i32>} : memref<118x108xf32, #tpu.memory_space<vmem>>, vector<118x4xf32>,
    %12 = vector.extract_strided_slice %1 {offsets = [12, 0], sizes = [118, 4], strides = [1, 1]} : vector<144x4xf32> to vector<118x4xf32>
    %c0_15 = arith.constant 0 : index
    %c12 = arith.constant 12 : index
    %13 = vector.load %arg9[%c0_15, %c12] : memref<118x108xf32, #tpu.memory_space<vmem>>, vector<118x4xf32>
    tpu.vector_store %arg9[%c0_15, %c12], %12 {strides = array<i32>} : memref<118x108xf32, #tpu.memory_space<vmem>>, vector<118x4xf32>,
    %14 = vector.extract_strided_slice %1 {offsets = [13, 0], sizes = [118, 4], strides = [1, 1]} : vector<144x4xf32> to vector<118x4xf32>
    %c0_16 = arith.constant 0 : index
    %c16 = arith.constant 16 : index
    %15 = vector.load %arg9[%c0_16, %c16] : memref<118x108xf32, #tpu.memory_space<vmem>>, vector<118x4xf32>
    tpu.vector_store %arg9[%c0_16, %c16], %14 {strides = array<i32>} : memref<118x108xf32, #tpu.memory_space<vmem>>, vector<118x4xf32>,
    %16 = vector.extract_strided_slice %1 {offsets = [14, 0], sizes = [118, 4], strides = [1, 1]} : vector<144x4xf32> to vector<118x4xf32>
    %c0_17 = arith.constant 0 : index
    %c20 = arith.constant 20 : index
    %17 = vector.load %arg9[%c0_17, %c20] : memref<118x108xf32, #tpu.memory_space<vmem>>, vector<118x4xf32>
    tpu.vector_store %arg9[%c0_17, %c20], %16 {strides = array<i32>} : memref<118x108xf32, #tpu.memory_space<vmem>>, vector<118x4xf32>,
    %18 = vector.extract_strided_slice %1 {offsets = [24, 0], sizes = [118, 4], strides = [1, 1]} : vector<144x4xf32> to vector<118x4xf32>
    %c0_18 = arith.constant 0 : index
    %c24 = arith.constant 24 : index
    %19 = vector.load %arg9[%c0_18, %c24] : memref<118x108xf32, #tpu.memory_space<vmem>>, vector<118x4xf32>
    tpu.vector_store %arg9[%c0_18, %c24], %18 {strides = array<i32>} : memref<118x108xf32, #tpu.memory_space<vmem>>, vector<118x4xf32>,
    %20 = vector.extract_strided_slice %1 {offsets = [25, 0], sizes = [118, 4], strides = [1, 1]} : vector<144x4xf32> to vector<118x4xf32>
    %c0_19 = arith.constant 0 : index
    %c28 = arith.constant 28 : index
    %21 = vector.load %arg9[%c0_19, %c28] : memref<118x108xf32, #tpu.memory_space<vmem>>, vector<118x4xf32>
    tpu.vector_store %arg9[%c0_19, %c28], %20 {strides = array<i32>} : memref<118x108xf32, #tpu.memory_space<vmem>>, vector<118x4xf32>,
    %22 = vector.extract_strided_slice %1 {offsets = [26, 0], sizes = [118, 4], strides = [1, 1]} : vector<144x4xf32> to vector<118x4xf32>
    %c0_20 = arith.constant 0 : index
    %c32 = arith.constant 32 : index
    %23 = vector.load %arg9[%c0_20, %c32] : memref<118x108xf32, #tpu.memory_space<vmem>>, vector<118x4xf32>
    tpu.vector_store %arg9[%c0_20, %c32], %22 {strides = array<i32>} : memref<118x108xf32, #tpu.memory_space<vmem>>, vector<118x4xf32>,
    %24 = vector.extract_strided_slice %3 {offsets = [0, 0], sizes = [118, 4], strides = [1, 1]} : vector<144x4xf32> to vector<118x4xf32>
    %c0_21 = arith.constant 0 : index
    %c36 = arith.constant 36 : index
    %25 = vector.load %arg9[%c0_21, %c36] : memref<118x108xf32, #tpu.memory_space<vmem>>, vector<118x4xf32>
    tpu.vector_store %arg9[%c0_21, %c36], %24 {strides = array<i32>} : memref<118x108xf32, #tpu.memory_space<vmem>>, vector<118x4xf32>,
    %26 = vector.extract_strided_slice %3 {offsets = [1, 0], sizes = [118, 4], strides = [1, 1]} : vector<144x4xf32> to vector<118x4xf32>
    %c0_22 = arith.constant 0 : index
    %c40 = arith.constant 40 : index
    %27 = vector.load %arg9[%c0_22, %c40] : memref<118x108xf32, #tpu.memory_space<vmem>>, vector<118x4xf32>
    tpu.vector_store %arg9[%c0_22, %c40], %26 {strides = array<i32>} : memref<118x108xf32, #tpu.memory_space<vmem>>, vector<118x4xf32>,
    %28 = vector.extract_strided_slice %3 {offsets = [2, 0], sizes = [118, 4], strides = [1, 1]} : vector<144x4xf32> to vector<118x4xf32>
    %c0_23 = arith.constant 0 : index
    %c44 = arith.constant 44 : index
    %29 = vector.load %arg9[%c0_23, %c44] : memref<118x108xf32, #tpu.memory_space<vmem>>, vector<118x4xf32>
    tpu.vector_store %arg9[%c0_23, %c44], %28 {strides = array<i32>} : memref<118x108xf32, #tpu.memory_space<vmem>>, vector<118x4xf32>,
    %30 = vector.extract_strided_slice %3 {offsets = [12, 0], sizes = [118, 4], strides = [1, 1]} : vector<144x4xf32> to vector<118x4xf32>
    %c0_24 = arith.constant 0 : index
    %c48 = arith.constant 48 : index
    %31 = vector.load %arg9[%c0_24, %c48] : memref<118x108xf32, #tpu.memory_space<vmem>>, vector<118x4xf32>
    tpu.vector_store %arg9[%c0_24, %c48], %30 {strides = array<i32>} : memref<118x108xf32, #tpu.memory_space<vmem>>, vector<118x4xf32>,
    %32 = vector.extract_strided_slice %3 {offsets = [13, 0], sizes = [118, 4], strides = [1, 1]} : vector<144x4xf32> to vector<118x4xf32>
    %c0_25 = arith.constant 0 : index
    %c52 = arith.constant 52 : index
    %33 = vector.load %arg9[%c0_25, %c52] : memref<118x108xf32, #tpu.memory_space<vmem>>, vector<118x4xf32>
    tpu.vector_store %arg9[%c0_25, %c52], %32 {strides = array<i32>} : memref<118x108xf32, #tpu.memory_space<vmem>>, vector<118x4xf32>,
    %34 = vector.extract_strided_slice %3 {offsets = [14, 0], sizes = [118, 4], strides = [1, 1]} : vector<144x4xf32> to vector<118x4xf32>
    %c0_26 = arith.constant 0 : index
    %c56 = arith.constant 56 : index
    %35 = vector.load %arg9[%c0_26, %c56] : memref<118x108xf32, #tpu.memory_space<vmem>>, vector<118x4xf32>
    tpu.vector_store %arg9[%c0_26, %c56], %34 {strides = array<i32>} : memref<118x108xf32, #tpu.memory_space<vmem>>, vector<118x4xf32>,
    %36 = vector.extract_strided_slice %3 {offsets = [24, 0], sizes = [118, 4], strides = [1, 1]} : vector<144x4xf32> to vector<118x4xf32>
    %c0_27 = arith.constant 0 : index
    %c60 = arith.constant 60 : index
    %37 = vector.load %arg9[%c0_27, %c60] : memref<118x108xf32, #tpu.memory_space<vmem>>, vector<118x4xf32>
    tpu.vector_store %arg9[%c0_27, %c60], %36 {strides = array<i32>} : memref<118x108xf32, #tpu.memory_space<vmem>>, vector<118x4xf32>,
    %38 = vector.extract_strided_slice %3 {offsets = [25, 0], sizes = [118, 4], strides = [1, 1]} : vector<144x4xf32> to vector<118x4xf32>
    %c0_28 = arith.constant 0 : index
    %c64 = arith.constant 64 : index
    %39 = vector.load %arg9[%c0_28, %c64] : memref<118x108xf32, #tpu.memory_space<vmem>>, vector<118x4xf32>
    tpu.vector_store %arg9[%c0_28, %c64], %38 {strides = array<i32>} : memref<118x108xf32, #tpu.memory_space<vmem>>, vector<118x4xf32>,
    %40 = vector.extract_strided_slice %3 {offsets = [26, 0], sizes = [118, 4], strides = [1, 1]} : vector<144x4xf32> to vector<118x4xf32>
    %c0_29 = arith.constant 0 : index
    %c68 = arith.constant 68 : index
    %41 = vector.load %arg9[%c0_29, %c68] : memref<118x108xf32, #tpu.memory_space<vmem>>, vector<118x4xf32>
    tpu.vector_store %arg9[%c0_29, %c68], %40 {strides = array<i32>} : memref<118x108xf32, #tpu.memory_space<vmem>>, vector<118x4xf32>,
    %42 = vector.extract_strided_slice %5 {offsets = [0, 0], sizes = [118, 4], strides = [1, 1]} : vector<144x4xf32> to vector<118x4xf32>
    %c0_30 = arith.constant 0 : index
    %c72 = arith.constant 72 : index
    %43 = vector.load %arg9[%c0_30, %c72] : memref<118x108xf32, #tpu.memory_space<vmem>>, vector<118x4xf32>
    tpu.vector_store %arg9[%c0_30, %c72], %42 {strides = array<i32>} : memref<118x108xf32, #tpu.memory_space<vmem>>, vector<118x4xf32>,
    %44 = vector.extract_strided_slice %5 {offsets = [1, 0], sizes = [118, 4], strides = [1, 1]} : vector<144x4xf32> to vector<118x4xf32>
    %c0_31 = arith.constant 0 : index
    %c76 = arith.constant 76 : index
    %45 = vector.load %arg9[%c0_31, %c76] : memref<118x108xf32, #tpu.memory_space<vmem>>, vector<118x4xf32>
    tpu.vector_store %arg9[%c0_31, %c76], %44 {strides = array<i32>} : memref<118x108xf32, #tpu.memory_space<vmem>>, vector<118x4xf32>,
    %46 = vector.extract_strided_slice %5 {offsets = [2, 0], sizes = [118, 4], strides = [1, 1]} : vector<144x4xf32> to vector<118x4xf32>
    %c0_32 = arith.constant 0 : index
    %c80 = arith.constant 80 : index
    %47 = vector.load %arg9[%c0_32, %c80] : memref<118x108xf32, #tpu.memory_space<vmem>>, vector<118x4xf32>
    tpu.vector_store %arg9[%c0_32, %c80], %46 {strides = array<i32>} : memref<118x108xf32, #tpu.memory_space<vmem>>, vector<118x4xf32>,
    %48 = vector.extract_strided_slice %5 {offsets = [12, 0], sizes = [118, 4], strides = [1, 1]} : vector<144x4xf32> to vector<118x4xf32>
    %c0_33 = arith.constant 0 : index
    %c84 = arith.constant 84 : index
    %49 = vector.load %arg9[%c0_33, %c84] : memref<118x108xf32, #tpu.memory_space<vmem>>, vector<118x4xf32>
    tpu.vector_store %arg9[%c0_33, %c84], %48 {strides = array<i32>} : memref<118x108xf32, #tpu.memory_space<vmem>>, vector<118x4xf32>,
    %50 = vector.extract_strided_slice %5 {offsets = [13, 0], sizes = [118, 4], strides = [1, 1]} : vector<144x4xf32> to vector<118x4xf32>
    %c0_34 = arith.constant 0 : index
    %c88 = arith.constant 88 : index
    %51 = vector.load %arg9[%c0_34, %c88] : memref<118x108xf32, #tpu.memory_space<vmem>>, vector<118x4xf32>
    tpu.vector_store %arg9[%c0_34, %c88], %50 {strides = array<i32>} : memref<118x108xf32, #tpu.memory_space<vmem>>, vector<118x4xf32>,
    %52 = vector.extract_strided_slice %5 {offsets = [14, 0], sizes = [118, 4], strides = [1, 1]} : vector<144x4xf32> to vector<118x4xf32>
    %c0_35 = arith.constant 0 : index
    %c92 = arith.constant 92 : index
    %53 = vector.load %arg9[%c0_35, %c92] : memref<118x108xf32, #tpu.memory_space<vmem>>, vector<118x4xf32>
    tpu.vector_store %arg9[%c0_35, %c92], %52 {strides = array<i32>} : memref<118x108xf32, #tpu.memory_space<vmem>>, vector<118x4xf32>,
    %54 = vector.extract_strided_slice %5 {offsets = [24, 0], sizes = [118, 4], strides = [1, 1]} : vector<144x4xf32> to vector<118x4xf32>
    %c0_36 = arith.constant 0 : index
    %c96 = arith.constant 96 : index
    %55 = vector.load %arg9[%c0_36, %c96] : memref<118x108xf32, #tpu.memory_space<vmem>>, vector<118x4xf32>
    tpu.vector_store %arg9[%c0_36, %c96], %54 {strides = array<i32>} : memref<118x108xf32, #tpu.memory_space<vmem>>, vector<118x4xf32>,
    %56 = vector.extract_strided_slice %5 {offsets = [25, 0], sizes = [118, 4], strides = [1, 1]} : vector<144x4xf32> to vector<118x4xf32>
    %c0_37 = arith.constant 0 : index
    %c100 = arith.constant 100 : index
    %57 = vector.load %arg9[%c0_37, %c100] : memref<118x108xf32, #tpu.memory_space<vmem>>, vector<118x4xf32>
    tpu.vector_store %arg9[%c0_37, %c100], %56 {strides = array<i32>} : memref<118x108xf32, #tpu.memory_space<vmem>>, vector<118x4xf32>,
    %58 = vector.extract_strided_slice %5 {offsets = [26, 0], sizes = [118, 4], strides = [1, 1]} : vector<144x4xf32> to vector<118x4xf32>
    %c0_38 = arith.constant 0 : index
    %c104 = arith.constant 104 : index
    %59 = vector.load %arg9[%c0_38, %c104] : memref<118x108xf32, #tpu.memory_space<vmem>>, vector<118x4xf32>
    tpu.vector_store %arg9[%c0_38, %c104], %58 {strides = array<i32>} : memref<118x108xf32, #tpu.memory_space<vmem>>, vector<118x4xf32>,
    %c0_39 = arith.constant 0 : index
    %c0_40 = arith.constant 0 : index
    %60 = vector.load %arg9[%c0_39, %c0_40] : memref<118x108xf32, #tpu.memory_space<vmem>>, vector<118x108xf32>
    %61 = arith.truncf %60 : vector<118x108xf32> to vector<118x108xbf16>
    %c0_41 = arith.constant 0 : index
    %c0_42 = arith.constant 0 : index
    %62 = vector.load %arg5[%c0_41, %c0_42] : memref<108x8xbf16, #tpu.memory_space<vmem>>, vector<108x8xbf16>
    %cst = arith.constant dense<0.000000e+00> : vector<118x8xf32>
    %63 = tpu.matmul %61, %62, %cst {dimension_numbers = #tpu.dot_dimension_numbers<[1], [0], [0], [1], [0, 0, 1, 1], [], []>} : vector<118x108xbf16>, vector<108x8xbf16>, vector<118x8xf32> -> vector<118x8xf32>
    %c0_43 = arith.constant 0 : index
    %c0_44 = arith.constant 0 : index
    %64 = vector.load %arg6[%c0_43, %c0_44] : memref<1x8xf32, #tpu.memory_space<vmem>>, vector<1x8xf32>
    %65 = vector.broadcast %64 : vector<1x8xf32> to vector<118x8xf32>
    %66 = arith.addf %63, %65 : vector<118x8xf32>
    %67 = vector.extract_strided_slice %66 {offsets = [0, 0], sizes = [10, 8], strides = [1, 1]} : vector<118x8xf32> to vector<10x8xf32>
    %68 = vector.extract_strided_slice %66 {offsets = [12, 0], sizes = [10, 8], strides = [1, 1]} : vector<118x8xf32> to vector<10x8xf32>
    %69 = vector.extract_strided_slice %66 {offsets = [24, 0], sizes = [10, 8], strides = [1, 1]} : vector<118x8xf32> to vector<10x8xf32>
    %70 = vector.extract_strided_slice %66 {offsets = [36, 0], sizes = [10, 8], strides = [1, 1]} : vector<118x8xf32> to vector<10x8xf32>
    %71 = vector.extract_strided_slice %66 {offsets = [48, 0], sizes = [10, 8], strides = [1, 1]} : vector<118x8xf32> to vector<10x8xf32>
    %72 = vector.extract_strided_slice %66 {offsets = [60, 0], sizes = [10, 8], strides = [1, 1]} : vector<118x8xf32> to vector<10x8xf32>
    %73 = vector.extract_strided_slice %66 {offsets = [72, 0], sizes = [10, 8], strides = [1, 1]} : vector<118x8xf32> to vector<10x8xf32>
    %74 = vector.extract_strided_slice %66 {offsets = [84, 0], sizes = [10, 8], strides = [1, 1]} : vector<118x8xf32> to vector<10x8xf32>
    %75 = vector.extract_strided_slice %66 {offsets = [96, 0], sizes = [10, 8], strides = [1, 1]} : vector<118x8xf32> to vector<10x8xf32>
    %76 = vector.extract_strided_slice %66 {offsets = [108, 0], sizes = [10, 8], strides = [1, 1]} : vector<118x8xf32> to vector<10x8xf32>
    %77 = tpu.concatenate %67, %68, %69, %70, %71, %72, %73, %74, %75, %76 in 0 : vector<10x8xf32>, vector<10x8xf32>, vector<10x8xf32>, vector<10x8xf32>, vector<10x8xf32>, vector<10x8xf32>, vector<10x8xf32>, vector<10x8xf32>, vector<10x8xf32>, vector<10x8xf32> -> vector<100x8xf32>
    %78 = arith.truncf %77 : vector<100x8xf32> to vector<100x8xbf16>
    %c0_45 = arith.constant 0 : index
    %c0_46 = arith.constant 0 : index
    %c0_47 = arith.constant 0 : index
    %c0_48 = arith.constant 0 : index
    %79 = vector.load %arg7[%c0_45, %c0_46, %c0_47, %c0_48] : memref<1x1x100x8xbf16, #tpu.memory_space<vmem>>, vector<1x1x100x8xbf16>
    %80 = vector.shape_cast %79 : vector<1x1x100x8xbf16> to vector<100x8xbf16>
    %81 = vector.shape_cast %78 : vector<100x8xbf16> to vector<1x1x100x8xbf16>
    tpu.vector_store %arg7[%c0_45, %c0_46, %c0_47, %c0_48], %81 {strides = array<i32>} : memref<1x1x100x8xbf16, #tpu.memory_space<vmem>>, vector<1x1x100x8xbf16>,
    %cst_49 = arith.constant dense<0.000000e+00> : vector<8xf32>
    %82 = vector.multi_reduction <add>, %77, %cst_49 [0] : vector<100x8xf32> to vector<8xf32>
    %83 = vector.shape_cast %82 : vector<8xf32> to vector<1x8xf32>
    %c0_50 = arith.constant 0 : index
    %c0_51 = arith.constant 0 : index
    %c0_52 = arith.constant 0 : index
    %c0_53 = arith.constant 0 : index
    %84 = vector.load %arg8[%c0_50, %c0_51, %c0_52, %c0_53] : memref<1x1x2x8xf32, #tpu.memory_space<vmem>>, vector<1x1x1x8xf32>
    %85 = vector.shape_cast %84 : vector<1x1x1x8xf32> to vector<1x8xf32>
    %86 = vector.shape_cast %83 : vector<1x8xf32> to vector<1x1x1x8xf32>
    tpu.vector_store %arg8[%c0_50, %c0_51, %c0_52, %c0_53], %86 {strides = array<i32>} : memref<1x1x2x8xf32, #tpu.memory_space<vmem>>, vector<1x1x1x8xf32>,
    %87 = arith.mulf %77, %77 : vector<100x8xf32>
    %cst_54 = arith.constant dense<0.000000e+00> : vector<8xf32>
    %88 = vector.multi_reduction <add>, %87, %cst_54 [0] : vector<100x8xf32> to vector<8xf32>
    %89 = vector.shape_cast %88 : vector<8xf32> to vector<1x8xf32>
    %c0_55 = arith.constant 0 : index
    %c0_56 = arith.constant 0 : index
    %c1 = arith.constant 1 : index
    %c0_57 = arith.constant 0 : index
    %90 = vector.load %arg8[%c0_55, %c0_56, %c1, %c0_57] : memref<1x1x2x8xf32, #tpu.memory_space<vmem>>, vector<1x1x1x8xf32>
    %91 = vector.shape_cast %90 : vector<1x1x1x8xf32> to vector<1x8xf32>
    %92 = vector.shape_cast %89 : vector<1x8xf32> to vector<1x1x1x8xf32>
    tpu.vector_store %arg8[%c0_55, %c0_56, %c1, %c0_57], %92 {strides = array<i32>} : memref<1x1x2x8xf32, #tpu.memory_space<vmem>>, vector<1x1x1x8xf32>,
    return
  }
  func.func @transform_0(%arg0: i32, %arg1: i32) -> (i32, i32, i32, i32) {
    %c0_i32 = arith.constant 0 : i32
    %0 = arith.addi %arg1, %c0_i32 : i32
    %c0_i32_0 = arith.constant 0 : i32
    %c0_i32_1 = arith.constant 0 : i32
    %c0_i32_2 = arith.constant 0 : i32
    return %arg0, %0, %c0_i32_0, %c0_i32_1 : i32, i32, i32, i32
  }
  func.func @transform_1(%arg0: i32, %arg1: i32) -> (i32, i32, i32, i32) {
    %c1_i32 = arith.constant 1 : i32
    %0 = arith.addi %arg1, %c1_i32 : i32
    %c0_i32 = arith.constant 0 : i32
    %c0_i32_0 = arith.constant 0 : i32
    %c0_i32_1 = arith.constant 0 : i32
    return %arg0, %0, %c0_i32, %c0_i32_0 : i32, i32, i32, i32
  }
  func.func @transform_2(%arg0: i32, %arg1: i32) -> (i32, i32, i32, i32) {
    %c2_i32 = arith.constant 2 : i32
    %0 = arith.addi %arg1, %c2_i32 : i32
    %c0_i32 = arith.constant 0 : i32
    %c0_i32_0 = arith.constant 0 : i32
    %c0_i32_1 = arith.constant 0 : i32
    return %arg0, %0, %c0_i32, %c0_i32_0 : i32, i32, i32, i32
  }
  func.func @transform_3(%arg0: i32, %arg1: i32) -> (i32, i32) {
    %c0_i32 = arith.constant 0 : i32
    %c0_i32_0 = arith.constant 0 : i32
    %c0_i32_1 = arith.constant 0 : i32
    return %c0_i32, %c0_i32_0 : i32, i32
  }
  func.func @transform_4(%arg0: i32, %arg1: i32) -> (i32, i32) {
    %c0_i32 = arith.constant 0 : i32
    %c0_i32_0 = arith.constant 0 : i32
    %c0_i32_1 = arith.constant 0 : i32
    return %c0_i32, %c0_i32_0 : i32, i32
  }
  func.func @transform_5(%arg0: i32, %arg1: i32) -> (i32, i32, i32, i32) {
    %c0_i32 = arith.constant 0 : i32
    %c0_i32_0 = arith.constant 0 : i32
    %c0_i32_1 = arith.constant 0 : i32
    return %arg0, %arg1, %c0_i32, %c0_i32_0 : i32, i32, i32, i32
  }
  func.func @transform_6(%arg0: i32, %arg1: i32) -> (i32, i32, i32, i32) {
    %c0_i32 = arith.constant 0 : i32
    %c0_i32_0 = arith.constant 0 : i32
    %c0_i32_1 = arith.constant 0 : i32
    return %arg0, %arg1, %c0_i32, %c0_i32_0 : i32, i32, i32, i32
  }
}

module attributes {stable_mosaic.version = 11 : i64} {
  func.func @_bn_relu_kernel(%arg0: i32, %arg1: memref<128x128xf32, #tpu.memory_space<vmem>>, %arg2: memref<1x128xf32, #tpu.memory_space<vmem>>, %arg3: memref<1x128xf32, #tpu.memory_space<vmem>>, %arg4: memref<128x128xf32, #tpu.memory_space<vmem>>) attributes {dimension_semantics = [#tpu.dimension_semantics<parallel>], iteration_bounds = array<i64: 1>, scalar_prefetch = 0 : i64, scratch_operands = 0 : i64, tpu.core_type = #tpu.core_type<tc>, window_params = [{transform_indices = @transform_0, window_bounds = array<i64: 128, 128>}, {pipeline_mode = #tpu.pipeline_mode<synchronous>, transform_indices = @transform_1, window_bounds = array<i64: 1, 128>}, {pipeline_mode = #tpu.pipeline_mode<synchronous>, transform_indices = @transform_2, window_bounds = array<i64: 1, 128>}, {transform_indices = @transform_3, window_bounds = array<i64: 128, 128>}]} {
    %c0 = arith.constant 0 : index
    %c0_0 = arith.constant 0 : index
    %0 = vector.load %arg1[%c0, %c0_0] : memref<128x128xf32, #tpu.memory_space<vmem>>, vector<128x128xf32>
    %c0_1 = arith.constant 0 : index
    %c0_2 = arith.constant 0 : index
    %1 = vector.load %arg2[%c0_1, %c0_2] : memref<1x128xf32, #tpu.memory_space<vmem>>, vector<1x128xf32>
    %2 = vector.broadcast %1 : vector<1x128xf32> to vector<128x128xf32>
    %3 = arith.mulf %0, %2 : vector<128x128xf32>
    %c0_3 = arith.constant 0 : index
    %c0_4 = arith.constant 0 : index
    %4 = vector.load %arg3[%c0_3, %c0_4] : memref<1x128xf32, #tpu.memory_space<vmem>>, vector<1x128xf32>
    %5 = vector.broadcast %4 : vector<1x128xf32> to vector<128x128xf32>
    %6 = arith.addf %3, %5 : vector<128x128xf32>
    %cst = arith.constant 0.000000e+00 : f32
    %7 = vector.broadcast %cst : f32 to vector<128x128xf32>
    %8 = arith.maximumf %6, %7 : vector<128x128xf32>
    %c0_5 = arith.constant 0 : index
    %c0_6 = arith.constant 0 : index
    %9 = vector.load %arg4[%c0_5, %c0_6] : memref<128x128xf32, #tpu.memory_space<vmem>>, vector<128x128xf32>
    tpu.vector_store %arg4[%c0_5, %c0_6], %8 {strides = array<i32>} : memref<128x128xf32, #tpu.memory_space<vmem>>, vector<128x128xf32>,
    return
  }
  func.func @transform_0(%arg0: i32) -> (i32, i32) {
    %c0_i32 = arith.constant 0 : i32
    %c0_i32_0 = arith.constant 0 : i32
    return %arg0, %c0_i32 : i32, i32
  }
  func.func @transform_1(%arg0: i32) -> (i32, i32) {
    %c0_i32 = arith.constant 0 : i32
    %c0_i32_0 = arith.constant 0 : i32
    %c0_i32_1 = arith.constant 0 : i32
    return %c0_i32, %c0_i32_0 : i32, i32
  }
  func.func @transform_2(%arg0: i32) -> (i32, i32) {
    %c0_i32 = arith.constant 0 : i32
    %c0_i32_0 = arith.constant 0 : i32
    %c0_i32_1 = arith.constant 0 : i32
    return %c0_i32, %c0_i32_0 : i32, i32
  }
  func.func @transform_3(%arg0: i32) -> (i32, i32) {
    %c0_i32 = arith.constant 0 : i32
    %c0_i32_0 = arith.constant 0 : i32
    return %arg0, %c0_i32 : i32, i32
  }
}

</mosaic_0001>

<bundles_post_ra>
// kernel: tile.13
= control target key start
LH: loop header
LB: loop body
LE: loop exit
PB: predicated region body
PF: predicated region fallthrough
CT: control target
= control target key end

     0   :  { %s22_s0 = inlined_call_operand.vmem [shape: f32[16], index: 0, kind: input, shape index: {}]   ;;  %s23_s1 = inlined_call_operand.vmem [shape: f32[8,16], index: 1, kind: output, shape index: {}]  }
   0x1   :  { %v4_v0 = vld [vmem:[%s22_s0] ss:$0 sm:$0xff] }
   0x2   :  { %5 = vst [vmem:[%s23_s1] sm:$0xff] %v4_v0 }

// kernel: tile.14
= control target key start
LH: loop header
LB: loop body
LE: loop exit
PB: predicated region body
PF: predicated region fallthrough
CT: control target
= control target key end

     0   :  { %s67_s10 = smov 112   ;;  %s68_s11 = smov 80   ;;  %vm3_vm0 = vcmask 130048   ;;  %vm9_vm1 = vcmask 1048448   ;;  %vm15_vm2 = vcmask 917248   ;;  %vm21_vm3 = vcmask 786048   ;;  %s111_s0 = inlined_call_operand.vmem [shape: f32[8,16], index: 0, kind: input, shape index: {}]   ;;  %s112_s1 = inlined_call_operand.vmem [shape: f32[1,128], index: 1, kind: output, shape index: {}]  }
   0x1   :  { %v53_v0 = vld [vmem:[%s111_s0 + $0x7] sm:$0x1]   ;;  %v55_v1 = vld [vmem:[%s111_s0 + $0x5] sm:$0x1]   ;;  %v54_v2 = vld [vmem:[%s111_s0 + $0x6] sm:$0x1]  }
   0x2   :  { %7 = vrot.lane.b32.xlu0 %v53_v0, %s67_s10  ;;  %19 = vrot.lane.b32.xlu1 %v55_v1, %s68_s11  ;;  %v56_v3 = vld [vmem:[%s111_s0 + $0x4] sm:$0x1]   ;;  %v2_v4 = vld [vmem:[%s111_s0] sm:$0x1]   ;;  %s69_s18 = smov 96   ;;  %s70_s19 = smov 64  }
   0x3   :  { %4 = vst.msk [vmem:[#allocation0] sm:$0x1] %vm3_vm0, %v2_v4   ;;  %v57_v5 = vld [vmem:[%s111_s0 + $0x3] sm:$0x1]   ;;  %v58_v6 = vld [vmem:[%s111_s0 + $0x2] sm:$0x1]  }
   0x4   :  { %s71_s24 = smov 48   ;;  %s72_s25 = smov 32   ;;  %v59_v7 = vld [vmem:[%s111_s0 + $0x1] sm:$0x1]   ;;  %vm27_vm4 = vcmask 654848   ;;  %vm33_vm5 = vcmask 523648  }
   0x5   :  { %s73_s0 = smov 16   ;;  %vm39_vm6 = vcmask 392448   ;;  %vm45_vm7 = vcmask 261248  }
   0x6   :  { %13 = vrot.lane.b32.xlu0 %v54_v2, %s69_s18  ;;  %25 = vrot.lane.b32.xlu1 %v56_v3, %s70_s19 }
   0xa   :  { %31 = vrot.lane.b32.xlu0 %v57_v5, %s71_s24  ;;  %37 = vrot.lane.b32.xlu1 %v58_v6, %s72_s25 }
   0xe   :  { %43 = vrot.lane.b32.xlu0 %v59_v7, %s73_s0 }
  0x74   :  { %v8_v8 = vpop.permute.xlu0 %7   ;;  %v20_v9 = vpop.permute.xlu1 %19  }
  0x75   :  { %10 = vst.msk [vmem:[#allocation0] sm:$0x1] %vm9_vm1, %v8_v8  }
  0x78   :  { %v14_v10 = vpop.permute.xlu0 %13   ;;  %v26_v11 = vpop.permute.xlu1 %25  }
  0x79   :  { %16 = vst.msk [vmem:[#allocation0] sm:$0x1] %vm15_vm2, %v14_v10  }
  0x7a   :  { %22 = vst.msk [vmem:[#allocation0] sm:$0x1] %vm21_vm3, %v20_v9  }
  0x7b   :  { %28 = vst.msk [vmem:[#allocation0] sm:$0x1] %vm27_vm4, %v26_v11  }
  0x7c   :  { %v32_v12 = vpop.permute.xlu0 %31   ;;  %v38_v13 = vpop.permute.xlu1 %37  }
  0x7d   :  { %34 = vst.msk [vmem:[#allocation0] sm:$0x1] %vm33_vm5, %v32_v12  }
  0x7e   :  { %40 = vst.msk [vmem:[#allocation0] sm:$0x1] %vm39_vm6, %v38_v13  }
  0x80   :  { %v44_v14 = vpop.permute.xlu0 %43  }
  0x81   :  { %46 = vst.msk [vmem:[#allocation0] sm:$0x1] %vm45_vm7, %v44_v14  }
  0x88   :  { %v50_v15 = vld [vmem:[#allocation0] sm:$0x1] }
  0x89   :  { %52 = vst [vmem:[%s112_s1] sm:$0x1] %v50_v15 }

// kernel: double_convolution.5
= control target key start
LH: loop header
LB: loop body
LE: loop exit
PB: predicated region body
PF: predicated region fallthrough
CT: control target
= control target key end

     0   :  { %s254_s0 = inlined_call_operand.vmem [shape: f32[128,128], index: 0, kind: input, shape index: {}]   ;;  %s255_s1 = inlined_call_operand.vmem [shape: f32[1,128], index: 1, kind: input, shape index: {}]   ;;  %s256_s2 = inlined_call_operand.vmem [shape: f32[1,128], index: 2, kind: input, shape index: {}]   ;;  %s257_s3 = inlined_call_operand.vmem [shape: f32[128,128], index: 3, kind: output, shape index: {}]  }
   0x1   :  { %v14_v0 = vld [vmem:[%s254_s0] sm:$0xff]  ;;  %v15_v4 = vld [vmem:[%s254_s0 + $0x8] sm:$0xff]  ;;  %v16_v5 = vld [vmem:[%s254_s0 + $0x10] sm:$0xff] }
   0x2   :  { %v112_v1 = vld [vmem:[%s255_s1] ss:$0 sm:$0xff]  ;;  %v17_v6 = vld [vmem:[%s254_s0 + $0x18] sm:$0xff]  ;;  %v19_v11 = vld [vmem:[%s254_s0 + $0x28] sm:$0xff] }
   0x3   :  { %v143_v2 = vld [vmem:[%s256_s2] ss:$0 sm:$0xff]  ;;  %v37_v3 = vmul.f32 %v112_v1, %v14_v0  ;;  %v38_v7 = vmul.f32 %v112_v1, %v15_v4  ;;  %v39_v8 = vmul.f32 %v112_v1, %v16_v5  ;;  %v40_v9 = vmul.f32 %v112_v1, %v17_v6  ;;  %v20_v12 = vld [vmem:[%s254_s0 + $0x30] sm:$0xff]  ;;  %v21_v17 = vld [vmem:[%s254_s0 + $0x38] sm:$0xff] }
   0x4   :  { %v18_v10 = vld [vmem:[%s254_s0 + $0x20] sm:$0xff]  ;;  %v42_v15 = vmul.f32 %v112_v1, %v19_v11  ;;  %v43_v16 = vmul.f32 %v112_v1, %v20_v12  ;;  %v44_v21 = vmul.f32 %v112_v1, %v21_v17  ;;  %v23_v27 = vld [vmem:[%s254_s0 + $0x48] sm:$0xff]  ;;  %v24_v28 = vld [vmem:[%s254_s0 + $0x50] sm:$0xff] }
   0x5   :  { %v60_v13 = vadd.f32 %v143_v2, %v37_v3  ;;  %v41_v14 = vmul.f32 %v112_v1, %v18_v10  ;;  %v61_v18 = vadd.f32 %v143_v2, %v38_v7  ;;  %v62_v19 = vadd.f32 %v143_v2, %v39_v8  ;;  %v22_v22 = vld [vmem:[%s254_s0 + $0x40] sm:$0xff]  ;;  %v25_v29 = vld [vmem:[%s254_s0 + $0x58] sm:$0xff]  ;;  %v27_v35 = vld [vmem:[%s254_s0 + $0x68] sm:$0xff] }
   0x6   :  { %v63_v20 = vadd.f32 %v143_v2, %v40_v9  ;;  %v65_v25 = vadd.f32 %v143_v2, %v42_v15  ;;  %v66_v26 = vadd.f32 %v143_v2, %v43_v16  ;;  %v67_v33 = vadd.f32 %v143_v2, %v44_v21  ;;  %v26_v34 = vld [vmem:[%s254_s0 + $0x60] sm:$0xff]  ;;  %v28_v36 = vld [vmem:[%s254_s0 + $0x70] sm:$0xff]  ;;  %v29_v41 = vld [vmem:[%s254_s0 + $0x78] sm:$0xff] }
   0x7   :  { %v76_v23 = vmax.f32 %v60_v13, 0.0  ;;  %v64_v24 = vadd.f32 %v143_v2, %v41_v14  ;;  %v77_v30 = vmax.f32 %v61_v18, 0.0  ;;  %v78_v31 = vmax.f32 %v62_v19, 0.0 }
   0x8   :  { %v79_v32 = vmax.f32 %v63_v20, 0.0  ;;  %v81_v38 = vmax.f32 %v65_v25, 0.0  ;;  %v82_v39 = vmax.f32 %v66_v26, 0.0  ;;  %v45_v40 = vmul.f32 %v112_v1, %v22_v22 }
   0x9   :  { %92 = vst [vmem:[%s257_s3] sm:$0xff] %v76_v23  ;;  %v80_v37 = vmax.f32 %v64_v24, 0.0  ;;  %93 = vst [vmem:[%s257_s3 + $0x8] sm:$0xff] %v77_v30  ;;  %v83_v42 = vmax.f32 %v67_v33, 0.0  ;;  %v46_v43 = vmul.f32 %v112_v1, %v23_v27  ;;  %v47_v44 = vmul.f32 %v112_v1, %v24_v28 }
   0xa   :  { %94 = vst [vmem:[%s257_s3 + $0x10] sm:$0xff] %v78_v31  ;;  %95 = vst [vmem:[%s257_s3 + $0x18] sm:$0xff] %v79_v32  ;;  %v48_v45 = vmul.f32 %v112_v1, %v25_v29  ;;  %v68_v46 = vadd.f32 %v143_v2, %v45_v40  ;;  %v49_v47 = vmul.f32 %v112_v1, %v26_v34 }
   0xb   :  { %96 = vst [vmem:[%s257_s3 + $0x20] sm:$0xff] %v80_v37  ;;  %97 = vst [vmem:[%s257_s3 + $0x28] sm:$0xff] %v81_v38  ;;  %v50_v48 = vmul.f32 %v112_v1, %v27_v35  ;;  %v51_v49 = vmul.f32 %v112_v1, %v28_v36  ;;  %v69_v50 = vadd.f32 %v143_v2, %v46_v43 }
   0xc   :  { %98 = vst [vmem:[%s257_s3 + $0x30] sm:$0xff] %v82_v39  ;;  %99 = vst [vmem:[%s257_s3 + $0x38] sm:$0xff] %v83_v42  ;;  %v70_v51 = vadd.f32 %v143_v2, %v47_v44  ;;  %v71_v52 = vadd.f32 %v143_v2, %v48_v45  ;;  %v52_v53 = vmul.f32 %v112_v1, %v29_v41  ;;  %v84_v54 = vmax.f32 %v68_v46, 0.0 }
   0xd   :  { %v72_v55 = vadd.f32 %v143_v2, %v49_v47  ;;  %v73_v56 = vadd.f32 %v143_v2, %v50_v48  ;;  %v74_v57 = vadd.f32 %v143_v2, %v51_v49  ;;  %v85_v58 = vmax.f32 %v69_v50, 0.0 }
   0xe   :  { %v86_v59 = vmax.f32 %v70_v51, 0.0  ;;  %v87_v60 = vmax.f32 %v71_v52, 0.0  ;;  %v75_v61 = vadd.f32 %v143_v2, %v52_v53  ;;  %100 = vst [vmem:[%s257_s3 + $0x40] sm:$0xff] %v84_v54 }
   0xf   :  { %v88_v62 = vmax.f32 %v72_v55, 0.0  ;;  %v89_v63 = vmax.f32 %v73_v56, 0.0  ;;  %v90_v0 = vmax.f32 %v74_v57, 0.0  ;;  %101 = vst [vmem:[%s257_s3 + $0x48] sm:$0xff] %v85_v58 }
  0x10   :  { %102 = vst [vmem:[%s257_s3 + $0x50] sm:$0xff] %v86_v59  ;;  %103 = vst [vmem:[%s257_s3 + $0x58] sm:$0xff] %v87_v60  ;;  %v91_v1 = vmax.f32 %v75_v61, 0.0 }
  0x11   :  { %104 = vst [vmem:[%s257_s3 + $0x60] sm:$0xff] %v88_v62  ;;  %105 = vst [vmem:[%s257_s3 + $0x68] sm:$0xff] %v89_v63 }
  0x12   :  { %106 = vst [vmem:[%s257_s3 + $0x70] sm:$0xff] %v90_v0  ;;  %107 = vst [vmem:[%s257_s3 + $0x78] sm:$0xff] %v91_v1 }

// kernel: double_convolution.3
= control target key start
LH: loop header
LB: loop body
LE: loop exit
PB: predicated region body
PF: predicated region fallthrough
CT: control target
= control target key end

     0   :  { %s3080_s21 = smov 0   ;;  %s3082_s22 = smov 0   ;;  %s4553_s0 = inlined_call_operand.vmem [shape: f32[2,12,144,4], index: 0, kind: input, shape index: {}, may-alias: {0,1,2}]   ;;  %s4554_s1 = inlined_call_operand.vmem [shape: f32[2,12,144,4], index: 1, kind: input, shape index: {}, may-alias: {0,1,2}]   ;;  %s4555_s2 = inlined_call_operand.vmem [shape: f32[2,12,144,4], index: 2, kind: input, shape index: {}, may-alias: {0,1,2}]   ;;  %s4556_s3 = inlined_call_operand.vmem [shape: bf16[108,8], index: 3, kind: input, shape index: {}]   ;;  %s4557_s4 = inlined_call_operand.vmem [shape: f32[1,8], index: 4, kind: input, shape index: {}]   ;;  %s4558_s5 = inlined_call_operand.vmem [shape: bf16[2,10,100,8], index: 5, kind: output, shape index: {0}]   ;;  %s4559_s6 = inlined_call_operand.vmem [shape: f32[2,10,2,8], index: 6, kind: output, shape index: {1}]  }
   0x1   :  { %s3084_s23 = smov 0   ;;  %s3086_s24 = smov 0  }
   0x2   :  { %s3088_s25 = smov 0  }
   0x3 LB: > { %s26_s26 = sadd.s32 1, %s3009_s23  ;;  %s29_s27 = sadd.s32 1, %s3013_s24  ;;  %s3017_s25 = sphi %s3088_s25, %s17_s25   ;;  %s3013_s24 = sphi %s3086_s24, %s4563_s24   ;;  %s3009_s23 = sphi %s3084_s23, %s4562_s23   ;;  %s3005_s22 = sphi %s3082_s22, %s4561_s22   ;;  %s3001_s21 = sphi %s3080_s21, %s4560_s21  }
   0x4   : > { %p27_p0 = scmp.ge.s32.totalorder %s26_s26, 10  ;;  %p2781_p1 = scmp.ge.s32.totalorder %s3017_s25, 1 }
   0x5   : > { %p277_p2 = scmp.lt.s32.totalorder %s3017_s25, 21 }
   0x6   : > { %s4565_s26 = smov (%p27_p0, %s26_s26), 0  ;;  %s4567_s27 = smov (!%p27_p0, %s29_s27), %s3013_s24 }
   0x7   : > { %p278_p3 = pnand %p2781_p1, %p277_p2  ;;  %p31_p4 = scmp.ge.s32.totalorder %s4567_s27, 2 }
   0x8   : > { %p343_p5 = scmp.lt.s32.totalorder (!%p278_p3), %s3005_s22, 1  ;;  %p345_p6 = scmp.lt.s32.totalorder (!%p278_p3), %s3001_s21, 11  ;;  %vm446_vm0 = vcmask (!%p278_p3), 31744   ;;  %vm461_vm1 = vcmask (!%p278_p3), 29696   ;;  %vm525_vm2 = vcmask (!%p278_p3), 64544   ;;  %vm523_vm3 = vcmask (!%p278_p3), 64545  }
   0x9   : > { %s4569_s27 = smov (%p31_p4, %s4567_s27), 0  ;;  %281 = sbr.rel (%p278_p3) target bundleno = 1188 (0x4a4), region = 40 }
   0xa   : > { %s3019_s12 = smov (!%p278_p3), 4   ;;  %s3020_s13 = smov (!%p278_p3), 8   ;;  %vm586_vm4 = vcmask (!%p278_p3), 97346   ;;  %vm539_vm5 = vcmask (!%p278_p3), 63520   ;;  %vm588_vm6 = vcmask (!%p278_p3), 97344   ;;  %vm655_vm7 = vcmask (!%p278_p3), 130144  }
   0xb   : > { %s3021_s14 = smov (!%p278_p3), 12   ;;  %s3022_s15 = smov (!%p278_p3), 16   ;;  %vm653_vm8 = vcmask (!%p278_p3), 130148   ;;  %vm670_vm9 = vcmask (!%p278_p3), 124000   ;;  %vm722_vm10 = vcmask (!%p278_p3), 162944   ;;  %vm720_vm11 = vcmask (!%p278_p3), 162949  }
   0xc   : > { %s3023_s16 = smov (!%p278_p3), 20   ;;  %s3024_s17 = smov (!%p278_p3), 24   ;;  %vm737_vm12 = vcmask (!%p278_p3), 157824   ;;  %vm789_vm13 = vcmask (!%p278_p3), 195744   ;;  %vm787_vm14 = vcmask (!%p278_p3), 195750   ;;  %vm804_vm15 = vcmask (!%p278_p3), 191648  }
   0xd   : > { %s3025_s18 = smov (!%p278_p3), 28   ;;  %s3026_s19 = smov (!%p278_p3), 32  }
   0xe   : > { %s352_s20 = sadd.s32 (!%p278_p3), 1, %s3001_s21  ;;  %p376_p9 = scmp.lt.s32.totalorder (!%p278_p3), %s3001_s21, 9 }
   0xf   : > { %p355_p7 = scmp.lt.s32.totalorder (!%p278_p3), %s352_s20, 11 }
  0x10   : > { %s4571_s22 = smov (!%p343_p5, %s3005_s22), 1 }
  0x11   : > { %s346_s28 = scalar_select %p345_p6, %s3001_s21, 11 }
  0x12   : > { %s3117_s29 = smul.u32 216, %s4571_s22  ;;  %s4573_s20 = smov (!%p355_p7, %s352_s20), 11 }
  0x13   : > { %s2892_s30 = smul.u32 18, %s346_s28 }
  0x14   : > { %s2894_s28 = smul.u32 18, %s4573_s20 }
  0x15   : > { %s349_s7 = sadd.s32 %s3117_s29, %s2892_s30 }
  0x16   : > { %s2782_s8 = sshll.u32 %s349_s7, 3  ;;  %s359_s30 = sadd.s32 %s2894_s28, %s3117_s29 }
  0x17   : > { %s3123_s11 = scalar_lea.vmem %s4553_s0, %s2782_s8  ;;  %s2783_s7 = sshll.u32 %s359_s30, 3 }
  0x18   : > { %v3126_v0 = vld [vmem:[%s3123_s11 + $0x10] sm:$0xff]  ;;  %v392_v1 = vld [vmem:[%s3123_s11] sm:$0xff]  ;;  %v3130_v2 = vld [vmem:[%s3123_s11 + $0x18] sm:$0xff]  ;;  %s3456_s10 = scalar_lea.vmem %s4554_s1, %s2783_s7  ;;  %s3035_s28 = smov 68  }
  0x19   : > { %482 = vrot.lane.b32.xlu1 %v3126_v0, %s3019_s12  ;;  %478 = vrot.lane.b32.xlu0 %v392_v1, %s3019_s12  ;;  %v3136_v3 = vld [vmem:[%s3123_s11 + $0x8] sm:$0xff]  ;;  %449 = vst.msk [vmem:[#allocation2 + $0x10] sm:$0xff] %vm446_vm0, %v3126_v0  ;;  %447 = vst.msk [vmem:[#allocation2] sm:$0xff] %vm446_vm0, %v392_v1  ;;  %v3147_v5 = vld [vmem:[%s3123_s11 + $0x20] sm:$0xff]  ;;  %s3044_s8 = smov 104  }
  0x1a   : > { %v3139_v4 = vld [vmem:[%s3123_s11 + $0x28] sm:$0xff]  ;;  %450 = vst.msk [vmem:[#allocation2 + $0x18] sm:$0xff] %vm446_vm0, %v3130_v2  ;;  %v3150_v6 = vld [vmem:[%s3123_s11 + $0x38] sm:$0xff]  ;;  %v3153_v7 = vld [vmem:[%s3123_s11 + $0x30] sm:$0xff] }
  0x1b   : > { %448 = vst.msk [vmem:[#allocation2 + $0x8] sm:$0xff] %vm446_vm0, %v3136_v3  ;;  %452 = vst.msk [vmem:[#allocation2 + $0x28] sm:$0xff] %vm446_vm0, %v3139_v4  ;;  %v3160_v8 = vld [vmem:[%s3123_s11 + $0x48] sm:$0xff]  ;;  %v3163_v9 = vld [vmem:[%s3123_s11 + $0x40] sm:$0xff] }
  0x1c   : > { %v3166_v10 = vld [vmem:[%s3123_s11 + $0x58] sm:$0xff]  ;;  %451 = vst.msk [vmem:[#allocation2 + $0x20] sm:$0xff] %vm446_vm0, %v3147_v5  ;;  %453 = vst.msk [vmem:[#allocation2 + $0x30] sm:$0xff] %vm446_vm0, %v3153_v7  ;;  %v3175_v11 = vld [vmem:[%s3123_s11 + $0x50] sm:$0xff] }
  0x1d   : > { %454 = vst.msk [vmem:[#allocation2 + $0x38] sm:$0xff] %vm446_vm0, %v3150_v6  ;;  %v3178_v12 = vld [vmem:[%s3123_s11 + $0x68] sm:$0xff]  ;;  %v3181_v13 = vld [vmem:[%s3123_s11 + $0x60] sm:$0xff]  ;;  %455 = vst.msk [vmem:[#allocation2 + $0x40] sm:$0xff] %vm446_vm0, %v3163_v9  ;;  %484 = vrot.lane.b32.xlu1 %v3130_v2, %s3019_s12  ;;  %480 = vrot.lane.b32.xlu0 %v3136_v3, %s3019_s12 }
  0x1e   : > { %456 = vst.msk [vmem:[#allocation2 + $0x48] sm:$0xff] %vm446_vm0, %v3160_v8  ;;  %458 = vst.msk [vmem:[#allocation2 + $0x58] sm:$0xff] %vm446_vm0, %v3166_v10  ;;  %v3208_v14 = vld [vmem:[%s3123_s11 + $0x70] sm:$0xff]  ;;  %v3254_v15 = vld [vmem:[%s3123_s11 + $0x80] sm:$0xff] }
  0x1f   : > { %457 = vst.msk [vmem:[#allocation2 + $0x50] sm:$0xff] %vm446_vm0, %v3175_v11  ;;  %459 = vst.msk [vmem:[#allocation2 + $0x60] sm:$0xff] %vm446_vm0, %v3181_v13  ;;  %v3257_v16 = vld [vmem:[%s3123_s11 + $0x78] sm:$0xff]  ;;  %v3368_v51 = vld [vmem:[%s3123_s11 + $0x88] sm:$0xff]  ;;  %s3027_s11 = smov 36  }
  0x20   : > { %460 = vst.msk [vmem:[#allocation2 + $0x68] sm:$0xff] %vm446_vm0, %v3178_v12  ;;  %vm852_vm0 = vcmask 228544  }
  0x21   : > { %488 = vrot.lane.b32.xlu1 %v3139_v4, %s3019_s12  ;;  %486 = vrot.lane.b32.xlu0 %v3147_v5, %s3019_s12  ;;  %462 = vst.msk [vmem:[#allocation2 + $0x70] sm:$0x3f] %vm461_vm1, %v3208_v14  ;;  %vm914_vm1 = vcmask 261345  }
  0x25   : > { %492 = vrot.lane.b32.xlu1 %v3150_v6, %s3019_s12  ;;  %490 = vrot.lane.b32.xlu0 %v3153_v7, %s3019_s12 }
  0x29   : > { %496 = vrot.lane.b32.xlu1 %v3160_v8, %s3019_s12  ;;  %494 = vrot.lane.b32.xlu0 %v3163_v9, %s3019_s12 }
  0x2d   : > { %500 = vrot.lane.b32.xlu1 %v3166_v10, %s3019_s12  ;;  %498 = vrot.lane.b32.xlu0 %v3175_v11, %s3019_s12 }
  0x31   : > { %504 = vrot.lane.b32.xlu1 %v3178_v12, %s3019_s12  ;;  %502 = vrot.lane.b32.xlu0 %v3181_v13, %s3019_s12 }
  0x35   : > { %541 = vrot.lane.b32.xlu1 %v392_v1, %s3020_s13  ;;  %506 = vrot.lane.b32.xlu0 %v3208_v14, %s3019_s12  ;;  %s3028_s12 = smov 40  }
  0x39   : > { %545 = vrot.lane.b32.xlu1 %v3126_v0, %s3020_s13  ;;  %543 = vrot.lane.b32.xlu0 %v3136_v3, %s3020_s13 }
  0x3d   : > { %549 = vrot.lane.b32.xlu1 %v3147_v5, %s3020_s13  ;;  %547 = vrot.lane.b32.xlu0 %v3130_v2, %s3020_s13 }
  0x41   : > { %553 = vrot.lane.b32.xlu1 %v3153_v7, %s3020_s13  ;;  %551 = vrot.lane.b32.xlu0 %v3139_v4, %s3020_s13 }
  0x45   : > { %557 = vrot.lane.b32.xlu1 %v3163_v9, %s3020_s13  ;;  %555 = vrot.lane.b32.xlu0 %v3150_v6, %s3020_s13 }
  0x49   : > { %561 = vrot.lane.b32.xlu1 %v3175_v11, %s3020_s13  ;;  %559 = vrot.lane.b32.xlu0 %v3160_v8, %s3020_s13 }
  0x4d   : > { %565 = vrot.lane.b32.xlu1 %v3181_v13, %s3020_s13  ;;  %563 = vrot.lane.b32.xlu0 %v3166_v10, %s3020_s13 }
  0x51   : > { %569 = vrot.lane.b32.xlu1 %v3208_v14, %s3020_s13  ;;  %567 = vrot.lane.b32.xlu0 %v3178_v12, %s3020_s13  ;;  %s3029_s13 = smov 44  }
  0x55   : > { %607 = vrot.lane.b32.xlu1 %v3126_v0, %s3021_s14  ;;  %605 = vrot.lane.b32.xlu0 %v3136_v3, %s3021_s14 }
  0x59   : > { %611 = vrot.lane.b32.xlu1 %v3147_v5, %s3021_s14  ;;  %609 = vrot.lane.b32.xlu0 %v3130_v2, %s3021_s14 }
  0x5d   : > { %615 = vrot.lane.b32.xlu1 %v3153_v7, %s3021_s14  ;;  %613 = vrot.lane.b32.xlu0 %v3139_v4, %s3021_s14 }
  0x61   : > { %619 = vrot.lane.b32.xlu1 %v3163_v9, %s3021_s14  ;;  %617 = vrot.lane.b32.xlu0 %v3150_v6, %s3021_s14 }
  0x65   : > { %623 = vrot.lane.b32.xlu1 %v3175_v11, %s3021_s14  ;;  %621 = vrot.lane.b32.xlu0 %v3160_v8, %s3021_s14 }
  0x69   : > { %627 = vrot.lane.b32.xlu1 %v3181_v13, %s3021_s14  ;;  %625 = vrot.lane.b32.xlu0 %v3166_v10, %s3021_s14 }
  0x6d   : > { %631 = vrot.lane.b32.xlu1 %v3208_v14, %s3021_s14  ;;  %629 = vrot.lane.b32.xlu0 %v3178_v12, %s3021_s14 }
  0x71   : > { %635 = vrot.lane.b32.xlu1 %v3254_v15, %s3021_s14  ;;  %633 = vrot.lane.b32.xlu0 %v3257_v16, %s3021_s14  ;;  %s3030_s14 = smov 48  }
  0x75   : > { %674 = vrot.lane.b32.xlu1 %v3126_v0, %s3022_s15  ;;  %672 = vrot.lane.b32.xlu0 %v3136_v3, %s3022_s15 }
  0x79   : > { %678 = vrot.lane.b32.xlu1 %v3147_v5, %s3022_s15  ;;  %676 = vrot.lane.b32.xlu0 %v3130_v2, %s3022_s15 }
  0x7d   : > { %682 = vrot.lane.b32.xlu1 %v3153_v7, %s3022_s15  ;;  %680 = vrot.lane.b32.xlu0 %v3139_v4, %s3022_s15 }
  0x81   : > { %686 = vrot.lane.b32.xlu1 %v3163_v9, %s3022_s15  ;;  %684 = vrot.lane.b32.xlu0 %v3150_v6, %s3022_s15 }
  0x85   : > { %690 = vrot.lane.b32.xlu1 %v3175_v11, %s3022_s15  ;;  %688 = vrot.lane.b32.xlu0 %v3160_v8, %s3022_s15 }
  0x89   : > { %694 = vrot.lane.b32.xlu1 %v3181_v13, %s3022_s15  ;;  %692 = vrot.lane.b32.xlu0 %v3166_v10, %s3022_s15 }
  0x8b   : > { %v483_v17 = vpop.permute.xlu1 %482  ;;  %v479_v18 = vpop.permute.xlu0 %478 }
  0x8c   : > { %527 = vst.msk [vmem:[#allocation2 + $0xf] sm:$0xff] %vm525_vm2, %v483_v17 }
  0x8d   : > { %524 = vst.msk [vmem:[#allocation2 - $0x1] sm:$0xfe] %vm523_vm3, %v479_v18  ;;  %698 = vrot.lane.b32.xlu1 %v3208_v14, %s3022_s15  ;;  %696 = vrot.lane.b32.xlu0 %v3178_v12, %s3022_s15  ;;  %vm916_vm3 = vcmask 261344  }
  0x8f   : > { %v485_v19 = vpop.permute.xlu1 %484  ;;  %v481_v20 = vpop.permute.xlu0 %480 }
  0x90   : > { %528 = vst.msk [vmem:[#allocation2 + $0x17] sm:$0xff] %vm525_vm2, %v485_v19  ;;  %526 = vst.msk [vmem:[#allocation2 + $0x7] sm:$0xff] %vm525_vm2, %v481_v20 }
  0x91   : > { %702 = vrot.lane.b32.xlu1 %v3254_v15, %s3022_s15  ;;  %700 = vrot.lane.b32.xlu0 %v3257_v16, %s3022_s15  ;;  %s3031_s15 = smov 52  }
  0x93   : > { %v489_v21 = vpop.permute.xlu1 %488  ;;  %v487_v22 = vpop.permute.xlu0 %486 }
  0x94   : > { %530 = vst.msk [vmem:[#allocation2 + $0x27] sm:$0xff] %vm525_vm2, %v489_v21  ;;  %529 = vst.msk [vmem:[#allocation2 + $0x1f] sm:$0xff] %vm525_vm2, %v487_v22 }
  0x95   : > { %741 = vrot.lane.b32.xlu1 %v3126_v0, %s3023_s16  ;;  %739 = vrot.lane.b32.xlu0 %v3136_v3, %s3023_s16 }
  0x97   : > { %v493_v23 = vpop.permute.xlu1 %492  ;;  %v491_v24 = vpop.permute.xlu0 %490 }
  0x98   : > { %532 = vst.msk [vmem:[#allocation2 + $0x37] sm:$0xff] %vm525_vm2, %v493_v23  ;;  %531 = vst.msk [vmem:[#allocation2 + $0x2f] sm:$0xff] %vm525_vm2, %v491_v24 }
  0x99   : > { %745 = vrot.lane.b32.xlu1 %v3147_v5, %s3023_s16  ;;  %743 = vrot.lane.b32.xlu0 %v3130_v2, %s3023_s16 }
  0x9b   : > { %v497_v25 = vpop.permute.xlu1 %496  ;;  %v495_v26 = vpop.permute.xlu0 %494 }
  0x9c   : > { %534 = vst.msk [vmem:[#allocation2 + $0x47] sm:$0xff] %vm525_vm2, %v497_v25  ;;  %533 = vst.msk [vmem:[#allocation2 + $0x3f] sm:$0xff] %vm525_vm2, %v495_v26  ;;  %v3485_v25 = vld [vmem:[%s3456_s10 + $0x20] sm:$0xff]  ;;  %v3488_v26 = vld [vmem:[%s3456_s10 + $0x18] sm:$0xff] }
  0x9d   : > { %749 = vrot.lane.b32.xlu1 %v3153_v7, %s3023_s16  ;;  %747 = vrot.lane.b32.xlu0 %v3139_v4, %s3023_s16 }
  0x9f   : > { %v501_v27 = vpop.permute.xlu1 %500  ;;  %v499_v28 = vpop.permute.xlu0 %498 }
  0xa0   : > { %536 = vst.msk [vmem:[#allocation2 + $0x57] sm:$0xff] %vm525_vm2, %v501_v27  ;;  %535 = vst.msk [vmem:[#allocation2 + $0x4f] sm:$0xff] %vm525_vm2, %v499_v28 }
  0xa1   : > { %753 = vrot.lane.b32.xlu1 %v3163_v9, %s3023_s16  ;;  %751 = vrot.lane.b32.xlu0 %v3150_v6, %s3023_s16 }
  0xa3   : > { %v505_v29 = vpop.permute.xlu1 %504  ;;  %v503_v30 = vpop.permute.xlu0 %502 }
  0xa4   : > { %538 = vst.msk [vmem:[#allocation2 + $0x67] sm:$0xff] %vm525_vm2, %v505_v29  ;;  %537 = vst.msk [vmem:[#allocation2 + $0x5f] sm:$0xff] %vm525_vm2, %v503_v30  ;;  %v3497_v29 = vld [vmem:[%s3456_s10 + $0x30] sm:$0xff]  ;;  %v3500_v30 = vld [vmem:[%s3456_s10 + $0x28] sm:$0xff]  ;;  %vm867_vm2 = vcmask 226496  }
  0xa5   : > { %757 = vrot.lane.b32.xlu1 %v3175_v11, %s3023_s16  ;;  %755 = vrot.lane.b32.xlu0 %v3160_v8, %s3023_s16 }
  0xa7   : > { %v542_v31 = vpop.permute.xlu1 %541  ;;  %v507_v32 = vpop.permute.xlu0 %506 }
  0xa8   : > { %587 = vst.msk [vmem:[#allocation2 - $0x2] sm:$0xfc] %vm586_vm4, %v542_v31  ;;  %vm930_vm4 = vcmask 260320  }
  0xa9   : > { %540 = vst.msk [vmem:[#allocation2 + $0x6f] sm:$0x7f] %vm539_vm5, %v507_v32  ;;  %761 = vrot.lane.b32.xlu1 %v3181_v13, %s3023_s16  ;;  %759 = vrot.lane.b32.xlu0 %v3166_v10, %s3023_s16  ;;  %vm979_vm5 = vcmask 294144  }
  0xab   : > { %v546_v33 = vpop.permute.xlu1 %545  ;;  %v544_v34 = vpop.permute.xlu0 %543 }
  0xac   : > { %590 = vst.msk [vmem:[#allocation2 + $0xe] sm:$0xff] %vm588_vm6, %v546_v33  ;;  %589 = vst.msk [vmem:[#allocation2 + $0x6] sm:$0xff] %vm588_vm6, %v544_v34  ;;  %v3509_v33 = vld [vmem:[%s3456_s10 + $0x40] sm:$0xff]  ;;  %v3512_v34 = vld [vmem:[%s3456_s10 + $0x38] sm:$0xff] }
  0xad   : > { %765 = vrot.lane.b32.xlu1 %v3208_v14, %s3023_s16  ;;  %763 = vrot.lane.b32.xlu0 %v3178_v12, %s3023_s16 }
  0xaf   : > { %v550_v35 = vpop.permute.xlu1 %549  ;;  %v548_v36 = vpop.permute.xlu0 %547 }
  0xb0   : > { %592 = vst.msk [vmem:[#allocation2 + $0x1e] sm:$0xff] %vm588_vm6, %v550_v35  ;;  %591 = vst.msk [vmem:[#allocation2 + $0x16] sm:$0xff] %vm588_vm6, %v548_v36 }
  0xb1   : > { %769 = vrot.lane.b32.xlu1 %v3254_v15, %s3023_s16  ;;  %767 = vrot.lane.b32.xlu0 %v3257_v16, %s3023_s16  ;;  %s3032_s16 = smov 56  }
  0xb3   : > { %v554_v37 = vpop.permute.xlu1 %553  ;;  %v552_v38 = vpop.permute.xlu0 %551 }
  0xb4   : > { %594 = vst.msk [vmem:[#allocation2 + $0x2e] sm:$0xff] %vm588_vm6, %v554_v37  ;;  %593 = vst.msk [vmem:[#allocation2 + $0x26] sm:$0xff] %vm588_vm6, %v552_v38  ;;  %v3521_v37 = vld [vmem:[%s3456_s10 + $0x50] sm:$0xff]  ;;  %v3524_v38 = vld [vmem:[%s3456_s10 + $0x48] sm:$0xff] }
  0xb5   : > { %809 = vrot.lane.b32.xlu1 %v3147_v5, %s3024_s17  ;;  %807 = vrot.lane.b32.xlu0 %v3130_v2, %s3024_s17 }
  0xb7   : > { %v558_v39 = vpop.permute.xlu1 %557  ;;  %v556_v40 = vpop.permute.xlu0 %555 }
  0xb8   : > { %596 = vst.msk [vmem:[#allocation2 + $0x3e] sm:$0xff] %vm588_vm6, %v558_v39  ;;  %595 = vst.msk [vmem:[#allocation2 + $0x36] sm:$0xff] %vm588_vm6, %v556_v40 }
  0xb9   : > { %813 = vrot.lane.b32.xlu1 %v3153_v7, %s3024_s17  ;;  %811 = vrot.lane.b32.xlu0 %v3139_v4, %s3024_s17 }
  0xbb   : > { %v562_v41 = vpop.permute.xlu1 %561  ;;  %v560_v42 = vpop.permute.xlu0 %559 }
  0xbc   : > { %598 = vst.msk [vmem:[#allocation2 + $0x4e] sm:$0xff] %vm588_vm6, %v562_v41  ;;  %597 = vst.msk [vmem:[#allocation2 + $0x46] sm:$0xff] %vm588_vm6, %v560_v42  ;;  %v3533_v41 = vld [vmem:[%s3456_s10 + $0x60] sm:$0xff]  ;;  %v3536_v42 = vld [vmem:[%s3456_s10 + $0x58] sm:$0xff] }
  0xbd   : > { %817 = vrot.lane.b32.xlu1 %v3163_v9, %s3024_s17  ;;  %815 = vrot.lane.b32.xlu0 %v3150_v6, %s3024_s17 }
  0xbf   : > { %v566_v43 = vpop.permute.xlu1 %565  ;;  %v564_v44 = vpop.permute.xlu0 %563 }
  0xc0   : > { %600 = vst.msk [vmem:[#allocation2 + $0x5e] sm:$0xff] %vm588_vm6, %v566_v43  ;;  %599 = vst.msk [vmem:[#allocation2 + $0x56] sm:$0xff] %vm588_vm6, %v564_v44 }
  0xc1   : > { %821 = vrot.lane.b32.xlu1 %v3175_v11, %s3024_s17  ;;  %819 = vrot.lane.b32.xlu0 %v3160_v8, %s3024_s17 }
  0xc3   : > { %v570_v45 = vpop.permute.xlu1 %569  ;;  %v568_v46 = vpop.permute.xlu0 %567 }
  0xc4   : > { %602 = vst.msk [vmem:[#allocation2 + $0x6e] sm:$0xff] %vm588_vm6, %v570_v45  ;;  %601 = vst.msk [vmem:[#allocation2 + $0x66] sm:$0xff] %vm588_vm6, %v568_v46  ;;  %v3544_v45 = vld [vmem:[%s3456_s10 + $0x70] sm:$0xff]  ;;  %v3547_v46 = vld [vmem:[%s3456_s10 + $0x68] sm:$0xff]  ;;  %vm977_vm6 = vcmask 294146  }
  0xc5   : > { %825 = vrot.lane.b32.xlu1 %v3181_v13, %s3024_s17  ;;  %823 = vrot.lane.b32.xlu0 %v3166_v10, %s3024_s17 }
  0xc7   : > { %v608_v47 = vpop.permute.xlu1 %607  ;;  %v606_v48 = vpop.permute.xlu0 %605 }
  0xc8   : > { %656 = vst.msk [vmem:[#allocation2 + $0x4] sm:$0xff] %vm655_vm7, %v608_v47 }
  0xc9   : > { %654 = vst.msk [vmem:[#allocation2 - $0x4] sm:$0xf0] %vm653_vm8, %v606_v48  ;;  %829 = vrot.lane.b32.xlu1 %v3208_v14, %s3024_s17  ;;  %827 = vrot.lane.b32.xlu0 %v3178_v12, %s3024_s17  ;;  %vm1069_vm8 = vcmask 324896  }
  0xcb   : > { %v612_v49 = vpop.permute.xlu1 %611  ;;  %v610_v50 = vpop.permute.xlu0 %609 }
  0xcc   : > { %658 = vst.msk [vmem:[#allocation2 + $0x14] sm:$0xff] %vm655_vm7, %v612_v49  ;;  %657 = vst.msk [vmem:[#allocation2 + $0xc] sm:$0xff] %vm655_vm7, %v610_v50 }
  0xcd   : > { %833 = vrot.lane.b32.xlu1 %v3254_v15, %s3024_s17  ;;  %831 = vrot.lane.b32.xlu0 %v3257_v16, %s3024_s17 }
  0xcf   : > { %v616_v52 = vpop.permute.xlu1 %615  ;;  %v614_v53 = vpop.permute.xlu0 %613 }
  0xd0   : > { %660 = vst.msk [vmem:[#allocation2 + $0x24] sm:$0xff] %vm655_vm7, %v616_v52  ;;  %659 = vst.msk [vmem:[#allocation2 + $0x1c] sm:$0xff] %vm655_vm7, %v614_v53 }
  0xd1   : > { %869 = vrot.lane.b32.xlu1 %v3130_v2, %s3025_s18  ;;  %835 = vrot.lane.b32.xlu0 %v3368_v51, %s3024_s17  ;;  %s3033_s17 = smov 60  }
  0xd3   : > { %v620_v54 = vpop.permute.xlu1 %619  ;;  %v618_v55 = vpop.permute.xlu0 %617 }
  0xd4   : > { %662 = vst.msk [vmem:[#allocation2 + $0x34] sm:$0xff] %vm655_vm7, %v620_v54  ;;  %661 = vst.msk [vmem:[#allocation2 + $0x2c] sm:$0xff] %vm655_vm7, %v618_v55 }
  0xd5   : > { %873 = vrot.lane.b32.xlu1 %v3139_v4, %s3025_s18  ;;  %871 = vrot.lane.b32.xlu0 %v3147_v5, %s3025_s18 }
  0xd7   : > { %v624_v56 = vpop.permute.xlu1 %623  ;;  %v622_v57 = vpop.permute.xlu0 %621 }
  0xd8   : > { %664 = vst.msk [vmem:[#allocation2 + $0x44] sm:$0xff] %vm655_vm7, %v624_v56  ;;  %663 = vst.msk [vmem:[#allocation2 + $0x3c] sm:$0xff] %vm655_vm7, %v622_v57 }
  0xd9   : > { %877 = vrot.lane.b32.xlu1 %v3150_v6, %s3025_s18  ;;  %875 = vrot.lane.b32.xlu0 %v3153_v7, %s3025_s18 }
  0xdb   : > { %v628_v58 = vpop.permute.xlu1 %627  ;;  %v626_v59 = vpop.permute.xlu0 %625 }
  0xdc   : > { %666 = vst.msk [vmem:[#allocation2 + $0x54] sm:$0xff] %vm655_vm7, %v628_v58  ;;  %665 = vst.msk [vmem:[#allocation2 + $0x4c] sm:$0xff] %vm655_vm7, %v626_v59 }
  0xdd   : > { %881 = vrot.lane.b32.xlu1 %v3160_v8, %s3025_s18  ;;  %879 = vrot.lane.b32.xlu0 %v3163_v9, %s3025_s18 }
  0xdf   : > { %v632_v60 = vpop.permute.xlu1 %631  ;;  %v630_v61 = vpop.permute.xlu0 %629 }
  0xe0   : > { %668 = vst.msk [vmem:[#allocation2 + $0x64] sm:$0xff] %vm655_vm7, %v632_v60  ;;  %667 = vst.msk [vmem:[#allocation2 + $0x5c] sm:$0xff] %vm655_vm7, %v630_v61 }
  0xe1   : > { %885 = vrot.lane.b32.xlu1 %v3166_v10, %s3025_s18  ;;  %883 = vrot.lane.b32.xlu0 %v3175_v11, %s3025_s18 }
  0xe3   : > { %v636_v62 = vpop.permute.xlu1 %635  ;;  %v634_v63 = vpop.permute.xlu0 %633 }
  0xe4   : > { %671 = vst.msk [vmem:[#allocation2 + $0x74] sm:$0x3] %vm670_vm9, %v636_v62  ;;  %vm1118_vm9 = vcmask 359744  }
  0xe5   : > { %669 = vst.msk [vmem:[#allocation2 + $0x6c] sm:$0xff] %vm655_vm7, %v634_v63  ;;  %889 = vrot.lane.b32.xlu1 %v3178_v12, %s3025_s18  ;;  %887 = vrot.lane.b32.xlu0 %v3181_v13, %s3025_s18  ;;  %vm1054_vm7 = vcmask 326944  }
  0xe7   : > { %v675_v0 = vpop.permute.xlu1 %674  ;;  %v673_v1 = vpop.permute.xlu0 %672 }
  0xe8   : > { %723 = vst.msk [vmem:[#allocation2 + $0x3] sm:$0xff] %vm722_vm10, %v675_v0 }
  0xe9   : > { %721 = vst.msk [vmem:[#allocation2 - $0x5] sm:$0xe0] %vm720_vm11, %v673_v1  ;;  %893 = vrot.lane.b32.xlu1 %v3257_v16, %s3025_s18  ;;  %891 = vrot.lane.b32.xlu0 %v3208_v14, %s3025_s18  ;;  %vm1179_vm11 = vcmask 392546  }
  0xeb   : > { %v679_v3 = vpop.permute.xlu1 %678  ;;  %v677_v17 = vpop.permute.xlu0 %676 }
  0xec   : > { %725 = vst.msk [vmem:[#allocation2 + $0x13] sm:$0xff] %vm722_vm10, %v679_v3  ;;  %724 = vst.msk [vmem:[#allocation2 + $0xb] sm:$0xff] %vm722_vm10, %v677_v17 }
  0xed   : > { %897 = vrot.lane.b32.xlu1 %v3368_v51, %s3025_s18  ;;  %895 = vrot.lane.b32.xlu0 %v3254_v15, %s3025_s18  ;;  %s3034_s18 = smov 64  }
  0xef   : > { %v683_v18 = vpop.permute.xlu1 %682  ;;  %v681_v19 = vpop.permute.xlu0 %680 }
  0xf0   : > { %727 = vst.msk [vmem:[#allocation2 + $0x23] sm:$0xff] %vm722_vm10, %v683_v18  ;;  %726 = vst.msk [vmem:[#allocation2 + $0x1b] sm:$0xff] %vm722_vm10, %v681_v19 }
  0xf1   : > { %934 = vrot.lane.b32.xlu1 %v3147_v5, %s3026_s19  ;;  %932 = vrot.lane.b32.xlu0 %v3130_v2, %s3026_s19 }
  0xf3   : > { %v687_v20 = vpop.permute.xlu1 %686  ;;  %v685_v21 = vpop.permute.xlu0 %684 }
  0xf4   : > { %729 = vst.msk [vmem:[#allocation2 + $0x33] sm:$0xff] %vm722_vm10, %v687_v20  ;;  %728 = vst.msk [vmem:[#allocation2 + $0x2b] sm:$0xff] %vm722_vm10, %v685_v21 }
  0xf5   : > { %938 = vrot.lane.b32.xlu1 %v3153_v7, %s3026_s19  ;;  %936 = vrot.lane.b32.xlu0 %v3139_v4, %s3026_s19 }
  0xf7   : > { %v691_v22 = vpop.permute.xlu1 %690  ;;  %v689_v23 = vpop.permute.xlu0 %688 }
  0xf8   : > { %731 = vst.msk [vmem:[#allocation2 + $0x43] sm:$0xff] %vm722_vm10, %v691_v22  ;;  %730 = vst.msk [vmem:[#allocation2 + $0x3b] sm:$0xff] %vm722_vm10, %v689_v23 }
  0xf9   : > { %942 = vrot.lane.b32.xlu1 %v3163_v9, %s3026_s19  ;;  %940 = vrot.lane.b32.xlu0 %v3150_v6, %s3026_s19 }
  0xfb   : > { %v695_v2 = vpop.permute.xlu1 %694  ;;  %v693_v5 = vpop.permute.xlu0 %692 }
  0xfc   : > { %733 = vst.msk [vmem:[#allocation2 + $0x53] sm:$0xff] %vm722_vm10, %v695_v2  ;;  %732 = vst.msk [vmem:[#allocation2 + $0x4b] sm:$0xff] %vm722_vm10, %v693_v5 }
  0xfd   : > { %946 = vrot.lane.b32.xlu1 %v3175_v11, %s3026_s19  ;;  %944 = vrot.lane.b32.xlu0 %v3160_v8, %s3026_s19 }
  0xff   : > { %v699_v4 = vpop.permute.xlu1 %698  ;;  %v697_v7 = vpop.permute.xlu0 %696 }
 0x100   : > { %735 = vst.msk [vmem:[#allocation2 + $0x63] sm:$0xff] %vm722_vm10, %v699_v4  ;;  %734 = vst.msk [vmem:[#allocation2 + $0x5b] sm:$0xff] %vm722_vm10, %v697_v7 }
 0x101   : > { %950 = vrot.lane.b32.xlu1 %v3181_v13, %s3026_s19  ;;  %948 = vrot.lane.b32.xlu0 %v3166_v10, %s3026_s19  ;;  %v3464_v10 = vld [vmem:[%s3456_s10] sm:$0xff] }
 0x103   : > { %v703_v6 = vpop.permute.xlu1 %702  ;;  %v701_v9 = vpop.permute.xlu0 %700 }
 0x104   : > { %738 = vst.msk [vmem:[#allocation2 + $0x73] sm:$0x7] %vm737_vm12, %v703_v6  ;;  %vm1132_vm12 = vcmask 358720  }
 0x105   : > { %736 = vst.msk [vmem:[#allocation2 + $0x6b] sm:$0xff] %vm722_vm10, %v701_v9  ;;  %954 = vrot.lane.b32.xlu1 %v3208_v14, %s3026_s19  ;;  %952 = vrot.lane.b32.xlu0 %v3178_v12, %s3026_s19  ;;  %v3473_v14 = vld [vmem:[%s3456_s10 + $0x10] sm:$0xff]  ;;  %vm1116_vm10 = vcmask 359745  }
 0x107   : > { %v742_v8 = vpop.permute.xlu1 %741  ;;  %v740_v11 = vpop.permute.xlu0 %739 }
 0x108   : > { %790 = vst.msk [vmem:[#allocation2 + $0x2] sm:$0xff] %vm789_vm13, %v742_v8 }
 0x109   : > { %788 = vst.msk [vmem:[#allocation2 - $0x6] sm:$0xc0] %vm787_vm14, %v740_v11  ;;  %958 = vrot.lane.b32.xlu1 %v3254_v15, %s3026_s19  ;;  %956 = vrot.lane.b32.xlu0 %v3257_v16, %s3026_s19  ;;  %v3476_v15 = vld [vmem:[%s3456_s10 + $0x8] sm:$0xff]  ;;  %vm1248_vm14 = vcmask 425344  }
 0x10b   : > { %v746_v12 = vpop.permute.xlu1 %745  ;;  %v744_v13 = vpop.permute.xlu0 %743 }
 0x10c   : > { %792 = vst.msk [vmem:[#allocation2 + $0x12] sm:$0xff] %vm789_vm13, %v746_v12  ;;  %791 = vst.msk [vmem:[#allocation2 + $0xa] sm:$0xff] %vm789_vm13, %v744_v13 }
 0x10d   : > { %1009 = vrot.lane.b32.xlu1 %v3464_v10, %s3027_s11  ;;  %960 = vrot.lane.b32.xlu0 %v3368_v51, %s3026_s19  ;;  %s363_s19 = sadd.s32 2, %s3001_s21  ;;  %s4577_s21 = smov (!%p376_p9, %s3001_s21), 9 }
 0x10e   : > { %p366_p8 = scmp.lt.s32.totalorder %s363_s19, 11 }
 0x10f   : > { %v750_v16 = vpop.permute.xlu1 %749  ;;  %v748_v24 = vpop.permute.xlu0 %747 }
 0x110   : > { %794 = vst.msk [vmem:[#allocation2 + $0x22] sm:$0xff] %vm789_vm13, %v750_v16  ;;  %793 = vst.msk [vmem:[#allocation2 + $0x1a] sm:$0xff] %vm789_vm13, %v748_v24  ;;  %s4575_s19 = smov (!%p366_p8, %s363_s19), 11 }
 0x111   : > { %1013 = vrot.lane.b32.xlu1 %v3473_v14, %s3027_s11  ;;  %1011 = vrot.lane.b32.xlu0 %v3476_v15, %s3027_s11  ;;  %s2895_s20 = smul.u32 18, %s4575_s19  ;;  %s3042_s19 = smov 96  }
 0x113   : > { %v754_v27 = vpop.permute.xlu1 %753  ;;  %v752_v28 = vpop.permute.xlu0 %751  ;;  %s370_s30 = sadd.s32 %s2895_s20, %s3117_s29 }
 0x114   : > { %796 = vst.msk [vmem:[#allocation2 + $0x32] sm:$0xff] %vm789_vm13, %v754_v27  ;;  %795 = vst.msk [vmem:[#allocation2 + $0x2a] sm:$0xff] %vm789_vm13, %v752_v28  ;;  %s2784_s7 = sshll.u32 %s370_s30, 3 }
 0x115   : > { %1017 = vrot.lane.b32.xlu1 %v3485_v25, %s3027_s11  ;;  %1015 = vrot.lane.b32.xlu0 %v3488_v26, %s3027_s11  ;;  %s3863_s29 = scalar_lea.vmem %s4555_s2, %s2784_s7  ;;  %s3043_s7 = smov 100  }
 0x117   : > { %v758_v31 = vpop.permute.xlu1 %757  ;;  %v756_v32 = vpop.permute.xlu0 %755 }
 0x118   : > { %798 = vst.msk [vmem:[#allocation2 + $0x42] sm:$0xff] %vm789_vm13, %v758_v31  ;;  %797 = vst.msk [vmem:[#allocation2 + $0x3a] sm:$0xff] %vm789_vm13, %v756_v32 }
 0x119   : > { %1021 = vrot.lane.b32.xlu1 %v3497_v29, %s3027_s11  ;;  %1019 = vrot.lane.b32.xlu0 %v3500_v30, %s3027_s11 }
 0x11b   : > { %v762_v35 = vpop.permute.xlu1 %761  ;;  %v760_v36 = vpop.permute.xlu0 %759 }
 0x11c   : > { %800 = vst.msk [vmem:[#allocation2 + $0x52] sm:$0xff] %vm789_vm13, %v762_v35  ;;  %799 = vst.msk [vmem:[#allocation2 + $0x4a] sm:$0xff] %vm789_vm13, %v760_v36 }
 0x11d   : > { %1025 = vrot.lane.b32.xlu1 %v3509_v33, %s3027_s11  ;;  %1023 = vrot.lane.b32.xlu0 %v3512_v34, %s3027_s11 }
 0x11f   : > { %v766_v39 = vpop.permute.xlu1 %765  ;;  %v764_v40 = vpop.permute.xlu0 %763 }
 0x120   : > { %802 = vst.msk [vmem:[#allocation2 + $0x62] sm:$0xff] %vm789_vm13, %v766_v39  ;;  %801 = vst.msk [vmem:[#allocation2 + $0x5a] sm:$0xff] %vm789_vm13, %v764_v40  ;;  %v3684_v39 = vld [vmem:[%s3456_s10 + $0x80] sm:$0xff]  ;;  %v3687_v40 = vld [vmem:[%s3456_s10 + $0x78] sm:$0xff] }
 0x121   : > { %1029 = vrot.lane.b32.xlu1 %v3521_v37, %s3027_s11  ;;  %1027 = vrot.lane.b32.xlu0 %v3524_v38, %s3027_s11 }
 0x123   : > { %v770_v43 = vpop.permute.xlu1 %769  ;;  %v768_v44 = vpop.permute.xlu0 %767 }
 0x124   : > { %805 = vst.msk [vmem:[#allocation2 + $0x72] sm:$0xf] %vm804_vm15, %v770_v43  ;;  %vm1246_vm15 = vcmask 425348  }
 0x125   : > { %803 = vst.msk [vmem:[#allocation2 + $0x6a] sm:$0xff] %vm789_vm13, %v768_v44  ;;  %1033 = vrot.lane.b32.xlu1 %v3533_v41, %s3027_s11  ;;  %1031 = vrot.lane.b32.xlu0 %v3536_v42, %s3027_s11  ;;  %vm1181_vm13 = vcmask 392544  }
 0x127   : > { %v810_v47 = vpop.permute.xlu1 %809  ;;  %v808_v48 = vpop.permute.xlu0 %807 }
 0x128   : > { %854 = vst.msk [vmem:[#allocation2 + $0x8] sm:$0xff] %vm852_vm0, %v810_v47  ;;  %853 = vst.msk [vmem:[#allocation2] sm:$0xff] %vm852_vm0, %v808_v48 }
 0x129   : > { %1037 = vrot.lane.b32.xlu1 %v3544_v45, %s3027_s11  ;;  %1035 = vrot.lane.b32.xlu0 %v3547_v46, %s3027_s11  ;;  %s3036_s11 = smov 72  }
 0x12b   : > { %v814_v49 = vpop.permute.xlu1 %813  ;;  %v812_v50 = vpop.permute.xlu0 %811 }
 0x12c   : > { %856 = vst.msk [vmem:[#allocation2 + $0x18] sm:$0xff] %vm852_vm0, %v814_v49  ;;  %855 = vst.msk [vmem:[#allocation2 + $0x10] sm:$0xff] %vm852_vm0, %v812_v50 }
 0x12d   : > { %1073 = vrot.lane.b32.xlu1 %v3476_v15, %s3028_s12  ;;  %1071 = vrot.lane.b32.xlu0 %v3464_v10, %s3028_s12 }
 0x12f   : > { %v818_v51 = vpop.permute.xlu1 %817  ;;  %v816_v52 = vpop.permute.xlu0 %815 }
 0x130   : > { %858 = vst.msk [vmem:[#allocation2 + $0x28] sm:$0xff] %vm852_vm0, %v818_v51  ;;  %857 = vst.msk [vmem:[#allocation2 + $0x20] sm:$0xff] %vm852_vm0, %v816_v52 }
 0x131   : > { %1077 = vrot.lane.b32.xlu1 %v3488_v26, %s3028_s12  ;;  %1075 = vrot.lane.b32.xlu0 %v3473_v14, %s3028_s12 }
 0x133   : > { %v822_v53 = vpop.permute.xlu1 %821  ;;  %v820_v54 = vpop.permute.xlu0 %819 }
 0x134   : > { %860 = vst.msk [vmem:[#allocation2 + $0x38] sm:$0xff] %vm852_vm0, %v822_v53  ;;  %859 = vst.msk [vmem:[#allocation2 + $0x30] sm:$0xff] %vm852_vm0, %v820_v54 }
 0x135   : > { %1081 = vrot.lane.b32.xlu1 %v3500_v30, %s3028_s12  ;;  %1079 = vrot.lane.b32.xlu0 %v3485_v25, %s3028_s12 }
 0x137   : > { %v826_v55 = vpop.permute.xlu1 %825  ;;  %v824_v56 = vpop.permute.xlu0 %823 }
 0x138   : > { %862 = vst.msk [vmem:[#allocation2 + $0x48] sm:$0xff] %vm852_vm0, %v826_v55  ;;  %861 = vst.msk [vmem:[#allocation2 + $0x40] sm:$0xff] %vm852_vm0, %v824_v56 }
 0x139   : > { %1085 = vrot.lane.b32.xlu1 %v3512_v34, %s3028_s12  ;;  %1083 = vrot.lane.b32.xlu0 %v3497_v29, %s3028_s12 }
 0x13b   : > { %v830_v57 = vpop.permute.xlu1 %829  ;;  %v828_v58 = vpop.permute.xlu0 %827 }
 0x13c   : > { %864 = vst.msk [vmem:[#allocation2 + $0x58] sm:$0xff] %vm852_vm0, %v830_v57  ;;  %863 = vst.msk [vmem:[#allocation2 + $0x50] sm:$0xff] %vm852_vm0, %v828_v58 }
 0x13d   : > { %1089 = vrot.lane.b32.xlu1 %v3524_v38, %s3028_s12  ;;  %1087 = vrot.lane.b32.xlu0 %v3509_v33, %s3028_s12 }
 0x13f   : > { %v834_v59 = vpop.permute.xlu1 %833  ;;  %v832_v60 = vpop.permute.xlu0 %831 }
 0x140   : > { %866 = vst.msk [vmem:[#allocation2 + $0x68] sm:$0xff] %vm852_vm0, %v834_v59  ;;  %865 = vst.msk [vmem:[#allocation2 + $0x60] sm:$0xff] %vm852_vm0, %v832_v60  ;;  %vm1263_vm0 = vcmask 419200  }
 0x141   : > { %1093 = vrot.lane.b32.xlu1 %v3536_v42, %s3028_s12  ;;  %1091 = vrot.lane.b32.xlu0 %v3521_v37, %s3028_s12 }
 0x143   : > { %v870_v61 = vpop.permute.xlu1 %869  ;;  %v836_v62 = vpop.permute.xlu0 %835 }
 0x144   : > { %915 = vst.msk [vmem:[#allocation2 - $0x1] sm:$0xfe] %vm914_vm1, %v870_v61  ;;  %vm1315_vm1 = vcmask 458144  }
 0x145   : > { %868 = vst.msk [vmem:[#allocation2 + $0x70] sm:$0x3f] %vm867_vm2, %v836_v62  ;;  %1097 = vrot.lane.b32.xlu1 %v3547_v46, %s3028_s12  ;;  %1095 = vrot.lane.b32.xlu0 %v3533_v41, %s3028_s12  ;;  %vm1313_vm2 = vcmask 458149  }
 0x147   : > { %v874_v63 = vpop.permute.xlu1 %873  ;;  %v872_v0 = vpop.permute.xlu0 %871 }
 0x148   : > { %918 = vst.msk [vmem:[#allocation2 + $0xf] sm:$0xff] %vm916_vm3, %v874_v63  ;;  %917 = vst.msk [vmem:[#allocation2 + $0x7] sm:$0xff] %vm916_vm3, %v872_v0 }
 0x149   : > { %1134 = vrot.lane.b32.xlu1 %v3464_v10, %s3029_s13  ;;  %1099 = vrot.lane.b32.xlu0 %v3544_v45, %s3028_s12  ;;  %s3037_s12 = smov 76  }
 0x14b   : > { %v878_v1 = vpop.permute.xlu1 %877  ;;  %v876_v3 = vpop.permute.xlu0 %875 }
 0x14c   : > { %920 = vst.msk [vmem:[#allocation2 + $0x1f] sm:$0xff] %vm916_vm3, %v878_v1  ;;  %919 = vst.msk [vmem:[#allocation2 + $0x17] sm:$0xff] %vm916_vm3, %v876_v3 }
 0x14d   : > { %1138 = vrot.lane.b32.xlu1 %v3473_v14, %s3029_s13  ;;  %1136 = vrot.lane.b32.xlu0 %v3476_v15, %s3029_s13 }
 0x14f   : > { %v882_v17 = vpop.permute.xlu1 %881  ;;  %v880_v18 = vpop.permute.xlu0 %879 }
 0x150   : > { %922 = vst.msk [vmem:[#allocation2 + $0x2f] sm:$0xff] %vm916_vm3, %v882_v17  ;;  %921 = vst.msk [vmem:[#allocation2 + $0x27] sm:$0xff] %vm916_vm3, %v880_v18 }
 0x151   : > { %1142 = vrot.lane.b32.xlu1 %v3485_v25, %s3029_s13  ;;  %1140 = vrot.lane.b32.xlu0 %v3488_v26, %s3029_s13 }
 0x153   : > { %v886_v19 = vpop.permute.xlu1 %885  ;;  %v884_v20 = vpop.permute.xlu0 %883 }
 0x154   : > { %924 = vst.msk [vmem:[#allocation2 + $0x3f] sm:$0xff] %vm916_vm3, %v886_v19  ;;  %923 = vst.msk [vmem:[#allocation2 + $0x37] sm:$0xff] %vm916_vm3, %v884_v20 }
 0x155   : > { %1146 = vrot.lane.b32.xlu1 %v3497_v29, %s3029_s13  ;;  %1144 = vrot.lane.b32.xlu0 %v3500_v30, %s3029_s13 }
 0x157   : > { %v890_v21 = vpop.permute.xlu1 %889  ;;  %v888_v22 = vpop.permute.xlu0 %887 }
 0x158   : > { %926 = vst.msk [vmem:[#allocation2 + $0x4f] sm:$0xff] %vm916_vm3, %v890_v21  ;;  %925 = vst.msk [vmem:[#allocation2 + $0x47] sm:$0xff] %vm916_vm3, %v888_v22 }
 0x159   : > { %1150 = vrot.lane.b32.xlu1 %v3509_v33, %s3029_s13  ;;  %1148 = vrot.lane.b32.xlu0 %v3512_v34, %s3029_s13 }
 0x15b   : > { %v894_v23 = vpop.permute.xlu1 %893  ;;  %v892_v2 = vpop.permute.xlu0 %891 }
 0x15c   : > { %928 = vst.msk [vmem:[#allocation2 + $0x5f] sm:$0xff] %vm916_vm3, %v894_v23  ;;  %927 = vst.msk [vmem:[#allocation2 + $0x57] sm:$0xff] %vm916_vm3, %v892_v2 }
 0x15d   : > { %1154 = vrot.lane.b32.xlu1 %v3521_v37, %s3029_s13  ;;  %1152 = vrot.lane.b32.xlu0 %v3524_v38, %s3029_s13 }
 0x15f   : > { %v898_v5 = vpop.permute.xlu1 %897  ;;  %v896_v4 = vpop.permute.xlu0 %895 }
 0x160   : > { %931 = vst.msk [vmem:[#allocation2 + $0x6f] sm:$0x7f] %vm930_vm4, %v898_v5  ;;  %vm1382_vm4 = vcmask 490944  }
 0x161   : > { %929 = vst.msk [vmem:[#allocation2 + $0x67] sm:$0xff] %vm916_vm3, %v896_v4  ;;  %1158 = vrot.lane.b32.xlu1 %v3533_v41, %s3029_s13  ;;  %1156 = vrot.lane.b32.xlu0 %v3536_v42, %s3029_s13  ;;  %vm1330_vm3 = vcmask 453024  }
 0x163   : > { %v935_v7 = vpop.permute.xlu1 %934  ;;  %v933_v6 = vpop.permute.xlu0 %932 }
 0x164   : > { %980 = vst.msk [vmem:[#allocation2 + $0x6] sm:$0xff] %vm979_vm5, %v935_v7 }
 0x165   : > { %978 = vst.msk [vmem:[#allocation2 - $0x2] sm:$0xfc] %vm977_vm6, %v933_v6  ;;  %1162 = vrot.lane.b32.xlu1 %v3544_v45, %s3029_s13  ;;  %1160 = vrot.lane.b32.xlu0 %v3547_v46, %s3029_s13  ;;  %s3038_s13 = smov 80   ;;  %vm1397_vm6 = vcmask 486848  }
 0x167   : > { %v939_v9 = vpop.permute.xlu1 %938  ;;  %v937_v8 = vpop.permute.xlu0 %936 }
 0x168   : > { %982 = vst.msk [vmem:[#allocation2 + $0x16] sm:$0xff] %vm979_vm5, %v939_v9  ;;  %981 = vst.msk [vmem:[#allocation2 + $0xe] sm:$0xff] %vm979_vm5, %v937_v8 }
 0x169   : > { %1200 = vrot.lane.b32.xlu1 %v3473_v14, %s3030_s14  ;;  %1198 = vrot.lane.b32.xlu0 %v3476_v15, %s3030_s14 }
 0x16b   : > { %v943_v11 = vpop.permute.xlu1 %942  ;;  %v941_v10 = vpop.permute.xlu0 %940 }
 0x16c   : > { %984 = vst.msk [vmem:[#allocation2 + $0x26] sm:$0xff] %vm979_vm5, %v943_v11  ;;  %983 = vst.msk [vmem:[#allocation2 + $0x1e] sm:$0xff] %vm979_vm5, %v941_v10 }
 0x16d   : > { %1204 = vrot.lane.b32.xlu1 %v3485_v25, %s3030_s14  ;;  %1202 = vrot.lane.b32.xlu0 %v3488_v26, %s3030_s14 }
 0x16f   : > { %v947_v12 = vpop.permute.xlu1 %946  ;;  %v945_v13 = vpop.permute.xlu0 %944 }
 0x170   : > { %986 = vst.msk [vmem:[#allocation2 + $0x36] sm:$0xff] %vm979_vm5, %v947_v12  ;;  %985 = vst.msk [vmem:[#allocation2 + $0x2e] sm:$0xff] %vm979_vm5, %v945_v13 }
 0x171   : > { %1208 = vrot.lane.b32.xlu1 %v3497_v29, %s3030_s14  ;;  %1206 = vrot.lane.b32.xlu0 %v3500_v30, %s3030_s14 }
 0x173   : > { %v951_v16 = vpop.permute.xlu1 %950  ;;  %v949_v24 = vpop.permute.xlu0 %948 }
 0x174   : > { %988 = vst.msk [vmem:[#allocation2 + $0x46] sm:$0xff] %vm979_vm5, %v951_v16  ;;  %987 = vst.msk [vmem:[#allocation2 + $0x3e] sm:$0xff] %vm979_vm5, %v949_v24 }
 0x175   : > { %1212 = vrot.lane.b32.xlu1 %v3509_v33, %s3030_s14  ;;  %1210 = vrot.lane.b32.xlu0 %v3512_v34, %s3030_s14 }
 0x177   : > { %v955_v27 = vpop.permute.xlu1 %954  ;;  %v953_v28 = vpop.permute.xlu0 %952 }
 0x178   : > { %990 = vst.msk [vmem:[#allocation2 + $0x56] sm:$0xff] %vm979_vm5, %v955_v27  ;;  %989 = vst.msk [vmem:[#allocation2 + $0x4e] sm:$0xff] %vm979_vm5, %v953_v28 }
 0x179   : > { %1216 = vrot.lane.b32.xlu1 %v3521_v37, %s3030_s14  ;;  %1214 = vrot.lane.b32.xlu0 %v3524_v38, %s3030_s14 }
 0x17b   : > { %v959_v31 = vpop.permute.xlu1 %958  ;;  %v957_v32 = vpop.permute.xlu0 %956 }
 0x17c   : > { %992 = vst.msk [vmem:[#allocation2 + $0x66] sm:$0xff] %vm979_vm5, %v959_v31  ;;  %991 = vst.msk [vmem:[#allocation2 + $0x5e] sm:$0xff] %vm979_vm5, %v957_v32 }
 0x17d   : > { %1220 = vrot.lane.b32.xlu1 %v3533_v41, %s3030_s14  ;;  %1218 = vrot.lane.b32.xlu0 %v3536_v42, %s3030_s14 }
 0x17f   : > { %v1010_v35 = vpop.permute.xlu1 %1009  ;;  %v961_v36 = vpop.permute.xlu0 %960 }
 0x180   : > { %1055 = vst.msk [vmem:[#allocation2] sm:$0xff] %vm1054_vm7, %v1010_v35 }
 0x181   : > { %993 = vst.msk [vmem:[#allocation2 + $0x6e] sm:$0xff] %vm979_vm5, %v961_v36  ;;  %1224 = vrot.lane.b32.xlu1 %v3544_v45, %s3030_s14  ;;  %1222 = vrot.lane.b32.xlu0 %v3547_v46, %s3030_s14  ;;  %vm1380_vm5 = vcmask 490950  }
 0x183   : > { %v1014_v43 = vpop.permute.xlu1 %1013  ;;  %v1012_v44 = vpop.permute.xlu0 %1011 }
 0x184   : > { %1057 = vst.msk [vmem:[#allocation2 + $0x10] sm:$0xff] %vm1054_vm7, %v1014_v43  ;;  %1056 = vst.msk [vmem:[#allocation2 + $0x8] sm:$0xff] %vm1054_vm7, %v1012_v44 }
 0x185   : > { %1228 = vrot.lane.b32.xlu1 %v3684_v39, %s3030_s14  ;;  %1226 = vrot.lane.b32.xlu0 %v3687_v40, %s3030_s14  ;;  %s3039_s14 = smov 84  }
 0x187   : > { %v1018_v47 = vpop.permute.xlu1 %1017  ;;  %v1016_v48 = vpop.permute.xlu0 %1015 }
 0x188   : > { %1059 = vst.msk [vmem:[#allocation2 + $0x20] sm:$0xff] %vm1054_vm7, %v1018_v47  ;;  %1058 = vst.msk [vmem:[#allocation2 + $0x18] sm:$0xff] %vm1054_vm7, %v1016_v48 }
 0x189   : > { %1267 = vrot.lane.b32.xlu1 %v3473_v14, %s3031_s15  ;;  %1265 = vrot.lane.b32.xlu0 %v3476_v15, %s3031_s15 }
 0x18b   : > { %v1022_v49 = vpop.permute.xlu1 %1021  ;;  %v1020_v50 = vpop.permute.xlu0 %1019 }
 0x18c   : > { %1061 = vst.msk [vmem:[#allocation2 + $0x30] sm:$0xff] %vm1054_vm7, %v1022_v49  ;;  %1060 = vst.msk [vmem:[#allocation2 + $0x28] sm:$0xff] %vm1054_vm7, %v1020_v50 }
 0x18d   : > { %1271 = vrot.lane.b32.xlu1 %v3485_v25, %s3031_s15  ;;  %1269 = vrot.lane.b32.xlu0 %v3488_v26, %s3031_s15 }
 0x18f   : > { %v1026_v51 = vpop.permute.xlu1 %1025  ;;  %v1024_v52 = vpop.permute.xlu0 %1023 }
 0x190   : > { %1063 = vst.msk [vmem:[#allocation2 + $0x40] sm:$0xff] %vm1054_vm7, %v1026_v51  ;;  %1062 = vst.msk [vmem:[#allocation2 + $0x38] sm:$0xff] %vm1054_vm7, %v1024_v52 }
 0x191   : > { %1275 = vrot.lane.b32.xlu1 %v3497_v29, %s3031_s15  ;;  %1273 = vrot.lane.b32.xlu0 %v3500_v30, %s3031_s15 }
 0x193   : > { %v1030_v53 = vpop.permute.xlu1 %1029  ;;  %v1028_v54 = vpop.permute.xlu0 %1027 }
 0x194   : > { %1065 = vst.msk [vmem:[#allocation2 + $0x50] sm:$0xff] %vm1054_vm7, %v1030_v53  ;;  %1064 = vst.msk [vmem:[#allocation2 + $0x48] sm:$0xff] %vm1054_vm7, %v1028_v54  ;;  %v3888_v54 = vld [vmem:[%s3863_s29 + $0x20] sm:$0xff] }
 0x195   : > { %1279 = vrot.lane.b32.xlu1 %v3509_v33, %s3031_s15  ;;  %1277 = vrot.lane.b32.xlu0 %v3512_v34, %s3031_s15 }
 0x197   : > { %v1034_v55 = vpop.permute.xlu1 %1033  ;;  %v1032_v56 = vpop.permute.xlu0 %1031 }
 0x198   : > { %1067 = vst.msk [vmem:[#allocation2 + $0x60] sm:$0xff] %vm1054_vm7, %v1034_v55  ;;  %1066 = vst.msk [vmem:[#allocation2 + $0x58] sm:$0xff] %vm1054_vm7, %v1032_v56 }
 0x199   : > { %1283 = vrot.lane.b32.xlu1 %v3521_v37, %s3031_s15  ;;  %1281 = vrot.lane.b32.xlu0 %v3524_v38, %s3031_s15 }
 0x19b   : > { %v1038_v57 = vpop.permute.xlu1 %1037  ;;  %v1036_v58 = vpop.permute.xlu0 %1035 }
 0x19c   : > { %1070 = vst.msk [vmem:[#allocation2 + $0x70] sm:$0x3f] %vm1069_vm8, %v1038_v57  ;;  %v3900_v57 = vld [vmem:[%s3863_s29 + $0x28] sm:$0xff]  ;;  %vm1507_vm8 = vcmask 556545  }
 0x19d   : > { %1068 = vst.msk [vmem:[#allocation2 + $0x68] sm:$0xff] %vm1054_vm7, %v1036_v58  ;;  %1287 = vrot.lane.b32.xlu1 %v3533_v41, %s3031_s15  ;;  %1285 = vrot.lane.b32.xlu0 %v3536_v42, %s3031_s15  ;;  %vm1445_vm7 = vcmask 523744  }
 0x19f   : > { %v1074_v59 = vpop.permute.xlu1 %1073  ;;  %v1072_v60 = vpop.permute.xlu0 %1071 }
 0x1a0   : > { %1119 = vst.msk [vmem:[#allocation2 + $0x7] sm:$0xff] %vm1118_vm9, %v1074_v59 }
 0x1a1   : > { %1117 = vst.msk [vmem:[#allocation2 - $0x1] sm:$0xfe] %vm1116_vm10, %v1072_v60  ;;  %1291 = vrot.lane.b32.xlu1 %v3544_v45, %s3031_s15  ;;  %1289 = vrot.lane.b32.xlu0 %v3547_v46, %s3031_s15  ;;  %vm1572_vm10 = vcmask 589344  }
 0x1a3   : > { %v1078_v61 = vpop.permute.xlu1 %1077  ;;  %v1076_v62 = vpop.permute.xlu0 %1075 }
 0x1a4   : > { %1121 = vst.msk [vmem:[#allocation2 + $0x17] sm:$0xff] %vm1118_vm9, %v1078_v61  ;;  %1120 = vst.msk [vmem:[#allocation2 + $0xf] sm:$0xff] %vm1118_vm9, %v1076_v62 }
 0x1a5   : > { %1295 = vrot.lane.b32.xlu1 %v3684_v39, %s3031_s15  ;;  %1293 = vrot.lane.b32.xlu0 %v3687_v40, %s3031_s15  ;;  %s3040_s15 = smov 88  }
 0x1a7   : > { %v1082_v63 = vpop.permute.xlu1 %1081  ;;  %v1080_v0 = vpop.permute.xlu0 %1079 }
 0x1a8   : > { %1123 = vst.msk [vmem:[#allocation2 + $0x27] sm:$0xff] %vm1118_vm9, %v1082_v63  ;;  %1122 = vst.msk [vmem:[#allocation2 + $0x1f] sm:$0xff] %vm1118_vm9, %v1080_v0 }
 0x1a9   : > { %1334 = vrot.lane.b32.xlu1 %v3473_v14, %s3032_s16  ;;  %1332 = vrot.lane.b32.xlu0 %v3476_v15, %s3032_s16 }
 0x1ab   : > { %v1086_v1 = vpop.permute.xlu1 %1085  ;;  %v1084_v3 = vpop.permute.xlu0 %1083 }
 0x1ac   : > { %1125 = vst.msk [vmem:[#allocation2 + $0x37] sm:$0xff] %vm1118_vm9, %v1086_v1  ;;  %1124 = vst.msk [vmem:[#allocation2 + $0x2f] sm:$0xff] %vm1118_vm9, %v1084_v3 }
 0x1ad   : > { %1338 = vrot.lane.b32.xlu1 %v3485_v25, %s3032_s16  ;;  %1336 = vrot.lane.b32.xlu0 %v3488_v26, %s3032_s16 }
 0x1af   : > { %v1090_v17 = vpop.permute.xlu1 %1089  ;;  %v1088_v18 = vpop.permute.xlu0 %1087 }
 0x1b0   : > { %1127 = vst.msk [vmem:[#allocation2 + $0x47] sm:$0xff] %vm1118_vm9, %v1090_v17  ;;  %1126 = vst.msk [vmem:[#allocation2 + $0x3f] sm:$0xff] %vm1118_vm9, %v1088_v18 }
 0x1b1   : > { %1342 = vrot.lane.b32.xlu1 %v3497_v29, %s3032_s16  ;;  %1340 = vrot.lane.b32.xlu0 %v3500_v30, %s3032_s16 }
 0x1b3   : > { %v1094_v14 = vpop.permute.xlu1 %1093  ;;  %v1092_v15 = vpop.permute.xlu0 %1091 }
 0x1b4   : > { %1129 = vst.msk [vmem:[#allocation2 + $0x57] sm:$0xff] %vm1118_vm9, %v1094_v14  ;;  %1128 = vst.msk [vmem:[#allocation2 + $0x4f] sm:$0xff] %vm1118_vm9, %v1092_v15 }
 0x1b5   : > { %1346 = vrot.lane.b32.xlu1 %v3509_v33, %s3032_s16  ;;  %1344 = vrot.lane.b32.xlu0 %v3512_v34, %s3032_s16 }
 0x1b7   : > { %v1098_v19 = vpop.permute.xlu1 %1097  ;;  %v1096_v20 = vpop.permute.xlu0 %1095 }
 0x1b8   : > { %1131 = vst.msk [vmem:[#allocation2 + $0x67] sm:$0xff] %vm1118_vm9, %v1098_v19  ;;  %1130 = vst.msk [vmem:[#allocation2 + $0x5f] sm:$0xff] %vm1118_vm9, %v1096_v20  ;;  %vm1509_vm9 = vcmask 556544  }
 0x1b9   : > { %1350 = vrot.lane.b32.xlu1 %v3521_v37, %s3032_s16  ;;  %1348 = vrot.lane.b32.xlu0 %v3524_v38, %s3032_s16 }
 0x1bb   : > { %v1135_v21 = vpop.permute.xlu1 %1134  ;;  %v1100_v22 = vpop.permute.xlu0 %1099 }
 0x1bc   : > { %1180 = vst.msk [vmem:[#allocation2 - $0x2] sm:$0xfc] %vm1179_vm11, %v1135_v21  ;;  %vm1570_vm11 = vcmask 589346  }
 0x1bd   : > { %1133 = vst.msk [vmem:[#allocation2 + $0x6f] sm:$0x7f] %vm1132_vm12, %v1100_v22  ;;  %1354 = vrot.lane.b32.xlu1 %v3533_v41, %s3032_s16  ;;  %1352 = vrot.lane.b32.xlu0 %v3536_v42, %s3032_s16  ;;  %vm1647_vm12 = vcmask 622144  }
 0x1bf   : > { %v1139_v23 = vpop.permute.xlu1 %1138  ;;  %v1137_v2 = vpop.permute.xlu0 %1136 }
 0x1c0   : > { %1183 = vst.msk [vmem:[#allocation2 + $0xe] sm:$0xff] %vm1181_vm13, %v1139_v23  ;;  %1182 = vst.msk [vmem:[#allocation2 + $0x6] sm:$0xff] %vm1181_vm13, %v1137_v2  ;;  %v3953_v2 = vld [vmem:[%s3863_s29 + $0x30] sm:$0xff] }
 0x1c1   : > { %1358 = vrot.lane.b32.xlu1 %v3544_v45, %s3032_s16  ;;  %1356 = vrot.lane.b32.xlu0 %v3547_v46, %s3032_s16 }
 0x1c3   : > { %v1143_v5 = vpop.permute.xlu1 %1142  ;;  %v1141_v4 = vpop.permute.xlu0 %1140 }
 0x1c4   : > { %1185 = vst.msk [vmem:[#allocation2 + $0x1e] sm:$0xff] %vm1181_vm13, %v1143_v5  ;;  %1184 = vst.msk [vmem:[#allocation2 + $0x16] sm:$0xff] %vm1181_vm13, %v1141_v4 }
 0x1c5   : > { %1362 = vrot.lane.b32.xlu1 %v3684_v39, %s3032_s16  ;;  %1360 = vrot.lane.b32.xlu0 %v3687_v40, %s3032_s16  ;;  %s3041_s16 = smov 92  }
 0x1c7   : > { %v1147_v7 = vpop.permute.xlu1 %1146  ;;  %v1145_v6 = vpop.permute.xlu0 %1144 }
 0x1c8   : > { %1187 = vst.msk [vmem:[#allocation2 + $0x2e] sm:$0xff] %vm1181_vm13, %v1147_v7  ;;  %1186 = vst.msk [vmem:[#allocation2 + $0x26] sm:$0xff] %vm1181_vm13, %v1145_v6 }
 0x1c9   : > { %1402 = vrot.lane.b32.xlu1 %v3485_v25, %s3033_s17  ;;  %1400 = vrot.lane.b32.xlu0 %v3488_v26, %s3033_s17 }
 0x1cb   : > { %v1151_v9 = vpop.permute.xlu1 %1150  ;;  %v1149_v8 = vpop.permute.xlu0 %1148 }
 0x1cc   : > { %1189 = vst.msk [vmem:[#allocation2 + $0x3e] sm:$0xff] %vm1181_vm13, %v1151_v9  ;;  %1188 = vst.msk [vmem:[#allocation2 + $0x36] sm:$0xff] %vm1181_vm13, %v1149_v8 }
 0x1cd   : > { %1406 = vrot.lane.b32.xlu1 %v3497_v29, %s3033_s17  ;;  %1404 = vrot.lane.b32.xlu0 %v3500_v30, %s3033_s17 }
 0x1cf   : > { %v1155_v11 = vpop.permute.xlu1 %1154  ;;  %v1153_v10 = vpop.permute.xlu0 %1152 }
 0x1d0   : > { %1191 = vst.msk [vmem:[#allocation2 + $0x4e] sm:$0xff] %vm1181_vm13, %v1155_v11  ;;  %1190 = vst.msk [vmem:[#allocation2 + $0x46] sm:$0xff] %vm1181_vm13, %v1153_v10 }
 0x1d1   : > { %1410 = vrot.lane.b32.xlu1 %v3509_v33, %s3033_s17  ;;  %1408 = vrot.lane.b32.xlu0 %v3512_v34, %s3033_s17 }
 0x1d3   : > { %v1159_v12 = vpop.permute.xlu1 %1158  ;;  %v1157_v13 = vpop.permute.xlu0 %1156 }
 0x1d4   : > { %1193 = vst.msk [vmem:[#allocation2 + $0x5e] sm:$0xff] %vm1181_vm13, %v1159_v12  ;;  %1192 = vst.msk [vmem:[#allocation2 + $0x56] sm:$0xff] %vm1181_vm13, %v1157_v13 }
 0x1d5   : > { %1414 = vrot.lane.b32.xlu1 %v3521_v37, %s3033_s17  ;;  %1412 = vrot.lane.b32.xlu0 %v3524_v38, %s3033_s17 }
 0x1d7   : > { %v1163_v16 = vpop.permute.xlu1 %1162  ;;  %v1161_v24 = vpop.permute.xlu0 %1160 }
 0x1d8   : > { %1195 = vst.msk [vmem:[#allocation2 + $0x6e] sm:$0xff] %vm1181_vm13, %v1163_v16  ;;  %1194 = vst.msk [vmem:[#allocation2 + $0x66] sm:$0xff] %vm1181_vm13, %v1161_v24  ;;  %vm2290_vm13 = vcmask 1045504  }
 0x1d9   : > { %1418 = vrot.lane.b32.xlu1 %v3533_v41, %s3033_s17  ;;  %1416 = vrot.lane.b32.xlu0 %v3536_v42, %s3033_s17 }
 0x1db   : > { %v1201_v27 = vpop.permute.xlu1 %1200  ;;  %v1199_v28 = vpop.permute.xlu0 %1198 }
 0x1dc   : > { %1249 = vst.msk [vmem:[#allocation2 + $0x4] sm:$0xff] %vm1248_vm14, %v1201_v27 }
 0x1dd   : > { %1247 = vst.msk [vmem:[#allocation2 - $0x4] sm:$0xf0] %vm1246_vm15, %v1199_v28  ;;  %1422 = vrot.lane.b32.xlu1 %v3544_v45, %s3033_s17  ;;  %1420 = vrot.lane.b32.xlu0 %v3547_v46, %s3033_s17  ;;  %vm1711_vm15 = vcmask 654944  }
 0x1df   : > { %v1205_v31 = vpop.permute.xlu1 %1204  ;;  %v1203_v32 = vpop.permute.xlu0 %1202 }
 0x1e0   : > { %1251 = vst.msk [vmem:[#allocation2 + $0x14] sm:$0xff] %vm1248_vm14, %v1205_v31  ;;  %1250 = vst.msk [vmem:[#allocation2 + $0xc] sm:$0xff] %vm1248_vm14, %v1203_v32 }
 0x1e1   : > { %1462 = vrot.lane.b32.xlu1 %v3488_v26, %s3034_s18  ;;  %1424 = vrot.lane.b32.xlu0 %v3687_v40, %s3033_s17 }
 0x1e3   : > { %v1209_v41 = vpop.permute.xlu1 %1208  ;;  %v1207_v35 = vpop.permute.xlu0 %1206 }
 0x1e4   : > { %1253 = vst.msk [vmem:[#allocation2 + $0x24] sm:$0xff] %vm1248_vm14, %v1209_v41  ;;  %1252 = vst.msk [vmem:[#allocation2 + $0x1c] sm:$0xff] %vm1248_vm14, %v1207_v35 }
 0x1e5   : > { %1466 = vrot.lane.b32.xlu1 %v3500_v30, %s3034_s18  ;;  %1464 = vrot.lane.b32.xlu0 %v3485_v25, %s3034_s18 }
 0x1e7   : > { %v1213_v45 = vpop.permute.xlu1 %1212  ;;  %v1211_v36 = vpop.permute.xlu0 %1210 }
 0x1e8   : > { %1255 = vst.msk [vmem:[#allocation2 + $0x34] sm:$0xff] %vm1248_vm14, %v1213_v45  ;;  %1254 = vst.msk [vmem:[#allocation2 + $0x2c] sm:$0xff] %vm1248_vm14, %v1211_v36  ;;  %v2972_v45 = vld [vmem:[%s3456_s10 + $0x60] sm:$0xff] }
 0x1e9   : > { %1470 = vrot.lane.b32.xlu1 %v3512_v34, %s3034_s18  ;;  %1468 = vrot.lane.b32.xlu0 %v3497_v29, %s3034_s18 }
 0x1eb   : > { %v1217_v43 = vpop.permute.xlu1 %1216  ;;  %v1215_v44 = vpop.permute.xlu0 %1214 }
 0x1ec   : > { %1257 = vst.msk [vmem:[#allocation2 + $0x44] sm:$0xff] %vm1248_vm14, %v1217_v43  ;;  %1256 = vst.msk [vmem:[#allocation2 + $0x3c] sm:$0xff] %vm1248_vm14, %v1215_v44  ;;  %v2973_v44 = vld [vmem:[%s3456_s10 + $0x58] sm:$0xff] }
 0x1ed   : > { %1474 = vrot.lane.b32.xlu1 %v3524_v38, %s3034_s18  ;;  %1472 = vrot.lane.b32.xlu0 %v3509_v33, %s3034_s18 }
 0x1ef   : > { %v1221_v47 = vpop.permute.xlu1 %1220  ;;  %v1219_v48 = vpop.permute.xlu0 %1218 }
 0x1f0   : > { %1259 = vst.msk [vmem:[#allocation2 + $0x54] sm:$0xff] %vm1248_vm14, %v1221_v47  ;;  %1258 = vst.msk [vmem:[#allocation2 + $0x4c] sm:$0xff] %vm1248_vm14, %v1219_v48  ;;  %v2974_v47 = vld [vmem:[%s3456_s10 + $0x50] sm:$0xff]  ;;  %v4020_v48 = vld [vmem:[%s3863_s29 + $0x38] sm:$0xff] }
 0x1f1   : > { %1527 = vrot.lane.b32.xlu1 %v3485_v25, %s3035_s28  ;;  %1525 = vrot.lane.b32.xlu0 %v3488_v26, %s3035_s28  ;;  %v428_v26 = vld [vmem:[%s3863_s29] sm:$0xff] }
 0x1f3   : > { %v1225_v49 = vpop.permute.xlu1 %1224  ;;  %v1223_v50 = vpop.permute.xlu0 %1222 }
 0x1f4   : > { %1261 = vst.msk [vmem:[#allocation2 + $0x64] sm:$0xff] %vm1248_vm14, %v1225_v49  ;;  %1260 = vst.msk [vmem:[#allocation2 + $0x5c] sm:$0xff] %vm1248_vm14, %v1223_v50 }
 0x1f5   : > { %1531 = vrot.lane.b32.xlu1 %v3497_v29, %s3035_s28  ;;  %1529 = vrot.lane.b32.xlu0 %v3500_v30, %s3035_s28 }
 0x1f7   : > { %v1229_v51 = vpop.permute.xlu1 %1228  ;;  %v1227_v25 = vpop.permute.xlu0 %1226 }
 0x1f8   : > { %1264 = vst.msk [vmem:[#allocation2 + $0x74] sm:$0x3] %vm1263_vm0, %v1229_v51  ;;  %vm1772_vm0 = vcmask 687746  }
 0x1f9   : > { %1262 = vst.msk [vmem:[#allocation2 + $0x6c] sm:$0xff] %vm1248_vm14, %v1227_v25  ;;  %1535 = vrot.lane.b32.xlu1 %v3509_v33, %s3035_s28  ;;  %1533 = vrot.lane.b32.xlu0 %v3512_v34, %s3035_s28  ;;  %v3876_v33 = vld [vmem:[%s3863_s29 + $0x10] sm:$0xff]  ;;  %v3879_v34 = vld [vmem:[%s3863_s29 + $0x8] sm:$0xff]  ;;  %vm1709_vm14 = vcmask 654945  }
 0x1fa   : > { %v2965_v25 = vld [vmem:[%s4556_s3] sm:$0xff]  }
 0x1fb   : > { %v1268_v29 = vpop.permute.xlu1 %1267  ;;  %v1266_v30 = vpop.permute.xlu0 %1265  ;;  %2846 = vmatprep.subr.bf16.mxu0 %v2965_v25  ;;  %2876 = vmatprep.subr.bf16.mxu1 %v2965_v25 }
 0x1fc   : > { %1316 = vst.msk [vmem:[#allocation2 + $0x3] sm:$0xff] %vm1315_vm1, %v1268_v29  ;;  %2847 = vmatpush3.bf16.msra.mxu0 %v2965_v25  ;;  %2883 = vmatpush3.bf16.msra.mxu1 %v2965_v25 }
 0x1fd   : > { %1314 = vst.msk [vmem:[#allocation2 - $0x5] sm:$0xe0] %vm1313_vm2, %v1266_v30  ;;  %1602 = vrot.lane.b32.xlu1 %v428_v26, %s3036_s11  ;;  %1537 = vrot.lane.b32.xlu0 %v3524_v38, %s3035_s28  ;;  %v3891_v38 = vld [vmem:[%s3863_s29 + $0x18] sm:$0xff]  ;;  %v2966_v30 = vld [vmem:[%s4556_s3 + $0x8] sm:$0xff]   ;;  %vm1839_vm2 = vcmask 720548  }
 0x1fe   : > { %2848 = vmatprep.subr.bf16.mxu0 %v2966_v30  ;;  %2877 = vmatprep.subr.bf16.mxu1 %v2966_v30 }
 0x1ff   : > { %v1272_v52 = vpop.permute.xlu1 %1271  ;;  %v1270_v53 = vpop.permute.xlu0 %1269 }
 0x200   : > { %1318 = vst.msk [vmem:[#allocation2 + $0x13] sm:$0xff] %vm1315_vm1, %v1272_v52  ;;  %1317 = vst.msk [vmem:[#allocation2 + $0xb] sm:$0xff] %vm1315_vm1, %v1270_v53  ;;  %2849 = vmatpush3.bf16.msra.mxu0 %v2966_v30  ;;  %2884 = vmatpush3.bf16.msra.mxu1 %v2966_v30  ;;  %v2967_v52 = vld [vmem:[%s4556_s3 + $0x10] sm:$0xff]   ;;  %v2975_v53 = vld [vmem:[%s3456_s10 + $0x68] sm:$0xff] }
 0x201   : > { %1606 = vrot.lane.b32.xlu1 %v3876_v33, %s3036_s11  ;;  %1604 = vrot.lane.b32.xlu0 %v3879_v34, %s3036_s11 }
 0x202   : > { %2850 = vmatprep.subr.bf16.mxu0 %v2967_v52  ;;  %2878 = vmatprep.subr.bf16.mxu1 %v2967_v52 }
 0x203   : > { %v1276_v55 = vpop.permute.xlu1 %1275  ;;  %v1274_v56 = vpop.permute.xlu0 %1273 }
 0x204   : > { %1320 = vst.msk [vmem:[#allocation2 + $0x23] sm:$0xff] %vm1315_vm1, %v1276_v55  ;;  %1319 = vst.msk [vmem:[#allocation2 + $0x1b] sm:$0xff] %vm1315_vm1, %v1274_v56  ;;  %2851 = vmatpush3.bf16.msra.mxu0 %v2967_v52  ;;  %2885 = vmatpush3.bf16.msra.mxu1 %v2967_v52 }
 0x205   : > { %1610 = vrot.lane.b32.xlu1 %v3888_v54, %s3036_s11  ;;  %1608 = vrot.lane.b32.xlu0 %v3891_v38, %s3036_s11 }
 0x207   : > { %v1280_v58 = vpop.permute.xlu1 %1279  ;;  %v1278_v59 = vpop.permute.xlu0 %1277 }
 0x208   : > { %1322 = vst.msk [vmem:[#allocation2 + $0x33] sm:$0xff] %vm1315_vm1, %v1280_v58  ;;  %1321 = vst.msk [vmem:[#allocation2 + $0x2b] sm:$0xff] %vm1315_vm1, %v1278_v59  ;;  %v2968_v58 = vld [vmem:[%s4556_s3 + $0x18] sm:$0xff]  }
 0x209   : > { %1664 = vrot.lane.b32.xlu1 %v428_v26, %s3037_s12  ;;  %1612 = vrot.lane.b32.xlu0 %v3900_v57, %s3036_s11 }
 0x20a   : > { %2852 = vmatprep.subr.bf16.mxu0 %v2968_v58  ;;  %2879 = vmatprep.subr.bf16.mxu1 %v2968_v58 }
 0x20b   : > { %v1284_v60 = vpop.permute.xlu1 %1283  ;;  %v1282_v61 = vpop.permute.xlu0 %1281  ;;  %2853 = vmatpush3.bf16.msra.mxu0 %v2968_v58  ;;  %2886 = vmatpush3.bf16.msra.mxu1 %v2968_v58 }
 0x20c   : > { %1324 = vst.msk [vmem:[#allocation2 + $0x43] sm:$0xff] %vm1315_vm1, %v1284_v60  ;;  %1323 = vst.msk [vmem:[#allocation2 + $0x3b] sm:$0xff] %vm1315_vm1, %v1282_v61  ;;  %v2969_v61 = vld [vmem:[%s4556_s3 + $0x20] sm:$0xff]  }
 0x20d   : > { %1668 = vrot.lane.b32.xlu1 %v3876_v33, %s3037_s12  ;;  %1666 = vrot.lane.b32.xlu0 %v3879_v34, %s3037_s12 }
 0x20e   : > { %2854 = vmatprep.subr.bf16.mxu0 %v2969_v61  ;;  %2880 = vmatprep.subr.bf16.mxu1 %v2969_v61 }
 0x20f   : > { %v1288_v62 = vpop.permute.xlu1 %1287  ;;  %v1286_v63 = vpop.permute.xlu0 %1285  ;;  %2855 = vmatpush3.bf16.msra.mxu0 %v2969_v61  ;;  %2887 = vmatpush3.bf16.msra.mxu1 %v2969_v61 }
 0x210   : > { %1326 = vst.msk [vmem:[#allocation2 + $0x53] sm:$0xff] %vm1315_vm1, %v1288_v62  ;;  %1325 = vst.msk [vmem:[#allocation2 + $0x4b] sm:$0xff] %vm1315_vm1, %v1286_v63 }
 0x211   : > { %1672 = vrot.lane.b32.xlu1 %v3888_v54, %s3037_s12  ;;  %1670 = vrot.lane.b32.xlu0 %v3891_v38, %s3037_s12 }
 0x213   : > { %v1292_v0 = vpop.permute.xlu1 %1291  ;;  %v1290_v1 = vpop.permute.xlu0 %1289 }
 0x214   : > { %1328 = vst.msk [vmem:[#allocation2 + $0x63] sm:$0xff] %vm1315_vm1, %v1292_v0  ;;  %1327 = vst.msk [vmem:[#allocation2 + $0x5b] sm:$0xff] %vm1315_vm1, %v1290_v1  ;;  %v2970_v0 = vld [vmem:[%s4556_s3 + $0x28] sm:$0xff]   ;;  %v4084_v1 = vld [vmem:[%s3863_s29 + $0x40] sm:$0xff] }
 0x215   : > { %1727 = vrot.lane.b32.xlu1 %v428_v26, %s3038_s13  ;;  %1674 = vrot.lane.b32.xlu0 %v3900_v57, %s3037_s12 }
 0x216   : > { %2856 = vmatprep.subr.bf16.mxu0 %v2970_v0  ;;  %2881 = vmatprep.subr.bf16.mxu1 %v2970_v0 }
 0x217   : > { %v1296_v3 = vpop.permute.xlu1 %1295  ;;  %v1294_v17 = vpop.permute.xlu0 %1293  ;;  %2857 = vmatpush3.bf16.msra.mxu0 %v2970_v0  ;;  %2888 = vmatpush3.bf16.msra.mxu1 %v2970_v0 }
 0x218   : > { %1331 = vst.msk [vmem:[#allocation2 + $0x73] sm:$0x7] %vm1330_vm3, %v1296_v3  ;;  %vm1841_vm3 = vcmask 720544  }
 0x219   : > { %1329 = vst.msk [vmem:[#allocation2 + $0x6b] sm:$0xff] %vm1315_vm1, %v1294_v17  ;;  %1731 = vrot.lane.b32.xlu1 %v3876_v33, %s3038_s13  ;;  %1729 = vrot.lane.b32.xlu0 %v3879_v34, %s3038_s13  ;;  %vm1774_vm1 = vcmask 687744  }
 0x21b   : > { %v1335_v18 = vpop.permute.xlu1 %1334  ;;  %v1333_v14 = vpop.permute.xlu0 %1332 }
 0x21c   : > { %1383 = vst.msk [vmem:[#allocation2 + $0x2] sm:$0xff] %vm1382_vm4, %v1335_v18 }
 0x21d   : > { %1381 = vst.msk [vmem:[#allocation2 - $0x6] sm:$0xc0] %vm1380_vm5, %v1333_v14  ;;  %1735 = vrot.lane.b32.xlu1 %v3888_v54, %s3038_s13  ;;  %1733 = vrot.lane.b32.xlu0 %v3891_v38, %s3038_s13  ;;  %vm1908_vm5 = vcmask 753344  }
 0x21f   : > { %v1339_v15 = vpop.permute.xlu1 %1338  ;;  %v1337_v19 = vpop.permute.xlu0 %1336 }
 0x220   : > { %1385 = vst.msk [vmem:[#allocation2 + $0x12] sm:$0xff] %vm1382_vm4, %v1339_v15  ;;  %1384 = vst.msk [vmem:[#allocation2 + $0xa] sm:$0xff] %vm1382_vm4, %v1337_v19 }
 0x221   : > { %1791 = vrot.lane.b32.xlu1 %v3879_v34, %s3039_s14  ;;  %1737 = vrot.lane.b32.xlu0 %v3900_v57, %s3038_s13 }
 0x223   : > { %v1343_v20 = vpop.permute.xlu1 %1342  ;;  %v1341_v21 = vpop.permute.xlu0 %1340 }
 0x224   : > { %1387 = vst.msk [vmem:[#allocation2 + $0x22] sm:$0xff] %vm1382_vm4, %v1343_v20  ;;  %1386 = vst.msk [vmem:[#allocation2 + $0x1a] sm:$0xff] %vm1382_vm4, %v1341_v21 }
 0x225   : > { %1795 = vrot.lane.b32.xlu1 %v3891_v38, %s3039_s14  ;;  %1793 = vrot.lane.b32.xlu0 %v3876_v33, %s3039_s14 }
 0x227   : > { %v1347_v22 = vpop.permute.xlu1 %1346  ;;  %v1345_v23 = vpop.permute.xlu0 %1344 }
 0x228   : > { %1389 = vst.msk [vmem:[#allocation2 + $0x32] sm:$0xff] %vm1382_vm4, %v1347_v22  ;;  %1388 = vst.msk [vmem:[#allocation2 + $0x2a] sm:$0xff] %vm1382_vm4, %v1345_v23 }
 0x229   : > { %1799 = vrot.lane.b32.xlu1 %v3900_v57, %s3039_s14  ;;  %1797 = vrot.lane.b32.xlu0 %v3888_v54, %s3039_s14 }
 0x22b   : > { %v1351_v5 = vpop.permute.xlu1 %1350  ;;  %v1349_v4 = vpop.permute.xlu0 %1348 }
 0x22c   : > { %1391 = vst.msk [vmem:[#allocation2 + $0x42] sm:$0xff] %vm1382_vm4, %v1351_v5  ;;  %1390 = vst.msk [vmem:[#allocation2 + $0x3a] sm:$0xff] %vm1382_vm4, %v1349_v4 }
 0x22d   : > { %1858 = vrot.lane.b32.xlu1 %v3879_v34, %s3040_s15  ;;  %1801 = vrot.lane.b32.xlu0 %v3953_v2, %s3039_s14 }
 0x22f   : > { %v1355_v7 = vpop.permute.xlu1 %1354  ;;  %v1353_v6 = vpop.permute.xlu0 %1352 }
 0x230   : > { %1393 = vst.msk [vmem:[#allocation2 + $0x52] sm:$0xff] %vm1382_vm4, %v1355_v7  ;;  %1392 = vst.msk [vmem:[#allocation2 + $0x4a] sm:$0xff] %vm1382_vm4, %v1353_v6 }
 0x231   : > { %1862 = vrot.lane.b32.xlu1 %v3891_v38, %s3040_s15  ;;  %1860 = vrot.lane.b32.xlu0 %v3876_v33, %s3040_s15 }
 0x233   : > { %v1359_v9 = vpop.permute.xlu1 %1358  ;;  %v1357_v8 = vpop.permute.xlu0 %1356 }
 0x234   : > { %1395 = vst.msk [vmem:[#allocation2 + $0x62] sm:$0xff] %vm1382_vm4, %v1359_v9  ;;  %1394 = vst.msk [vmem:[#allocation2 + $0x5a] sm:$0xff] %vm1382_vm4, %v1357_v8 }
 0x235   : > { %1866 = vrot.lane.b32.xlu1 %v3900_v57, %s3040_s15  ;;  %1864 = vrot.lane.b32.xlu0 %v3888_v54, %s3040_s15 }
 0x237   : > { %v1363_v11 = vpop.permute.xlu1 %1362  ;;  %v1361_v10 = vpop.permute.xlu0 %1360 }
 0x238   : > { %1398 = vst.msk [vmem:[#allocation2 + $0x72] sm:$0xf] %vm1397_vm6, %v1363_v11  ;;  %vm1973_vm6 = vcmask 786150  }
 0x239   : > { %1396 = vst.msk [vmem:[#allocation2 + $0x6a] sm:$0xff] %vm1382_vm4, %v1361_v10  ;;  %1925 = vrot.lane.b32.xlu1 %v3879_v34, %s3041_s16  ;;  %1868 = vrot.lane.b32.xlu0 %v3953_v2, %s3040_s15  ;;  %vm1906_vm4 = vcmask 753349  }
 0x23b   : > { %v1403_v12 = vpop.permute.xlu1 %1402  ;;  %v1401_v13 = vpop.permute.xlu0 %1400 }
 0x23c   : > { %1447 = vst.msk [vmem:[#allocation2 + $0x8] sm:$0xff] %vm1445_vm7, %v1403_v12  ;;  %1446 = vst.msk [vmem:[#allocation2] sm:$0xff] %vm1445_vm7, %v1401_v13  ;;  %v2976_v12 = vld [vmem:[%s3456_s10 + $0x70] sm:$0xff] }
 0x23d   : > { %1929 = vrot.lane.b32.xlu1 %v3891_v38, %s3041_s16  ;;  %1927 = vrot.lane.b32.xlu0 %v3876_v33, %s3041_s16  ;;  %v4147_v13 = vld [vmem:[%s3863_s29 + $0x50] sm:$0xff] }
 0x23f   : > { %v1407_v16 = vpop.permute.xlu1 %1406  ;;  %v1405_v24 = vpop.permute.xlu0 %1404 }
 0x240   : > { %1449 = vst.msk [vmem:[#allocation2 + $0x18] sm:$0xff] %vm1445_vm7, %v1407_v16  ;;  %1448 = vst.msk [vmem:[#allocation2 + $0x10] sm:$0xff] %vm1445_vm7, %v1405_v24 }
 0x241   : > { %1476 = vrot.lane.b32.xlu1 %v3521_v37, %s3034_s18  ;;  %1931 = vrot.lane.b32.xlu0 %v3888_v54, %s3041_s16 }
 0x243   : > { %v1411_v27 = vpop.permute.xlu1 %1410  ;;  %v1409_v28 = vpop.permute.xlu0 %1408 }
 0x244   : > { %1451 = vst.msk [vmem:[#allocation2 + $0x28] sm:$0xff] %vm1445_vm7, %v1411_v27  ;;  %1450 = vst.msk [vmem:[#allocation2 + $0x20] sm:$0xff] %vm1445_vm7, %v1409_v28 }
 0x245   : > { %1933 = vrot.lane.b32.xlu1 %v3900_v57, %s3041_s16  ;;  %1478 = vrot.lane.b32.xlu0 %v3536_v42, %s3034_s18 }
 0x247   : > { %v1415_v31 = vpop.permute.xlu1 %1414  ;;  %v1413_v32 = vpop.permute.xlu0 %1412 }
 0x248   : > { %1453 = vst.msk [vmem:[#allocation2 + $0x38] sm:$0xff] %vm1445_vm7, %v1415_v31  ;;  %1452 = vst.msk [vmem:[#allocation2 + $0x30] sm:$0xff] %vm1445_vm7, %v1413_v32  ;;  %v2977_v31 = vld [vmem:[%s3456_s10 + $0x80] sm:$0xff] }
 0x249   : > { %1993 = vrot.lane.b32.xlu1 %v3891_v38, %s3042_s19  ;;  %1935 = vrot.lane.b32.xlu0 %v3953_v2, %s3041_s16 }
 0x24b   : > { %v1419_v37 = vpop.permute.xlu1 %1418  ;;  %v1417_v41 = vpop.permute.xlu0 %1416 }
 0x24c   : > { %1455 = vst.msk [vmem:[#allocation2 + $0x48] sm:$0xff] %vm1445_vm7, %v1419_v37  ;;  %1454 = vst.msk [vmem:[#allocation2 + $0x40] sm:$0xff] %vm1445_vm7, %v1417_v41  ;;  %v2978_v41 = vld [vmem:[%s3456_s10 + $0x78] sm:$0xff] }
 0x24d   : > { %1997 = vrot.lane.b32.xlu1 %v3900_v57, %s3042_s19  ;;  %1995 = vrot.lane.b32.xlu0 %v3888_v54, %s3042_s19 }
 0x24f   : > { %v1423_v42 = vpop.permute.xlu1 %1422  ;;  %v1421_v35 = vpop.permute.xlu0 %1420 }
 0x250   : > { %1457 = vst.msk [vmem:[#allocation2 + $0x58] sm:$0xff] %vm1445_vm7, %v1423_v42  ;;  %1456 = vst.msk [vmem:[#allocation2 + $0x50] sm:$0xff] %vm1445_vm7, %v1421_v35 }
 0x251   : > { %1482 = vrot.lane.b32.xlu1 %v3547_v46, %s3034_s18  ;;  %1480 = vrot.lane.b32.xlu0 %v2972_v45, %s3034_s18 }
 0x253   : > { %v1463_v36 = vpop.permute.xlu1 %1462  ;;  %v1425_v43 = vpop.permute.xlu0 %1424 }
 0x254   : > { %1508 = vst.msk [vmem:[#allocation2 - $0x1] sm:$0xfe] %vm1507_vm8, %v1463_v36  ;;  %vm1975_vm8 = vcmask 786144  }
 0x255   : > { %1458 = vst.msk [vmem:[#allocation2 + $0x60] sm:$0xff] %vm1445_vm7, %v1425_v43  ;;  %1541 = vrot.lane.b32.xlu1 %v2973_v44, %s3035_s28  ;;  %1539 = vrot.lane.b32.xlu0 %v2974_v47, %s3035_s28  ;;  %v4188_v47 = vld [vmem:[%s3863_s29 + $0x58] sm:$0xff] }
 0x257   : > { %v1467_v49 = vpop.permute.xlu1 %1466  ;;  %v1465_v46 = vpop.permute.xlu0 %1464 }
 0x258   : > { %1511 = vst.msk [vmem:[#allocation2 + $0xf] sm:$0xff] %vm1509_vm9, %v1467_v49  ;;  %1510 = vst.msk [vmem:[#allocation2 + $0x7] sm:$0xff] %vm1509_vm9, %v1465_v46 }
 0x259   : > { %2001 = vrot.lane.b32.xlu1 %v4020_v48, %s3042_s19  ;;  %1999 = vrot.lane.b32.xlu0 %v3953_v2, %s3042_s19 }
 0x25b   : > { %v1471_v50 = vpop.permute.xlu1 %1470  ;;  %v1469_v51 = vpop.permute.xlu0 %1468 }
 0x25c   : > { %1513 = vst.msk [vmem:[#allocation2 + $0x1f] sm:$0xff] %vm1509_vm9, %v1471_v50  ;;  %1512 = vst.msk [vmem:[#allocation2 + $0x17] sm:$0xff] %vm1509_vm9, %v1469_v51 }
 0x25d   : > { %2057 = vrot.lane.b32.xlu1 %v3888_v54, %s3043_s7  ;;  %2055 = vrot.lane.b32.xlu0 %v3891_v38, %s3043_s7 }
 0x25f   : > { %v1475_v26 = vpop.permute.xlu1 %1474  ;;  %v1473_v29 = vpop.permute.xlu0 %1472 }
 0x260   : > { %1515 = vst.msk [vmem:[#allocation2 + $0x2f] sm:$0xff] %vm1509_vm9, %v1475_v26  ;;  %1514 = vst.msk [vmem:[#allocation2 + $0x27] sm:$0xff] %vm1509_vm9, %v1473_v29  ;;  %v4209_v26 = vld [vmem:[%s3863_s29 + $0x68] sm:$0xff]  ;;  %v4212_v29 = vld [vmem:[%s3863_s29 + $0x60] sm:$0xff] }
 0x261   : > { %1543 = vrot.lane.b32.xlu1 %v2972_v45, %s3035_s28  ;;  %2059 = vrot.lane.b32.xlu0 %v3900_v57, %s3043_s7 }
 0x263   : > { %v1528_v33 = vpop.permute.xlu1 %1527  ;;  %v1526_v34 = vpop.permute.xlu0 %1525 }
 0x264   : > { %1573 = vst.msk [vmem:[#allocation2 + $0x6] sm:$0xff] %vm1572_vm10, %v1528_v33 }
 0x265   : > { %1571 = vst.msk [vmem:[#allocation2 - $0x2] sm:$0xfc] %vm1570_vm11, %v1526_v34  ;;  %1614 = vrot.lane.b32.xlu1 %v3953_v2, %s3036_s11  ;;  %1545 = vrot.lane.b32.xlu0 %v2975_v53, %s3035_s28  ;;  %vm2038_vm11 = vcmask 818944  }
 0x267   : > { %v1532_v55 = vpop.permute.xlu1 %1531  ;;  %v1530_v56 = vpop.permute.xlu0 %1529 }
 0x268   : > { %1575 = vst.msk [vmem:[#allocation2 + $0x16] sm:$0xff] %vm1572_vm10, %v1532_v55  ;;  %1574 = vst.msk [vmem:[#allocation2 + $0xe] sm:$0xff] %vm1572_vm10, %v1530_v56 }
 0x269   : > { %2061 = vrot.lane.b32.xlu1 %v3953_v2, %s3043_s7  ;;  %1616 = vrot.lane.b32.xlu0 %v4020_v48, %s3036_s11 }
 0x26b   : > { %v1536_v59 = vpop.permute.xlu1 %1535  ;;  %v1534_v60 = vpop.permute.xlu0 %1533 }
 0x26c   : > { %1577 = vst.msk [vmem:[#allocation2 + $0x26] sm:$0xff] %vm1572_vm10, %v1536_v59  ;;  %1576 = vst.msk [vmem:[#allocation2 + $0x1e] sm:$0xff] %vm1572_vm10, %v1534_v60 }
 0x26d   : > { %2118 = vrot.lane.b32.xlu1 %v3891_v38, %s3044_s8  ;;  %2063 = vrot.lane.b32.xlu0 %v4020_v48, %s3043_s7  ;;  %v4081_v38 = vld [vmem:[%s3863_s29 + $0x48] sm:$0xff] }
 0x26f   : > { %v1603_v62 = vpop.permute.xlu1 %1602  ;;  %v1538_v63 = vpop.permute.xlu0 %1537 }
 0x270   : > { %1648 = vst.msk [vmem:[#allocation2] sm:$0xff] %vm1647_vm12, %v1603_v62 }
 0x271   : > { %1578 = vst.msk [vmem:[#allocation2 + $0x2e] sm:$0xff] %vm1572_vm10, %v1538_v63  ;;  %2122 = vrot.lane.b32.xlu1 %v3900_v57, %s3044_s8  ;;  %2120 = vrot.lane.b32.xlu0 %v3888_v54, %s3044_s8  ;;  %v2971_v57 = vld [vmem:[%s4556_s3 + $0x30] sm:$0x3f]  }
 0x272   : > { %2890 = vmatprep.subr.msk.bf16.mxu0 %vm2290_vm13, %v2971_v57  ;;  %v2292_v54 = vsel %vm2290_vm13, %v2971_v57, 0  ;;  %2891 = vmatprep.subr.msk.bf16.mxu1 %vm2290_vm13, %v2971_v57 }
 0x273   : > { %v1607_v3 = vpop.permute.xlu1 %1606  ;;  %v1605_v17 = vpop.permute.xlu0 %1604  ;;  %2859 = vmatpush3.bf16.msra.mxu0 %v2292_v54  ;;  %2889 = vmatpush3.bf16.msra.mxu1 %v2292_v54 }
 0x274   : > { %1650 = vst.msk [vmem:[#allocation2 + $0x10] sm:$0xff] %vm1647_vm12, %v1607_v3  ;;  %1649 = vst.msk [vmem:[#allocation2 + $0x8] sm:$0xff] %vm1647_vm12, %v1605_v17 }
 0x275   : > { %1620 = vrot.lane.b32.xlu1 %v4081_v38, %s3036_s11  ;;  %1618 = vrot.lane.b32.xlu0 %v4084_v1, %s3036_s11 }
 0x277   : > { %v1611_v18 = vpop.permute.xlu1 %1610  ;;  %v1609_v14 = vpop.permute.xlu0 %1608 }
 0x278   : > { %1652 = vst.msk [vmem:[#allocation2 + $0x20] sm:$0xff] %vm1647_vm12, %v1611_v18  ;;  %1651 = vst.msk [vmem:[#allocation2 + $0x18] sm:$0xff] %vm1647_vm12, %v1609_v14 }
 0x279   : > { %1678 = vrot.lane.b32.xlu1 %v4020_v48, %s3037_s12  ;;  %1676 = vrot.lane.b32.xlu0 %v3953_v2, %s3037_s12 }
 0x27b   : > { %v1665_v15 = vpop.permute.xlu1 %1664  ;;  %v1613_v19 = vpop.permute.xlu0 %1612 }
 0x27c   : > { %1710 = vst.msk [vmem:[#allocation2 - $0x1] sm:$0xfe] %vm1709_vm14, %v1665_v15  ;;  %vm2102_vm14 = vcmask 851744   ;;  %v4279_v15 = vld [vmem:[%s3863_s29 + $0x70] sm:$0xff] }
 0x27d   : > { %1653 = vst.msk [vmem:[#allocation2 + $0x28] sm:$0xff] %vm1647_vm12, %v1613_v19  ;;  %2126 = vrot.lane.b32.xlu1 %v4020_v48, %s3044_s8  ;;  %2124 = vrot.lane.b32.xlu0 %v3953_v2, %s3044_s8 }
 0x27f   : > { %v1669_v20 = vpop.permute.xlu1 %1668  ;;  %v1667_v21 = vpop.permute.xlu0 %1666 }
 0x280   : > { %1713 = vst.msk [vmem:[#allocation2 + $0xf] sm:$0xff] %vm1711_vm15, %v1669_v20  ;;  %1712 = vst.msk [vmem:[#allocation2 + $0x7] sm:$0xff] %vm1711_vm15, %v1667_v21 }
 0x281   : > { %1682 = vrot.lane.b32.xlu1 %v4081_v38, %s3037_s12  ;;  %1680 = vrot.lane.b32.xlu0 %v4084_v1, %s3037_s12 }
 0x283   : > { %v1673_v22 = vpop.permute.xlu1 %1672  ;;  %v1671_v23 = vpop.permute.xlu0 %1670 }
 0x284   : > { %1715 = vst.msk [vmem:[#allocation2 + $0x1f] sm:$0xff] %vm1711_vm15, %v1673_v22  ;;  %1714 = vst.msk [vmem:[#allocation2 + $0x17] sm:$0xff] %vm1711_vm15, %v1671_v23 }
 0x285   : > { %1741 = vrot.lane.b32.xlu1 %v4020_v48, %s3038_s13  ;;  %1739 = vrot.lane.b32.xlu0 %v3953_v2, %s3038_s13  ;;  %v4133_v2 = vld [vmem:[%s3456_s10 + $0x88] sm:$0xff]  ;;  %s2896_s10 = smul.u32 13, %s4577_s21 }
 0x287   : > { %v1728_v5 = vpop.permute.xlu1 %1727  ;;  %v1675_v4 = vpop.permute.xlu0 %1674 }
 0x288   : > { %1773 = vst.msk [vmem:[#allocation2 - $0x2] sm:$0xfc] %vm1772_vm0, %v1728_v5  ;;  %vm2100_vm0 = vcmask 851745  }
 0x289   : > { %1716 = vst.msk [vmem:[#allocation2 + $0x27] sm:$0xff] %vm1711_vm15, %v1675_v4  ;;  %1745 = vrot.lane.b32.xlu1 %v4081_v38, %s3038_s13  ;;  %1743 = vrot.lane.b32.xlu0 %v4084_v1, %s3038_s13 }
 0x28b   : > { %v1732_v7 = vpop.permute.xlu1 %1731  ;;  %v1730_v6 = vpop.permute.xlu0 %1729 }
 0x28c   : > { %1776 = vst.msk [vmem:[#allocation2 + $0xe] sm:$0xff] %vm1774_vm1, %v1732_v7  ;;  %1775 = vst.msk [vmem:[#allocation2 + $0x6] sm:$0xff] %vm1774_vm1, %v1730_v6 }
 0x28d   : > { %1805 = vrot.lane.b32.xlu1 %v4084_v1, %s3039_s14  ;;  %1803 = vrot.lane.b32.xlu0 %v4020_v48, %s3039_s14 }
 0x28f   : > { %v1736_v9 = vpop.permute.xlu1 %1735  ;;  %v1734_v8 = vpop.permute.xlu0 %1733 }
 0x290   : > { %1778 = vst.msk [vmem:[#allocation2 + $0x1e] sm:$0xff] %vm1774_vm1, %v1736_v9  ;;  %1777 = vst.msk [vmem:[#allocation2 + $0x16] sm:$0xff] %vm1774_vm1, %v1734_v8 }
 0x291   : > { %1428 = vrot.lane.b32.xlu1 %v4133_v2, %s3033_s17  ;;  %1426 = vrot.lane.b32.xlu0 %v3684_v39, %s3033_s17  ;;  %s2897_s17 = smul.u32 130, %s4571_s22 }
 0x293   : > { %v1792_v11 = vpop.permute.xlu1 %1791  ;;  %v1738_v10 = vpop.permute.xlu0 %1737 }
 0x294   : > { %1840 = vst.msk [vmem:[#allocation2 - $0x4] sm:$0xf0] %vm1839_vm2, %v1792_v11  ;;  %vm2163_vm2 = vcmask 884546  }
 0x295   : > { %1779 = vst.msk [vmem:[#allocation2 + $0x26] sm:$0xff] %vm1774_vm1, %v1738_v10  ;;  %1486 = vrot.lane.b32.xlu1 %v3687_v40, %s3034_s18  ;;  %1484 = vrot.lane.b32.xlu0 %v2976_v12, %s3034_s18 }
 0x297   : > { %v1796_v16 = vpop.permute.xlu1 %1795  ;;  %v1794_v24 = vpop.permute.xlu0 %1793 }
 0x298   : > { %1843 = vst.msk [vmem:[#allocation2 + $0xc] sm:$0xff] %vm1841_vm3, %v1796_v16  ;;  %1842 = vst.msk [vmem:[#allocation2 + $0x4] sm:$0xff] %vm1841_vm3, %v1794_v24 }
 0x299   : > { %1809 = vrot.lane.b32.xlu1 %v4147_v13, %s3039_s14  ;;  %1807 = vrot.lane.b32.xlu0 %v4081_v38, %s3039_s14 }
 0x29b   : > { %v1800_v39 = vpop.permute.xlu1 %1799  ;;  %v1798_v40 = vpop.permute.xlu0 %1797 }
 0x29c   : > { %1845 = vst.msk [vmem:[#allocation2 + $0x1c] sm:$0xff] %vm1841_vm3, %v1800_v39  ;;  %1844 = vst.msk [vmem:[#allocation2 + $0x14] sm:$0xff] %vm1841_vm3, %v1798_v40  ;;  %v443_v39 = vld [vmem:[%s3863_s29 + $0x78] sm:$0xff] }
 0x29d   : > { %1872 = vrot.lane.b32.xlu1 %v4084_v1, %s3040_s15  ;;  %1870 = vrot.lane.b32.xlu0 %v4020_v48, %s3040_s15 }
 0x29f   : > { %v1859_v27 = vpop.permute.xlu1 %1858  ;;  %v1802_v28 = vpop.permute.xlu0 %1801 }
 0x2a0   : > { %1907 = vst.msk [vmem:[#allocation2 - $0x5] sm:$0xe0] %vm1906_vm4, %v1859_v27  ;;  %vm2165_vm4 = vcmask 884544  }
 0x2a1   : > { %1846 = vst.msk [vmem:[#allocation2 + $0x24] sm:$0xff] %vm1841_vm3, %v1802_v28  ;;  %1490 = vrot.lane.b32.xlu1 %v4133_v2, %s3034_s18  ;;  %1488 = vrot.lane.b32.xlu0 %v2977_v31, %s3034_s18  ;;  %s380_s18 = sadd.s32 %s2897_s17, %s2896_s10 }
 0x2a3   : > { %v1863_v32 = vpop.permute.xlu1 %1862  ;;  %v1861_v37 = vpop.permute.xlu0 %1860 }
 0x2a4   : > { %1910 = vst.msk [vmem:[#allocation2 + $0xb] sm:$0xff] %vm1908_vm5, %v1863_v32  ;;  %1909 = vst.msk [vmem:[#allocation2 + $0x3] sm:$0xff] %vm1908_vm5, %v1861_v37 }
 0x2a5   : > { %1549 = vrot.lane.b32.xlu1 %v2978_v41, %s3035_s28  ;;  %1547 = vrot.lane.b32.xlu0 %v2976_v12, %s3035_s28 }
 0x2a7   : > { %v1867_v42 = vpop.permute.xlu1 %1866  ;;  %v1865_v35 = vpop.permute.xlu0 %1864 }
 0x2a8   : > { %1912 = vst.msk [vmem:[#allocation2 + $0x1b] sm:$0xff] %vm1908_vm5, %v1867_v42  ;;  %1911 = vst.msk [vmem:[#allocation2 + $0x13] sm:$0xff] %vm1908_vm5, %v1865_v35 }
 0x2a9   : > { %1876 = vrot.lane.b32.xlu1 %v4147_v13, %s3040_s15  ;;  %1874 = vrot.lane.b32.xlu0 %v4081_v38, %s3040_s15 }
 0x2ab   : > { %v1926_v45 = vpop.permute.xlu1 %1925  ;;  %v1869_v36 = vpop.permute.xlu0 %1868 }
 0x2ac   : > { %1974 = vst.msk [vmem:[#allocation2 - $0x6] sm:$0xc0] %vm1973_vm6, %v1926_v45  ;;  %vm2265_vm6 = vcmask 883712  }
 0x2ad   : > { %1913 = vst.msk [vmem:[#allocation2 + $0x23] sm:$0xff] %vm1908_vm5, %v1869_v36  ;;  %1939 = vrot.lane.b32.xlu1 %v4084_v1, %s3041_s16  ;;  %1937 = vrot.lane.b32.xlu0 %v4020_v48, %s3041_s16 }
 0x2af   : > { %v1930_v43 = vpop.permute.xlu1 %1929  ;;  %v1928_v44 = vpop.permute.xlu0 %1927 }
 0x2b0   : > { %1977 = vst.msk [vmem:[#allocation2 + $0xa] sm:$0xff] %vm1975_vm8, %v1930_v43  ;;  %1976 = vst.msk [vmem:[#allocation2 + $0x2] sm:$0xff] %vm1975_vm8, %v1928_v44 }
 0x2b1   : > { %1553 = vrot.lane.b32.xlu1 %v4133_v2, %s3035_s28  ;;  %1551 = vrot.lane.b32.xlu0 %v2977_v31, %s3035_s28 }
 0x2b3   : > { %v1477_v49 = vpop.permute.xlu1 %1476  ;;  %v1932_v46 = vpop.permute.xlu0 %1931 }
 0x2b4   : > { %1516 = vst.msk [vmem:[#allocation2 + $0x37] sm:$0xff] %vm1509_vm9, %v1477_v49  ;;  %v444_v49 = vld [vmem:[%s3863_s29 + $0x80] sm:$0xff] }
 0x2b5   : > { %1978 = vst.msk [vmem:[#allocation2 + $0x12] sm:$0xff] %vm1975_vm8, %v1932_v46  ;;  %1624 = vrot.lane.b32.xlu1 %v4188_v47, %s3036_s11  ;;  %1622 = vrot.lane.b32.xlu0 %v4147_v13, %s3036_s11 }
 0x2b7   : > { %v1934_v48 = vpop.permute.xlu1 %1933  ;;  %v1479_v50 = vpop.permute.xlu0 %1478 }
 0x2b8   : > { %1979 = vst.msk [vmem:[#allocation2 + $0x1a] sm:$0xff] %vm1975_vm8, %v1934_v48 }
 0x2b9   : > { %1517 = vst.msk [vmem:[#allocation2 + $0x3f] sm:$0xff] %vm1509_vm9, %v1479_v50  ;;  %1943 = vrot.lane.b32.xlu1 %v4147_v13, %s3041_s16  ;;  %1941 = vrot.lane.b32.xlu0 %v4081_v38, %s3041_s16 }
 0x2bb   : > { %v1994_v51 = vpop.permute.xlu1 %1993  ;;  %v1936_v25 = vpop.permute.xlu0 %1935 }
 0x2bc   : > { %2039 = vst.msk [vmem:[#allocation2] sm:$0xff] %vm2038_vm11, %v1994_v51 }
 0x2bd   : > { %1980 = vst.msk [vmem:[#allocation2 + $0x22] sm:$0xff] %vm1975_vm8, %v1936_v25  ;;  %2005 = vrot.lane.b32.xlu1 %v4081_v38, %s3042_s19  ;;  %2003 = vrot.lane.b32.xlu0 %v4084_v1, %s3042_s19 }
 0x2bf   : > { %v1998_v30 = vpop.permute.xlu1 %1997  ;;  %v1996_v33 = vpop.permute.xlu0 %1995 }
 0x2c0   : > { %2041 = vst.msk [vmem:[#allocation2 + $0x10] sm:$0xff] %vm2038_vm11, %v1998_v30  ;;  %2040 = vst.msk [vmem:[#allocation2 + $0x8] sm:$0xff] %vm2038_vm11, %v1996_v33 }
 0x2c1   : > { %1628 = vrot.lane.b32.xlu1 %v4209_v26, %s3036_s11  ;;  %1626 = vrot.lane.b32.xlu0 %v4212_v29, %s3036_s11 }
 0x2c3   : > { %v1483_v34 = vpop.permute.xlu1 %1482  ;;  %v1481_v52 = vpop.permute.xlu0 %1480 }
 0x2c4   : > { %1519 = vst.msk [vmem:[#allocation2 + $0x4f] sm:$0xff] %vm1509_vm9, %v1483_v34  ;;  %1518 = vst.msk [vmem:[#allocation2 + $0x47] sm:$0xff] %vm1509_vm9, %v1481_v52 }
 0x2c5   : > { %1686 = vrot.lane.b32.xlu1 %v4188_v47, %s3037_s12  ;;  %1684 = vrot.lane.b32.xlu0 %v4147_v13, %s3037_s12 }
 0x2c7   : > { %v1542_v53 = vpop.permute.xlu1 %1541  ;;  %v1540_v55 = vpop.permute.xlu0 %1539 }
 0x2c8   : > { %1580 = vst.msk [vmem:[#allocation2 + $0x3e] sm:$0xff] %vm1572_vm10, %v1542_v53  ;;  %1579 = vst.msk [vmem:[#allocation2 + $0x36] sm:$0xff] %vm1572_vm10, %v1540_v55 }
 0x2c9   : > { %2009 = vrot.lane.b32.xlu1 %v4188_v47, %s3042_s19  ;;  %2007 = vrot.lane.b32.xlu0 %v4147_v13, %s3042_s19 }
 0x2cb   : > { %v2002_v56 = vpop.permute.xlu1 %2001  ;;  %v2000_v58 = vpop.permute.xlu0 %1999 }
 0x2cc   : > { %2043 = vst.msk [vmem:[#allocation2 + $0x20] sm:$0xff] %vm2038_vm11, %v2002_v56  ;;  %2042 = vst.msk [vmem:[#allocation2 + $0x18] sm:$0xff] %vm2038_vm11, %v2000_v58 }
 0x2cd   : > { %2067 = vrot.lane.b32.xlu1 %v4081_v38, %s3043_s7  ;;  %2065 = vrot.lane.b32.xlu0 %v4084_v1, %s3043_s7 }
 0x2cf   : > { %v2058_v59 = vpop.permute.xlu1 %2057  ;;  %v2056_v60 = vpop.permute.xlu0 %2055 }
 0x2d0   : > { %2103 = vst.msk [vmem:[#allocation2 + $0x7] sm:$0xff] %vm2102_vm14, %v2058_v59 }
 0x2d1   : > { %2101 = vst.msk [vmem:[#allocation2 - $0x1] sm:$0xfe] %vm2100_vm0, %v2056_v60  ;;  %1690 = vrot.lane.b32.xlu1 %v4209_v26, %s3037_s12  ;;  %1688 = vrot.lane.b32.xlu0 %v4212_v29, %s3037_s12  ;;  %vm1460_vm0 = vcmask 521696  }
 0x2d3   : > { %v1544_v61 = vpop.permute.xlu1 %1543  ;;  %v2060_v62 = vpop.permute.xlu0 %2059 }
 0x2d4   : > { %1581 = vst.msk [vmem:[#allocation2 + $0x46] sm:$0xff] %vm1572_vm10, %v1544_v61 }
 0x2d5   : > { %2104 = vst.msk [vmem:[#allocation2 + $0xf] sm:$0xff] %vm2102_vm14, %v2060_v62  ;;  %1749 = vrot.lane.b32.xlu1 %v4188_v47, %s3038_s13  ;;  %1747 = vrot.lane.b32.xlu0 %v4147_v13, %s3038_s13 }
 0x2d7   : > { %v1615_v63 = vpop.permute.xlu1 %1614  ;;  %v1546_v0 = vpop.permute.xlu0 %1545 }
 0x2d8   : > { %1654 = vst.msk [vmem:[#allocation2 + $0x30] sm:$0xff] %vm1647_vm12, %v1615_v63 }
 0x2d9   : > { %1582 = vst.msk [vmem:[#allocation2 + $0x4e] sm:$0xff] %vm1572_vm10, %v1546_v0  ;;  %2071 = vrot.lane.b32.xlu1 %v4188_v47, %s3043_s7  ;;  %2069 = vrot.lane.b32.xlu0 %v4147_v13, %s3043_s7 }
 0x2db   : > { %v2062_v3 = vpop.permute.xlu1 %2061  ;;  %v1617_v17 = vpop.permute.xlu0 %1616 }
 0x2dc   : > { %2105 = vst.msk [vmem:[#allocation2 + $0x17] sm:$0xff] %vm2102_vm14, %v2062_v3 }
 0x2dd   : > { %1655 = vst.msk [vmem:[#allocation2 + $0x38] sm:$0xff] %vm1647_vm12, %v1617_v17  ;;  %2130 = vrot.lane.b32.xlu1 %v4081_v38, %s3044_s8  ;;  %2128 = vrot.lane.b32.xlu0 %v4084_v1, %s3044_s8 }
 0x2df   : > { %v2119_v57 = vpop.permute.xlu1 %2118  ;;  %v2064_v54 = vpop.permute.xlu0 %2063 }
 0x2e0   : > { %2164 = vst.msk [vmem:[#allocation2 - $0x2] sm:$0xfc] %vm2163_vm2, %v2119_v57  ;;  %vm2406_vm2 = vcmask 1041408  }
 0x2e1   : > { %2106 = vst.msk [vmem:[#allocation2 + $0x1f] sm:$0xff] %vm2102_vm14, %v2064_v54  ;;  %1753 = vrot.lane.b32.xlu1 %v4209_v26, %s3038_s13  ;;  %1751 = vrot.lane.b32.xlu0 %v4212_v29, %s3038_s13 }
 0x2e3   : > { %v2123_v18 = vpop.permute.xlu1 %2122  ;;  %v2121_v14 = vpop.permute.xlu0 %2120 }
 0x2e4   : > { %2167 = vst.msk [vmem:[#allocation2 + $0xe] sm:$0xff] %vm2165_vm4, %v2123_v18  ;;  %2166 = vst.msk [vmem:[#allocation2 + $0x6] sm:$0xff] %vm2165_vm4, %v2121_v14 }
 0x2e5   : > { %1813 = vrot.lane.b32.xlu1 %v4212_v29, %s3039_s14  ;;  %1811 = vrot.lane.b32.xlu0 %v4188_v47, %s3039_s14 }
 0x2e7   : > { %v1621_v38 = vpop.permute.xlu1 %1620  ;;  %v1619_v1 = vpop.permute.xlu0 %1618 }
 0x2e8   : > { %1657 = vst.msk [vmem:[#allocation2 + $0x48] sm:$0xff] %vm1647_vm12, %v1621_v38  ;;  %1656 = vst.msk [vmem:[#allocation2 + $0x40] sm:$0xff] %vm1647_vm12, %v1619_v1 }
 0x2e9   : > { %2134 = vrot.lane.b32.xlu1 %v4188_v47, %s3044_s8  ;;  %2132 = vrot.lane.b32.xlu0 %v4147_v13, %s3044_s8 }
 0x2eb   : > { %v1679_v19 = vpop.permute.xlu1 %1678  ;;  %v1677_v20 = vpop.permute.xlu0 %1676  ;;  %v2180_v21 = vld [vmem:[#allocation2] sm:$0xff]  ;;  %v2181_v22 = vld [vmem:[#allocation2 + $0x8] sm:$0xff] }
 0x2ec   : > { %1718 = vst.msk [vmem:[#allocation2 + $0x37] sm:$0xff] %vm1711_vm15, %v1679_v19  ;;  %1717 = vst.msk [vmem:[#allocation2 + $0x2f] sm:$0xff] %vm1711_vm15, %v1677_v20  ;;  %v2195_v23 = vpack.c.bf16 %v2181_v22, %v2180_v21 }
 0x2ed   : > { %1817 = vrot.lane.b32.xlu1 %v4279_v15, %s3039_s14  ;;  %1815 = vrot.lane.b32.xlu0 %v4209_v26, %s3039_s14 }
 0x2ee   : > { %2860 = vmatprep.mubr.msk.bf16.mxu0 %vm2265_vm6, %v2195_v23 }
 0x2ef   : > { %v2127_v5 = vpop.permute.xlu1 %2126  ;;  %v2125_v4 = vpop.permute.xlu0 %2124 }
 0x2f0   : > { %2169 = vst.msk [vmem:[#allocation2 + $0x1e] sm:$0xff] %vm2165_vm4, %v2127_v5  ;;  %2168 = vst.msk [vmem:[#allocation2 + $0x16] sm:$0xff] %vm2165_vm4, %v2125_v4 }
 0x2f1   : > { %1880 = vrot.lane.b32.xlu1 %v4212_v29, %s3040_s15  ;;  %1878 = vrot.lane.b32.xlu0 %v4188_v47, %s3040_s15 }
 0x2f3   : > { %v1683_v7 = vpop.permute.xlu1 %1682  ;;  %v1681_v6 = vpop.permute.xlu0 %1680 }
 0x2f4   : > { %1720 = vst.msk [vmem:[#allocation2 + $0x47] sm:$0xff] %vm1711_vm15, %v1683_v7  ;;  %1719 = vst.msk [vmem:[#allocation2 + $0x3f] sm:$0xff] %vm1711_vm15, %v1681_v6 }
 0x2f5   : > { %1884 = vrot.lane.b32.xlu1 %v4279_v15, %s3040_s15  ;;  %1882 = vrot.lane.b32.xlu0 %v4209_v26, %s3040_s15 }
 0x2f7   : > { %v1742_v2 = vpop.permute.xlu1 %1741  ;;  %v1740_v9 = vpop.permute.xlu0 %1739  ;;  %v2182_v8 = vld [vmem:[#allocation2 + $0x10] sm:$0xff]  ;;  %v2183_v11 = vld [vmem:[#allocation2 + $0x18] sm:$0xff] }
 0x2f8   : > { %1781 = vst.msk [vmem:[#allocation2 + $0x36] sm:$0xff] %vm1774_vm1, %v1742_v2  ;;  %1780 = vst.msk [vmem:[#allocation2 + $0x2e] sm:$0xff] %vm1774_vm1, %v1740_v9  ;;  %v2196_v10 = vpack.c.bf16 %v2183_v11, %v2182_v8 }
 0x2f9   : > { %1947 = vrot.lane.b32.xlu1 %v4212_v29, %s3041_s16  ;;  %1945 = vrot.lane.b32.xlu0 %v4188_v47, %s3041_s16 }
 0x2fa   : > { %2861 = vmatmul.mubr.msk.bf16.vlgmr.msra.gmra.mrb[0].mxu0 %vm2265_vm6, %v2196_v10 }
 0x2fb   : > { %v1746_v12 = vpop.permute.xlu1 %1745  ;;  %v1744_v13 = vpop.permute.xlu0 %1743 }
 0x2fc   : > { %1783 = vst.msk [vmem:[#allocation2 + $0x46] sm:$0xff] %vm1774_vm1, %v1746_v12  ;;  %1782 = vst.msk [vmem:[#allocation2 + $0x3e] sm:$0xff] %vm1774_vm1, %v1744_v13 }
 0x2fd   : > { %1951 = vrot.lane.b32.xlu1 %v4279_v15, %s3041_s16  ;;  %1949 = vrot.lane.b32.xlu0 %v4209_v26, %s3041_s16 }
 0x2ff   : > { %v1806_v16 = vpop.permute.xlu1 %1805  ;;  %v1804_v24 = vpop.permute.xlu0 %1803 }
 0x300   : > { %1848 = vst.msk [vmem:[#allocation2 + $0x34] sm:$0xff] %vm1841_vm3, %v1806_v16  ;;  %1847 = vst.msk [vmem:[#allocation2 + $0x2c] sm:$0xff] %vm1841_vm3, %v1804_v24 }
 0x301   : > { %2013 = vrot.lane.b32.xlu1 %v4209_v26, %s3042_s19  ;;  %2011 = vrot.lane.b32.xlu0 %v4212_v29, %s3042_s19 }
 0x303   : > { %v1429_v40 = vpop.permute.xlu1 %1428  ;;  %v1427_v27 = vpop.permute.xlu0 %1426 }
 0x304   : > { %1461 = vst.msk [vmem:[#allocation2 + $0x70] sm:$0x3f] %vm1460_vm0, %v1429_v40 }
 0x305   : > { %1459 = vst.msk [vmem:[#allocation2 + $0x68] sm:$0xff] %vm1445_vm7, %v1427_v27  ;;  %2017 = vrot.lane.b32.xlu1 %v443_v39, %s3042_s19  ;;  %2015 = vrot.lane.b32.xlu0 %v4279_v15, %s3042_s19  ;;  %vm1523_vm7 = vcmask 555520  }
 0x307   : > { %v1487_v28 = vpop.permute.xlu1 %1486  ;;  %v1485_v31 = vpop.permute.xlu0 %1484 }
 0x308   : > { %1521 = vst.msk [vmem:[#allocation2 + $0x5f] sm:$0xff] %vm1509_vm9, %v1487_v28  ;;  %1520 = vst.msk [vmem:[#allocation2 + $0x57] sm:$0xff] %vm1509_vm9, %v1485_v31 }
 0x309   : > { %2075 = vrot.lane.b32.xlu1 %v4209_v26, %s3043_s7  ;;  %2073 = vrot.lane.b32.xlu0 %v4212_v29, %s3043_s7 }
 0x30b   : > { %v1810_v32 = vpop.permute.xlu1 %1809  ;;  %v1808_v37 = vpop.permute.xlu0 %1807 }
 0x30c   : > { %1850 = vst.msk [vmem:[#allocation2 + $0x44] sm:$0xff] %vm1841_vm3, %v1810_v32  ;;  %1849 = vst.msk [vmem:[#allocation2 + $0x3c] sm:$0xff] %vm1841_vm3, %v1808_v37 }
 0x30d   : > { %2077 = vrot.lane.b32.xlu1 %v4279_v15, %s3043_s7  ;;  %1630 = vrot.lane.b32.xlu0 %v4279_v15, %s3036_s11  ;;  %s2785_s11 = sshll.u32 %s380_s18, 2 }
 0x30f   : > { %v1873_v41 = vpop.permute.xlu1 %1872  ;;  %v1871_v42 = vpop.permute.xlu0 %1870 }
 0x310   : > { %1915 = vst.msk [vmem:[#allocation2 + $0x33] sm:$0xff] %vm1908_vm5, %v1873_v41  ;;  %1914 = vst.msk [vmem:[#allocation2 + $0x2b] sm:$0xff] %vm1908_vm5, %v1871_v42 }
 0x311   : > { %2136 = vrot.lane.b32.xlu1 %v4212_v29, %s3044_s8  ;;  %2079 = vrot.lane.b32.xlu0 %v443_v39, %s3043_s7  ;;  %v445_v29 = vld [vmem:[%s3863_s29 + $0x88] sm:$0xff] }
 0x313   : > { %v1491_v35 = vpop.permute.xlu1 %1490  ;;  %v1489_v45 = vpop.permute.xlu0 %1488 }
 0x314   : > { %1524 = vst.msk [vmem:[#allocation2 + $0x6f] sm:$0x7f] %vm1523_vm7, %v1491_v35 }
 0x315   : > { %1522 = vst.msk [vmem:[#allocation2 + $0x67] sm:$0xff] %vm1509_vm9, %v1489_v45  ;;  %1692 = vrot.lane.b32.xlu1 %v4279_v15, %s3037_s12  ;;  %2138 = vrot.lane.b32.xlu0 %v4209_v26, %s3044_s8  ;;  %vm1662_vm9 = vcmask 620096  }
 0x317   : > { %v1550_v36 = vpop.permute.xlu1 %1549  ;;  %v1548_v43 = vpop.permute.xlu0 %1547 }
 0x318   : > { %1584 = vst.msk [vmem:[#allocation2 + $0x5e] sm:$0xff] %vm1572_vm10, %v1550_v36  ;;  %1583 = vst.msk [vmem:[#allocation2 + $0x56] sm:$0xff] %vm1572_vm10, %v1548_v43 }
 0x319   : > { %2142 = vrot.lane.b32.xlu1 %v443_v39, %s3044_s8  ;;  %2140 = vrot.lane.b32.xlu0 %v4279_v15, %s3044_s8 }
 0x31b   : > { %v1877_v44 = vpop.permute.xlu1 %1876  ;;  %v1875_v47 = vpop.permute.xlu0 %1874 }
 0x31c   : > { %1917 = vst.msk [vmem:[#allocation2 + $0x43] sm:$0xff] %vm1908_vm5, %v1877_v44  ;;  %1916 = vst.msk [vmem:[#allocation2 + $0x3b] sm:$0xff] %vm1908_vm5, %v1875_v47 }
 0x31d   : > { %1819 = vrot.lane.b32.xlu1 %v443_v39, %s3039_s14  ;;  %1755 = vrot.lane.b32.xlu0 %v4279_v15, %s3038_s13 }
 0x31f   : > { %v1940_v46 = vpop.permute.xlu1 %1939  ;;  %v1938_v48 = vpop.permute.xlu0 %1937 }
 0x320   : > { %1982 = vst.msk [vmem:[#allocation2 + $0x32] sm:$0xff] %vm1975_vm8, %v1940_v46  ;;  %1981 = vst.msk [vmem:[#allocation2 + $0x2a] sm:$0xff] %vm1975_vm8, %v1938_v48 }
 0x321   : > { %1886 = vrot.lane.b32.xlu1 %v443_v39, %s3040_s15  ;;  %1821 = vrot.lane.b32.xlu0 %v444_v49, %s3039_s14  ;;  %s4453_s14 = scalar_lea.vmem %s4558_s5, %s2785_s11 }
 0x323   : > { %v1554_v50 = vpop.permute.xlu1 %1553  ;;  %v1552_v51 = vpop.permute.xlu0 %1551 }
 0x324   : > { %1586 = vst.msk [vmem:[#allocation2 + $0x6e] sm:$0xff] %vm1572_vm10, %v1554_v50  ;;  %1585 = vst.msk [vmem:[#allocation2 + $0x66] sm:$0xff] %vm1572_vm10, %v1552_v51  ;;  %vm1725_vm10 = vcmask 653920  }
 0x325   : > { %1953 = vrot.lane.b32.xlu1 %v443_v39, %s3041_s16  ;;  %1888 = vrot.lane.b32.xlu0 %v444_v49, %s3040_s15  ;;  %s2898_s15 = smul.u32 10, %s4571_s22 }
 0x327   : > { %v1625_v25 = vpop.permute.xlu1 %1624  ;;  %v1623_v26 = vpop.permute.xlu0 %1622 }
 0x328   : > { %1659 = vst.msk [vmem:[#allocation2 + $0x58] sm:$0xff] %vm1647_vm12, %v1625_v25  ;;  %1658 = vst.msk [vmem:[#allocation2 + $0x50] sm:$0xff] %vm1647_vm12, %v1623_v26 }
 0x329   : > { %2019 = vrot.lane.b32.xlu1 %v444_v49, %s3042_s19  ;;  %1955 = vrot.lane.b32.xlu0 %v444_v49, %s3041_s16  ;;  %s388_s16 = sadd.s32 %s2898_s15, %s4577_s21 }
 0x32b   : > { %v1944_v30 = vpop.permute.xlu1 %1943  ;;  %v1942_v33 = vpop.permute.xlu0 %1941 }
 0x32c   : > { %1984 = vst.msk [vmem:[#allocation2 + $0x42] sm:$0xff] %vm1975_vm8, %v1944_v30  ;;  %1983 = vst.msk [vmem:[#allocation2 + $0x3a] sm:$0xff] %vm1975_vm8, %v1942_v33 }
 0x32d   : > { %2081 = vrot.lane.b32.xlu1 %v444_v49, %s3043_s7  ;;  %2021 = vrot.lane.b32.xlu0 %v445_v29, %s3042_s19  ;;  %s2786_s19 = sshll.u32 %s388_s16, 1 }
 0x32e   : > { %s390_s20 = scalar_lea.vmem %s4559_s6, %s2786_s19 }
 0x32f   : > { %v2006_v34 = vpop.permute.xlu1 %2005  ;;  %v2004_v52 = vpop.permute.xlu0 %2003 }
 0x330   : > { %2045 = vst.msk [vmem:[#allocation2 + $0x30] sm:$0xff] %vm2038_vm11, %v2006_v34  ;;  %2044 = vst.msk [vmem:[#allocation2 + $0x28] sm:$0xff] %vm2038_vm11, %v2004_v52 }
 0x331   : > { %2144 = vrot.lane.b32.xlu1 %v444_v49, %s3044_s8  ;;  %2083 = vrot.lane.b32.xlu0 %v445_v29, %s3043_s7 }
 0x333   : > { %v1629_v53 = vpop.permute.xlu1 %1628  ;;  %v1627_v55 = vpop.permute.xlu0 %1626 }
 0x334   : > { %1661 = vst.msk [vmem:[#allocation2 + $0x68] sm:$0xff] %vm1647_vm12, %v1629_v53  ;;  %1660 = vst.msk [vmem:[#allocation2 + $0x60] sm:$0xff] %vm1647_vm12, %v1627_v55  ;;  %vm1856_vm12 = vcmask 714400  }
 0x335   : > { %2146 = vrot.lane.b32.xlu0 %v445_v29, %s3044_s8 }
 0x337   : > { %v1687_v56 = vpop.permute.xlu1 %1686  ;;  %v1685_v58 = vpop.permute.xlu0 %1684 }
 0x338   : > { %1722 = vst.msk [vmem:[#allocation2 + $0x57] sm:$0xff] %vm1711_vm15, %v1687_v56  ;;  %1721 = vst.msk [vmem:[#allocation2 + $0x4f] sm:$0xff] %vm1711_vm15, %v1685_v58 }
 0x33b   : > { %v2010_v59 = vpop.permute.xlu1 %2009  ;;  %v2008_v60 = vpop.permute.xlu0 %2007 }
 0x33c   : > { %2047 = vst.msk [vmem:[#allocation2 + $0x40] sm:$0xff] %vm2038_vm11, %v2010_v59  ;;  %2046 = vst.msk [vmem:[#allocation2 + $0x38] sm:$0xff] %vm2038_vm11, %v2008_v60 }
 0x33f   : > { %v2068_v61 = vpop.permute.xlu1 %2067  ;;  %v2066_v62 = vpop.permute.xlu0 %2065 }
 0x340   : > { %2108 = vst.msk [vmem:[#allocation2 + $0x2f] sm:$0xff] %vm2102_vm14, %v2068_v61  ;;  %2107 = vst.msk [vmem:[#allocation2 + $0x27] sm:$0xff] %vm2102_vm14, %v2066_v62 }
 0x343   : > { %v1691_v63 = vpop.permute.xlu1 %1690  ;;  %v1689_v0 = vpop.permute.xlu0 %1688 }
 0x344   : > { %1724 = vst.msk [vmem:[#allocation2 + $0x67] sm:$0xff] %vm1711_vm15, %v1691_v63  ;;  %1723 = vst.msk [vmem:[#allocation2 + $0x5f] sm:$0xff] %vm1711_vm15, %v1689_v0  ;;  %vm1923_vm15 = vcmask 748224  }
 0x347   : > { %v1750_v3 = vpop.permute.xlu1 %1749  ;;  %v1748_v17 = vpop.permute.xlu0 %1747 }
 0x348   : > { %1785 = vst.msk [vmem:[#allocation2 + $0x56] sm:$0xff] %vm1774_vm1, %v1750_v3  ;;  %1784 = vst.msk [vmem:[#allocation2 + $0x4e] sm:$0xff] %vm1774_vm1, %v1748_v17 }
 0x34b   : > { %v2072_v57 = vpop.permute.xlu1 %2071  ;;  %v2070_v54 = vpop.permute.xlu0 %2069 }
 0x34c   : > { %2110 = vst.msk [vmem:[#allocation2 + $0x3f] sm:$0xff] %vm2102_vm14, %v2072_v57  ;;  %2109 = vst.msk [vmem:[#allocation2 + $0x37] sm:$0xff] %vm2102_vm14, %v2070_v54  ;;  %v4446_v57 = vld [vmem:[%s4557_s4] ss:$0 sm:$0xff] }
 0x34f   : > { %v2131_v18 = vpop.permute.xlu1 %2130  ;;  %v2129_v14 = vpop.permute.xlu0 %2128 }
 0x350   : > { %2171 = vst.msk [vmem:[#allocation2 + $0x2e] sm:$0xff] %vm2165_vm4, %v2131_v18  ;;  %2170 = vst.msk [vmem:[#allocation2 + $0x26] sm:$0xff] %vm2165_vm4, %v2129_v14 }
 0x353   : > { %v1754_v38 = vpop.permute.xlu1 %1753  ;;  %v1752_v1 = vpop.permute.xlu0 %1751 }
 0x354   : > { %1787 = vst.msk [vmem:[#allocation2 + $0x66] sm:$0xff] %vm1774_vm1, %v1754_v38  ;;  %1786 = vst.msk [vmem:[#allocation2 + $0x5e] sm:$0xff] %vm1774_vm1, %v1752_v1 }
 0x357   : > { %v1814_v15 = vpop.permute.xlu1 %1813  ;;  %v1812_v19 = vpop.permute.xlu0 %1811  ;;  %v2184_v20 = vld [vmem:[#allocation2 + $0x20] sm:$0xff]  ;;  %v2185_v21 = vld [vmem:[#allocation2 + $0x28] sm:$0xff] }
 0x358   : > { %1852 = vst.msk [vmem:[#allocation2 + $0x54] sm:$0xff] %vm1841_vm3, %v1814_v15  ;;  %1851 = vst.msk [vmem:[#allocation2 + $0x4c] sm:$0xff] %vm1841_vm3, %v1812_v19  ;;  %v2197_v22 = vpack.c.bf16 %v2185_v21, %v2184_v20 }
 0x35a   : > { %2864 = vmatprep.mubr.msk.bf16.mxu0 %vm2265_vm6, %v2197_v22 }
 0x35b   : > { %v2135_v23 = vpop.permute.xlu1 %2134  ;;  %v2133_v5 = vpop.permute.xlu0 %2132 }
 0x35c   : > { %2173 = vst.msk [vmem:[#allocation2 + $0x3e] sm:$0xff] %vm2165_vm4, %v2135_v23  ;;  %2172 = vst.msk [vmem:[#allocation2 + $0x36] sm:$0xff] %vm2165_vm4, %v2133_v5 }
 0x35f   : > { %v1818_v4 = vpop.permute.xlu1 %1817  ;;  %v1816_v7 = vpop.permute.xlu0 %1815 }
 0x360   : > { %1854 = vst.msk [vmem:[#allocation2 + $0x64] sm:$0xff] %vm1841_vm3, %v1818_v4  ;;  %1853 = vst.msk [vmem:[#allocation2 + $0x5c] sm:$0xff] %vm1841_vm3, %v1816_v7 }
 0x363   : > { %v1881_v6 = vpop.permute.xlu1 %1880  ;;  %v1879_v2 = vpop.permute.xlu0 %1878  ;;  %v2186_v9 = vld [vmem:[#allocation2 + $0x30] sm:$0xff]  ;;  %v2187_v8 = vld [vmem:[#allocation2 + $0x38] sm:$0xff] }
 0x364   : > { %1919 = vst.msk [vmem:[#allocation2 + $0x53] sm:$0xff] %vm1908_vm5, %v1881_v6  ;;  %1918 = vst.msk [vmem:[#allocation2 + $0x4b] sm:$0xff] %vm1908_vm5, %v1879_v2  ;;  %v2198_v11 = vpack.c.bf16 %v2187_v8, %v2186_v9 }
 0x366   : > { %2865 = vmatmul.mubr.msk.bf16.gmra.mrb[4].mxu0 %vm2265_vm6, %v2198_v11 }
 0x367   : > { %v1885_v10 = vpop.permute.xlu1 %1884  ;;  %v1883_v12 = vpop.permute.xlu0 %1882 }
 0x368   : > { %1921 = vst.msk [vmem:[#allocation2 + $0x63] sm:$0xff] %vm1908_vm5, %v1885_v10  ;;  %1920 = vst.msk [vmem:[#allocation2 + $0x5b] sm:$0xff] %vm1908_vm5, %v1883_v12 }
 0x36b   : > { %v1948_v13 = vpop.permute.xlu1 %1947  ;;  %v1946_v16 = vpop.permute.xlu0 %1945 }
 0x36c   : > { %1986 = vst.msk [vmem:[#allocation2 + $0x52] sm:$0xff] %vm1975_vm8, %v1948_v13  ;;  %1985 = vst.msk [vmem:[#allocation2 + $0x4a] sm:$0xff] %vm1975_vm8, %v1946_v16 }
 0x36f   : > { %v1952_v24 = vpop.permute.xlu1 %1951  ;;  %v1950_v39 = vpop.permute.xlu0 %1949 }
 0x370   : > { %1988 = vst.msk [vmem:[#allocation2 + $0x62] sm:$0xff] %vm1975_vm8, %v1952_v24  ;;  %1987 = vst.msk [vmem:[#allocation2 + $0x5a] sm:$0xff] %vm1975_vm8, %v1950_v39 }
 0x373   : > { %v2014_v40 = vpop.permute.xlu1 %2013  ;;  %v2012_v27 = vpop.permute.xlu0 %2011 }
 0x374   : > { %2049 = vst.msk [vmem:[#allocation2 + $0x50] sm:$0xff] %vm2038_vm11, %v2014_v40  ;;  %2048 = vst.msk [vmem:[#allocation2 + $0x48] sm:$0xff] %vm2038_vm11, %v2012_v27 }
 0x377   : > { %v2018_v28 = vpop.permute.xlu1 %2017  ;;  %v2016_v31 = vpop.permute.xlu0 %2015 }
 0x378   : > { %2051 = vst.msk [vmem:[#allocation2 + $0x60] sm:$0xff] %vm2038_vm11, %v2018_v28  ;;  %2050 = vst.msk [vmem:[#allocation2 + $0x58] sm:$0xff] %vm2038_vm11, %v2016_v31 }
 0x37b   : > { %v2076_v32 = vpop.permute.xlu1 %2075  ;;  %v2074_v37 = vpop.permute.xlu0 %2073 }
 0x37c   : > { %2112 = vst.msk [vmem:[#allocation2 + $0x4f] sm:$0xff] %vm2102_vm14, %v2076_v32  ;;  %2111 = vst.msk [vmem:[#allocation2 + $0x47] sm:$0xff] %vm2102_vm14, %v2074_v37 }
 0x37f   : > { %v2078_v41 = vpop.permute.xlu1 %2077  ;;  %v1631_v42 = vpop.permute.xlu0 %1630 }
 0x380   : > { %2113 = vst.msk [vmem:[#allocation2 + $0x57] sm:$0xff] %vm2102_vm14, %v2078_v41 }
 0x381   : > { %1663 = vst.msk [vmem:[#allocation2 + $0x70] sm:$0x3f] %vm1662_vm9, %v1631_v42 }
 0x383   : > { %v2137_v35 = vpop.permute.xlu1 %2136  ;;  %v2080_v45 = vpop.permute.xlu0 %2079 }
 0x384   : > { %2174 = vst.msk [vmem:[#allocation2 + $0x46] sm:$0xff] %vm2165_vm4, %v2137_v35 }
 0x385   : > { %2114 = vst.msk [vmem:[#allocation2 + $0x5f] sm:$0xff] %vm2102_vm14, %v2080_v45 }
 0x387   : > { %v1693_v36 = vpop.permute.xlu1 %1692  ;;  %v2139_v43 = vpop.permute.xlu0 %2138 }
 0x388   : > { %1726 = vst.msk [vmem:[#allocation2 + $0x6f] sm:$0x7f] %vm1725_vm10, %v1693_v36 }
 0x389   : > { %2175 = vst.msk [vmem:[#allocation2 + $0x4e] sm:$0xff] %vm2165_vm4, %v2139_v43 }
 0x38b   : > { %v2143_v44 = vpop.permute.xlu1 %2142  ;;  %v2141_v47 = vpop.permute.xlu0 %2140  ;;  %v2188_v48 = vld [vmem:[#allocation2 + $0x40] sm:$0xff] }
 0x38c   : > { %2177 = vst.msk [vmem:[#allocation2 + $0x5e] sm:$0xff] %vm2165_vm4, %v2143_v44  ;;  %2176 = vst.msk [vmem:[#allocation2 + $0x56] sm:$0xff] %vm2165_vm4, %v2141_v47 }
 0x38f   : > { %v1820_v49 = vpop.permute.xlu1 %1819  ;;  %v1756_v46 = vpop.permute.xlu0 %1755 }
 0x390   : > { %v2189_v50 = vld [vmem:[#allocation2 + $0x48] sm:$0xff]  ;;  %1788 = vst.msk [vmem:[#allocation2 + $0x6e] sm:$0xff] %vm1774_vm1, %v1756_v46  ;;  %vm1990_vm1 = vcmask 782048  }
 0x391   : > { %v2199_v51 = vpack.c.bf16 %v2189_v50, %v2188_v48  ;;  %1855 = vst.msk [vmem:[#allocation2 + $0x6c] sm:$0xff] %vm1841_vm3, %v1820_v49  ;;  %vm2053_vm3 = vcmask 816896  }
 0x393   : > { %2868 = vmatprep.mubr.msk.bf16.mxu1 %vm2265_vm6, %v2199_v51  ;;  %v1887_v25 = vpop.permute.xlu1 %1886  ;;  %v1822_v26 = vpop.permute.xlu0 %1821  ;;  %v2190_v29 = vld [vmem:[#allocation2 + $0x50] sm:$0xff]  ;;  %v2191_v30 = vld [vmem:[#allocation2 + $0x58] sm:$0xff] }
 0x394   : > { %1922 = vst.msk [vmem:[#allocation2 + $0x6b] sm:$0xff] %vm1908_vm5, %v1887_v25  ;;  %v2200_v33 = vpack.c.bf16 %v2191_v30, %v2190_v29  ;;  %vm2116_vm5 = vcmask 850720  }
 0x395   : > { %1857 = vst.msk [vmem:[#allocation2 + $0x74] sm:$0x3] %vm1856_vm12, %v1822_v26 }
 0x396   : > { %2869 = vmatmul.mubr.msk.bf16.vlgmr.msra.gmra.mrb[0].mxu1 %vm2265_vm6, %v2200_v33 }
 0x397   : > { %v1954_v34 = vpop.permute.xlu1 %1953  ;;  %v1889_v52 = vpop.permute.xlu0 %1888 }
 0x398   : > { %1989 = vst.msk [vmem:[#allocation2 + $0x6a] sm:$0xff] %vm1975_vm8, %v1954_v34  ;;  %vm2499_vm8 = vcmask 60416  }
 0x399   : > { %1924 = vst.msk [vmem:[#allocation2 + $0x73] sm:$0x7] %vm1923_vm15, %v1889_v52 }
 0x39b   : > { %v2020_v53 = vpop.permute.xlu1 %2019  ;;  %v1956_v55 = vpop.permute.xlu0 %1955 }
 0x39c   : > { %2052 = vst.msk [vmem:[#allocation2 + $0x68] sm:$0xff] %vm2038_vm11, %v2020_v53  ;;  %vm2399_vm11 = vcmask 1043456  }
 0x39d   : > { %1991 = vst.msk [vmem:[#allocation2 + $0x72] sm:$0xf] %vm1990_vm1, %v1956_v55 }
 0x39f   : > { %v2082_v56 = vpop.permute.xlu1 %2081  ;;  %v2022_v58 = vpop.permute.xlu0 %2021 }
 0x3a0   : > { %2115 = vst.msk [vmem:[#allocation2 + $0x67] sm:$0xff] %vm2102_vm14, %v2082_v56  ;;  %vm2514_vm14 = vcmask 64512  }
 0x3a1   : > { %2054 = vst.msk [vmem:[#allocation2 + $0x70] sm:$0x3f] %vm2053_vm3, %v2022_v58 }
 0x3a3   : > { %v2145_v59 = vpop.permute.xlu1 %2144  ;;  %v2084_v60 = vpop.permute.xlu0 %2083 }
 0x3a4   : > { %2178 = vst.msk [vmem:[#allocation2 + $0x66] sm:$0xff] %vm2165_vm4, %v2145_v59 }
 0x3a5   : > { %2117 = vst.msk [vmem:[#allocation2 + $0x6f] sm:$0x7f] %vm2116_vm5, %v2084_v60 }
 0x3a7   : > { %v2147_v61 = vpop.permute.xlu0 %2146 }
 0x3a8   : > { %2179 = vst.msk [vmem:[#allocation2 + $0x6e] sm:$0xff] %vm2165_vm4, %v2147_v61  ;;  %vm2512_vm4 = vcmask 58368  }
 0x3ab   : > { %v2192_v62 = vld [vmem:[#allocation2 + $0x60] sm:$0xff] }
 0x3af   : > { %v2193_v63 = vld [vmem:[#allocation2 + $0x68] sm:$0xff]  ;;  %v2194_v0 = vld [vmem:[#allocation2 + $0x70] sm:$0x3f] }
 0x3b0   : > { %v2201_v3 = vpack.c.bf16 %v2193_v63, %v2192_v62  ;;  %v2202_v17 = vpack.c.bf16 %v2194_v0, %v2194_v0 }
 0x3b2   : > { %2872 = vmatprep.mubr.msk.bf16.mxu1 %vm2265_vm6, %v2201_v3 }
 0x3b3   : > { %2873 = vmatmul.mubr.msk.bf16.gmra.mrb[4].mxu1 %vm2265_vm6, %v2202_v17 }
 0x3cd   : > { %v2862_v54 = vpop.f32.mrb[0].mxu0 }
 0x3ce   : > { %v2337_v18 = vadd.f32 %v2862_v54, %v4446_v57  ;;  %v2328_v14 = vpop.f32.mrb[1].mxu0 }
 0x3cf   : > { %v2329_v38 = vadd.f32 %v4446_v57, %v2328_v14  ;;  %v2863_v1 = vpop.f32.mrb[2].mxu0 }
 0x3d0   : > { %v2340_v15 = vadd.f32 %v2863_v1, %v4446_v57  ;;  %v2331_v19 = vpop.f32.mrb[3].mxu0  ;;  %v2393_v22 = vrot.slane %v2337_v18, 2 }
 0x3d1   : > { %v2818_v20 = vpack.c.bf16 %v2329_v38, %v2329_v38  ;;  %v2332_v21 = vadd.f32 %v4446_v57, %v2331_v19  ;;  %v2548_v7 = vmul.f32 %v2329_v38, %v2329_v38  ;;  %v2515_v9 = vsel %vm2514_vm14, %v2329_v38, 0.0 }
 0x3d2   : > { %v2400_v23 = vrot.slane %v2340_v15, 4 }
 0x3d3   : > { %2500 = vst.msk [vmem:[%s4453_s14] sm:$0xf] %vm2499_vm8, %v2818_v20  ;;  %v2392_v5 = vrot.slane %v2332_v21, 2  ;;  %v2561_v24 = vsel %vm2514_vm14, %v2548_v7, 0.0 }
 0x3d4   : > { %v2440_v4 = vsel %vm2399_vm11, %v2393_v22, %v2400_v23 }
 0x3d5   : > { %v2820_v6 = vpack.c.bf16 %v2440_v4, %v2440_v4  ;;  %v2394_v2 = vsel %vm2290_vm13, %v2392_v5, %v2393_v22  ;;  %v2550_v11 = vmul.f32 %v2440_v4, %v2440_v4  ;;  %v2518_v39 = vsel %vm2514_vm14, %v2440_v4, 0.0 }
 0x3d6   : > { %v2439_v8 = vsel %vm2406_vm2, %v2332_v21, %v2394_v2 }
 0x3d7   : > { %2502 = vst.msk [vmem:[%s4453_s14 + $0x8] sm:$0xf] %vm2499_vm8, %v2820_v6  ;;  %v2819_v10 = vpack.c.bf16 %v2439_v8, %v2439_v8  ;;  %v2516_v12 = vsel %vm2514_vm14, %v2439_v8, 0.0  ;;  %v2549_v13 = vmul.f32 %v2439_v8, %v2439_v8  ;;  %v2564_v31 = vsel %vm2514_vm14, %v2550_v11, 0.0 }
 0x3d8   : > { %v2517_v16 = vadd.f32 %v2516_v12, %v2515_v9 }
 0x3d9   : > { %2501 = vst.msk [vmem:[%s4453_s14 + $0x4] sm:$0xf] %vm2499_vm8, %v2819_v10  ;;  %v2562_v40 = vsel %vm2514_vm14, %v2549_v13, 0.0 }
 0x3da   : > { %v2519_v27 = vadd.f32 %v2518_v39, %v2517_v16  ;;  %v2563_v28 = vadd.f32 %v2562_v40, %v2561_v24 }
 0x3dc   : > { %v2565_v32 = vadd.f32 %v2564_v31, %v2563_v28 }
 0x439   : > { %v2866_v37 = vpop.f32.mrb[4].mxu0 }
 0x43a   : > { %v2353_v41 = vadd.f32 %v2866_v37, %v4446_v57  ;;  %v2344_v42 = vpop.f32.mrb[5].mxu0 }
 0x43b   : > { %v2345_v35 = vadd.f32 %v4446_v57, %v2344_v42  ;;  %v2867_v45 = vpop.f32.mrb[6].mxu0 }
 0x43c   : > { %v2823_v36 = vpack.c.bf16 %v2353_v41, %v2353_v41  ;;  %v2347_v43 = vpop.f32.mrb[7].mxu0  ;;  %v2553_v53 = vmul.f32 %v2353_v41, %v2353_v41  ;;  %v2524_v60 = vsel %vm2514_vm14, %v2353_v41, 0.0  ;;  %v2356_v3 = vadd.f32 %v2867_v45, %v4446_v57 }
 0x43d   : > { %v2401_v44 = vrot.slane %v2345_v35, 4  ;;  %v2407_v47 = vrot.slane %v2345_v35, 6  ;;  %v2348_v49 = vadd.f32 %v4446_v57, %v2347_v43 }
 0x43e   : > { %2505 = vst.msk [vmem:[%s4453_s14 + $0x14] sm:$0xf] %vm2499_vm8, %v2823_v36  ;;  %v2570_v63 = vsel %vm2514_vm14, %v2553_v53, 0.0  ;;  %v2414_v19 = vrot.slane %v2356_v3, 2 }
 0x43f   : > { %v2402_v46 = vsel %vm2399_vm11, %v2400_v23, %v2401_v44  ;;  %v2408_v48 = vrot.slane %v2348_v49, 6 }
 0x440   : > { %v2441_v50 = vsel %vm2290_vm13, %v2402_v46, %v2407_v47 }
 0x441   : > { %v2821_v51 = vpack.c.bf16 %v2441_v50, %v2441_v50  ;;  %v2520_v25 = vsel %vm2514_vm14, %v2441_v50, 0.0  ;;  %v2551_v26 = vmul.f32 %v2441_v50, %v2441_v50  ;;  %v2409_v29 = vsel %vm2406_vm2, %v2407_v47, %v2408_v48 }
 0x442   : > { %v2521_v30 = vadd.f32 %v2520_v25, %v2519_v27  ;;  %v2822_v33 = vpack.c.bf16 %v2409_v29, %v2409_v29  ;;  %v2522_v34 = vsel %vm2514_vm14, %v2409_v29, 0.0  ;;  %v2552_v52 = vmul.f32 %v2409_v29, %v2409_v29 }
 0x443   : > { %2503 = vst.msk [vmem:[%s4453_s14 + $0xc] sm:$0xf] %vm2499_vm8, %v2821_v51  ;;  %v2566_v55 = vsel %vm2514_vm14, %v2551_v26, 0.0 }
 0x444   : > { %v2567_v56 = vadd.f32 %v2566_v55, %v2565_v32  ;;  %2504 = vst.msk [vmem:[%s4453_s14 + $0x10] sm:$0xf] %vm2499_vm8, %v2822_v33  ;;  %v2523_v58 = vadd.f32 %v2522_v34, %v2521_v30  ;;  %v2568_v59 = vsel %vm2514_vm14, %v2552_v52, 0.0 }
 0x446   : > { %v2525_v61 = vadd.f32 %v2524_v60, %v2523_v58  ;;  %v2569_v62 = vadd.f32 %v2568_v59, %v2567_v56 }
 0x448   : > { %v2571_v0 = vadd.f32 %v2570_v63, %v2569_v62 }
 0x469   : > { %v2870_v17 = vpop.f32.mrb[0].mxu1 }
 0x46a   : > { %v2369_v54 = vadd.f32 %v2870_v17, %v4446_v57  ;;  %v2360_v18 = vpop.f32.mrb[1].mxu1 }
 0x46b   : > { %v2361_v14 = vadd.f32 %v4446_v57, %v2360_v18  ;;  %v2871_v38 = vpop.f32.mrb[2].mxu1 }
 0x46c   : > { %v2372_v1 = vadd.f32 %v2871_v38, %v4446_v57  ;;  %v2363_v15 = vpop.f32.mrb[3].mxu1  ;;  %v2427_v22 = vrot.slane %v2369_v54, 6  ;;  %v2422_v7 = vrot.slane %v2369_v54, 4 }
 0x46d   : > { %v2415_v20 = vrot.slane %v2361_v14, 2  ;;  %v2364_v21 = vadd.f32 %v4446_v57, %v2363_v15 }
 0x46e   : > { %v2428_v23 = vrot.slane %v2372_v1, 6 }
 0x46f   : > { %v2416_v5 = vsel %vm2290_vm13, %v2414_v19, %v2415_v20  ;;  %v2421_v4 = vrot.slane %v2364_v21, 4 }
 0x470   : > { %v2442_v6 = vsel %vm2406_vm2, %v2356_v3, %v2416_v5  ;;  %v2429_v2 = vsel %vm2406_vm2, %v2427_v22, %v2428_v23 }
 0x471   : > { %v2824_v9 = vpack.c.bf16 %v2442_v6, %v2442_v6  ;;  %v2526_v8 = vsel %vm2514_vm14, %v2442_v6, 0.0  ;;  %v2554_v11 = vmul.f32 %v2442_v6, %v2442_v6  ;;  %v2827_v10 = vpack.c.bf16 %v2429_v2, %v2429_v2 }
 0x472   : > { %v2423_v12 = vsel %vm2399_vm11, %v2421_v4, %v2422_v7  ;;  %v2443_v13 = vsel %vm2399_vm11, %v2415_v20, %v2421_v4  ;;  %v2527_v40 = vadd.f32 %v2526_v8, %v2525_v61  ;;  %v2557_v35 = vmul.f32 %v2429_v2, %v2429_v2 }
 0x473   : > { %2506 = vst.msk [vmem:[%s4453_s14 + $0x18] sm:$0xf] %vm2499_vm8, %v2824_v9  ;;  %v2572_v16 = vsel %vm2514_vm14, %v2554_v11, 0.0  ;;  %2509 = vst.msk [vmem:[%s4453_s14 + $0x24] sm:$0xf] %vm2499_vm8, %v2827_v10  ;;  %v2444_v24 = vsel %vm2290_vm13, %v2423_v12, %v2427_v22  ;;  %v2825_v39 = vpack.c.bf16 %v2443_v13, %v2443_v13  ;;  %v2528_v28 = vsel %vm2514_vm14, %v2443_v13, 0.0 }
 0x474   : > { %v2826_v27 = vpack.c.bf16 %v2444_v24, %v2444_v24  ;;  %v2529_v31 = vadd.f32 %v2528_v28, %v2527_v40  ;;  %v2555_v32 = vmul.f32 %v2443_v13, %v2443_v13  ;;  %v2556_v37 = vmul.f32 %v2444_v24, %v2444_v24 }
 0x475   : > { %2507 = vst.msk [vmem:[%s4453_s14 + $0x1c] sm:$0xf] %vm2499_vm8, %v2825_v39  ;;  %v2573_v41 = vadd.f32 %v2572_v16, %v2571_v0  ;;  %v2530_v42 = vsel %vm2514_vm14, %v2444_v24, 0.0  ;;  %v2532_v43 = vsel %vm2514_vm14, %v2429_v2, 0.0  ;;  %v2578_v48 = vsel %vm2514_vm14, %v2557_v35, 0.0 }
 0x476   : > { %2508 = vst.msk [vmem:[%s4453_s14 + $0x20] sm:$0xf] %vm2499_vm8, %v2826_v27  ;;  %v2574_v45 = vsel %vm2514_vm14, %v2555_v32, 0.0  ;;  %v2531_v36 = vadd.f32 %v2530_v42, %v2529_v31  ;;  %v2576_v47 = vsel %vm2514_vm14, %v2556_v37, 0.0 }
 0x477   : > { %v2575_v44 = vadd.f32 %v2574_v45, %v2573_v41 }
 0x478   : > { %v2533_v49 = vadd.f32 %v2532_v43, %v2531_v36 }
 0x479   : > { %v2577_v46 = vadd.f32 %v2576_v47, %v2575_v44 }
 0x47b   : > { %v2579_v50 = vadd.f32 %v2578_v48, %v2577_v46 }
 0x486   : > { %v2874_v51 = vpop.f32.mrb[4].mxu1 }
 0x487   : > { %v2385_v25 = vadd.f32 %v2874_v51, %v4446_v57  ;;  %v2376_v26 = vpop.f32.mrb[5].mxu1 }
 0x488   : > { %v2377_v29 = vadd.f32 %v4446_v57, %v2376_v26  ;;  %v2875_v30 = vpop.f32.mrb[6].mxu1 }
 0x489   : > { %v2435_v33 = vrot.slane %v2385_v25, 2  ;;  %v2379_v34 = vpop.f32.mrb[7].mxu1 }
 0x48a   : > { %v2828_v52 = vpack.c.bf16 %v2377_v29, %v2377_v29  ;;  %v2534_v53 = vsel %vm2514_vm14, %v2377_v29, 0.0  ;;  %v2558_v55 = vmul.f32 %v2377_v29, %v2377_v29  ;;  %v2380_v56 = vadd.f32 %v4446_v57, %v2379_v34 }
 0x48b   : > { %v2830_v58 = vpack.c.bf16 %v2435_v33, %v2435_v33  ;;  %v2535_v59 = vadd.f32 %v2534_v53, %v2533_v49  ;;  %v2560_v3 = vmul.f32 %v2435_v33, %v2435_v33  ;;  %v2538_v14 = vsel %vm2499_vm8, %v2435_v33, 0.0 }
 0x48c   : > { %2510 = vst.msk [vmem:[%s4453_s14 + $0x28] sm:$0xf] %vm2499_vm8, %v2828_v52  ;;  %v2580_v60 = vsel %vm2514_vm14, %v2558_v55, 0.0  ;;  %v2434_v61 = vrot.slane %v2380_v56, 2 }
 0x48d   : > { %2513 = vst.msk [vmem:[%s4453_s14 + $0x30] sm:$0x3] %vm2512_vm4, %v2830_v58  ;;  %v2581_v62 = vadd.f32 %v2580_v60, %v2579_v50  ;;  %v2584_v19 = vsel %vm2499_vm8, %v2560_v3, 0.0 }
 0x48e   : > { %v2436_v63 = vsel %vm2290_vm13, %v2434_v61, %v2435_v33  ;;  %vm2546_vm13 = vcmask 57344  }
 0x48f   : > { %v2445_v0 = vsel %vm2406_vm2, %v2380_v56, %v2436_v63 }
 0x490   : > { %v2829_v17 = vpack.c.bf16 %v2445_v0, %v2445_v0  ;;  %v2536_v57 = vsel %vm2514_vm14, %v2445_v0, 0.0  ;;  %v2559_v54 = vmul.f32 %v2445_v0, %v2445_v0 }
 0x491   : > { %v2537_v18 = vadd.f32 %v2536_v57, %v2535_v59 }
 0x492   : > { %2511 = vst.msk [vmem:[%s4453_s14 + $0x2c] sm:$0xf] %vm2499_vm8, %v2829_v17  ;;  %v2582_v38 = vsel %vm2514_vm14, %v2559_v54, 0.0 }
 0x493   : > { %v2539_v1 = vadd.f32 %v2538_v14, %v2537_v18  ;;  %v2583_v15 = vadd.f32 %v2582_v38, %v2581_v62 }
 0x495   : > { %v2540_v20 = vrot.slane %v2539_v1, 4  ;;  %v2585_v21 = vadd.f32 %v2584_v19, %v2583_v15 }
 0x497   : > { %v2541_v22 = vadd.f32 %v2540_v20, %v2539_v1  ;;  %v2586_v23 = vrot.slane %v2585_v21, 4 }
 0x499   : > { %v2542_v5 = vrot.slane %v2541_v22, 2  ;;  %v2587_v4 = vadd.f32 %v2586_v23, %v2585_v21 }
 0x49b   : > { %v2543_v7 = vadd.f32 %v2542_v5, %v2541_v22  ;;  %v2588_v6 = vrot.slane %v2587_v4, 2 }
 0x49d   : > { %v2544_v2 = vrot.slane %v2543_v7, 1  ;;  %v2589_v9 = vadd.f32 %v2588_v6, %v2587_v4 }
 0x49f   : > { %v2545_v8 = vadd.f32 %v2544_v2, %v2543_v7  ;;  %v2590_v11 = vrot.slane %v2589_v9, 1 }
 0x4a1   : > { %2547 = vst.msk [vmem:[%s390_s20] sm:$0x1] %vm2546_vm13, %v2545_v8  ;;  %v2591_v10 = vadd.f32 %v2590_v11, %v2589_v9 }
 0x4a3   : > { %2592 = vst.msk [vmem:[%s390_s20 + $0x1] sm:$0x1] %vm2546_vm13, %v2591_v10 }
 0x4a4 PF: > { %s17_s25 = sadd.s32 1, %s3017_s25   ;;  %s4560_s21 = smov %s3009_s23 }
 0x4a5   : > { %p14_p10 = scmp.ge.s32.totalorder %s17_s25, 22   ;;  %s4561_s22 = smov %s3013_s24 }
 0x4a6   : > { %s4562_s23 = smov %s4565_s26  ;;  %s4563_s24 = smov %s4569_s27 }
 0x4a7   :  { %16 = sbr.rel (!%p14_p10) target bundleno = 3 (0x3), region = 88 }

// kernel: double_convolution.4
= control target key start
LH: loop header
LB: loop body
LE: loop exit
PB: predicated region body
PF: predicated region fallthrough
CT: control target
= control target key end

     0   :  { %s2986_s27 = smov 0   ;;  %s2988_s28 = smov 0   ;;  %s4757_s0 = inlined_call_operand.vmem [shape: bf16[2,10,100,8], index: 0, kind: input, shape index: {}, may-alias: {0,1,2}]   ;;  %s4758_s1 = inlined_call_operand.vmem [shape: bf16[2,10,100,8], index: 1, kind: input, shape index: {}, may-alias: {0,1,2}]   ;;  %s4759_s2 = inlined_call_operand.vmem [shape: bf16[2,10,100,8], index: 2, kind: input, shape index: {}, may-alias: {0,1,2}]   ;;  %s4760_s3 = inlined_call_operand.vmem [shape: bf16[216,16], index: 3, kind: input, shape index: {}]   ;;  %s4761_s4 = inlined_call_operand.vmem [shape: f32[1,16], index: 4, kind: input, shape index: {}]   ;;  %s4762_s5 = inlined_call_operand.vmem [shape: f32[1,8], index: 5, kind: input, shape index: {}]   ;;  %s4763_s6 = inlined_call_operand.vmem [shape: f32[1,8], index: 6, kind: input, shape index: {}]   ;;  %s4764_s7 = inlined_call_operand.vmem [shape: f32[2,8,64,16], index: 7, kind: output, shape index: {0}]   ;;  %s4765_s8 = inlined_call_operand.vmem [shape: f32[2,8,2,16], index: 8, kind: output, shape index: {1}]  }
   0x1   :  { %s2990_s29 = smov 0   ;;  %s2992_s30 = smov 0  }
   0x2   :  { %s2994_s9 = smov 0  }
   0x3 LB: > { %s28_s10 = sadd.s32 1, %s2915_s29  ;;  %s31_s11 = sadd.s32 1, %s2919_s30  ;;  %s2923_s9 = sphi %s2994_s9, %s19_s9   ;;  %s2919_s30 = sphi %s2992_s30, %s4908_s30   ;;  %s2915_s29 = sphi %s2990_s29, %s4907_s29   ;;  %s2911_s28 = sphi %s2988_s28, %s4906_s28   ;;  %s2907_s27 = sphi %s2986_s27, %s4905_s27  }
   0x4   : > { %p29_p0 = scmp.ge.s32.totalorder %s28_s10, 8  ;;  %p2659_p1 = scmp.ge.s32.totalorder %s2923_s9, 1 }
   0x5   : > { %p327_p2 = scmp.lt.s32.totalorder %s2923_s9, 17 }
   0x6   : > { %s4910_s10 = smov (%p29_p0, %s28_s10), 0  ;;  %s4912_s11 = smov (!%p29_p0, %s31_s11), %s2919_s30 }
   0x7   : > { %p328_p3 = pnand %p2659_p1, %p327_p2  ;;  %p33_p4 = scmp.ge.s32.totalorder %s4912_s11, 2 }
   0x8   : > { %p397_p5 = scmp.lt.s32.totalorder (!%p328_p3), %s2911_s28, 1  ;;  %p399_p6 = scmp.lt.s32.totalorder (!%p328_p3), %s2907_s27, 9  ;;  %v3029_v0 = vld [vmem:[%s4762_s5] ss:$0 sm:$0xff] (!%p328_p3)  ;;  %vm4802_vm0 = vcmask (!%p328_p3), 1046528   ;;  %vm4780_vm1 = vcmask (!%p328_p3), 62464  }
   0x9   : > { %s4914_s11 = smov (%p33_p4, %s4912_s11), 0  ;;  %331 = sbr.rel (%p328_p3) target bundleno = 895 (0x37f), region = 48 }
   0xa   : > { %vm4788_vm2 = vcmask (!%p328_p3), 64512   ;;  %v3044_v10 = vld [vmem:[%s4763_s6] ss:$0 sm:$0xff] (!%p328_p3)  ;;  %s4786_s24 = smov (!%p328_p3), 8   ;;  %vm739_vm3 = vcmask (!%p328_p3), 1045504   ;;  %vm847_vm4 = vcmask (!%p328_p3), 1044480  }
   0xb   : > { %vm911_vm5 = vcmask (!%p328_p3), 1043456   ;;  %s2926_s25 = smov (!%p328_p3), 16   ;;  %vm4791_vm6 = vcmask (!%p328_p3), 1042432   ;;  %vm1084_vm7 = vcmask (!%p328_p3), 1041408   ;;  %s4796_s26 = smov (!%p328_p3), 24   ;;  %vm4778_vm8 = vcmask (!%p328_p3), 128064  }
   0xc   : > { %vm727_vm9 = vcmask (!%p328_p3), 130112   ;;  %s2931_s18 = smov (!%p328_p3), 56   ;;  %s417_s20 = sadd.s32 (!%p328_p3), 2, %s2907_s27  ;;  %vm789_vm10 = vcmask (!%p328_p3), 195712   ;;  %vm4772_vm11 = vcmask (!%p328_p3), 193664   ;;  %vm834_vm12 = vcmask (!%p328_p3), 261312  }
   0xd   : > { %p420_p8 = scmp.lt.s32.totalorder (!%p328_p3), %s417_s20, 9  ;;  %vm4768_vm13 = vcmask (!%p328_p3), 259264   ;;  %vm4801_vm14 = vcmask (!%p328_p3), 326912   ;;  %vm4771_vm15 = vcmask (!%p328_p3), 324864   ;;  %s4804_s22 = smov (!%p328_p3), 40  }
   0xe   : > { %p430_p9 = scmp.lt.s32.totalorder (!%p328_p3), %s2907_s27, 7 }
  0x10   : > { %s4916_s28 = smov (!%p397_p5, %s2911_s28), 1  ;;  %s4920_s20 = smov (!%p420_p8, %s417_s20), 9 }
  0x11   : > { %s400_s12 = scalar_select %p399_p6, %s2907_s27, 9 }
  0x12   : > { %s3023_s13 = smul.u32 130, %s4916_s28 }
  0x13   : > { %s2807_s14 = smul.u32 13, %s400_s12  ;;  %s4794_s12 = smov 32  }
  0x15   : > { %s403_s15 = sadd.s32 %s3023_s13, %s2807_s14  ;;  %s4766_s14 = smov 40  }
  0x16   : > { %s2660_s16 = sshll.u32 %s403_s15, 2  ;;  %s2930_s15 = smov 48  }
  0x17   : > { %s3034_s21 = scalar_lea.vmem %s4757_s0, %s2660_s16  ;;  %s406_s16 = sadd.s32 1, %s2907_s27 }
  0x18   : > { %v2767_v1 = vld [vmem:[%s3034_s21 + $0x20] sm:$0xff]   ;;  %v2764_v3 = vld [vmem:[%s3034_s21 + $0x8] sm:$0xff]   ;;  %v2765_v8 = vld [vmem:[%s3034_s21 + $0x10] sm:$0xff]   ;;  %p409_p7 = scmp.lt.s32.totalorder %s406_s16, 9  ;;  %s4922_s27 = smov (!%p430_p9, %s2907_s27), 7 }
  0x19   : > { %v2693_v2 = vld [vmem:[%s3034_s21] sm:$0xff]   ;;  %v2711_v4 = vunpack.c.h.bf16 %v2767_v1  ;;  %v2710_v5 = vunpack.c.l.bf16 %v2767_v1  ;;  %v2766_v9 = vld [vmem:[%s3034_s21 + $0x18] sm:$0xff]   ;;  %v2698_v11 = vunpack.c.l.bf16 %v2764_v3  ;;  %v2699_v12 = vunpack.c.h.bf16 %v2764_v3  ;;  %v2768_v61 = vld [vmem:[%s3034_s21 + $0x28] sm:$0xff]  }
  0x1a   : > { %v2694_v6 = vunpack.c.l.bf16 %v2693_v2  ;;  %v2695_v7 = vunpack.c.h.bf16 %v2693_v2  ;;  %v2702_v13 = vunpack.c.l.bf16 %v2765_v8  ;;  %v2703_v14 = vunpack.c.h.bf16 %v2765_v8  ;;  %s4918_s16 = smov (!%p409_p7, %s406_s16), 9 }
  0x1b   : > { %v488_v15 = vmul.f32 %v2711_v4, %v3029_v0  ;;  %v2706_v18 = vunpack.c.l.bf16 %v2766_v9  ;;  %v481_v19 = vmul.f32 %v2698_v11, %v3029_v0  ;;  %v482_v20 = vmul.f32 %v2699_v12, %v3029_v0  ;;  %s2809_s17 = smul.u32 13, %s4918_s16 }
  0x1c   : > { %v479_v16 = vmul.f32 %v2694_v6, %v3029_v0  ;;  %v480_v17 = vmul.f32 %v2695_v7, %v3029_v0  ;;  %v483_v21 = vmul.f32 %v2702_v13, %v3029_v0  ;;  %v484_v22 = vmul.f32 %v2703_v14, %v3029_v0 }
  0x1d   : > { %v508_v23 = vadd.f32 %v3044_v10, %v488_v15  ;;  %v485_v26 = vmul.f32 %v2706_v18, %v3029_v0  ;;  %v501_v27 = vadd.f32 %v3044_v10, %v481_v19  ;;  %v502_v28 = vadd.f32 %v3044_v10, %v482_v20  ;;  %s413_s19 = sadd.s32 %s2809_s17, %s3023_s13  ;;  %s2810_s17 = smul.u32 13, %s4920_s20 }
  0x1e   : > { %v499_v24 = vadd.f32 %v3044_v10, %v479_v16  ;;  %v500_v25 = vadd.f32 %v3044_v10, %v480_v17  ;;  %v503_v29 = vadd.f32 %v3044_v10, %v483_v21  ;;  %v504_v30 = vadd.f32 %v3044_v10, %v484_v22 }
  0x1f   : > { %v3061_v31 = vmax.f32 %v508_v23, 0.0  ;;  %v505_v34 = vadd.f32 %v3044_v10, %v485_v26  ;;  %v3068_v35 = vmax.f32 %v501_v27, 0.0  ;;  %v3070_v36 = vmax.f32 %v502_v28, 0.0  ;;  %v458_v27 = vld [vmem:[%s3034_s21 + $0x30] sm:$0x3]  ;;  %s2661_s21 = sshll.u32 %s413_s19, 2  ;;  %s424_s19 = sadd.s32 %s2810_s17, %s3023_s13 }
  0x20   : > { %v3063_v32 = vmax.f32 %v499_v24, 0.0  ;;  %v3065_v33 = vmax.f32 %v500_v25, 0.0  ;;  %v3072_v37 = vmax.f32 %v503_v29, 0.0  ;;  %v3074_v38 = vmax.f32 %v504_v30, 0.0  ;;  %s3431_s16 = scalar_lea.vmem %s4758_s1, %s2661_s21  ;;  %s2662_s20 = sshll.u32 %s424_s19, 2 }
  0x21   : > { %v695_v39 = vrot.slane %v3061_v31, 1  ;;  %v3079_v42 = vmax.f32 %v505_v34, 0.0  ;;  %666 = vst.msk [vmem:[#allocation2 + $0x90] sm:$0x3f] %vm4780_vm1, %v3061_v31  ;;  %v681_v43 = vrot.slane %v3068_v35, 1  ;;  %v683_v44 = vrot.slane %v3070_v36, 1  ;;  %s3476_s23 = scalar_lea.vmem %s4759_s2, %s2662_s20 }
  0x22   : > { %v678_v40 = vrot.slane %v3063_v32, 1  ;;  %v679_v41 = vrot.slane %v3065_v33, 1  ;;  %656 = vst.msk [vmem:[#allocation2] sm:$0xff] %vm4788_vm2, %v3063_v32  ;;  %657 = vst.msk [vmem:[#allocation2 + $0x10] sm:$0xff] %vm4788_vm2, %v3065_v33  ;;  %v2707_v46 = vunpack.c.h.bf16 %v2766_v9  ;;  %v487_v47 = vmul.f32 %v2710_v5, %v3029_v0  ;;  %s4769_s21 = smov 64   ;;  %s2933_s17 = smov 72  }
  0x23   : > { %658 = vst.msk [vmem:[#allocation2 + $0x20] sm:$0xff] %vm4788_vm2, %v3068_v35  ;;  %659 = vst.msk [vmem:[#allocation2 + $0x30] sm:$0xff] %vm4788_vm2, %v3070_v36  ;;  %715 = vrot.lane.b32.xlu1 %v695_v39, %s4786_s24  ;;  %v684_v48 = vsel %vm4802_vm0, %v681_v43, %v683_v44  ;;  %v685_v49 = vrot.slane %v3072_v37, 1  ;;  %v687_v51 = vrot.slane %v3074_v38, 1  ;;  %v689_v57 = vrot.slane %v3079_v42, 1  ;;  %s2935_s13 = smov 80  }
  0x24   : > { %660 = vst.msk [vmem:[#allocation2 + $0x40] sm:$0xff] %vm4788_vm2, %v3072_v37  ;;  %661 = vst.msk [vmem:[#allocation2 + $0x50] sm:$0xff] %vm4788_vm2, %v3074_v38  ;;  %v680_v45 = vsel %vm4802_vm0, %v678_v40, %v679_v41  ;;  %v682_v50 = vsel %vm4802_vm0, %v679_v41, %v681_v43  ;;  %v486_v52 = vmul.f32 %v2707_v46, %v3029_v0  ;;  %v741_v2 = vrot.slane %v3065_v33, 2  ;;  %s4783_s19 = smov 96   ;;  %s4805_s20 = smov 64  }
  0x25   : > { %662 = vst.msk [vmem:[#allocation2 + $0x60] sm:$0xff] %vm4788_vm2, %v3079_v42  ;;  %697 = vrot.lane.b32.xlu0 %v680_v45, %s4786_s24  ;;  %v507_v53 = vadd.f32 %v3044_v10, %v487_v47  ;;  %v686_v56 = vsel %vm4802_vm0, %v683_v44, %v685_v49  ;;  %v688_v58 = vsel %vm4802_vm0, %v685_v49, %v687_v51  ;;  %v743_v3 = vrot.slane %v3068_v35, 2 }
  0x26   : > { %v506_v54 = vadd.f32 %v3044_v10, %v486_v52  ;;  %v690_v62 = vsel %vm4802_vm0, %v687_v51, %v689_v57  ;;  %v2714_v4 = vunpack.c.l.bf16 %v2768_v61  ;;  %v740_v5 = vrot.slane %v3063_v32, 2 }
  0x27   : > { %701 = vrot.lane.b32.xlu1 %v684_v48, %s4786_s24  ;;  %v3111_v55 = vmax.f32 %v507_v53, 0.0  ;;  %v745_v8 = vrot.slane %v3070_v36, 2  ;;  %v747_v9 = vrot.slane %v3072_v37, 2  ;;  %v863_v11 = vrot.slane %v3061_v31, 3 }
  0x28   : > { %v3117_v59 = vmax.f32 %v506_v54, 0.0  ;;  %v749_v13 = vrot.slane %v3074_v38, 2  ;;  %v913_v14 = vrot.slane %v3068_v35, 4  ;;  %v3144_v15 = vsel %vm739_vm3, %v741_v2, %v743_v3 }
  0x29   : > { %699 = vrot.lane.b32.xlu0 %v682_v50, %s4786_s24  ;;  %664 = vst.msk [vmem:[#allocation2 + $0x80] sm:$0xff] %vm4788_vm2, %v3111_v55  ;;  %v693_v63 = vrot.slane %v3111_v55, 1  ;;  %v861_v6 = vrot.slane %v3111_v55, 3  ;;  %v751_v16 = vrot.slane %v3079_v42, 2  ;;  %v489_v17 = vmul.f32 %v2714_v4, %v3029_v0 }
  0x2a   : > { %v691_v60 = vrot.slane %v3117_v59, 1  ;;  %663 = vst.msk [vmem:[#allocation2 + $0x70] sm:$0xff] %vm4788_vm2, %v3117_v59  ;;  %v915_v19 = vrot.slane %v3070_v36, 4  ;;  %v912_v20 = vrot.slane %v3065_v33, 4  ;;  %v917_v21 = vrot.slane %v3072_v37, 4 }
  0x2b   : > { %703 = vrot.lane.b32.xlu1 %v686_v56, %s4786_s24  ;;  %v696_v12 = vsel %vm4802_vm0, %v693_v63, %v695_v39  ;;  %v3153_v18 = vsel %vm847_vm4, %v861_v6, %v863_v11  ;;  %v919_v22 = vrot.slane %v3074_v38, 4  ;;  %v742_v23 = vsel %vm739_vm3, %v740_v5, %v741_v2 }
  0x2c   : > { %v692_v1 = vsel %vm4802_vm0, %v689_v57, %v691_v60  ;;  %v694_v7 = vsel %vm4802_vm0, %v691_v60, %v693_v63  ;;  %v3163_v24 = vsel %vm739_vm3, %v745_v8, %v747_v9  ;;  %v2715_v25 = vunpack.c.h.bf16 %v2768_v61 }
  0x2d   : > { %705 = vrot.lane.b32.xlu0 %v688_v58, %s4786_s24  ;;  %v921_v26 = vrot.slane %v3079_v42, 4  ;;  %v3168_v28 = vsel %vm911_vm5, %v913_v14, %v915_v19  ;;  %v3171_v29 = vsel %vm911_vm5, %v912_v20, %v913_v14  ;;  %v3174_v30 = vsel %vm911_vm5, %v917_v21, %v919_v22 }
  0x2e   : > { %v3177_v32 = vsel %vm911_vm5, %v915_v19, %v917_v21  ;;  %v509_v34 = vadd.f32 %v3044_v10, %v489_v17  ;;  %v923_v39 = vrot.slane %v3117_v59, 4  ;;  %v925_v41 = vrot.slane %v3111_v55, 4 }
  0x2f   : > { %707 = vrot.lane.b32.xlu1 %v690_v62, %s4786_s24  ;;  %v3182_v40 = vsel %vm911_vm5, %v919_v22, %v921_v26  ;;  %v3188_v43 = vsel %vm739_vm3, %v743_v3, %v745_v8  ;;  %v3193_v44 = vsel %vm739_vm3, %v749_v13, %v751_v16  ;;  %v927_v45 = vrot.slane %v3061_v31, 4 }
  0x30   : > { %v471_v46 = vunpack.c.l.bf16 %v458_v27  ;;  %v3198_v47 = vsel %vm739_vm3, %v747_v9, %v749_v13  ;;  %v755_v48 = vrot.slane %v3111_v55, 2  ;;  %v3202_v49 = vsel %vm911_vm5, %v921_v26, %v923_v39 }
  0x31   : > { %709 = vrot.lane.b32.xlu0 %v692_v1, %s4786_s24  ;;  %v3205_v50 = vsel %vm911_vm5, %v923_v39, %v925_v41  ;;  %v490_v51 = vmul.f32 %v2715_v25, %v3029_v0  ;;  %v3211_v52 = vsel %vm911_vm5, %v925_v41, %v927_v45  ;;  %v1022_v53 = vrot.slane %v3070_v36, 5 }
  0x32   : > { %v753_v54 = vrot.slane %v3117_v59, 2  ;;  %v3215_v56 = vmax.f32 %v509_v34, 0.0  ;;  %v1024_v57 = vrot.slane %v3072_v37, 5  ;;  %v1021_v58 = vrot.slane %v3068_v35, 5 }
  0x33   : > { %711 = vrot.lane.b32.xlu1 %v694_v7, %s4786_s24  ;;  %v491_v60 = vmul.f32 %v3029_v0, %v471_v46  ;;  %v1026_v61 = vrot.slane %v3074_v38, 5  ;;  %v1028_v62 = vrot.slane %v3079_v42, 5  ;;  %v1030_v63 = vrot.slane %v3117_v59, 5 }
  0x34   : > { %v3228_v1 = vsel %vm4791_vm6, %v1022_v53, %v1024_v57  ;;  %v3231_v2 = vsel %vm4791_vm6, %v1021_v58, %v1022_v53  ;;  %v1032_v3 = vrot.slane %v3111_v55, 5  ;;  %v1034_v4 = vrot.slane %v3061_v31, 5 }
  0x35   : > { %713 = vrot.lane.b32.xlu0 %v696_v12, %s4786_s24  ;;  %v510_v5 = vadd.f32 %v3044_v10, %v490_v51  ;;  %v3237_v7 = vsel %vm4791_vm6, %v1026_v61, %v1028_v62  ;;  %v3240_v8 = vsel %vm4791_vm6, %v1024_v57, %v1026_v61  ;;  %v3243_v9 = vsel %vm4791_vm6, %v1028_v62, %v1030_v63 }
  0x36   : > { %v3246_v12 = vsel %vm4791_vm6, %v1030_v63, %v1032_v3  ;;  %v1036_v13 = vrot.slane %v3215_v56, 5  ;;  %v3250_v14 = vsel %vm4791_vm6, %v1032_v3, %v1034_v4  ;;  %v756_v17 = vsel %vm739_vm3, %v753_v54, %v755_v48 }
  0x37   : > { %761 = vrot.lane.b32.xlu1 %v3144_v15, %s2926_s25  ;;  %v757_v19 = vrot.slane %v3061_v31, 2  ;;  %v511_v20 = vadd.f32 %v3044_v10, %v491_v60  ;;  %v1086_v22 = vrot.slane %v3070_v36, 6  ;;  %v1085_v25 = vrot.slane %v3068_v35, 6 }
  0x38   : > { %v3262_v21 = vsel %vm4791_vm6, %v1034_v4, %v1036_v13  ;;  %v754_v26 = vsel %vm739_vm3, %v751_v16, %v753_v54  ;;  %v3270_v27 = vmax.f32 %v510_v5, 0.0  ;;  %v1090_v34 = vrot.slane %v3074_v38, 6 }
  0x39   : > { %759 = vrot.lane.b32.xlu0 %v742_v23, %s2926_s25  ;;  %v1088_v23 = vrot.slane %v3072_v37, 6  ;;  %v3277_v41 = vsel %vm1084_vm7, %v1085_v25, %v1086_v22  ;;  %v1092_v46 = vrot.slane %v3079_v42, 6  ;;  %v1094_v51 = vrot.slane %v3117_v59, 6 }
  0x3a   : > { %v3282_v53 = vmax.f32 %v511_v20, 0.0  ;;  %v1096_v54 = vrot.slane %v3111_v55, 6  ;;  %v1098_v57 = vrot.slane %v3061_v31, 6  ;;  %v758_v58 = vsel %vm739_vm3, %v755_v48, %v757_v19 }
  0x3b   : > { %765 = vrot.lane.b32.xlu1 %v3163_v24, %s2926_s25  ;;  %v3274_v39 = vsel %vm1084_vm7, %v1086_v22, %v1088_v23  ;;  %v3285_v16 = vsel %vm1084_vm7, %v1088_v23, %v1090_v34  ;;  %v3292_v60 = vsel %vm1084_vm7, %v1090_v34, %v1092_v46  ;;  %v3295_v61 = vsel %vm1084_vm7, %v1092_v46, %v1094_v51 }
  0x3c   : > { %v1100_v62 = vrot.slane %v3215_v56, 6  ;;  %v3299_v63 = vsel %vm1084_vm7, %v1094_v51, %v1096_v54  ;;  %v3302_v3 = vsel %vm1084_vm7, %v1096_v54, %v1098_v57  ;;  %v1102_v4 = vrot.slane %v3270_v27, 6  ;;  %v2769_v54 = vld [vmem:[%s3431_s16 + $0x8] sm:$0xff]  }
  0x3d   : > { %763 = vrot.lane.b32.xlu0 %v3188_v43, %s2926_s25  ;;  %v1104_v5 = vrot.slane %v3282_v53, 6  ;;  %v802_v23 = vrot.slane %v3215_v56, 2  ;;  %v848_v25 = vrot.slane %v3065_v33, 3  ;;  %v857_v33 = vrot.slane %v3079_v42, 3 }
  0x3e   : > { %v3307_v48 = vsel %vm1084_vm7, %v1098_v57, %v1100_v62  ;;  %v3314_v22 = vsel %vm1084_vm7, %v1100_v62, %v1102_v4  ;;  %v865_v34 = vrot.slane %v3215_v56, 3  ;;  %v867_v42 = vrot.slane %v3270_v27, 3  ;;  %v3443_v57 = vld [vmem:[%s3431_s16 + $0x10] sm:$0xff]  }
  0x3f   : > { %769 = vrot.lane.b32.xlu1 %v3193_v44, %s2926_s25  ;;  %v3311_v20 = vsel %vm1084_vm7, %v1102_v4, %v1104_v5  ;;  %v929_v55 = vrot.slane %v3215_v56, 4  ;;  %v976_v31 = vrot.slane %v3282_v53, 4  ;;  %v2722_v62 = vunpack.c.l.bf16 %v2769_v54 }
  0x40   : > { %v868_v46 = vsel %vm847_vm4, %v865_v34, %v867_v42  ;;  %v866_v51 = vsel %vm847_vm4, %v863_v11, %v865_v34  ;;  %vm1136_vm1 = vcmask 589312  }
  0x41   : > { %767 = vrot.lane.b32.xlu0 %v3198_v47, %s2926_s25  ;;  %v553_v4 = vmul.f32 %v2722_v62, %v3029_v0 }
  0x43   : > { %773 = vrot.lane.b32.xlu1 %v756_v17, %s2926_s25 }
  0x45   : > { %771 = vrot.lane.b32.xlu0 %v754_v26, %s2926_s25 }
  0x47   : > { %777 = vrot.lane.b32.xlu1 %v757_v19, %s2926_s25 }
  0x49   : > { %775 = vrot.lane.b32.xlu0 %v758_v58, %s2926_s25 }
  0x4b   : > { %806 = vrot.lane.b32.xlu1 %v3188_v43, %s4796_s26  ;;  %v849_v43 = vrot.slane %v3068_v35, 3 }
  0x4d   : > { %804 = vrot.lane.b32.xlu0 %v3144_v15, %s4796_s26  ;;  %v851_v15 = vrot.slane %v3070_v36, 3  ;;  %v859_v36 = vrot.slane %v3117_v59, 3 }
  0x4f   : > { %810 = vrot.lane.b32.xlu1 %v3198_v47, %s4796_s26  ;;  %v803_v47 = vsel %vm739_vm3, %v757_v19, %v802_v23  ;;  %v862_v59 = vsel %vm847_vm4, %v859_v36, %v861_v6  ;;  %v931_v6 = vrot.slane %v3270_v27, 4 }
  0x51   : > { %808 = vrot.lane.b32.xlu0 %v3163_v24, %s4796_s26  ;;  %v852_v24 = vsel %vm847_vm4, %v849_v43, %v851_v15  ;;  %v932_v11 = vsel %vm911_vm5, %v929_v55, %v931_v6 }
  0x53   : > { %814 = vrot.lane.b32.xlu1 %v754_v26, %s4796_s26  ;;  %v855_v26 = vrot.slane %v3074_v38, 3 }
  0x55   : > { %812 = vrot.lane.b32.xlu0 %v3193_v44, %s4796_s26  ;;  %v853_v44 = vrot.slane %v3072_v37, 3  ;;  %v860_v37 = vsel %vm847_vm4, %v857_v33, %v859_v36  ;;  %v858_v38 = vsel %vm847_vm4, %v855_v26, %v857_v33  ;;  %v2774_v36 = vld [vmem:[%s3476_s23 + $0x8] sm:$0xff]  }
  0x57   : > { %818 = vrot.lane.b32.xlu1 %v758_v58, %s4796_s26  ;;  %v856_v35 = vsel %vm847_vm4, %v853_v44, %v855_v26  ;;  %v854_v19 = vsel %vm847_vm4, %v851_v15, %v853_v44  ;;  %v2726_v58 = vunpack.c.l.bf16 %v3443_v57 }
  0x59   : > { %816 = vrot.lane.b32.xlu0 %v756_v17, %s4796_s26  ;;  %v850_v17 = vsel %vm847_vm4, %v848_v25, %v849_v43  ;;  %v566_v25 = vadd.f32 %v3044_v10, %v553_v4 }
  0x5b   : > { %822 = vrot.lane.b32.xlu1 %v802_v23, %s4796_s26  ;;  %v2717_v23 = vld [vmem:[%s3431_s16] sm:$0xff]   ;;  %v3489_v33 = vmax.f32 %v566_v25, 0.0 }
  0x5c   : > { %v2718_v44 = vunpack.c.l.bf16 %v2717_v23 }
  0x5d   : > { %820 = vrot.lane.b32.xlu0 %v803_v47, %s4796_s26  ;;  %v1539_v42 = vrot.slane %v3489_v33, 5 }
  0x5f   : > { %871 = vrot.lane.b32.xlu1 %v852_v24, %s4794_s12  ;;  %v2719_v24 = vunpack.c.h.bf16 %v2717_v23 }
  0x61   : > { %869 = vrot.lane.b32.xlu0 %v850_v17, %s4794_s12 }
  0x63   : > { %875 = vrot.lane.b32.xlu1 %v856_v35, %s4794_s12 }
  0x65   : > { %873 = vrot.lane.b32.xlu0 %v854_v19, %s4794_s12 }
  0x67   : > { %879 = vrot.lane.b32.xlu1 %v860_v37, %s4794_s12  ;;  %v552_v37 = vmul.f32 %v2719_v24, %v3029_v0  ;;  %v2867_v24 = vld [vmem:[%s4760_s3] sm:$0xff]  }
  0x69   : > { %877 = vrot.lane.b32.xlu0 %v858_v38, %s4794_s12 }
  0x6b   : > { %883 = vrot.lane.b32.xlu1 %v3153_v18, %s4794_s12  ;;  %v930_v18 = vsel %vm911_vm5, %v927_v45, %v929_v55 }
  0x6d   : > { %881 = vrot.lane.b32.xlu0 %v862_v59, %s4794_s12  ;;  %v2746_v59 = vunpack.c.l.bf16 %v2774_v36 }
  0x6f   : > { %887 = vrot.lane.b32.xlu1 %v868_v46, %s4794_s12 }
  0x71   : > { %885 = vrot.lane.b32.xlu0 %v866_v51, %s4794_s12 }
  0x73   : > { %935 = vrot.lane.b32.xlu1 %v3168_v28, %s4766_s14 }
  0x75   : > { %933 = vrot.lane.b32.xlu0 %v3171_v29, %s4766_s14 }
  0x77   : > { %939 = vrot.lane.b32.xlu1 %v3174_v30, %s4766_s14 }
  0x79   : > { %937 = vrot.lane.b32.xlu0 %v3177_v32, %s4766_s14 }
  0x7b   : > { %943 = vrot.lane.b32.xlu1 %v3202_v49, %s4766_s14 }
  0x7d   : > { %941 = vrot.lane.b32.xlu0 %v3182_v40, %s4766_s14 }
  0x7f   : > { %947 = vrot.lane.b32.xlu1 %v3211_v52, %s4766_s14 }
  0x81   : > { %945 = vrot.lane.b32.xlu0 %v3205_v50, %s4766_s14 }
  0x83   : > { %951 = vrot.lane.b32.xlu1 %v932_v11, %s4766_s14 }
  0x85   : > { %949 = vrot.lane.b32.xlu0 %v930_v18, %s4766_s14 }
  0x87   : > { %980 = vrot.lane.b32.xlu1 %v3177_v32, %s2930_s15 }
  0x89   : > { %978 = vrot.lane.b32.xlu0 %v3168_v28, %s2930_s15  ;;  %v977_v28 = vsel %vm911_vm5, %v931_v6, %v976_v31  ;;  %v618_v31 = vmul.f32 %v2746_v59, %v3029_v0  ;;  %v3601_v59 = vld [vmem:[%s3476_s23 + $0x10] sm:$0xff]  }
  0x8b   : > { %984 = vrot.lane.b32.xlu1 %v3182_v40, %s2930_s15 }
  0x8d   : > { %982 = vrot.lane.b32.xlu0 %v3174_v30, %s2930_s15 }
  0x8f   : > { %988 = vrot.lane.b32.xlu1 %v3205_v50, %s2930_s15 }
  0x91   : > { %986 = vrot.lane.b32.xlu0 %v3202_v49, %s2930_s15 }
  0x93   : > { %992 = vrot.lane.b32.xlu1 %v930_v18, %s2930_s15 }
  0x95   : > { %990 = vrot.lane.b32.xlu0 %v3211_v52, %s2930_s15  ;;  %v716_v29 = vpop.permute.xlu1 %715 }
  0x96   : > { %738 = vst.msk [vmem:[#allocation2 + $0x90] sm:$0x3f] %vm4778_vm8, %v716_v29  ;;  %vm4782_vm8 = vcmask 523712  }
  0x97   : > { %v698_v30 = vpop.permute.xlu0 %697  ;;  %996 = vrot.lane.b32.xlu1 %v977_v28, %s2930_s15 }
  0x98   : > { %728 = vst.msk [vmem:[#allocation2] sm:$0xff] %vm727_vm9, %v698_v30 }
  0x99   : > { %994 = vrot.lane.b32.xlu0 %v932_v11, %s2930_s15  ;;  %v702_v32 = vpop.permute.xlu1 %701 }
  0x9a   : > { %730 = vst.msk [vmem:[#allocation2 + $0x20] sm:$0xff] %vm727_vm9, %v702_v32 }
  0x9b   : > { %v700_v40 = vpop.permute.xlu0 %699  ;;  %1044 = vrot.lane.b32.xlu1 %v3228_v1, %s2931_s18  ;;  %v1038_v1 = vrot.slane %v3270_v27, 5 }
  0x9c   : > { %729 = vst.msk [vmem:[#allocation2 + $0x10] sm:$0xff] %vm727_vm9, %v700_v40 }
  0x9d   : > { %1042 = vrot.lane.b32.xlu0 %v3231_v2, %s2931_s18  ;;  %v704_v45 = vpop.permute.xlu1 %703  ;;  %v1040_v2 = vrot.slane %v3282_v53, 5  ;;  %v1039_v27 = vsel %vm4791_vm6, %v1036_v13, %v1038_v1  ;;  %v2723_v53 = vunpack.c.h.bf16 %v2769_v54  ;;  %v555_v13 = vmul.f32 %v2726_v58, %v3029_v0 }
  0x9e   : > { %731 = vst.msk [vmem:[#allocation2 + $0x30] sm:$0xff] %vm727_vm9, %v704_v45 }
  0x9f   : > { %v706_v49 = vpop.permute.xlu0 %705  ;;  %1048 = vrot.lane.b32.xlu1 %v3237_v7, %s2931_s18  ;;  %v554_v56 = vmul.f32 %v2723_v53, %v3029_v0  ;;  %v568_v47 = vadd.f32 %v3044_v10, %v555_v13 }
  0xa0   : > { %732 = vst.msk [vmem:[#allocation2 + $0x40] sm:$0xff] %vm727_vm9, %v706_v49  ;;  %v631_v49 = vadd.f32 %v3044_v10, %v618_v31 }
  0xa1   : > { %1046 = vrot.lane.b32.xlu0 %v3240_v8, %s2931_s18  ;;  %v708_v50 = vpop.permute.xlu1 %707  ;;  %v567_v15 = vadd.f32 %v3044_v10, %v554_v56  ;;  %v3487_v35 = vmax.f32 %v568_v47, 0.0 }
  0xa2   : > { %733 = vst.msk [vmem:[#allocation2 + $0x50] sm:$0xff] %vm727_vm9, %v708_v50  ;;  %v2747_v50 = vunpack.c.h.bf16 %v2774_v36 }
  0xa3   : > { %v710_v52 = vpop.permute.xlu0 %709  ;;  %1052 = vrot.lane.b32.xlu1 %v3246_v12, %s2931_s18  ;;  %v3485_v17 = vmax.f32 %v567_v15, 0.0  ;;  %v1542_v34 = vrot.slane %v3487_v35, 5  ;;  %v1583_v45 = vrot.slane %v3487_v35, 6 }
  0xa4   : > { %734 = vst.msk [vmem:[#allocation2 + $0x60] sm:$0xff] %vm727_vm9, %v710_v52  ;;  %v619_v54 = vmul.f32 %v2747_v50, %v3029_v0  ;;  %v3639_v50 = vld [vmem:[%s4762_s5] ss:$0 sm:$0xff] }
  0xa5   : > { %1050 = vrot.lane.b32.xlu0 %v3243_v9, %s2931_s18  ;;  %v712_v7 = vpop.permute.xlu1 %711  ;;  %v1041_v9 = vsel %vm4791_vm6, %v1038_v1, %v1040_v2  ;;  %v1540_v38 = vrot.slane %v3485_v17, 5  ;;  %v1580_v1 = vrot.slane %v3489_v33, 6 }
  0xa6   : > { %735 = vst.msk [vmem:[#allocation2 + $0x70] sm:$0xff] %vm727_vm9, %v712_v7 }
  0xa7   : > { %v714_v8 = vpop.permute.xlu0 %713  ;;  %1056 = vrot.lane.b32.xlu1 %v3262_v21, %s2931_s18  ;;  %v1543_v55 = vsel %vm4791_vm6, %v1540_v38, %v1542_v34  ;;  %v1541_v6 = vsel %vm4791_vm6, %v1539_v42, %v1540_v38 }
  0xa8   : > { %736 = vst.msk [vmem:[#allocation2 + $0x80] sm:$0xff] %vm727_vm9, %v714_v8  ;;  %v3547_v8 = vmax.f32 %v631_v49, 0.0  ;;  %v1264_v49 = vrot.slane %v3489_v33, 2 }
  0xa9   : > { %1054 = vrot.lane.b32.xlu0 %v3250_v14, %s2931_s18  ;;  %v762_v12 = vpop.permute.xlu1 %761  ;;  %1571 = vst.msk [vmem:[#allocation2 + $0x18] sm:$0xff] %vm4788_vm2, %v1543_v55  ;;  %1570 = vst.msk [vmem:[#allocation2 + $0x8] sm:$0xff] %vm4788_vm2, %v1541_v6 }
  0xaa   : > { %791 = vst.msk [vmem:[#allocation2 + $0x10] sm:$0xff] %vm789_vm10, %v762_v12  ;;  %v1694_v62 = vrot.slane %v3547_v8, 1  ;;  %v1854_v6 = vrot.slane %v3547_v8, 3 }
  0xab   : > { %v760_v21 = vpop.permute.xlu0 %759  ;;  %1060 = vrot.lane.b32.xlu1 %v1041_v9, %s2931_s18 }
  0xac   : > { %790 = vst.msk [vmem:[#allocation2] sm:$0xff] %vm789_vm10, %v760_v21  ;;  %v632_v21 = vadd.f32 %v3044_v10, %v619_v54 }
  0xad   : > { %1058 = vrot.lane.b32.xlu0 %v1039_v27, %s2931_s18  ;;  %v766_v14 = vpop.permute.xlu1 %765 }
  0xae   : > { %793 = vst.msk [vmem:[#allocation2 + $0x30] sm:$0xff] %vm789_vm10, %v766_v14 }
  0xaf   : > { %v764_v5 = vpop.permute.xlu0 %763  ;;  %1108 = vrot.lane.b32.xlu1 %v3274_v39, %s4769_s21 }
  0xb0   : > { %792 = vst.msk [vmem:[#allocation2 + $0x20] sm:$0xff] %vm789_vm10, %v764_v5  ;;  %v3568_v5 = vmax.f32 %v632_v21, 0.0 }
  0xb1   : > { %1106 = vrot.lane.b32.xlu0 %v3277_v41, %s4769_s21  ;;  %v770_v43 = vpop.permute.xlu1 %769  ;;  %v2741_v41 = vld [vmem:[%s3476_s23] sm:$0xff]  }
  0xb2   : > { %795 = vst.msk [vmem:[#allocation2 + $0x50] sm:$0xff] %vm789_vm10, %v770_v43  ;;  %v2742_v51 = vunpack.c.l.bf16 %v2741_v41 }
  0xb3   : > { %v768_v39 = vpop.permute.xlu0 %767  ;;  %1112 = vrot.lane.b32.xlu1 %v3292_v60, %s4769_s21  ;;  %v551_v60 = vmul.f32 %v2718_v44, %v3029_v0 }
  0xb4   : > { %794 = vst.msk [vmem:[#allocation2 + $0x40] sm:$0xff] %vm789_vm10, %v768_v39  ;;  %v616_v29 = vmul.f32 %v2742_v51, %v3029_v0  ;;  %v1755_v39 = vrot.slane %v3568_v5, 2  ;;  %v3605_v51 = vld [vmem:[%s3431_s16 + $0x18] sm:$0xff]  }
  0xb5   : > { %1110 = vrot.lane.b32.xlu0 %v3285_v16, %s4769_s21  ;;  %v774_v26 = vpop.permute.xlu1 %773  ;;  %v2743_v16 = vunpack.c.h.bf16 %v2741_v41  ;;  %v564_v11 = vadd.f32 %v3044_v10, %v551_v60  ;;  %v1203_v60 = vrot.slane %v3489_v33, 1 }
  0xb6   : > { %797 = vst.msk [vmem:[#allocation2 + $0x70] sm:$0xff] %vm789_vm10, %v774_v26  ;;  %v2934_v26 = vmov 0  }
  0xb7   : > { %v772_v19 = vpop.permute.xlu0 %771  ;;  %1116 = vrot.lane.b32.xlu1 %v3299_v63, %s4769_s21  ;;  %v617_v18 = vmul.f32 %v2743_v16, %v3029_v0  ;;  %v3526_v32 = vmax.f32 %v564_v11, 0.0  ;;  %2304 = vmatprep.subr.bf16.mxu0 %v2934_v26  ;;  %v2868_v16 = vld [vmem:[%s4760_s3 + $0x8] sm:$0xff]   ;;  %v2869_v11 = vld [vmem:[%s4760_s3 + $0x10] sm:$0xff]  }
  0xb8   : > { %796 = vst.msk [vmem:[#allocation2 + $0x60] sm:$0xff] %vm789_vm10, %v772_v19  ;;  %2779 = vmatprep.subr.bf16.mxu1 %v2934_v26  ;;  %2305 = vmatpush1.bf16.msra.mxu0 %v2867_v24 }
  0xb9   : > { %1114 = vrot.lane.b32.xlu0 %v3295_v61, %s4769_s21  ;;  %v778_v46 = vpop.permute.xlu1 %777  ;;  %v565_v61 = vadd.f32 %v3044_v10, %v552_v37  ;;  %v630_v40 = vadd.f32 %v3044_v10, %v617_v18  ;;  %2793 = vmatpush1.bf16.msra.mxu1 %v2867_v24  ;;  %v1200_v42 = vrot.slane %v3526_v32, 1 }
  0xba   : > { %800 = vst.msk [vmem:[#allocation2 + $0x90] sm:$0x3f] %vm4772_vm11, %v778_v46  ;;  %2306 = vmatprep.subr.bf16.mxu0 %v2934_v26  ;;  %2780 = vmatprep.subr.bf16.mxu1 %v2934_v26  ;;  %vm4789_vm11 = vcmask 458112  }
  0xbb   : > { %v776_v63 = vpop.permute.xlu0 %775  ;;  %1120 = vrot.lane.b32.xlu1 %v3307_v48, %s4769_s21  ;;  %v3524_v48 = vmax.f32 %v565_v61, 0.0  ;;  %v3545_v7 = vmax.f32 %v630_v40, 0.0  ;;  %v2750_v61 = vunpack.c.l.bf16 %v3601_v59 }
  0xbc   : > { %798 = vst.msk [vmem:[#allocation2 + $0x80] sm:$0xff] %vm789_vm10, %v776_v63  ;;  %2307 = vmatpush1.bf16.msra.mxu0 %v2868_v16  ;;  %v1856_v63 = vrot.slane %v3568_v5, 3 }
  0xbd   : > { %1118 = vrot.lane.b32.xlu0 %v3302_v3, %s4769_s21  ;;  %v807_v28 = vpop.permute.xlu1 %806  ;;  %v1581_v3 = vrot.slane %v3485_v17, 6  ;;  %v1692_v58 = vrot.slane %v3545_v7, 1  ;;  %v1751_v4 = vrot.slane %v3545_v7, 2  ;;  %v1201_v37 = vrot.slane %v3524_v48, 1  ;;  %2794 = vmatpush1.bf16.msra.mxu1 %v2868_v16 }
  0xbe   : > { %836 = vst.msk [vmem:[#allocation2 + $0x10] sm:$0xff] %vm834_vm12, %v807_v28  ;;  %2308 = vmatprep.subr.bf16.mxu0 %v2934_v26  ;;  %2781 = vmatprep.subr.bf16.mxu1 %v2934_v26  ;;  %v1853_v28 = vrot.slane %v3545_v7, 3 }
  0xbf   : > { %v805_v30 = vpop.permute.xlu0 %804  ;;  %1124 = vrot.lane.b32.xlu1 %v3311_v20, %s4769_s21  ;;  %v629_v20 = vadd.f32 %v3044_v10, %v616_v29  ;;  %v1582_v12 = vsel %vm1084_vm7, %v1580_v1, %v1581_v3  ;;  %v1695_v13 = vsel %vm4802_vm0, %v1692_v58, %v1694_v62  ;;  %v1753_v10 = vrot.slane %v3547_v8, 2  ;;  %v2870_v1 = vld [vmem:[%s4760_s3 + $0x18] sm:$0xff]  }
  0xc0   : > { %835 = vst.msk [vmem:[#allocation2] sm:$0xff] %vm834_vm12, %v805_v30  ;;  %v1204_v55 = vsel %vm4802_vm0, %v1201_v37, %v1203_v60  ;;  %v1202_v31 = vsel %vm4802_vm0, %v1200_v42, %v1201_v37  ;;  %v2727_v29 = vunpack.c.h.bf16 %v3443_v57  ;;  %v2730_v30 = vunpack.c.l.bf16 %v3605_v51  ;;  %2309 = vmatpush1.bf16.msra.mxu0 %v2869_v11 }
  0xc1   : > { %1122 = vrot.lane.b32.xlu0 %v3314_v22, %s4769_s21  ;;  %v811_v52 = vpop.permute.xlu1 %810  ;;  %v1584_v22 = vsel %vm1084_vm7, %v1581_v3, %v1583_v45  ;;  %v642_v27 = vmax.f32 %v629_v20, 0.0  ;;  %v1754_v25 = vsel %vm739_vm3, %v1751_v4, %v1753_v10  ;;  %v3591_v19 = vsel %vm739_vm3, %v1753_v10, %v1755_v39  ;;  %2795 = vmatpush1.bf16.msra.mxu1 %v2869_v11 }
  0xc2   : > { %838 = vst.msk [vmem:[#allocation2 + $0x30] sm:$0xff] %vm834_vm12, %v811_v52  ;;  %2310 = vmatprep.subr.bf16.mxu0 %v2934_v26  ;;  %v1857_v57 = vsel %vm847_vm4, %v1854_v6, %v1856_v63  ;;  %v1262_v3 = vrot.slane %v3524_v48, 2  ;;  %v620_v52 = vmul.f32 %v3639_v50, %v2750_v61  ;;  %2782 = vmatprep.subr.bf16.mxu1 %v2934_v26 }
  0xc3   : > { %v809_v2 = vpop.permute.xlu0 %808  ;;  %1160 = vrot.lane.b32.xlu1 %v3524_v48, %s2933_s17  ;;  %v1691_v14 = vrot.slane %v642_v27, 1  ;;  %v1750_v15 = vrot.slane %v642_v27, 2  ;;  %v556_v54 = vmul.f32 %v3639_v50, %v2727_v29 }
  0xc4   : > { %837 = vst.msk [vmem:[#allocation2 + $0x20] sm:$0xff] %vm834_vm12, %v809_v2  ;;  %v1855_v2 = vsel %vm847_vm4, %v1853_v28, %v1854_v6  ;;  %2311 = vmatpush1.bf16.msra.mxu0 %v2870_v1  ;;  %v2874_v28 = vld [vmem:[%s4760_s3 + $0x38] sm:$0xff]  }
  0xc5   : > { %1158 = vrot.lane.b32.xlu0 %v3526_v32, %s2933_s17  ;;  %v815_v9 = vpop.permute.xlu1 %814  ;;  %v1693_v43 = vsel %vm4802_vm0, %v1691_v14, %v1692_v58  ;;  %v1752_v41 = vsel %vm739_vm3, %v1750_v15, %v1751_v4  ;;  %2796 = vmatpush1.bf16.msra.mxu1 %v2870_v1  ;;  %v3661_v58 = vld [vmem:[%s4763_s6] ss:$0 sm:$0xff] }
  0xc6   : > { %840 = vst.msk [vmem:[#allocation2 + $0x50] sm:$0xff] %vm834_vm12, %v815_v9  ;;  %v557_v9 = vmul.f32 %v3639_v50, %v2730_v30  ;;  %2312 = vmatprep.subr.bf16.mxu0 %v2934_v26  ;;  %v633_v21 = vadd.f32 %v3661_v58, %v620_v52  ;;  %2783 = vmatprep.subr.bf16.mxu1 %v2934_v26  ;;  %v1368_v30 = vrot.slane %v3524_v48, 3  ;;  %v2875_v52 = vld [vmem:[%s4760_s3 + $0x40] sm:$0xff]  }
  0xc7   : > { %v813_v53 = vpop.permute.xlu0 %812  ;;  %1603 = vrot.lane.b32.xlu1 %v1584_v22, %s4786_s24  ;;  %v1261_v22 = vrot.slane %v3526_v32, 2  ;;  %v1265_v32 = vsel %vm739_vm3, %v1262_v3, %v1264_v49  ;;  %v569_v4 = vadd.f32 %v3661_v58, %v556_v54  ;;  %v2019_v54 = vrot.slane %v3568_v5, 5 }
  0xc8   : > { %839 = vst.msk [vmem:[#allocation2 + $0x40] sm:$0xff] %vm834_vm12, %v813_v53  ;;  %v1917_v53 = vrot.slane %v3568_v5, 4  ;;  %v570_v10 = vadd.f32 %v3661_v58, %v557_v9  ;;  %v3679_v15 = vmax.f32 %v633_v21, 0.0 }
  0xc9   : > { %1601 = vrot.lane.b32.xlu0 %v1582_v12, %s4786_s24  ;;  %v819_v0 = vpop.permute.xlu1 %818 }
  0xca   : > { %842 = vst.msk [vmem:[#allocation2 + $0x70] sm:$0xff] %vm834_vm12, %v819_v0  ;;  %v2871_v0 = vld [vmem:[%s4760_s3 + $0x20] sm:$0xff]   ;;  %v1919_v42 = vrot.slane %v3679_v15, 4  ;;  %v2021_v9 = vrot.slane %v3679_v15, 5 }
  0xcb   : > { %v817_v56 = vpop.permute.xlu0 %816  ;;  %1653 = vrot.lane.b32.xlu1 %v3545_v7, %s2926_s25  ;;  %2313 = vmatpush1.bf16.msra.mxu0 %v2871_v0 }
  0xcc   : > { %841 = vst.msk [vmem:[#allocation2 + $0x60] sm:$0xff] %vm834_vm12, %v817_v56  ;;  %v1263_v56 = vsel %vm739_vm3, %v1261_v22, %v1262_v3  ;;  %2797 = vmatpush1.bf16.msra.mxu1 %v2871_v0  ;;  %2314 = vmatprep.subr.bf16.mxu0 %v2934_v26  ;;  %v1432_v0 = vrot.slane %v3489_v33, 4 }
  0xcd   : > { %1651 = vrot.lane.b32.xlu0 %v642_v27, %s2926_s25  ;;  %v823_v23 = vpop.permute.xlu1 %822  ;;  %v1915_v27 = vrot.slane %v3547_v8, 4  ;;  %2784 = vmatprep.subr.bf16.mxu1 %v2934_v26 }
  0xce   : > { %845 = vst.msk [vmem:[#allocation2 + $0x90] sm:$0x3f] %vm4768_vm13, %v823_v23  ;;  %vm4798_vm13 = vcmask 392512  }
  0xcf   : > { %v821_v47 = vpop.permute.xlu0 %820  ;;  %1712 = vrot.lane.b32.xlu1 %v1695_v13, %s4796_s26  ;;  %v1914_v13 = vrot.slane %v3545_v7, 4  ;;  %v1918_v7 = vsel %vm911_vm5, %v1915_v27, %v1917_v53 }
  0xd0   : > { %843 = vst.msk [vmem:[#allocation2 + $0x80] sm:$0xff] %vm834_vm12, %v821_v47  ;;  %v2872_v47 = vld [vmem:[%s4760_s3 + $0x28] sm:$0xff]  }
  0xd1   : > { %1710 = vrot.lane.b32.xlu0 %v1693_v43, %s4796_s26  ;;  %v872_v44 = vpop.permute.xlu1 %871  ;;  %v1266_v43 = vrot.slane %v3485_v17, 2  ;;  %v1916_v24 = vsel %vm911_vm5, %v1914_v13, %v1915_v27  ;;  %2315 = vmatpush1.bf16.msra.mxu0 %v2872_v47 }
  0xd2   : > { %901 = vst.msk [vmem:[#allocation2 + $0x10] sm:$0xff] %vm4801_vm14, %v872_v44  ;;  %v3686_v44 = vmax.f32 %v569_v4, 0.0  ;;  %2798 = vmatpush1.bf16.msra.mxu1 %v2872_v47  ;;  %2316 = vmatprep.subr.bf16.mxu0 %v2934_v26  ;;  %v2878_v47 = vld [vmem:[%s4760_s3 + $0x58] sm:$0xff]  }
  0xd3   : > { %v870_v36 = vpop.permute.xlu0 %869  ;;  %1771 = vrot.lane.b32.xlu1 %v1754_v25, %s4794_s12  ;;  %2785 = vmatprep.subr.bf16.mxu1 %v2934_v26 }
  0xd4   : > { %900 = vst.msk [vmem:[#allocation2] sm:$0xff] %vm4801_vm14, %v870_v36  ;;  %v1544_v37 = vrot.slane %v3686_v44, 5  ;;  %v1585_v3 = vrot.slane %v3686_v44, 6 }
  0xd5   : > { %1769 = vrot.lane.b32.xlu0 %v1752_v41, %s4794_s12  ;;  %v876_v38 = vpop.permute.xlu1 %875  ;;  %v3688_v41 = vmax.f32 %v570_v10, 0.0  ;;  %v1431_v10 = vrot.slane %v3524_v48, 4 }
  0xd6   : > { %903 = vst.msk [vmem:[#allocation2 + $0x30] sm:$0xff] %vm4801_vm14, %v876_v38  ;;  %v3700_v38 = vsel %vm739_vm3, %v1264_v49, %v1266_v43  ;;  %v1545_v61 = vsel %vm4791_vm6, %v1542_v34, %v1544_v37  ;;  %v3724_v34 = vsel %vm911_vm5, %v1917_v53, %v1919_v42  ;;  %v1586_v27 = vsel %vm1084_vm7, %v1583_v45, %v1585_v3 }
  0xd7   : > { %v874_v46 = vpop.permute.xlu0 %873  ;;  %1814 = vrot.lane.b32.xlu1 %v3591_v19, %s4766_s14  ;;  %v1546_v16 = vrot.slane %v3688_v41, 5  ;;  %1572 = vst.msk [vmem:[#allocation2 + $0x28] sm:$0xff] %vm4788_vm2, %v1545_v61  ;;  %v1587_v49 = vrot.slane %v3688_v41, 6  ;;  %v2018_v53 = vrot.slane %v3547_v8, 5  ;;  %v2022_v45 = vsel %vm4791_vm6, %v2019_v54, %v2021_v9 }
  0xd8   : > { %902 = vst.msk [vmem:[#allocation2 + $0x20] sm:$0xff] %vm4801_vm14, %v874_v46  ;;  %v2873_v46 = vld [vmem:[%s4760_s3 + $0x30] sm:$0xff]  }
  0xd9   : > { %1812 = vrot.lane.b32.xlu0 %v1754_v25, %s4766_s14  ;;  %v880_v18 = vpop.permute.xlu1 %879  ;;  %s2936_s14 = smov 88   ;;  %v1547_v6 = vsel %vm4791_vm6, %v1544_v37, %v1546_v16  ;;  %2317 = vmatpush1.bf16.msra.mxu0 %v2873_v46  ;;  %v1588_v22 = vsel %vm1084_vm7, %v1585_v3, %v1587_v49  ;;  %v2020_v4 = vsel %vm4791_vm6, %v2018_v53, %v2019_v54  ;;  %v2082_v37 = vrot.slane %v3679_v15, 6  ;;  %v3839_v54 = vld [vmem:[%s3431_s16 + $0x28] sm:$0xff]  }
  0xda   : > { %905 = vst.msk [vmem:[#allocation2 + $0x50] sm:$0xff] %vm4801_vm14, %v880_v18  ;;  %2799 = vmatpush1.bf16.msra.mxu1 %v2873_v46  ;;  %2318 = vmatprep.subr.bf16.mxu0 %v2934_v26  ;;  %v1369_v18 = vrot.slane %v3489_v33, 3  ;;  %v2879_v46 = vld [vmem:[%s4760_s3 + $0x60] sm:$0xff]  }
  0xdb   : > { %v878_v40 = vpop.permute.xlu0 %877  ;;  %1221 = vrot.lane.b32.xlu1 %v1204_v55, %s2935_s13  ;;  %1573 = vst.msk [vmem:[#allocation2 + $0x38] sm:$0xff] %vm4788_vm2, %v1547_v6  ;;  %2786 = vmatprep.subr.bf16.mxu1 %v2934_v26  ;;  %v2079_v6 = vrot.slane %v3547_v8, 6 }
  0xdc   : > { %904 = vst.msk [vmem:[#allocation2 + $0x40] sm:$0xff] %vm4801_vm14, %v878_v40 }
  0xdd   : > { %1219 = vrot.lane.b32.xlu0 %v1202_v31, %s2935_s13  ;;  %v884_v20 = vpop.permute.xlu1 %883  ;;  %v1371_v31 = vrot.slane %v3485_v17, 3  ;;  %2319 = vmatpush1.bf16.msra.mxu0 %v2874_v28 }
  0xde   : > { %907 = vst.msk [vmem:[#allocation2 + $0x70] sm:$0xff] %vm4801_vm14, %v884_v20  ;;  %2800 = vmatpush1.bf16.msra.mxu1 %v2874_v28  ;;  %2320 = vmatprep.subr.bf16.mxu0 %v2934_v26  ;;  %v1370_v20 = vsel %vm847_vm4, %v1368_v30, %v1369_v18  ;;  %v1436_v28 = vrot.slane %v3487_v35, 4 }
  0xdf   : > { %v882_v12 = vpop.permute.xlu0 %881  ;;  %1876 = vrot.lane.b32.xlu1 %v1857_v57, %s2930_s15  ;;  %v1372_v57 = vsel %vm847_vm4, %v1369_v18, %v1371_v31  ;;  %2787 = vmatprep.subr.bf16.mxu1 %v2934_v26 }
  0xe0   : > { %906 = vst.msk [vmem:[#allocation2 + $0x60] sm:$0xff] %vm4801_vm14, %v882_v12  ;;  %v2876_v12 = vld [vmem:[%s4760_s3 + $0x48] sm:$0xff]  }
  0xe1   : > { %1874 = vrot.lane.b32.xlu0 %v1855_v2, %s2930_s15  ;;  %v888_v14 = vpop.permute.xlu1 %887  ;;  %2321 = vmatpush1.bf16.msra.mxu0 %v2875_v52 }
  0xe2   : > { %910 = vst.msk [vmem:[#allocation2 + $0x90] sm:$0x3f] %vm4771_vm15, %v888_v14  ;;  %2801 = vmatpush1.bf16.msra.mxu1 %v2875_v52  ;;  %vm4777_vm15 = vcmask 390464   ;;  %2322 = vmatprep.subr.bf16.mxu0 %v2934_v26  ;;  %v1434_v14 = vrot.slane %v3485_v17, 4  ;;  %v1698_v52 = vrot.slane %v3679_v15, 1 }
  0xe3   : > { %v886_v23 = vpop.permute.xlu0 %885  ;;  %1282 = vrot.lane.b32.xlu1 %v1265_v32, %s2936_s14  ;;  %2788 = vmatprep.subr.bf16.mxu1 %v2934_v26 }
  0xe4   : > { %908 = vst.msk [vmem:[#allocation2 + $0x80] sm:$0xff] %vm4801_vm14, %v886_v23 }
  0xe5   : > { %1280 = vrot.lane.b32.xlu0 %v1263_v56, %s2936_s14  ;;  %v936_v25 = vpop.permute.xlu1 %935  ;;  %2323 = vmatpush1.bf16.msra.mxu0 %v2876_v12  ;;  %v2877_v56 = vld [vmem:[%s4760_s3 + $0x50] sm:$0xff]  }
  0xe6   : > { %965 = vst.msk [vmem:[#allocation2 + $0x10] sm:$0xff] %vm4798_vm13, %v936_v25  ;;  %2802 = vmatpush1.bf16.msra.mxu1 %v2876_v12  ;;  %2324 = vmatprep.subr.bf16.mxu0 %v2934_v26  ;;  %v1433_v25 = vsel %vm911_vm5, %v1431_v10, %v1432_v0 }
  0xe7   : > { %v934_v36 = vpop.permute.xlu0 %933  ;;  %1937 = vrot.lane.b32.xlu1 %v1918_v7, %s2931_s18  ;;  %2789 = vmatprep.subr.bf16.mxu1 %v2934_v26 }
  0xe8   : > { %964 = vst.msk [vmem:[#allocation2] sm:$0xff] %vm4798_vm13, %v934_v36  ;;  %v2080_v36 = vrot.slane %v3568_v5, 6 }
  0xe9   : > { %1935 = vrot.lane.b32.xlu0 %v1916_v24, %s2931_s18  ;;  %v940_v55 = vpop.permute.xlu1 %939  ;;  %2325 = vmatpush1.bf16.msra.mxu0 %v2877_v56 }
  0xea   : > { %967 = vst.msk [vmem:[#allocation2 + $0x30] sm:$0xff] %vm4798_vm13, %v940_v55  ;;  %2803 = vmatpush1.bf16.msra.mxu1 %v2877_v56  ;;  %2326 = vmatprep.subr.bf16.mxu0 %v2934_v26  ;;  %v2083_v18 = vsel %vm1084_vm7, %v2080_v36, %v2082_v37 }
  0xeb   : > { %v938_v11 = vpop.permute.xlu0 %937  ;;  %1327 = vrot.lane.b32.xlu1 %v3700_v38, %s4783_s19  ;;  %2790 = vmatprep.subr.bf16.mxu1 %v2934_v26 }
  0xec   : > { %966 = vst.msk [vmem:[#allocation2 + $0x20] sm:$0xff] %vm4798_vm13, %v938_v11  ;;  %v2880_v11 = vld [vmem:[%s4760_s3 + $0x68] ss:$0 sps:$4 sm:$0xff]  }
  0xed   : > { %1325 = vrot.lane.b32.xlu0 %v1265_v32, %s4783_s19  ;;  %v944_v29 = vpop.permute.xlu1 %943  ;;  %2327 = vmatpush1.bf16.msra.mxu0 %v2878_v47 }
  0xee   : > { %969 = vst.msk [vmem:[#allocation2 + $0x50] sm:$0xff] %vm4798_vm13, %v944_v29  ;;  %2804 = vmatpush1.bf16.msra.mxu1 %v2878_v47  ;;  %2328 = vmatprep.subr.bf16.mxu0 %v2934_v26  ;;  %v2751_v29 = vunpack.c.h.bf16 %v3601_v59  ;;  %v1696_v59 = vrot.slane %v3568_v5, 1 }
  0xef   : > { %v942_v40 = vpop.permute.xlu0 %941  ;;  %1980 = vrot.lane.b32.xlu1 %v3724_v34, %s4769_s21  ;;  %2791 = vmatprep.subr.bf16.mxu1 %v2934_v26 }
  0xf0   : > { %968 = vst.msk [vmem:[#allocation2 + $0x40] sm:$0xff] %vm4798_vm13, %v942_v40  ;;  %v2081_v40 = vsel %vm1084_vm7, %v2079_v6, %v2080_v36  ;;  %v1699_v12 = vsel %vm4802_vm0, %v1696_v59, %v1698_v52 }
  0xf1   : > { %1978 = vrot.lane.b32.xlu0 %v1918_v7, %s4769_s21  ;;  %v948_v1 = vpop.permute.xlu1 %947  ;;  %s4773_s21 = smov 104   ;;  %v1435_v7 = vsel %vm911_vm5, %v1432_v0, %v1434_v14  ;;  %2329 = vmatpush1.bf16.msra.mxu0 %v2879_v46  ;;  %v2738_v0 = vunpack.c.l.bf16 %v3839_v54 }
  0xf2   : > { %971 = vst.msk [vmem:[#allocation2 + $0x70] sm:$0xff] %vm4798_vm13, %v948_v1  ;;  %2805 = vmatpush1.bf16.msra.mxu1 %v2879_v46  ;;  %2330 = vmatprep.subr.bf16.mxu0 %v2934_v26  ;;  %v621_v1 = vmul.f32 %v3639_v50, %v2751_v29  ;;  %v1205_v46 = vrot.slane %v3485_v17, 1 }
  0xf3   : > { %v946_v2 = vpop.permute.xlu0 %945  ;;  %1391 = vrot.lane.b32.xlu1 %v1372_v57, %s4773_s21  ;;  %2792 = vmatprep.subr.bf16.mxu1 %v2934_v26  ;;  %v2302_v57 = vsel %vm911_vm5, %v2880_v11, 0  ;;  %v3831_v26 = vsel %vm911_vm5, %v1434_v14, %v1436_v28  ;;  %v561_v10 = vmul.f32 %v3639_v50, %v2738_v0 }
  0xf4   : > { %970 = vst.msk [vmem:[#allocation2 + $0x60] sm:$0xff] %vm4798_vm13, %v946_v2 }
  0xf5   : > { %1389 = vrot.lane.b32.xlu0 %v1370_v20, %s4773_s21  ;;  %v952_v32 = vpop.permute.xlu1 %951  ;;  %s4775_s21 = smov 112   ;;  %2331 = vmatpush1.bf16.msra.mxu0 %v2302_v57 }
  0xf6   : > { %974 = vst.msk [vmem:[#allocation2 + $0x90] sm:$0x3f] %vm4777_vm15, %v952_v32  ;;  %2806 = vmatpush1.bf16.msra.mxu1 %v2302_v57  ;;  %vm4779_vm15 = vcmask 456064   ;;  %v1757_v32 = vrot.slane %v3679_v15, 2 }
  0xf7   : > { %v950_v21 = vpop.permute.xlu0 %949  ;;  %1607 = vrot.lane.b32.xlu1 %v1588_v22, %s4786_s24  ;;  %v2772_v22 = vld [vmem:[%s3431_s16 + $0x20] sm:$0xff]  }
  0xf8   : > { %972 = vst.msk [vmem:[#allocation2 + $0x80] sm:$0xff] %vm4798_vm13, %v950_v21  ;;  %v1697_v21 = vsel %vm4802_vm0, %v1694_v62, %v1696_v59  ;;  %v2734_v14 = vunpack.c.l.bf16 %v2772_v22  ;;  %v1858_v59 = vrot.slane %v3679_v15, 3 }
  0xf9   : > { %1605 = vrot.lane.b32.xlu0 %v1586_v27, %s4786_s24  ;;  %v981_v13 = vpop.permute.xlu1 %980  ;;  %v634_v27 = vadd.f32 %v3661_v58, %v621_v1 }
  0xfa   : > { %1010 = vst.msk [vmem:[#allocation2 + $0x10] sm:$0xff] %vm4789_vm11, %v981_v13  ;;  %v1758_v13 = vsel %vm739_vm3, %v1755_v39, %v1757_v32 }
  0xfb   : > { %v979_v23 = vpop.permute.xlu0 %978  ;;  %2041 = vrot.lane.b32.xlu1 %v2022_v45, %s2933_s17  ;;  %v2735_v45 = vunpack.c.h.bf16 %v2772_v22 }
  0xfc   : > { %1009 = vst.msk [vmem:[#allocation2] sm:$0xff] %vm4789_vm11, %v979_v23  ;;  %v559_v23 = vmul.f32 %v3639_v50, %v2734_v14 }
  0xfd   : > { %2039 = vrot.lane.b32.xlu0 %v2020_v4, %s2933_s17  ;;  %v985_v48 = vpop.permute.xlu1 %984  ;;  %v560_v4 = vmul.f32 %v3639_v50, %v2735_v45 }
  0xfe   : > { %1012 = vst.msk [vmem:[#allocation2 + $0x30] sm:$0xff] %vm4789_vm11, %v985_v48 }
  0xff   : > { %v983_v24 = vpop.permute.xlu0 %982  ;;  %1454 = vrot.lane.b32.xlu1 %v1435_v7, %s4775_s21  ;;  %v573_v48 = vadd.f32 %v3661_v58, %v560_v4 }
 0x100   : > { %1011 = vst.msk [vmem:[#allocation2 + $0x20] sm:$0xff] %vm4789_vm11, %v983_v24  ;;  %v572_v24 = vadd.f32 %v3661_v58, %v559_v23 }
 0x101   : > { %1452 = vrot.lane.b32.xlu0 %v1433_v25, %s4775_s21  ;;  %v989_v55 = vpop.permute.xlu1 %988  ;;  %s2940_s21 = smov 120   ;;  %v574_v25 = vadd.f32 %v3661_v58, %v561_v10 }
 0x102   : > { %1014 = vst.msk [vmem:[#allocation2 + $0x50] sm:$0xff] %vm4789_vm11, %v989_v55  ;;  %v1207_v55 = vrot.slane %v3487_v35, 1 }
 0x103   : > { %v987_v61 = vpop.permute.xlu0 %986  ;;  %1657 = vrot.lane.b32.xlu1 %v3568_v5, %s2926_s25  ;;  %v3890_v11 = vmax.f32 %v574_v25, 0.0 }
 0x104   : > { %1013 = vst.msk [vmem:[#allocation2 + $0x40] sm:$0xff] %vm4789_vm11, %v987_v61  ;;  %v3888_v61 = vmax.f32 %v573_v48, 0.0 }
 0x105   : > { %1655 = vrot.lane.b32.xlu0 %v3547_v8, %s2926_s25  ;;  %v993_v30 = vpop.permute.xlu1 %992  ;;  %v3861_v8 = vmax.f32 %v634_v27, 0.0  ;;  %v1595_v5 = vrot.slane %v3890_v11, 6 }
 0x106   : > { %1016 = vst.msk [vmem:[#allocation2 + $0x70] sm:$0xff] %vm4789_vm11, %v993_v30  ;;  %v1552_v30 = vrot.slane %v3888_v61, 5  ;;  %v1593_v14 = vrot.slane %v3888_v61, 6 }
 0x107   : > { %v991_v3 = vpop.permute.xlu0 %990  ;;  %2102 = vrot.lane.b32.xlu1 %v2083_v18, %s2935_s13  ;;  %v1759_v39 = vrot.slane %v3861_v8, 2  ;;  %v3892_v18 = vmax.f32 %v572_v24, 0.0  ;;  %v1860_v1 = vrot.slane %v3861_v8, 3  ;;  %v1921_v23 = vrot.slane %v3861_v8, 4 }
 0x108   : > { %1015 = vst.msk [vmem:[#allocation2 + $0x60] sm:$0xff] %vm4789_vm11, %v991_v3  ;;  %v1208_v3 = vsel %vm4802_vm0, %v1205_v46, %v1207_v55 }
 0x109   : > { %2100 = vrot.lane.b32.xlu0 %v2081_v40, %s2935_s13  ;;  %v997_v20 = vpop.permute.xlu1 %996  ;;  %v1554_v40 = vrot.slane %v3890_v11, 5  ;;  %v1550_v57 = vrot.slane %v3892_v18, 5  ;;  %v1922_v24 = vsel %vm911_vm5, %v1919_v42, %v1921_v23 }
 0x10a   : > { %1019 = vst.msk [vmem:[#allocation2 + $0x90] sm:$0x3f] %vm4779_vm15, %v997_v20  ;;  %vm4781_vm15 = vcmask 521664  }
 0x10b   : > { %v995_v2 = vpop.permute.xlu0 %994  ;;  %1499 = vrot.lane.b32.xlu1 %v3831_v26, %s2940_s21  ;;  %v1555_v22 = vsel %vm4791_vm6, %v1552_v30, %v1554_v40 }
 0x10c   : > { %1017 = vst.msk [vmem:[#allocation2 + $0x80] sm:$0xff] %vm4789_vm11, %v995_v2  ;;  %v1206_v2 = vsel %vm4802_vm0, %v1203_v60, %v1205_v46  ;;  %v1268_v60 = vrot.slane %v3487_v35, 2 }
 0x10d   : > { %1497 = vrot.lane.b32.xlu0 %v1435_v7, %s2940_s21  ;;  %v1045_v53 = vpop.permute.xlu1 %1044  ;;  %1577 = vst.msk [vmem:[#allocation2 + $0x78] sm:$0xff] %vm4788_vm2, %v1555_v22 }
 0x10e   : > { %1074 = vst.msk [vmem:[#allocation2 + $0x10] sm:$0xff] %vm4782_vm8, %v1045_v53  ;;  %v1859_v53 = vsel %vm847_vm4, %v1856_v63, %v1858_v59  ;;  %v1269_v0 = vsel %vm739_vm3, %v1266_v43, %v1268_v60  ;;  %v1596_v43 = vsel %vm1084_vm7, %v1593_v14, %v1595_v5 }
 0x10f   : > { %v1043_v56 = vpop.permute.xlu0 %1042  ;;  %1716 = vrot.lane.b32.xlu1 %v1699_v12, %s4796_s26  ;;  %v1553_v12 = vsel %vm4791_vm6, %v1550_v57, %v1552_v30  ;;  %v3967_v30 = vld [vmem:[%s3476_s23 + $0x20] sm:$0xff]  }
 0x110   : > { %1073 = vst.msk [vmem:[#allocation2] sm:$0xff] %vm4782_vm8, %v1043_v56 }
 0x111   : > { %1714 = vrot.lane.b32.xlu0 %v1697_v21, %s4796_s26  ;;  %v1049_v62 = vpop.permute.xlu1 %1048  ;;  %1576 = vst.msk [vmem:[#allocation2 + $0x68] sm:$0xff] %vm4788_vm2, %v1553_v12  ;;  %v2776_v21 = vld [vmem:[%s3476_s23 + $0x18] sm:$0xff]  }
 0x112   : > { %1076 = vst.msk [vmem:[#allocation2 + $0x30] sm:$0xff] %vm4782_vm8, %v1049_v62  ;;  %v2754_v56 = vunpack.c.l.bf16 %v2776_v21  ;;  %v2731_v62 = vunpack.c.h.bf16 %v3605_v51  ;;  %v2755_v10 = vunpack.c.h.bf16 %v2776_v21 }
 0x113   : > { %v1047_v7 = vpop.permute.xlu0 %1046  ;;  %1775 = vrot.lane.b32.xlu1 %v1758_v13, %s4794_s12 }
 0x114   : > { %1075 = vst.msk [vmem:[#allocation2 + $0x20] sm:$0xff] %vm4782_vm8, %v1047_v7  ;;  %v622_v51 = vmul.f32 %v3639_v50, %v2754_v56  ;;  %v558_v48 = vmul.f32 %v3639_v50, %v2731_v62 }
 0x115   : > { %1773 = vrot.lane.b32.xlu0 %v3591_v19, %s4794_s12  ;;  %v1053_v47 = vpop.permute.xlu1 %1052  ;;  %v3884_v19 = vsel %vm739_vm3, %v1757_v32, %v1759_v39 }
 0x116   : > { %1078 = vst.msk [vmem:[#allocation2 + $0x50] sm:$0xff] %vm4782_vm8, %v1053_v47  ;;  %v635_v46 = vadd.f32 %v3661_v58, %v622_v51 }
 0x117   : > { %v1051_v36 = vpop.permute.xlu0 %1050  ;;  %1164 = vrot.lane.b32.xlu1 %v3485_v17, %s2933_s17 }
 0x118   : > { %1077 = vst.msk [vmem:[#allocation2 + $0x40] sm:$0xff] %vm4782_vm8, %v1051_v36  ;;  %v1270_v36 = vrot.slane %v3686_v44, 2 }
 0x119   : > { %1162 = vrot.lane.b32.xlu0 %v3489_v33, %s2933_s17  ;;  %v1057_v6 = vpop.permute.xlu1 %1056  ;;  %v1861_v33 = vsel %vm847_vm4, %v1858_v59, %v1860_v1 }
 0x11a   : > { %1080 = vst.msk [vmem:[#allocation2 + $0x70] sm:$0xff] %vm4782_vm8, %v1057_v6  ;;  %v3978_v42 = vsel %vm739_vm3, %v1268_v60, %v1270_v36 }
 0x11b   : > { %v1055_v29 = vpop.permute.xlu0 %1054  ;;  %1818 = vrot.lane.b32.xlu1 %v3884_v19, %s4804_s22 }
 0x11c   : > { %1079 = vst.msk [vmem:[#allocation2 + $0x60] sm:$0xff] %vm4782_vm8, %v1055_v29  ;;  %v571_v29 = vadd.f32 %v3661_v58, %v558_v48 }
 0x11d   : > { %1816 = vrot.lane.b32.xlu0 %v1758_v13, %s4804_s22  ;;  %v1061_v20 = vpop.permute.xlu1 %1060  ;;  %v1591_v13 = vrot.slane %v3892_v18, 6 }
 0x11e   : > { %1083 = vst.msk [vmem:[#allocation2 + $0x90] sm:$0x3f] %vm4781_vm15, %v1061_v20  ;;  %vm4785_vm15 = vcmask 587264   ;;  %v3980_v20 = vmax.f32 %v635_v46, 0.0  ;;  %v3983_v12 = vmax.f32 %v571_v29, 0.0  ;;  %v2023_v46 = vrot.slane %v3861_v8, 5 }
 0x11f   : > { %v1059_v32 = vpop.permute.xlu0 %1058  ;;  %1225 = vrot.lane.b32.xlu1 %v1208_v3, %s2935_s13  ;;  %v1594_v47 = vsel %vm1084_vm7, %v1591_v13, %v1593_v14 }
 0x120   : > { %1081 = vst.msk [vmem:[#allocation2 + $0x80] sm:$0xff] %vm4782_vm8, %v1059_v32  ;;  %vm4803_vm8 = vcmask 654912   ;;  %v1923_v60 = vrot.slane %v3980_v20, 4 }
 0x121   : > { %1223 = vrot.lane.b32.xlu0 %v1206_v2, %s2935_s13  ;;  %v1109_v27 = vpop.permute.xlu1 %1108  ;;  %v2758_v2 = vunpack.c.l.bf16 %v3967_v30 }
 0x122   : > { %1138 = vst.msk [vmem:[#allocation2 + $0x10] sm:$0xff] %vm1136_vm1, %v1109_v27 }
 0x123   : > { %v1107_v45 = vpop.permute.xlu0 %1106  ;;  %1880 = vrot.lane.b32.xlu1 %v1861_v33, %s2930_s15  ;;  %v1548_v33 = vrot.slane %v3983_v12, 5  ;;  %v624_v27 = vmul.f32 %v3639_v50, %v2758_v2  ;;  %v1438_v2 = vrot.slane %v3686_v44, 4 }
 0x124   : > { %1137 = vst.msk [vmem:[#allocation2] sm:$0xff] %vm1136_vm1, %v1107_v45 }
 0x125   : > { %1878 = vrot.lane.b32.xlu0 %v1859_v53, %s2930_s15  ;;  %v1113_v63 = vpop.permute.xlu1 %1112  ;;  %v1551_v21 = vsel %vm4791_vm6, %v1548_v33, %v1550_v57  ;;  %v1549_v45 = vsel %vm4791_vm6, %v1546_v16, %v1548_v33  ;;  %v4012_v57 = vsel %vm911_vm5, %v1921_v23, %v1923_v60  ;;  %v1373_v16 = vrot.slane %v3487_v35, 3 }
 0x126   : > { %1140 = vst.msk [vmem:[#allocation2 + $0x30] sm:$0xff] %vm1136_vm1, %v1113_v63  ;;  %v637_v56 = vadd.f32 %v3661_v58, %v624_v27  ;;  %v1439_v27 = vsel %vm911_vm5, %v1436_v28, %v1438_v2 }
 0x127   : > { %v1111_v4 = vpop.permute.xlu0 %1110  ;;  %1286 = vrot.lane.b32.xlu1 %v1269_v0, %s2936_s14  ;;  %1575 = vst.msk [vmem:[#allocation2 + $0x58] sm:$0xff] %vm4788_vm2, %v1551_v21  ;;  %1574 = vst.msk [vmem:[#allocation2 + $0x48] sm:$0xff] %vm4788_vm2, %v1549_v45  ;;  %v1374_v51 = vsel %vm847_vm4, %v1371_v31, %v1373_v16  ;;  %vm4790_vm2 = vcmask 786112  }
 0x128   : > { %1139 = vst.msk [vmem:[#allocation2 + $0x20] sm:$0xff] %vm1136_vm1, %v1111_v4 }
 0x129   : > { %1284 = vrot.lane.b32.xlu0 %v3700_v38, %s2936_s14  ;;  %v1117_v7 = vpop.permute.xlu1 %1116  ;;  %v623_v38 = vmul.f32 %v3639_v50, %v2755_v10  ;;  %v1589_v10 = vrot.slane %v3983_v12, 6 }
 0x12a   : > { %1142 = vst.msk [vmem:[#allocation2 + $0x50] sm:$0xff] %vm1136_vm1, %v1117_v7 }
 0x12b   : > { %v1115_v25 = vpop.permute.xlu0 %1114  ;;  %1615 = vrot.lane.b32.xlu1 %v1596_v43, %s4786_s24  ;;  %v636_v59 = vadd.f32 %v3661_v58, %v623_v38  ;;  %v4026_v43 = vmax.f32 %v637_v56, 0.0  ;;  %v1590_v31 = vsel %vm1084_vm7, %v1587_v49, %v1589_v10  ;;  %v1702_v38 = vrot.slane %v3980_v20, 1 }
 0x12c   : > { %1141 = vst.msk [vmem:[#allocation2 + $0x40] sm:$0xff] %vm1136_vm1, %v1115_v25  ;;  %v2084_v56 = vrot.slane %v3861_v8, 6 }
 0x12d   : > { %1613 = vrot.lane.b32.xlu0 %v1594_v47, %s4786_s24  ;;  %v1121_v6 = vpop.permute.xlu1 %1120  ;;  %v1592_v47 = vsel %vm1084_vm7, %v1589_v10, %v1591_v13  ;;  %v1706_v25 = vrot.slane %v4026_v43, 1  ;;  %v1765_v45 = vrot.slane %v4026_v43, 2 }
 0x12e   : > { %1144 = vst.msk [vmem:[#allocation2 + $0x70] sm:$0xff] %vm1136_vm1, %v1121_v6  ;;  %v2025_v6 = vrot.slane %v3980_v20, 5 }
 0x12f   : > { %v1119_v3 = vpop.permute.xlu0 %1118  ;;  %1941 = vrot.lane.b32.xlu1 %v1922_v24, %s2931_s18 }
 0x130   : > { %1143 = vst.msk [vmem:[#allocation2 + $0x60] sm:$0xff] %vm1136_vm1, %v1119_v3 }
 0x131   : > { %1939 = vrot.lane.b32.xlu0 %v3724_v34, %s2931_s18  ;;  %v1125_v22 = vpop.permute.xlu1 %1124  ;;  %v3989_v34 = vmax.f32 %v636_v59, 0.0  ;;  %v2026_v59 = vsel %vm4791_vm6, %v2023_v46, %v2025_v6 }
 0x132   : > { %1147 = vst.msk [vmem:[#allocation2 + $0x90] sm:$0x3f] %vm4785_vm15, %v1125_v22  ;;  %vm4800_vm15 = vcmask 720512  }
 0x133   : > { %v1123_v32 = vpop.permute.xlu0 %1122  ;;  %1331 = vrot.lane.b32.xlu1 %v3978_v42, %s4783_s19  ;;  %v1704_v48 = vrot.slane %v3989_v34, 1 }
 0x134   : > { %1145 = vst.msk [vmem:[#allocation2 + $0x80] sm:$0xff] %vm1136_vm1, %v1123_v32  ;;  %v2024_v32 = vsel %vm4791_vm6, %v2021_v9, %v2023_v46  ;;  %v1763_v9 = vrot.slane %v3989_v34, 2  ;;  %vm1355_vm6 = vcmask 851712  }
 0x135   : > { %1329 = vrot.lane.b32.xlu0 %v1269_v0, %s4783_s19  ;;  %v1161_v53 = vpop.permute.xlu1 %1160  ;;  %v1375_v0 = vrot.slane %v3686_v44, 3  ;;  %s4806_s19 = smov 104   ;;  %v1707_v13 = vsel %vm4802_vm0, %v1704_v48, %v1706_v25  ;;  %v1705_v29 = vsel %vm4802_vm0, %v1702_v38, %v1704_v48 }
 0x136   : > { %1190 = vst.msk [vmem:[#allocation2 + $0x10] sm:$0xff] %vm4803_vm8, %v1161_v53 }
 0x137   : > { %v1159_v14 = vpop.permute.xlu0 %1158  ;;  %1665 = vrot.lane.b32.xlu1 %v3989_v34, %s2926_s25  ;;  %v1376_v4 = vsel %vm847_vm4, %v1373_v16, %v1375_v0  ;;  %v1761_v16 = vrot.slane %v3980_v20, 2 }
 0x138   : > { %1189 = vst.msk [vmem:[#allocation2] sm:$0xff] %vm4803_vm8, %v1159_v14 }
 0x139   : > { %1663 = vrot.lane.b32.xlu0 %v3980_v20, %s2926_s25  ;;  %v1604_v63 = vpop.permute.xlu1 %1603  ;;  %v4095_v10 = vsel %vm739_vm3, %v1761_v16, %v1763_v9 }
 0x13a   : > { %1632 = vst.msk [vmem:[#allocation2 + $0x18] sm:$0xff] %vm727_vm9, %v1604_v63  ;;  %v2086_v63 = vrot.slane %v3980_v20, 6 }
 0x13b   : > { %v1602_v62 = vpop.permute.xlu0 %1601  ;;  %1984 = vrot.lane.b32.xlu1 %v4012_v57, %s4805_s20 }
 0x13c   : > { %1631 = vst.msk [vmem:[#allocation2 + $0x8] sm:$0xff] %vm727_vm9, %v1602_v62  ;;  %v2759_v62 = vunpack.c.h.bf16 %v3967_v30  ;;  %v2087_v30 = vsel %vm1084_vm7, %v2084_v56, %v2086_v63 }
 0x13d   : > { %1982 = vrot.lane.b32.xlu0 %v1922_v24, %s4805_s20  ;;  %v1654_v23 = vpop.permute.xlu1 %1653 }
 0x13e   : > { %1682 = vst.msk [vmem:[#allocation2 + $0x18] sm:$0xff] %vm789_vm10, %v1654_v23 }
 0x13f   : > { %v1652_v7 = vpop.permute.xlu0 %1651  ;;  %1395 = vrot.lane.b32.xlu1 %v1376_v4, %s4806_s19 }
 0x140   : > { %1681 = vst.msk [vmem:[#allocation2 + $0x8] sm:$0xff] %vm789_vm10, %v1652_v7 }
 0x141   : > { %1393 = vrot.lane.b32.xlu0 %v1374_v51, %s4806_s19  ;;  %v1713_v17 = vpop.permute.xlu1 %1712  ;;  %v625_v51 = vmul.f32 %v3639_v50, %v2759_v62  ;;  %v1864_v62 = vrot.slane %v3989_v34, 3 }
 0x142   : > { %1741 = vst.msk [vmem:[#allocation2 + $0x18] sm:$0xff] %vm834_vm12, %v1713_v17  ;;  %v1440_v17 = vrot.slane %v3688_v41, 4 }
 0x143   : > { %v1711_v24 = vpop.permute.xlu0 %1710  ;;  %1611 = vrot.lane.b32.xlu1 %v1592_v47, %s4786_s24  ;;  %v2085_v47 = vsel %vm1084_vm7, %v2082_v37, %v2084_v56 }
 0x144   : > { %1740 = vst.msk [vmem:[#allocation2 + $0x8] sm:$0xff] %vm834_vm12, %v1711_v24  ;;  %v4124_v37 = vsel %vm911_vm5, %v1438_v2, %v1440_v17 }
 0x145   : > { %1609 = vrot.lane.b32.xlu0 %v1590_v31, %s4786_s24  ;;  %v1772_v49 = vpop.permute.xlu1 %1771  ;;  %s4807_s24 = smov 112   ;;  %v638_v31 = vadd.f32 %v3661_v58, %v625_v51  ;;  %v1276_v51 = vrot.slane %v3892_v18, 2 }
 0x146   : > { %1800 = vst.msk [vmem:[#allocation2 + $0x18] sm:$0xff] %vm4801_vm14, %v1772_v49 }
 0x147   : > { %v1770_v3 = vpop.permute.xlu0 %1769  ;;  %1724 = vrot.lane.b32.xlu1 %v1707_v13, %s4796_s26  ;;  %v1700_v13 = vrot.slane %v3861_v8, 1  ;;  %v4127_v58 = vmax.f32 %v638_v31, 0.0 }
 0x148   : > { %1799 = vst.msk [vmem:[#allocation2 + $0x8] sm:$0xff] %vm4801_vm14, %v1770_v3 }
 0x149   : > { %1722 = vrot.lane.b32.xlu0 %v1705_v29, %s4796_s26  ;;  %v1815_v22 = vpop.permute.xlu1 %1814  ;;  %v1703_v29 = vsel %vm4802_vm0, %v1700_v13, %v1702_v38  ;;  %v4138_v3 = vrot.slane %v4127_v58, 2  ;;  %v1701_v2 = vsel %vm4802_vm0, %v1698_v52, %v1700_v13  ;;  %v1211_v52 = vrot.slane %v3688_v41, 1  ;;  %v4212_v13 = vld [vmem:[%s3476_s23 + $0x28] sm:$0xff]  }
 0x14a   : > { %1843 = vst.msk [vmem:[#allocation2 + $0x18] sm:$0xff] %vm4798_vm13, %v1815_v22 }
 0x14b   : > { %v1813_v33 = vpop.permute.xlu0 %1812  ;;  %2045 = vrot.lane.b32.xlu1 %v2026_v59, %s2933_s17  ;;  %v4149_v38 = vsel %vm739_vm3, %v1765_v45, %v4138_v3 }
 0x14c   : > { %1842 = vst.msk [vmem:[#allocation2 + $0x8] sm:$0xff] %vm4798_vm13, %v1813_v33  ;;  %v1215_v33 = vrot.slane %v3892_v18, 1 }
 0x14d   : > { %2043 = vrot.lane.b32.xlu0 %v2024_v32, %s2933_s17  ;;  %v1222_v53 = vpop.permute.xlu1 %1221  ;;  %v1213_v32 = vrot.slane %v3983_v12, 1 }
 0x14e   : > { %1251 = vst.msk [vmem:[#allocation2 + $0x10] sm:$0xff] %vm4800_vm15, %v1222_v53 }
 0x14f   : > { %v1220_v21 = vpop.permute.xlu0 %1219  ;;  %1458 = vrot.lane.b32.xlu1 %v1439_v27, %s4807_s24  ;;  %v1216_v53 = vsel %vm4802_vm0, %v1213_v32, %v1215_v33 }
 0x150   : > { %1250 = vst.msk [vmem:[#allocation2] sm:$0xff] %vm4800_vm15, %v1220_v21 }
 0x151   : > { %1456 = vrot.lane.b32.xlu0 %v3831_v26, %s4807_s24  ;;  %v1877_v14 = vpop.permute.xlu1 %1876  ;;  %v1766_v26 = vsel %vm739_vm3, %v1763_v9, %v1765_v45  ;;  %v1214_v9 = vsel %vm4802_vm0, %v1211_v52, %v1213_v32  ;;  %v1925_v32 = vrot.slane %v3989_v34, 4 }
 0x152   : > { %1905 = vst.msk [vmem:[#allocation2 + $0x18] sm:$0xff] %vm4789_vm11, %v1877_v14  ;;  %v1762_v14 = vsel %vm739_vm3, %v1759_v39, %v1761_v16 }
 0x153   : > { %v1875_v28 = vpop.permute.xlu0 %1874  ;;  %1661 = vrot.lane.b32.xlu1 %v3861_v8, %s2926_s25 }
 0x154   : > { %1904 = vst.msk [vmem:[#allocation2 + $0x8] sm:$0xff] %vm4789_vm11, %v1875_v28  ;;  %vm4808_vm11 = vcmask 523712   ;;  %v1866_v28 = vrot.slane %v4026_v43, 3 }
 0x155   : > { %1659 = vrot.lane.b32.xlu0 %v3679_v15, %s2926_s25  ;;  %v1283_v4 = vpop.permute.xlu1 %1282 }
 0x156   : > { %1312 = vst.msk [vmem:[#allocation2 + $0x10] sm:$0xff] %vm4790_vm2, %v1283_v4 }
 0x157   : > { %v1281_v23 = vpop.permute.xlu0 %1280  ;;  %1783 = vrot.lane.b32.xlu1 %v1766_v26, %s4794_s12 }
 0x158   : > { %1311 = vst.msk [vmem:[#allocation2] sm:$0xff] %vm4790_vm2, %v1281_v23  ;;  %vm4809_vm2 = vmmov %vm4808_vm11  ;;  %v1867_v23 = vsel %vm847_vm4, %v1864_v62, %v1866_v28 }
 0x159   : > { %1781 = vrot.lane.b32.xlu0 %v4095_v10, %s4794_s12  ;;  %v1938_v7 = vpop.permute.xlu1 %1937 }
 0x15a   : > { %1966 = vst.msk [vmem:[#allocation2 + $0x18] sm:$0xff] %vm4808_vm11, %v1938_v7  ;;  %vm4792_vm11 = vcmask 982912  }
 0x15b   : > { %v1936_v48 = vpop.permute.xlu0 %1935  ;;  %2106 = vrot.lane.b32.xlu1 %v2087_v30, %s2935_s13 }
 0x15c   : > { %1965 = vst.msk [vmem:[#allocation2 + $0x8] sm:$0xff] %vm4809_vm2, %v1936_v48  ;;  %vm1419_vm2 = vcmask 917312  }
 0x15d   : > { %2104 = vrot.lane.b32.xlu0 %v2085_v47, %s2935_s13  ;;  %v1328_v50 = vpop.permute.xlu1 %1327  ;;  %v1272_v47 = vrot.slane %v3688_v41, 2 }
 0x15e   : > { %1357 = vst.msk [vmem:[#allocation2 + $0x10] sm:$0xff] %vm1355_vm6, %v1328_v50 }
 0x15f   : > { %v1326_v24 = vpop.permute.xlu0 %1325  ;;  %1172 = vrot.lane.b32.xlu1 %v3983_v12, %s2933_s17 }
 0x160   : > { %1356 = vst.msk [vmem:[#allocation2] sm:$0xff] %vm1355_vm6, %v1326_v24 }
 0x161   : > { %1170 = vrot.lane.b32.xlu0 %v3688_v41, %s2933_s17  ;;  %v1981_v46 = vpop.permute.xlu1 %1980 }
 0x162   : > { %2009 = vst.msk [vmem:[#allocation2 + $0x18] sm:$0xff] %vm1136_vm1, %v1981_v46 }
 0x163   : > { %v1979_v49 = vpop.permute.xlu0 %1978  ;;  %1503 = vrot.lane.b32.xlu1 %v4124_v37, %s2940_s21 }
 0x164   : > { %2008 = vst.msk [vmem:[#allocation2 + $0x8] sm:$0xff] %vm1136_vm1, %v1979_v49  ;;  %v1927_v49 = vrot.slane %v4026_v43, 4 }
 0x165   : > { %1501 = vrot.lane.b32.xlu0 %v1439_v27, %s2940_s21  ;;  %v1392_v59 = vpop.permute.xlu1 %1391 }
 0x166   : > { %1421 = vst.msk [vmem:[#allocation2 + $0x10] sm:$0xff] %vm1419_vm2, %v1392_v59  ;;  %v2762_v59 = vunpack.c.l.bf16 %v4212_v13 }
 0x167   : > { %v1390_v22 = vpop.permute.xlu0 %1389  ;;  %1720 = vrot.lane.b32.xlu1 %v1703_v29, %s4796_s26  ;;  %v1929_v29 = vrot.slane %v4127_v58, 4 }
 0x168   : > { %1420 = vst.msk [vmem:[#allocation2] sm:$0xff] %vm1419_vm2, %v1390_v22 }
 0x169   : > { %1718 = vrot.lane.b32.xlu0 %v1701_v2, %s4796_s26  ;;  %v1608_v15 = vpop.permute.xlu1 %1607  ;;  %s4821_s26 = smov 8  }
 0x16a   : > { %1634 = vst.msk [vmem:[#allocation2 + $0x38] sm:$0xff] %vm727_vm9, %v1608_v15 }
 0x16b   : > { %v1606_v27 = vpop.permute.xlu0 %1605  ;;  %1826 = vrot.lane.b32.xlu1 %v4149_v38, %s4804_s22 }
 0x16c   : > { %1633 = vst.msk [vmem:[#allocation2 + $0x28] sm:$0xff] %vm727_vm9, %v1606_v27 }
 0x16d   : > { %1824 = vrot.lane.b32.xlu0 %v1766_v26, %s4804_s22  ;;  %v2042_v21 = vpop.permute.xlu1 %2041  ;;  %v1868_v26 = vrot.slane %v4127_v58, 3 }
 0x16e   : > { %2070 = vst.msk [vmem:[#allocation2 + $0x18] sm:$0xff] %vm4803_vm8, %v2042_v21 }
 0x16f   : > { %v2040_v45 = vpop.permute.xlu0 %2039  ;;  %1233 = vrot.lane.b32.xlu1 %v1216_v53, %s2935_s13  ;;  %v1869_v39 = vsel %vm847_vm4, %v1866_v28, %v1868_v26  ;;  %v537_v53 = vld [vmem:[%s3431_s16 + $0x30] sm:$0x3]  ;;  %v4239_v28 = vld [vmem:[%s4762_s5] ss:$0 sm:$0xff]  ;;  %s4810_s16 = smov 96  }
 0x170   : > { %2069 = vst.msk [vmem:[#allocation2 + $0x8] sm:$0xff] %vm4803_vm8, %v2040_v45  ;;  %v1209_v45 = vrot.slane %v3686_v44, 1 }
 0x171   : > { %1231 = vrot.lane.b32.xlu0 %v1214_v9, %s2935_s13  ;;  %v1455_v56 = vpop.permute.xlu1 %1454  ;;  %v4233_v9 = vsel %vm911_vm5, %v1927_v49, %v1929_v29 }
 0x172   : > { %1484 = vst.msk [vmem:[#allocation2 + $0x10] sm:$0xff] %vm4792_vm11, %v1455_v56  ;;  %v626_v56 = vmul.f32 %v4239_v28, %v2762_v59 }
 0x173   : > { %v1453_v4 = vpop.permute.xlu0 %1452  ;;  %1779 = vrot.lane.b32.xlu1 %v1762_v14, %s4794_s12 }
 0x174   : > { %1483 = vst.msk [vmem:[#allocation2] sm:$0xff] %vm4792_vm11, %v1453_v4  ;;  %vm4793_vm11 = vcmask 1048512  }
 0x175   : > { %1777 = vrot.lane.b32.xlu0 %v3884_v19, %s4794_s12  ;;  %v1658_v16 = vpop.permute.xlu1 %1657  ;;  %v1274_v19 = vrot.slane %v3983_v12, 2  ;;  %s4839_s12 = smov 32  }
 0x176   : > { %1684 = vst.msk [vmem:[#allocation2 + $0x38] sm:$0xff] %vm789_vm10, %v1658_v16  ;;  %v550_v16 = vunpack.c.l.bf16 %v537_v53 }
 0x177   : > { %v1656_v30 = vpop.permute.xlu0 %1655  ;;  %1888 = vrot.lane.b32.xlu1 %v1869_v39, %s2930_s15  ;;  %v4204_v31 = vsel %vm739_vm3, %v1274_v19, %v1276_v51  ;;  %v4209_v24 = vsel %vm739_vm3, %v1272_v47, %v1274_v19  ;;  %v2739_v39 = vunpack.c.h.bf16 %v3839_v54  ;;  %v4259_v54 = vrot.slane %v3888_v61, 2 }
 0x178   : > { %1683 = vst.msk [vmem:[#allocation2 + $0x28] sm:$0xff] %vm789_vm10, %v1656_v30 }
 0x179   : > { %1886 = vrot.lane.b32.xlu0 %v1867_v23, %s2930_s15  ;;  %v2103_v7 = vpop.permute.xlu1 %2102  ;;  %v562_v59 = vmul.f32 %v4239_v28, %v2739_v39 }
 0x17a   : > { %2131 = vst.msk [vmem:[#allocation2 + $0x18] sm:$0xff] %vm4800_vm15, %v2103_v7  ;;  %v1212_v7 = vsel %vm4802_vm0, %v1209_v45, %v1211_v52  ;;  %v563_v52 = vmul.f32 %v4239_v28, %v550_v16 }
 0x17b   : > { %v2101_v48 = vpop.permute.xlu0 %2100  ;;  %1168 = vrot.lane.b32.xlu1 %v3686_v44, %s2933_s17 }
 0x17c   : > { %2130 = vst.msk [vmem:[#allocation2 + $0x8] sm:$0xff] %vm4800_vm15, %v2101_v48  ;;  %v4264_v48 = vld [vmem:[%s4763_s6] ss:$0 sm:$0xff] }
 0x17d   : > { %1166 = vrot.lane.b32.xlu0 %v3487_v35, %s2933_s17  ;;  %v1500_v50 = vpop.permute.xlu1 %1499  ;;  %v4280_v35 = vsel %vm739_vm3, %v1276_v51, %v4259_v54  ;;  %v576_v53 = vadd.f32 %v4264_v48, %v563_v52 }
 0x17e   : > { %1529 = vst.msk [vmem:[#allocation2 + $0x10] sm:$0xff] %vm4793_vm11, %v1500_v50  ;;  %v639_v50 = vadd.f32 %v4264_v48, %v626_v56 }
 0x17f   : > { %v1498_v46 = vpop.permute.xlu0 %1497  ;;  %1294 = vrot.lane.b32.xlu1 %v4204_v31, %s2936_s14  ;;  %v4302_v39 = vmax.f32 %v576_v53, 0.0  ;;  %v1926_v53 = vsel %vm911_vm5, %v1923_v60, %v1925_v32 }
 0x180   : > { %1528 = vst.msk [vmem:[#allocation2] sm:$0xff] %vm4793_vm11, %v1498_v46  ;;  %vm4799_vm11 = vcmask 719872  }
 0x181   : > { %1292 = vrot.lane.b32.xlu0 %v4209_v24, %s2936_s14  ;;  %v1717_v2 = vpop.permute.xlu1 %1716  ;;  %v2143_v22 = vld [vmem:[#allocation2 + $0x18] sm:$0xff] }
 0x182   : > { %1743 = vst.msk [vmem:[#allocation2 + $0x38] sm:$0xff] %vm834_vm12, %v1717_v2 }
 0x183   : > { %v1715_v15 = vpop.permute.xlu0 %1714  ;;  %v2141_v27 = vld [vmem:[#allocation2 + $0x8] sm:$0xff]  ;;  %1822 = vrot.lane.b32.xlu1 %v4095_v10, %s4804_s22 }
 0x184   : > { %1742 = vst.msk [vmem:[#allocation2 + $0x28] sm:$0xff] %vm834_vm12, %v1715_v15  ;;  %v2161_v21 = vpack.c.bf16 %v2143_v22, %v2141_v27  ;;  %v4283_v22 = vmax.f32 %v639_v50, 0.0  ;;  %v575_v27 = vadd.f32 %v4264_v48, %v562_v59 }
 0x185   : > { %1820 = vrot.lane.b32.xlu0 %v1762_v14, %s4804_s22  ;;  %v1776_v10 = vpop.permute.xlu1 %1775  ;;  %v4246_v14 = vsel %vm911_vm5, %v1925_v32, %v1927_v49  ;;  %v2142_v4 = vld [vmem:[#allocation2 + $0x10] sm:$0xff]  ;;  %v1210_v49 = vsel %vm4802_vm0, %v1207_v55, %v1209_v45  ;;  %v1862_v55 = vrot.slane %v3980_v20, 3  ;;  %vm4815_vm0 = vcmask 64512  }
 0x186   : > { %2685 = vmatprep.mubr.msk.bf16.mxu0 %vm4799_vm11, %v2161_v21  ;;  %1802 = vst.msk [vmem:[#allocation2 + $0x38] sm:$0xff] %vm4801_vm14, %v1776_v10  ;;  %v1931_v45 = vrot.slane %v4283_v22, 4 }
 0x187   : > { %v1774_v23 = vpop.permute.xlu0 %1773  ;;  %v2140_v30 = vld [vmem:[#allocation2] sm:$0xff]  ;;  %1949 = vrot.lane.b32.xlu1 %v4233_v9, %s2931_s18  ;;  %v1865_v51 = vsel %vm847_vm4, %v1862_v55, %v1864_v62  ;;  %v1863_v10 = vsel %vm847_vm4, %v1860_v1, %v1862_v55 }
 0x188   : > { %1801 = vst.msk [vmem:[#allocation2 + $0x28] sm:$0xff] %vm4801_vm14, %v1774_v23  ;;  %v2160_v19 = vpack.c.bf16 %v2142_v4, %v2140_v30  ;;  %v4300_v4 = vmax.f32 %v575_v27, 0.0  ;;  %v4315_v8 = vsel %vm911_vm5, %v1929_v29, %v1931_v45  ;;  %vm4814_vm14 = vcmask 62464  }
 0x189   : > { %1947 = vrot.lane.b32.xlu0 %v4246_v14, %s2931_s18  ;;  %v1165_v46 = vpop.permute.xlu1 %1164  ;;  %v1381_v29 = vrot.slane %v3892_v18, 3 }
 0x18a   : > { %2337 = vmatmul.mubr.bf16.vlgmr.msra.gmra.mrb[0].mxu0 %v2160_v19  ;;  %1192 = vst.msk [vmem:[#allocation2 + $0x30] sm:$0xff] %vm4803_vm8, %v1165_v46  ;;  %v1556_v62 = vrot.slane %v4300_v4, 5  ;;  %v1379_v46 = vrot.slane %v3983_v12, 3 }
 0x18b   : > { %v1163_v2 = vpop.permute.xlu0 %1162  ;;  %1229 = vrot.lane.b32.xlu1 %v1212_v7, %s2935_s13  ;;  %v1383_v7 = vrot.slane %v3888_v61, 3 }
 0x18c   : > { %1191 = vst.msk [vmem:[#allocation2 + $0x20] sm:$0xff] %vm4803_vm8, %v1163_v2  ;;  %v1382_v52 = vsel %vm847_vm4, %v1379_v46, %v1381_v29 }
 0x18d   : > { %1227 = vrot.lane.b32.xlu0 %v1210_v49, %s2935_s13  ;;  %v1819_v15 = vpop.permute.xlu1 %1818 }
 0x18e   : > { %1845 = vst.msk [vmem:[#allocation2 + $0x38] sm:$0xff] %vm4798_vm13, %v1819_v15 }
 0x18f   : > { %v1817_v21 = vpop.permute.xlu0 %1816  ;;  %1339 = vrot.lane.b32.xlu1 %v4280_v35, %s4810_s16 }
 0x190   : > { %1844 = vst.msk [vmem:[#allocation2 + $0x28] sm:$0xff] %vm4798_vm13, %v1817_v21  ;;  %vm4811_vm13 = vcmask 1042432   ;;  %v2031_v21 = vrot.slane %v4127_v58, 5 }
 0x191   : > { %1337 = vrot.lane.b32.xlu0 %v4204_v31, %s4810_s16  ;;  %v1226_v56 = vpop.permute.xlu1 %1225  ;;  %v1558_v31 = vrot.slane %v4302_v39, 5  ;;  %vm4812_vm11 = vmmov %vm4811_vm13 }
 0x192   : > { %1253 = vst.msk [vmem:[#allocation2 + $0x30] sm:$0xff] %vm4800_vm15, %v1226_v56  ;;  %v1557_v30 = vsel %vm4812_vm11, %v1554_v40, %v1556_v62  ;;  %v1273_v40 = vsel %vm739_vm3, %v1270_v36, %v1272_v47  ;;  %v1384_v36 = vsel %vm847_vm4, %v1381_v29, %v1383_v7  ;;  %v1597_v47 = vrot.slane %v4300_v4, 6 }
 0x193   : > { %v1224_v16 = vpop.permute.xlu0 %1223  ;;  %1884 = vrot.lane.b32.xlu1 %v1865_v51, %s2930_s15  ;;  %v1559_v23 = vsel %vm4811_vm13, %v1556_v62, %v1558_v31  ;;  %1578 = vst.msk [vmem:[#allocation2 + $0x88] sm:$0xff] %vm4815_vm0, %v1557_v30  ;;  %vm4817_vm0 = vcmask 786112   ;;  %vm4819_vm13 = vcmask 523712   ;;  %v2033_v51 = vrot.slane %v4283_v22, 5 }
 0x194   : > { %1252 = vst.msk [vmem:[#allocation2 + $0x20] sm:$0xff] %vm4800_vm15, %v1224_v16  ;;  %vm4813_vm15 = vcmask 458112   ;;  %v1598_v15 = vsel %vm1084_vm7, %v1595_v5, %v1597_v47  ;;  %v2029_v56 = vrot.slane %v4026_v43, 5  ;;  %v1446_v31 = vrot.slane %v3888_v61, 4 }
 0x195   : > { %1882 = vrot.lane.b32.xlu0 %v1863_v10, %s2930_s15  ;;  %v1881_v1 = vpop.permute.xlu1 %1880  ;;  %1579 = vst.msk [vmem:[#allocation2 + $0x98] sm:$0x3f] %vm4814_vm14, %v1559_v23  ;;  %vm4816_vm8 = vmmov %vm4813_vm15  ;;  %v1442_v23 = vrot.slane %v3983_v12, 4 }
 0x196   : > { %1907 = vst.msk [vmem:[#allocation2 + $0x38] sm:$0xff] %vm4813_vm15, %v1881_v1  ;;  %vm4820_vm14 = vmmov %vm4819_vm13  ;;  %v2032_v16 = vsel %vm4812_vm11, %v2029_v56, %v2031_v21 }
 0x197   : > { %v1879_v19 = vpop.permute.xlu0 %1878  ;;  %1992 = vrot.lane.b32.xlu1 %v4315_v8, %s4805_s20  ;;  %vm4822_vm15 = vmmov %vm4812_vm11  ;;  %vm4828_vm11 = vcmask 326912  }
 0x198   : > { %1906 = vst.msk [vmem:[#allocation2 + $0x28] sm:$0xff] %vm4816_vm8, %v1879_v19  ;;  %vm4818_vm8 = vmmov %vm4817_vm0  ;;  %v2034_v60 = vsel %vm4822_vm15, %v2031_v21, %v2033_v51  ;;  %vm4827_vm15 = vcmask 1046528  }
 0x199   : > { %1990 = vrot.lane.b32.xlu0 %v4233_v9, %s4805_s20  ;;  %v1287_v50 = vpop.permute.xlu1 %1286  ;;  %v1599_v9 = vrot.slane %v4302_v39, 6 }
 0x19a   : > { %1314 = vst.msk [vmem:[#allocation2 + $0x30] sm:$0xff] %vm4817_vm0, %v1287_v50  ;;  %vm4823_vm0 = vcmask 654912  }
 0x19b   : > { %v1285_v49 = vpop.permute.xlu0 %1284  ;;  %1290 = vrot.lane.b32.xlu1 %v1273_v40, %s2936_s14 }
 0x19c   : > { %1313 = vst.msk [vmem:[#allocation2 + $0x20] sm:$0xff] %vm4818_vm8, %v1285_v49  ;;  %vm4824_vm8 = vmmov %vm4823_vm0 }
 0x19d   : > { %1288 = vrot.lane.b32.xlu0 %v3978_v42, %s2936_s14  ;;  %v1616_v59 = vpop.permute.xlu1 %1615  ;;  %v1600_v42 = vsel %vm1084_vm7, %v1597_v47, %v1599_v9  ;;  %v2094_v47 = vrot.slane %v4283_v22, 6 }
 0x19e   : > { %1638 = vst.msk [vmem:[#allocation2 + $0x78] sm:$0xff] %vm727_vm9, %v1616_v59  ;;  %v2090_v59 = vrot.slane %v4026_v43, 6 }
 0x19f   : > { %v1614_v2 = vpop.permute.xlu0 %1613  ;;  %1403 = vrot.lane.b32.xlu1 %v1384_v36, %s4806_s19  ;;  %v2092_v36 = vrot.slane %v4127_v58, 6 }
 0x1a0   : > { %1637 = vst.msk [vmem:[#allocation2 + $0x68] sm:$0xff] %vm727_vm9, %v1614_v2 }
 0x1a1   : > { %1401 = vrot.lane.b32.xlu0 %v1382_v52, %s4806_s19  ;;  %v1942_v55 = vpop.permute.xlu1 %1941  ;;  %v2095_v2 = vsel %vm1084_vm7, %v2092_v36, %v2094_v47 }
 0x1a2   : > { %1968 = vst.msk [vmem:[#allocation2 + $0x38] sm:$0xff] %vm4819_vm13, %v1942_v55  ;;  %vm4825_vm13 = vcmask 982912  }
 0x1a3   : > { %v1940_v27 = vpop.permute.xlu0 %1939  ;;  %1619 = vrot.lane.b32.xlu1 %v1600_v42, %s4821_s26  ;;  %v1377_v42 = vrot.slane %v3688_v41, 3 }
 0x1a4   : > { %1967 = vst.msk [vmem:[#allocation2 + $0x28] sm:$0xff] %vm4820_vm14, %v1940_v27  ;;  %vm4826_vm14 = vmmov %vm4825_vm13 }
 0x1a5   : > { %1617 = vrot.lane.b32.xlu0 %v1598_v15, %s4821_s26  ;;  %v1332_v5 = vpop.permute.xlu1 %1331  ;;  %v2093_v15 = vsel %vm1084_vm7, %v2090_v59, %v2092_v36 }
 0x1a6   : > { %1359 = vst.msk [vmem:[#allocation2 + $0x30] sm:$0xff] %vm1355_vm6, %v1332_v5  ;;  %v1378_v5 = vsel %vm847_vm4, %v1375_v0, %v1377_v42  ;;  %v2027_v0 = vrot.slane %v3989_v34, 5 }
 0x1a7   : > { %v1330_v10 = vpop.permute.xlu0 %1329  ;;  %1945 = vrot.lane.b32.xlu1 %v1926_v53, %s2931_s18 }
 0x1a8   : > { %1358 = vst.msk [vmem:[#allocation2 + $0x20] sm:$0xff] %vm1355_vm6, %v1330_v10 }
 0x1a9   : > { %1943 = vrot.lane.b32.xlu0 %v4012_v57, %s2931_s18  ;;  %v1666_v32 = vpop.permute.xlu1 %1665  ;;  %v1444_v57 = vrot.slane %v3892_v18, 4 }
 0x1aa   : > { %1688 = vst.msk [vmem:[#allocation2 + $0x78] sm:$0xff] %vm789_vm10, %v1666_v32  ;;  %v1708_v32 = vrot.slane %v4127_v58, 1 }
 0x1ab   : > { %v1664_v62 = vpop.permute.xlu0 %1663  ;;  %2053 = vrot.lane.b32.xlu1 %v2034_v60, %s2933_s17  ;;  %v1447_v19 = vsel %vm911_vm5, %v1444_v57, %v1446_v31  ;;  %v4397_v50 = vsel %vm911_vm5, %v1442_v23, %v1444_v57 }
 0x1ac   : > { %1687 = vst.msk [vmem:[#allocation2 + $0x68] sm:$0xff] %vm789_vm10, %v1664_v62  ;;  %v1709_v62 = vsel %vm4827_vm15, %v1706_v25, %v1708_v32 }
 0x1ad   : > { %2051 = vrot.lane.b32.xlu0 %v2032_v16, %s2933_s17  ;;  %v1985_v1 = vpop.permute.xlu1 %1984 }
 0x1ae   : > { %2011 = vst.msk [vmem:[#allocation2 + $0x38] sm:$0xff] %vm1136_vm1, %v1985_v1 }
 0x1af   : > { %v1983_v30 = vpop.permute.xlu0 %1982  ;;  %1335 = vrot.lane.b32.xlu1 %v4209_v24, %s4810_s16 }
 0x1b0   : > { %2010 = vst.msk [vmem:[#allocation2 + $0x28] sm:$0xff] %vm1136_vm1, %v1983_v30 }
 0x1b1   : > { %1333 = vrot.lane.b32.xlu0 %v1273_v40, %s4810_s16  ;;  %v1396_v29 = vpop.permute.xlu1 %1395 }
 0x1b2   : > { %1423 = vst.msk [vmem:[#allocation2 + $0x30] sm:$0xff] %vm1419_vm2, %v1396_v29 }
 0x1b3   : > { %v1394_v49 = vpop.permute.xlu0 %1393  ;;  %1466 = vrot.lane.b32.xlu1 %v1447_v19, %s4807_s24 }
 0x1b4   : > { %1422 = vst.msk [vmem:[#allocation2 + $0x20] sm:$0xff] %vm1419_vm2, %v1394_v49 }
 0x1b5   : > { %1464 = vrot.lane.b32.xlu0 %v4397_v50, %s4807_s24  ;;  %v1612_v24 = vpop.permute.xlu1 %1611 }
 0x1b6   : > { %1636 = vst.msk [vmem:[#allocation2 + $0x58] sm:$0xff] %vm727_vm9, %v1612_v24 }
 0x1b7   : > { %v1610_v40 = vpop.permute.xlu0 %1609  ;;  %1669 = vrot.lane.b32.xlu1 %v4127_v58, %s2926_s25 }
 0x1b8   : > { %1635 = vst.msk [vmem:[#allocation2 + $0x48] sm:$0xff] %vm727_vm9, %v1610_v40 }
 0x1b9   : > { %1667 = vrot.lane.b32.xlu0 %v4026_v43, %s2926_s25  ;;  %v1725_v9 = vpop.permute.xlu1 %1724  ;;  %s4830_s25 = smov 24  }
 0x1ba   : > { %1747 = vst.msk [vmem:[#allocation2 + $0x78] sm:$0xff] %vm834_vm12, %v1725_v9 }
 0x1bb   : > { %v1723_v52 = vpop.permute.xlu0 %1722  ;;  %1988 = vrot.lane.b32.xlu1 %v4246_v14, %s4805_s20  ;;  %v1380_v14 = vsel %vm847_vm4, %v1377_v42, %v1379_v46 }
 0x1bc   : > { %1746 = vst.msk [vmem:[#allocation2 + $0x68] sm:$0xff] %vm834_vm12, %v1723_v52 }
 0x1bd   : > { %1986 = vrot.lane.b32.xlu0 %v1926_v53, %s4805_s20  ;;  %v2046_v55 = vpop.permute.xlu1 %2045  ;;  %v1448_v53 = vrot.slane %v3890_v11, 4 }
 0x1be   : > { %2072 = vst.msk [vmem:[#allocation2 + $0x38] sm:$0xff] %vm4823_vm0, %v2046_v55  ;;  %vm4829_vm0 = vmmov %vm4828_vm11 }
 0x1bf   : > { %v2044_v27 = vpop.permute.xlu0 %2043  ;;  %2114 = vrot.lane.b32.xlu1 %v2095_v2, %s2935_s13  ;;  %v4443_v46 = vsel %vm911_vm5, %v1446_v31, %v1448_v53  ;;  %v1810_v2 = vrot.slane %v4283_v22, 2 }
 0x1c0   : > { %2071 = vst.msk [vmem:[#allocation2 + $0x28] sm:$0xff] %vm4824_vm8, %v2044_v27  ;;  %vm4831_vm8 = vcmask 1042432  }
 0x1c1   : > { %2112 = vrot.lane.b32.xlu0 %v2093_v15, %s2935_s13  ;;  %v1459_v21 = vpop.permute.xlu1 %1458  ;;  %v2030_v31 = vsel %vm4831_vm8, %v2027_v0, %v2029_v56  ;;  %v1443_v56 = vsel %vm911_vm5, %v1440_v17, %v1442_v23  ;;  %v1811_v27 = vsel %vm739_vm3, %v4138_v3, %v1810_v2 }
 0x1c2   : > { %1486 = vst.msk [vmem:[#allocation2 + $0x30] sm:$0xff] %vm4825_vm13, %v1459_v21  ;;  %vm4832_vm13 = vmmov %vm4831_vm8  ;;  %vm4837_vm8 = vcmask 1048512   ;;  %v602_v21 = vld [vmem:[%s3476_s23 + $0x30] sm:$0x3] }
 0x1c3   : > { %v1457_v10 = vpop.permute.xlu0 %1456  ;;  %1399 = vrot.lane.b32.xlu1 %v1380_v14, %s4806_s19  ;;  %v2028_v30 = vsel %vm4832_vm13, %v2025_v6, %v2027_v0  ;;  %v2088_v6 = vrot.slane %v3989_v34, 6  ;;  %vm4838_vm13 = vmmov %vm4837_vm8  ;;  %v2763_v34 = vunpack.c.h.bf16 %v4212_v13  ;;  %v1217_v14 = vrot.slane %v3888_v61, 1 }
 0x1c4   : > { %1485 = vst.msk [vmem:[#allocation2 + $0x20] sm:$0xff] %vm4826_vm14, %v1457_v10  ;;  %vm4833_vm14 = vcmask 720512  }
 0x1c5   : > { %1397 = vrot.lane.b32.xlu0 %v1378_v5, %s4806_s19  ;;  %v1662_v60 = vpop.permute.xlu1 %1661  ;;  %vm4834_vm15 = vmmov %vm4833_vm14  ;;  %v2089_v40 = vsel %vm1084_vm7, %v2086_v63, %v2088_v6  ;;  %v627_v43 = vmul.f32 %v4239_v28, %v2763_v34 }
 0x1c6   : > { %1686 = vst.msk [vmem:[#allocation2 + $0x58] sm:$0xff] %vm789_vm10, %v1662_v60  ;;  %v615_v60 = vunpack.c.l.bf16 %v602_v21 }
 0x1c7   : > { %v1660_v44 = vpop.permute.xlu0 %1659  ;;  %1511 = vrot.lane.b32.xlu1 %v4443_v46, %s2940_s21  ;;  %v640_v63 = vadd.f32 %v4264_v48, %v627_v43 }
 0x1c8   : > { %1685 = vst.msk [vmem:[#allocation2 + $0x48] sm:$0xff] %vm789_vm10, %v1660_v44 }
 0x1c9   : > { %1509 = vrot.lane.b32.xlu0 %v1447_v19, %s2940_s21  ;;  %v1784_v16 = vpop.permute.xlu1 %1783  ;;  %v4512_v55 = vmax.f32 %v640_v63, 0.0 }
 0x1ca   : > { %1806 = vst.msk [vmem:[#allocation2 + $0x78] sm:$0xff] %vm4828_vm11, %v1784_v16  ;;  %vm4835_vm11 = vcmask 654912   ;;  %v628_v16 = vmul.f32 %v4239_v28, %v615_v60 }
 0x1cb   : > { %v1782_v57 = vpop.permute.xlu0 %1781  ;;  %1728 = vrot.lane.b32.xlu1 %v1708_v32, %s4830_s25  ;;  %v1872_v10 = vrot.slane %v4512_v55, 3 }
 0x1cc   : > { %1805 = vst.msk [vmem:[#allocation2 + $0x68] sm:$0xff] %vm4829_vm0, %v1782_v57  ;;  %vm4836_vm0 = vmmov %vm4835_vm11  ;;  %v1933_v57 = vrot.slane %v4512_v55, 4 }
 0x1cd   : > { %1726 = vrot.lane.b32.xlu0 %v1709_v62, %s4830_s25  ;;  %v2107_v1 = vpop.permute.xlu1 %2106 }
 0x1ce   : > { %2133 = vst.msk [vmem:[#allocation2 + $0x38] sm:$0xff] %vm4833_vm14, %v2107_v1  ;;  %vm4840_vm14 = vcmask 719872   ;;  %v1934_v58 = vsel %vm911_vm5, %v1931_v45, %v1933_v57 }
 0x1cf   : > { %v2105_v25 = vpop.permute.xlu0 %2104  ;;  %2049 = vrot.lane.b32.xlu1 %v2030_v31, %s2933_s17  ;;  %v641_v31 = vadd.f32 %v4264_v48, %v628_v16  ;;  %v1323_v48 = vrot.slane %v3890_v11, 2 }
 0x1d0   : > { %2132 = vst.msk [vmem:[#allocation2 + $0x28] sm:$0xff] %vm4834_vm15, %v2105_v25  ;;  %vm4841_vm15 = vcmask 392512  }
 0x1d1   : > { %2047 = vrot.lane.b32.xlu0 %v2028_v30, %s2933_s17  ;;  %v1173_v19 = vpop.permute.xlu1 %1172 }
 0x1d2   : > { %1196 = vst.msk [vmem:[#allocation2 + $0x70] sm:$0xff] %vm4835_vm11, %v1173_v19  ;;  %vm4842_vm11 = vmmov %vm4841_vm15  ;;  %v1324_v19 = vsel %vm739_vm3, %v4259_v54, %v1323_v48 }
 0x1d3   : > { %v1171_v29 = vpop.permute.xlu0 %1170  ;;  %1462 = vrot.lane.b32.xlu1 %v1443_v56, %s4807_s24 }
 0x1d4   : > { %1195 = vst.msk [vmem:[#allocation2 + $0x60] sm:$0xff] %vm4836_vm0, %v1171_v29  ;;  %vm4843_vm0 = vcmask 720512  }
 0x1d5   : > { %1460 = vrot.lane.b32.xlu0 %v4124_v37, %s4807_s24  ;;  %v1504_v49 = vpop.permute.xlu1 %1503  ;;  %v2147_v24 = vld [vmem:[#allocation2 + $0x38] sm:$0xff]  ;;  %v2091_v37 = vsel %vm1084_vm7, %v2088_v6, %v2090_v59  ;;  %v1385_v6 = vrot.slane %v3890_v11, 3  ;;  %v1495_v11 = vrot.slane %v4302_v39, 4 }
 0x1d6   : > { %1531 = vst.msk [vmem:[#allocation2 + $0x30] sm:$0xff] %vm4837_vm8, %v1504_v49  ;;  %vm4844_vm8 = vmmov %vm4843_vm0 }
 0x1d7   : > { %v1502_v41 = vpop.permute.xlu0 %1501  ;;  %v2145_v12 = vld [vmem:[#allocation2 + $0x28] sm:$0xff]  ;;  %1787 = vrot.lane.b32.xlu1 %v4138_v3, %s4839_s12 }
 0x1d8   : > { %1530 = vst.msk [vmem:[#allocation2 + $0x20] sm:$0xff] %vm4838_vm13, %v1502_v41  ;;  %v2163_v17 = vpack.c.bf16 %v2147_v24, %v2145_v12  ;;  %vm4845_vm13 = vcmask 326912   ;;  %v2035_v41 = vrot.slane %v4512_v55, 5 }
 0x1d9   : > { %1785 = vrot.lane.b32.xlu0 %v4149_v38, %s4839_s12  ;;  %v1721_v23 = vpop.permute.xlu1 %1720 }
 0x1da   : > { %2686 = vmatprep.mubr.msk.bf16.mxu0 %vm4840_vm14, %v2163_v17  ;;  %1745 = vst.msk [vmem:[#allocation2 + $0x58] sm:$0xff] %vm834_vm12, %v1721_v23  ;;  %vm4846_vm14 = vmmov %vm4845_vm13 }
 0x1db   : > { %v1719_v36 = vpop.permute.xlu0 %1718  ;;  %2110 = vrot.lane.b32.xlu1 %v2091_v37, %s2935_s13  ;;  %v1386_v37 = vsel %vm847_vm4, %v1383_v7, %v1385_v6 }
 0x1dc   : > { %1744 = vst.msk [vmem:[#allocation2 + $0x48] sm:$0xff] %vm834_vm12, %v1719_v36 }
 0x1dd   : > { %2108 = vrot.lane.b32.xlu0 %v2089_v40, %s2935_s13  ;;  %v1827_v38 = vpop.permute.xlu1 %1826  ;;  %v2146_v13 = vld [vmem:[#allocation2 + $0x30] sm:$0xff]  ;;  %v1450_v40 = vrot.slane %v4300_v4, 4 }
 0x1de   : > { %1849 = vst.msk [vmem:[#allocation2 + $0x78] sm:$0xff] %vm4841_vm15, %v1827_v38  ;;  %vm4847_vm15 = vcmask 1046528  }
 0x1df   : > { %v1825_v9 = vpop.permute.xlu0 %1824  ;;  %v2144_v59 = vld [vmem:[#allocation2 + $0x20] sm:$0xff]  ;;  %1176 = vrot.lane.b32.xlu1 %v3888_v61, %s2933_s17  ;;  %v1218_v3 = vsel %vm4847_vm15, %v1215_v33, %v1217_v14  ;;  %v1451_v43 = vsel %vm911_vm5, %v1448_v53, %v1450_v40 }
 0x1e0   : > { %1848 = vst.msk [vmem:[#allocation2 + $0x68] sm:$0xff] %vm4842_vm11, %v1825_v9  ;;  %v2162_v20 = vpack.c.bf16 %v2146_v13, %v2144_v59  ;;  %vm4848_vm11 = vcmask 458112  }
 0x1e1   : > { %1174 = vrot.lane.b32.xlu0 %v3892_v18, %s2933_s17  ;;  %v1234_v52 = vpop.permute.xlu1 %1233 }
 0x1e2   : > { %2345 = vmatmul.mubr.bf16.gmra.mrb[4].mxu0 %v2162_v20  ;;  %1257 = vst.msk [vmem:[#allocation2 + $0x70] sm:$0xff] %vm4843_vm0, %v1234_v52  ;;  %vm4849_vm0 = vmmov %vm4848_vm11 }
 0x1e3   : > { %v1232_v42 = vpop.permute.xlu0 %1231  ;;  %1507 = vrot.lane.b32.xlu1 %v4397_v50, %s2940_s21  ;;  %v1870_v50 = vrot.slane %v4283_v22, 3 }
 0x1e4   : > { %1256 = vst.msk [vmem:[#allocation2 + $0x60] sm:$0xff] %vm4844_vm8, %v1232_v42  ;;  %vm4850_vm8 = vcmask 654912  }
 0x1e5   : > { %1505 = vrot.lane.b32.xlu0 %v1443_v56, %s2940_s21  ;;  %v1780_v15 = vpop.permute.xlu1 %1779  ;;  %v1873_v0 = vsel %vm847_vm4, %v1870_v50, %v1872_v10  ;;  %v1871_v18 = vsel %vm847_vm4, %v1868_v26, %v1870_v50  ;;  %v654_v26 = vmax.f32 %v641_v31, 0.0 }
 0x1e6   : > { %1804 = vst.msk [vmem:[#allocation2 + $0x58] sm:$0xff] %vm4845_vm13, %v1780_v15  ;;  %vm4851_vm13 = vmmov %vm4850_vm8 }
 0x1e7   : > { %v1778_v5 = vpop.permute.xlu0 %1777  ;;  %1830 = vrot.lane.b32.xlu1 %v1810_v2, %s4804_s22  ;;  %v1976_v56 = vrot.slane %v654_v26, 4  ;;  %v2037_v12 = vrot.slane %v654_v26, 5  ;;  %v2098_v38 = vrot.slane %v654_v26, 6 }
 0x1e8   : > { %1803 = vst.msk [vmem:[#allocation2 + $0x48] sm:$0xff] %vm4846_vm14, %v1778_v5  ;;  %vm4852_vm14 = vcmask 786112  }
 0x1e9   : > { %1828 = vrot.lane.b32.xlu0 %v1811_v27, %s4804_s22  ;;  %v1889_v32 = vpop.permute.xlu1 %1888  ;;  %vm4853_vm15 = vmmov %vm4852_vm14  ;;  %v1977_v29 = vsel %vm911_vm5, %v1933_v57, %v1976_v56  ;;  %s2666_s22 = sshll.u32 %s4916_s28, 3 }
 0x1ea   : > { %1911 = vst.msk [vmem:[#allocation2 + $0x78] sm:$0xff] %vm4848_vm11, %v1889_v32  ;;  %vm4854_vm11 = vcmask 392512  }
 0x1eb   : > { %v1887_v44 = vpop.permute.xlu0 %1886  ;;  %1237 = vrot.lane.b32.xlu1 %v1217_v14, %s2935_s13 }
 0x1ec   : > { %1910 = vst.msk [vmem:[#allocation2 + $0x68] sm:$0xff] %vm4849_vm0, %v1887_v44  ;;  %vm4855_vm0 = vmmov %vm4854_vm11 }
 0x1ed   : > { %1235 = vrot.lane.b32.xlu0 %v1218_v3, %s2935_s13  ;;  %v1169_v62 = vpop.permute.xlu1 %1168 }
 0x1ee   : > { %1194 = vst.msk [vmem:[#allocation2 + $0x50] sm:$0xff] %vm4850_vm8, %v1169_v62  ;;  %vm4856_vm8 = vcmask 523712  }
 0x1ef   : > { %v1167_v33 = vpop.permute.xlu0 %1166  ;;  %1892 = vrot.lane.b32.xlu1 %v1873_v0, %s2930_s15 }
 0x1f0   : > { %1193 = vst.msk [vmem:[#allocation2 + $0x40] sm:$0xff] %vm4851_vm13, %v1167_v33  ;;  %vm4857_vm13 = vmmov %vm4856_vm8 }
 0x1f1   : > { %1890 = vrot.lane.b32.xlu0 %v1871_v18, %s2930_s15  ;;  %v1295_v1 = vpop.permute.xlu1 %1294  ;;  %s2664_s15 = sshll.u32 %s4916_s28, 6 }
 0x1f2   : > { %1318 = vst.msk [vmem:[#allocation2 + $0x70] sm:$0xff] %vm4852_vm14, %v1295_v1  ;;  %vm4858_vm14 = vcmask 720512  }
 0x1f3   : > { %v1293_v28 = vpop.permute.xlu0 %1292  ;;  %1298 = vrot.lane.b32.xlu1 %v4259_v54, %s2936_s14 }
 0x1f4   : > { %1317 = vst.msk [vmem:[#allocation2 + $0x60] sm:$0xff] %vm4853_vm15, %v1293_v28  ;;  %vm4859_vm15 = vmmov %vm4858_vm14 }
 0x1f5   : > { %1296 = vrot.lane.b32.xlu0 %v4280_v35, %s2936_s14  ;;  %v1823_v30 = vpop.permute.xlu1 %1822 }
 0x1f6   : > { %1847 = vst.msk [vmem:[#allocation2 + $0x58] sm:$0xff] %vm4854_vm11, %v1823_v30  ;;  %vm4860_vm11 = vcmask 1042432  }
 0x1f7   : > { %v1821_v25 = vpop.permute.xlu0 %1820  ;;  %1953 = vrot.lane.b32.xlu1 %v1934_v58, %s2931_s18  ;;  %v2038_v23 = vsel %vm4860_vm11, %v2035_v41, %v2037_v12 }
 0x1f8   : > { %1846 = vst.msk [vmem:[#allocation2 + $0x48] sm:$0xff] %vm4855_vm0, %v1821_v25  ;;  %vm4861_vm0 = vmmov %vm4860_vm11  ;;  %vm4867_vm11 = vcmask 523712  }
 0x1f9   : > { %1951 = vrot.lane.b32.xlu0 %v4315_v8, %s2931_s18  ;;  %v1950_v35 = vpop.permute.xlu1 %1949  ;;  %v1387_v8 = vrot.slane %v4300_v4, 3  ;;  %v2036_v61 = vsel %vm4861_vm0, %v2033_v51, %v2035_v41  ;;  %v2096_v4 = vrot.slane %v4512_v55, 6  ;;  %vm4868_vm0 = vmmov %vm4867_vm11 }
 0x1fa   : > { %1972 = vst.msk [vmem:[#allocation2 + $0x78] sm:$0xff] %vm4856_vm8, %v1950_v35  ;;  %vm4862_vm8 = vcmask 458112  }
 0x1fb   : > { %v1948_v45 = vpop.permute.xlu0 %1947  ;;  %1343 = vrot.lane.b32.xlu1 %v1323_v48, %s4810_s16  ;;  %v1388_v54 = vsel %vm847_vm4, %v1385_v6, %v1387_v8  ;;  %vm4863_vm4 = vmmov %vm4862_vm8  ;;  %v2099_v9 = vsel %vm1084_vm7, %v2096_v4, %v2098_v38  ;;  %v2097_v53 = vsel %vm1084_vm7, %v2094_v47, %v2096_v4 }
 0x1fc   : > { %1971 = vst.msk [vmem:[#allocation2 + $0x68] sm:$0xff] %vm4857_vm13, %v1948_v45  ;;  %vm4864_vm13 = vcmask 786112  }
 0x1fd   : > { %1341 = vrot.lane.b32.xlu0 %v1324_v19, %s4810_s16  ;;  %v1230_v49 = vpop.permute.xlu1 %1229 }
 0x1fe   : > { %1255 = vst.msk [vmem:[#allocation2 + $0x50] sm:$0xff] %vm4858_vm14, %v1230_v49  ;;  %vm4865_vm14 = vmmov %vm4864_vm13 }
 0x1ff   : > { %v1228_v24 = vpop.permute.xlu0 %1227  ;;  %1996 = vrot.lane.b32.xlu1 %v1977_v29, %s4805_s20 }
 0x200   : > { %1254 = vst.msk [vmem:[#allocation2 + $0x40] sm:$0xff] %vm4859_vm15, %v1228_v24  ;;  %vm4866_vm15 = vcmask 128064  }
 0x201   : > { %1994 = vrot.lane.b32.xlu0 %v1934_v58, %s4805_s20  ;;  %v1340_v17 = vpop.permute.xlu1 %1339  ;;  %s442_s20 = sadd.s32 %s2666_s22, %s4922_s27 }
 0x202   : > { %1363 = vst.msk [vmem:[#allocation2 + $0x70] sm:$0xff] %vm1355_vm6, %v1340_v17  ;;  %s2667_s16 = sshll.u32 %s442_s20, 1 }
 0x203   : > { %v1338_v34 = vpop.permute.xlu0 %1337  ;;  %1407 = vrot.lane.b32.xlu1 %v1388_v54, %s4806_s19  ;;  %s444_s12 = scalar_lea.vmem %s4765_s8, %s2667_s16 }
 0x204   : > { %1362 = vst.msk [vmem:[#allocation2 + $0x60] sm:$0xff] %vm1355_vm6, %v1338_v34  ;;  %v4657_v34 = vld [vmem:[%s4761_s4] ss:$0 sm:$0xff] }
 0x205   : > { %1405 = vrot.lane.b32.xlu0 %v1386_v37, %s4806_s19  ;;  %v1885_v36 = vpop.permute.xlu1 %1884 }
 0x206   : > { %1909 = vst.msk [vmem:[#allocation2 + $0x58] sm:$0xff] %vm4862_vm8, %v1885_v36  ;;  %vm4869_vm8 = vcmask 654912  }
 0x207   : > { %v1883_v7 = vpop.permute.xlu0 %1882  ;;  %2057 = vrot.lane.b32.xlu1 %v2038_v23, %s2933_s17 }
 0x208   : > { %1908 = vst.msk [vmem:[#allocation2 + $0x48] sm:$0xff] %vm4863_vm4, %v1883_v7  ;;  %vm4870_vm4 = vmmov %vm4869_vm8 }
 0x209   : > { %2055 = vrot.lane.b32.xlu0 %v2036_v61, %s2933_s17  ;;  %v1993_v13 = vpop.permute.xlu1 %1992 }
 0x20a   : > { %2015 = vst.msk [vmem:[#allocation2 + $0x78] sm:$0xff] %vm1136_vm1, %v1993_v13 }
 0x20b   : > { %v1991_v51 = vpop.permute.xlu0 %1990  ;;  %1470 = vrot.lane.b32.xlu1 %v1451_v43, %s4807_s24 }
 0x20c   : > { %2014 = vst.msk [vmem:[#allocation2 + $0x68] sm:$0xff] %vm1136_vm1, %v1991_v51 }
 0x20d   : > { %1468 = vrot.lane.b32.xlu0 %v4443_v46, %s4807_s24  ;;  %v1291_v59 = vpop.permute.xlu1 %1290  ;;  %v1496_v46 = vsel %vm911_vm5, %v1450_v40, %v1495_v11  ;;  %s2663_s24 = sshll.u32 %s4922_s27, 3 }
 0x20e   : > { %1316 = vst.msk [vmem:[#allocation2 + $0x50] sm:$0xff] %vm4864_vm13, %v1291_v59  ;;  %s434_s18 = sadd.s32 %s2664_s15, %s2663_s24 }
 0x20f   : > { %v1289_v20 = vpop.permute.xlu0 %1288  ;;  %2118 = vrot.lane.b32.xlu1 %v2099_v9, %s2935_s13  ;;  %s2665_s23 = sshll.u32 %s434_s18, 3 }
 0x210   : > { %1315 = vst.msk [vmem:[#allocation2 + $0x40] sm:$0xff] %vm4865_vm14, %v1289_v20  ;;  %vm4873_vm14 = vcmask 193664  }
 0x211   : > { %2116 = vrot.lane.b32.xlu0 %v2097_v53, %s2935_s13  ;;  %v1404_v63 = vpop.permute.xlu1 %1403 }
 0x212   : > { %1427 = vst.msk [vmem:[#allocation2 + $0x70] sm:$0xff] %vm1419_vm2, %v1404_v63 }
 0x213   : > { %v1402_v39 = vpop.permute.xlu0 %1401  ;;  %1515 = vrot.lane.b32.xlu1 %v1496_v46, %s2940_s21 }
 0x214   : > { %1426 = vst.msk [vmem:[#allocation2 + $0x60] sm:$0xff] %vm1419_vm2, %v1402_v39 }
 0x215   : > { %1513 = vrot.lane.b32.xlu0 %v1451_v43, %s2940_s21  ;;  %v1620_v22 = vpop.permute.xlu1 %1619  ;;  %s4663_s21 = scalar_lea.vmem %s4764_s7, %s2665_s23 }
 0x216   : > { %1640 = vst.msk [vmem:[#allocation2 + $0x98] sm:$0x3f] %vm4866_vm15, %v1620_v22  ;;  %vm4874_vm15 = vcmask 720512  }
 0x217   : > { %v1618_v47 = vpop.permute.xlu0 %1617 }
 0x218   : > { %1639 = vst.msk [vmem:[#allocation2 + $0x88] sm:$0xff] %vm727_vm9, %v1618_v47  ;;  %vm4871_vm9 = vcmask 982912  }
 0x219   : > { %v1946_v52 = vpop.permute.xlu1 %1945  ;;  %vm4872_vm13 = vmmov %vm4871_vm9 }
 0x21a   : > { %1970 = vst.msk [vmem:[#allocation2 + $0x58] sm:$0xff] %vm4867_vm11, %v1946_v52  ;;  %vm4875_vm11 = vmmov %vm4874_vm15 }
 0x21b   : > { %v1944_v2 = vpop.permute.xlu0 %1943 }
 0x21c   : > { %1969 = vst.msk [vmem:[#allocation2 + $0x48] sm:$0xff] %vm4868_vm0, %v1944_v2 }
 0x21d   : > { %v2054_v42 = vpop.permute.xlu1 %2053 }
 0x21e   : > { %2076 = vst.msk [vmem:[#allocation2 + $0x78] sm:$0xff] %vm4869_vm8, %v2054_v42  ;;  %vm4878_vm8 = vcmask 719872  }
 0x21f   : > { %v2052_v55 = vpop.permute.xlu0 %2051 }
 0x220   : > { %2075 = vst.msk [vmem:[#allocation2 + $0x68] sm:$0xff] %vm4870_vm4, %v2052_v55  ;;  %vm4879_vm4 = vcmask 259264  }
 0x221   : > { %v1336_v15 = vpop.permute.xlu1 %1335 }
 0x222   : > { %1361 = vst.msk [vmem:[#allocation2 + $0x50] sm:$0xff] %vm1355_vm6, %v1336_v15 }
 0x223   : > { %v1334_v27 = vpop.permute.xlu0 %1333 }
 0x224   : > { %1360 = vst.msk [vmem:[#allocation2 + $0x40] sm:$0xff] %vm1355_vm6, %v1334_v27 }
 0x225   : > { %v1467_v14 = vpop.permute.xlu1 %1466 }
 0x226   : > { %1490 = vst.msk [vmem:[#allocation2 + $0x70] sm:$0xff] %vm4871_vm9, %v1467_v14  ;;  %vm4880_vm9 = vcmask 654912  }
 0x227   : > { %v1465_v21 = vpop.permute.xlu0 %1464 }
 0x228   : > { %1489 = vst.msk [vmem:[#allocation2 + $0x60] sm:$0xff] %vm4872_vm13, %v1465_v21  ;;  %vm4881_vm13 = vmmov %vm4880_vm9 }
 0x229   : > { %v1670_v5 = vpop.permute.xlu1 %1669 }
 0x22a   : > { %1690 = vst.msk [vmem:[#allocation2 + $0x98] sm:$0x3f] %vm4873_vm14, %v1670_v5  ;;  %vm4882_vm14 = vcmask 982912  }
 0x22b   : > { %v1668_v50 = vpop.permute.xlu0 %1667 }
 0x22c   : > { %1689 = vst.msk [vmem:[#allocation2 + $0x88] sm:$0xff] %vm789_vm10, %v1668_v50  ;;  %vm4876_vm10 = vcmask 1048512  }
 0x22d   : > { %v1989_v10 = vpop.permute.xlu1 %1988  ;;  %vm4877_vm0 = vmmov %vm4876_vm10 }
 0x22e   : > { %2013 = vst.msk [vmem:[#allocation2 + $0x58] sm:$0xff] %vm1136_vm1, %v1989_v10 }
 0x22f   : > { %v1987_v60 = vpop.permute.xlu0 %1986 }
 0x230   : > { %2012 = vst.msk [vmem:[#allocation2 + $0x48] sm:$0xff] %vm1136_vm1, %v1987_v60 }
 0x231   : > { %v2115_v32 = vpop.permute.xlu1 %2114 }
 0x232   : > { %2137 = vst.msk [vmem:[#allocation2 + $0x78] sm:$0xff] %vm4874_vm15, %v2115_v32  ;;  %vm4883_vm15 = vmmov %vm4882_vm14 }
 0x233   : > { %v2113_v3 = vpop.permute.xlu0 %2112 }
 0x234   : > { %2136 = vst.msk [vmem:[#allocation2 + $0x68] sm:$0xff] %vm4875_vm11, %v2113_v3  ;;  %vm4885_vm11 = vcmask 326912  }
 0x235   : > { %v1400_v44 = vpop.permute.xlu1 %1399 }
 0x236   : > { %1425 = vst.msk [vmem:[#allocation2 + $0x50] sm:$0xff] %vm1419_vm2, %v1400_v44 }
 0x237   : > { %v1398_v0 = vpop.permute.xlu0 %1397 }
 0x238   : > { %1424 = vst.msk [vmem:[#allocation2 + $0x40] sm:$0xff] %vm1419_vm2, %v1398_v0 }
 0x239   : > { %v1512_v16 = vpop.permute.xlu1 %1511  ;;  %v2155_v62 = vld [vmem:[#allocation2 + $0x78] sm:$0xff] }
 0x23a   : > { %1535 = vst.msk [vmem:[#allocation2 + $0x70] sm:$0xff] %vm4876_vm10, %v1512_v16  ;;  %vm4886_vm10 = vcmask 720512  }
 0x23b   : > { %v1510_v18 = vpop.permute.xlu0 %1509  ;;  %v2153_v33 = vld [vmem:[#allocation2 + $0x68] sm:$0xff] }
 0x23c   : > { %1534 = vst.msk [vmem:[#allocation2 + $0x60] sm:$0xff] %vm4877_vm0, %v1510_v18  ;;  %v2167_v57 = vpack.c.bf16 %v2155_v62, %v2153_v33  ;;  %vm4887_vm0 = vmmov %vm4886_vm10 }
 0x23d   : > { %v1729_v31 = vpop.permute.xlu1 %1728 }
 0x23e   : > { %2688 = vmatprep.mubr.msk.bf16.mxu1 %vm4878_vm8, %v2167_v57  ;;  %1749 = vst.msk [vmem:[#allocation2 + $0x98] sm:$0x3f] %vm4879_vm4, %v1729_v31  ;;  %vm1198_vm8 = vcmask 652864   ;;  %vm4888_vm4 = vmmov %vm4880_vm9 }
 0x23f   : > { %v1727_v1 = vpop.permute.xlu0 %1726 }
 0x240   : > { %1748 = vst.msk [vmem:[#allocation2 + $0x88] sm:$0xff] %vm834_vm12, %v1727_v1  ;;  %vm4884_vm12 = vcmask 324864  }
 0x241   : > { %v2050_v28 = vpop.permute.xlu1 %2049  ;;  %v2154_v58 = vld [vmem:[#allocation2 + $0x70] sm:$0xff] }
 0x242   : > { %2074 = vst.msk [vmem:[#allocation2 + $0x58] sm:$0xff] %vm4880_vm9, %v2050_v28  ;;  %vm4889_vm9 = vcmask 1048512  }
 0x243   : > { %v2048_v26 = vpop.permute.xlu0 %2047  ;;  %v2152_v30 = vld [vmem:[#allocation2 + $0x60] sm:$0xff] }
 0x244   : > { %2073 = vst.msk [vmem:[#allocation2 + $0x48] sm:$0xff] %vm4881_vm13, %v2048_v26  ;;  %v2166_v48 = vpack.c.bf16 %v2154_v58, %v2152_v30  ;;  %vm4890_vm13 = vmmov %vm4889_vm9 }
 0x245   : > { %v1463_v25 = vpop.permute.xlu1 %1462 }
 0x246   : > { %2361 = vmatmul.mubr.bf16.vlgmr.msra.gmra.mrb[0].mxu1 %v2166_v48  ;;  %1488 = vst.msk [vmem:[#allocation2 + $0x50] sm:$0xff] %vm4882_vm14, %v1463_v25  ;;  %vm4891_vm14 = vcmask 719872  }
 0x247   : > { %v1461_v56 = vpop.permute.xlu0 %1460 }
 0x248   : > { %1487 = vst.msk [vmem:[#allocation2 + $0x40] sm:$0xff] %vm4883_vm15, %v1461_v56  ;;  %vm4892_vm15 = vcmask 390464  }
 0x249   : > { %v1788_v35 = vpop.permute.xlu1 %1787 }
 0x24a   : > { %1808 = vst.msk [vmem:[#allocation2 + $0x98] sm:$0x3f] %vm4884_vm12, %v1788_v35  ;;  %vm4893_vm12 = vcmask 392512  }
 0x24b   : > { %v1786_v19 = vpop.permute.xlu0 %1785 }
 0x24c   : > { %1807 = vst.msk [vmem:[#allocation2 + $0x88] sm:$0xff] %vm4885_vm11, %v1786_v19  ;;  %vm1259_vm11 = vcmask 718464  }
 0x24d   : > { %v2111_v45 = vpop.permute.xlu1 %2110 }
 0x24e   : > { %2135 = vst.msk [vmem:[#allocation2 + $0x58] sm:$0xff] %vm4886_vm10, %v2111_v45  ;;  %vm2409_vm10 = vcmask 130048  }
 0x24f   : > { %v2109_v29 = vpop.permute.xlu0 %2108 }
 0x250   : > { %2134 = vst.msk [vmem:[#allocation2 + $0x48] sm:$0xff] %vm4887_vm0, %v2109_v29 }
 0x251   : > { %v1177_v6 = vpop.permute.xlu1 %1176 }
 0x252   : > { %1199 = vst.msk [vmem:[#allocation2 + $0x90] sm:$0x3f] %vm1198_vm8, %v1177_v6 }
 0x253   : > { %v1175_v8 = vpop.permute.xlu0 %1174 }
 0x254   : > { %1197 = vst.msk [vmem:[#allocation2 + $0x80] sm:$0xff] %vm4888_vm4, %v1175_v8  ;;  %vm4894_vm4 = vcmask 456064  }
 0x255   : > { %v1508_v49 = vpop.permute.xlu1 %1507  ;;  %v2151_v24 = vld [vmem:[#allocation2 + $0x58] sm:$0xff] }
 0x256   : > { %1533 = vst.msk [vmem:[#allocation2 + $0x50] sm:$0xff] %vm4889_vm9, %v1508_v49  ;;  %vm4895_vm9 = vcmask 458112  }
 0x257   : > { %v1506_v54 = vpop.permute.xlu0 %1505  ;;  %v2149_v41 = vld [vmem:[#allocation2 + $0x48] sm:$0xff] }
 0x258   : > { %1532 = vst.msk [vmem:[#allocation2 + $0x40] sm:$0xff] %vm4890_vm13, %v1506_v54  ;;  %v2165_v12 = vpack.c.bf16 %v2151_v24, %v2149_v41  ;;  %vm1320_vm13 = vcmask 784064  }
 0x259   : > { %v1831_v17 = vpop.permute.xlu1 %1830 }
 0x25a   : > { %2687 = vmatprep.mubr.msk.bf16.mxu0 %vm4891_vm14, %v2165_v12  ;;  %1851 = vst.msk [vmem:[#allocation2 + $0x98] sm:$0x3f] %vm4892_vm15, %v1831_v17  ;;  %vm4896_vm14 = vcmask 786112   ;;  %vm4897_vm15 = vcmask 521664  }
 0x25b   : > { %v1829_v37 = vpop.permute.xlu0 %1828 }
 0x25c   : > { %1850 = vst.msk [vmem:[#allocation2 + $0x88] sm:$0xff] %vm4893_vm12, %v1829_v37  ;;  %vm4898_vm12 = vcmask 523712  }
 0x25d   : > { %v2338_v23 = vpop.f32.mrb[0].mxu0  ;;  %v1238_v61 = vpop.permute.xlu1 %1237  ;;  %v2150_v7 = vld [vmem:[#allocation2 + $0x50] sm:$0xff] }
 0x25e   : > { %v4666_v40 = vadd.f32 %v4657_v34, %v2338_v23  ;;  %v2340_v36 = vpop.f32.mrb[1].mxu0  ;;  %1260 = vst.msk [vmem:[#allocation2 + $0x90] sm:$0x3f] %vm1259_vm11, %v1238_v61 }
 0x25f   : > { %v1236_v43 = vpop.permute.xlu0 %1235  ;;  %v2341_v4 = vpop.f32.mrb[2].mxu0  ;;  %v2148_v38 = vld [vmem:[#allocation2 + $0x40] sm:$0xff] }
 0x260   : > { %2410 = vst.msk [vmem:[%s4663_s21] sm:$0xff] %vm2409_vm10, %v4666_v40  ;;  %v2343_v13 = vpop.f32.mrb[3].mxu0  ;;  %v2164_v51 = vpack.c.bf16 %v2150_v7, %v2148_v38  ;;  %v2342_v16 = vadd.f32 %v4657_v34, %v2341_v4  ;;  %v2441_v26 = vmul.f32 %v4666_v40, %v4666_v40  ;;  %v2418_v56 = vsel %vm2409_vm10, %v4666_v40, 0.0 }
 0x261   : > { %1258 = vst.msk [vmem:[#allocation2 + $0x80] sm:$0xff] %vm4887_vm0, %v1236_v43  ;;  %v1893_v9 = vpop.permute.xlu1 %1892  ;;  %vm1365_vm0 = vcmask 849664  }
 0x262   : > { %2353 = vmatmul.mubr.bf16.gmra.mrb[8].mxu0 %v2164_v51  ;;  %1913 = vst.msk [vmem:[#allocation2 + $0x98] sm:$0x3f] %vm4894_vm4, %v1893_v9  ;;  %vm4899_vm4 = vcmask 587264   ;;  %v2379_v31 = vrot.slane %v2342_v16, 2  ;;  %v2449_v6 = vsel %vm2409_vm10, %v2441_v26, 0.0 }
 0x263   : > { %v1891_v11 = vpop.permute.xlu0 %1890 }
 0x264   : > { %1912 = vst.msk [vmem:[#allocation2 + $0x88] sm:$0xff] %vm4895_vm9, %v1891_v11  ;;  %vm1429_vm9 = vcmask 915264  }
 0x265   : > { %v1299_v59 = vpop.permute.xlu1 %1298 }
 0x266   : > { %1321 = vst.msk [vmem:[#allocation2 + $0x90] sm:$0x3f] %vm1320_vm13, %v1299_v59  ;;  %vm4900_vm13 = vcmask 654912  }
 0x267   : > { %v1297_v53 = vpop.permute.xlu0 %1296 }
 0x268   : > { %1319 = vst.msk [vmem:[#allocation2 + $0x80] sm:$0xff] %vm4896_vm14, %v1297_v53  ;;  %vm1492_vm14 = vcmask 980864  }
 0x269   : > { %v1954_v20 = vpop.permute.xlu1 %1953 }
 0x26a   : > { %1974 = vst.msk [vmem:[#allocation2 + $0x98] sm:$0x3f] %vm4897_vm15, %v1954_v20  ;;  %vm1537_vm15 = vcmask 1046464  }
 0x26b   : > { %v1952_v46 = vpop.permute.xlu0 %1951 }
 0x26c   : > { %1973 = vst.msk [vmem:[#allocation2 + $0x88] sm:$0xff] %vm4898_vm12, %v1952_v46 }
 0x26d   : > { %v1344_v63 = vpop.permute.xlu1 %1343 }
 0x26e   : > { %1366 = vst.msk [vmem:[#allocation2 + $0x90] sm:$0x3f] %vm1365_vm0, %v1344_v63 }
 0x26f   : > { %v1342_v39 = vpop.permute.xlu0 %1341 }
 0x270   : > { %1364 = vst.msk [vmem:[#allocation2 + $0x80] sm:$0xff] %vm1355_vm6, %v1342_v39  ;;  %vm4901_vm6 = vcmask 982912  }
 0x271   : > { %v1997_v22 = vpop.permute.xlu1 %1996 }
 0x272   : > { %2017 = vst.msk [vmem:[#allocation2 + $0x98] sm:$0x3f] %vm4899_vm4, %v1997_v22 }
 0x273   : > { %v1995_v47 = vpop.permute.xlu0 %1994 }
 0x274   : > { %2016 = vst.msk [vmem:[#allocation2 + $0x88] sm:$0xff] %vm1136_vm1, %v1995_v47  ;;  %vm4902_vm1 = vcmask 720512  }
 0x275   : > { %v1408_v52 = vpop.permute.xlu1 %1407 }
 0x276   : > { %1430 = vst.msk [vmem:[#allocation2 + $0x90] sm:$0x3f] %vm1429_vm9, %v1408_v52 }
 0x277   : > { %v1406_v2 = vpop.permute.xlu0 %1405 }
 0x278   : > { %1428 = vst.msk [vmem:[#allocation2 + $0x80] sm:$0xff] %vm1419_vm2, %v1406_v2  ;;  %vm4903_vm2 = vcmask 1048512  }
 0x279   : > { %v2058_v42 = vpop.permute.xlu1 %2057 }
 0x27a   : > { %2078 = vst.msk [vmem:[#allocation2 + $0x98] sm:$0x3f] %vm1198_vm8, %v2058_v42  ;;  %vm4904_vm8 = vcmask 719872  }
 0x27b   : > { %v2056_v55 = vpop.permute.xlu0 %2055 }
 0x27c   : > { %2077 = vst.msk [vmem:[#allocation2 + $0x88] sm:$0xff] %vm4900_vm13, %v2056_v55 }
 0x27d   : > { %v1471_v15 = vpop.permute.xlu1 %1470 }
 0x27e   : > { %1493 = vst.msk [vmem:[#allocation2 + $0x90] sm:$0x3f] %vm1492_vm14, %v1471_v15 }
 0x27f   : > { %v1469_v27 = vpop.permute.xlu0 %1468 }
 0x280   : > { %1491 = vst.msk [vmem:[#allocation2 + $0x80] sm:$0xff] %vm4901_vm6, %v1469_v27 }
 0x281   : > { %v2119_v14 = vpop.permute.xlu1 %2118 }
 0x282   : > { %2139 = vst.msk [vmem:[#allocation2 + $0x98] sm:$0x3f] %vm1259_vm11, %v2119_v14 }
 0x283   : > { %v2117_v21 = vpop.permute.xlu0 %2116 }
 0x284   : > { %2138 = vst.msk [vmem:[#allocation2 + $0x88] sm:$0xff] %vm4902_vm1, %v2117_v21 }
 0x285   : > { %v1516_v5 = vpop.permute.xlu1 %1515 }
 0x286   : > { %1538 = vst.msk [vmem:[#allocation2 + $0x90] sm:$0x3f] %vm1537_vm15, %v1516_v5 }
 0x287   : > { %v1514_v50 = vpop.permute.xlu0 %1513 }
 0x288   : > { %1536 = vst.msk [vmem:[#allocation2 + $0x80] sm:$0xff] %vm4903_vm2, %v1514_v50 }
 0x289   : > { %v2159_v10 = vld [vmem:[#allocation2 + $0x98] sm:$0x3f] }
 0x28b   : > { %v2157_v60 = vld [vmem:[#allocation2 + $0x88] sm:$0xff] }
 0x28c   : > { %v2169_v32 = vpack.c.bf16 %v2159_v10, %v2157_v60 }
 0x28d   : > { %v2158_v3 = vld [vmem:[#allocation2 + $0x90] sm:$0x3f] }
 0x28e   : > { %2689 = vmatprep.mubr.msk.bf16.mxu1 %vm4904_vm8, %v2169_v32 }
 0x28f   : > { %v2156_v44 = vld [vmem:[#allocation2 + $0x80] sm:$0xff] }
 0x290   : > { %v2168_v0 = vpack.c.bf16 %v2158_v3, %v2156_v44 }
 0x292   : > { %2369 = vmatmul.mubr.bf16.gmra.mrb[4].mxu1 %v2168_v0 }
 0x2b5   : > { %v2346_v62 = vpop.f32.mrb[4].mxu0 }
 0x2b6   : > { %v2347_v18 = vadd.f32 %v4657_v34, %v2346_v62  ;;  %v2348_v33 = vpop.f32.mrb[5].mxu0 }
 0x2b7   : > { %v2349_v57 = vpop.f32.mrb[6].mxu0 }
 0x2b8   : > { %v2380_v1 = vrot.slane %v2347_v18, 2  ;;  %v2350_v28 = vadd.f32 %v4657_v34, %v2349_v57  ;;  %v2351_v58 = vpop.f32.mrb[7].mxu0  ;;  %v2384_v48 = vrot.slane %v2347_v18, 4 }
 0x2ba   : > { %v2381_v30 = vsel %vm739_vm3, %v2379_v31, %v2380_v1  ;;  %v2385_v25 = vrot.slane %v2350_v28, 4  ;;  %v2389_v59 = vrot.slane %v2350_v28, 6 }
 0x2bb   : > { %2411 = vst.msk [vmem:[%s4663_s21 + $0x8] sm:$0xff] %vm2409_vm10, %v2381_v30  ;;  %v2419_v35 = vsel %vm2409_vm10, %v2381_v30, 0.0  ;;  %v2442_v19 = vmul.f32 %v2381_v30, %v2381_v30 }
 0x2bc   : > { %v2420_v45 = vadd.f32 %v2419_v35, %v2418_v56  ;;  %v2386_v29 = vsel %vm911_vm5, %v2384_v48, %v2385_v25 }
 0x2bd   : > { %v2450_v8 = vsel %vm2409_vm10, %v2442_v19, 0.0  ;;  %2412 = vst.msk [vmem:[%s4663_s21 + $0x10] sm:$0xff] %vm2409_vm10, %v2386_v29  ;;  %v2421_v49 = vsel %vm2409_vm10, %v2386_v29, 0.0  ;;  %v2443_v24 = vmul.f32 %v2386_v29, %v2386_v29 }
 0x2be   : > { %v2451_v54 = vadd.f32 %v2450_v8, %v2449_v6  ;;  %v2422_v41 = vadd.f32 %v2421_v49, %v2420_v45 }
 0x2bf   : > { %v2452_v12 = vsel %vm2409_vm10, %v2443_v24, 0.0 }
 0x2c0   : > { %v2453_v17 = vadd.f32 %v2452_v12, %v2451_v54 }
 0x319   : > { %v2362_v37 = vpop.f32.mrb[0].mxu1 }
 0x31a   : > { %v2363_v23 = vadd.f32 %v4657_v34, %v2362_v37  ;;  %v2364_v40 = vpop.f32.mrb[1].mxu1 }
 0x31b   : > { %v2365_v36 = vpop.f32.mrb[2].mxu1 }
 0x31c   : > { %v2366_v61 = vadd.f32 %v4657_v34, %v2365_v36  ;;  %v2367_v7 = vpop.f32.mrb[3].mxu1  ;;  %v2395_v43 = vrot.slane %v2363_v23, 2 }
 0x31e   : > { %v2396_v4 = vrot.slane %v2366_v61, 2  ;;  %v2400_v16 = vrot.slane %v2366_v61, 4 }
 0x320   : > { %v2397_v38 = vsel %vm739_vm3, %v2395_v43, %v2396_v4  ;;  %vm2439_vm3 = vcmask 122880  }
 0x321   : > { %2415 = vst.msk [vmem:[%s4663_s21 + $0x28] sm:$0xff] %vm2409_vm10, %v2397_v38  ;;  %v2446_v2 = vmul.f32 %v2397_v38, %v2397_v38  ;;  %v2427_v14 = vsel %vm2409_vm10, %v2397_v38, 0.0 }
 0x323   : > { %v2458_v10 = vsel %vm2409_vm10, %v2446_v2, 0.0 }
 0x335   : > { %v2354_v13 = vpop.f32.mrb[8].mxu0 }
 0x336   : > { %v2355_v51 = vadd.f32 %v4657_v34, %v2354_v13  ;;  %v2356_v9 = vpop.f32.mrb[9].mxu0 }
 0x337   : > { %v2357_v11 = vpop.f32.mrb[10].mxu0 }
 0x338   : > { %v2390_v53 = vrot.slane %v2355_v51, 6  ;;  %v2358_v20 = vadd.f32 %v4657_v34, %v2357_v11  ;;  %v2359_v46 = vpop.f32.mrb[11].mxu0 }
 0x33a   : > { %v2391_v63 = vsel %vm1084_vm7, %v2389_v59, %v2390_v53  ;;  %2414 = vst.msk [vmem:[%s4663_s21 + $0x20] sm:$0xff] %vm2409_vm10, %v2358_v20  ;;  %v2445_v47 = vmul.f32 %v2358_v20, %v2358_v20  ;;  %v2425_v55 = vsel %vm2409_vm10, %v2358_v20, 0.0 }
 0x33b   : > { %2413 = vst.msk [vmem:[%s4663_s21 + $0x18] sm:$0xff] %vm2409_vm10, %v2391_v63  ;;  %v2423_v39 = vsel %vm2409_vm10, %v2391_v63, 0.0  ;;  %v2444_v22 = vmul.f32 %v2391_v63, %v2391_v63 }
 0x33c   : > { %v2424_v52 = vadd.f32 %v2423_v39, %v2422_v41  ;;  %v2456_v21 = vsel %vm2409_vm10, %v2445_v47, 0.0 }
 0x33d   : > { %v2454_v42 = vsel %vm2409_vm10, %v2444_v22, 0.0 }
 0x33e   : > { %v2426_v15 = vadd.f32 %v2425_v55, %v2424_v52  ;;  %v2455_v27 = vadd.f32 %v2454_v42, %v2453_v17 }
 0x340   : > { %v2428_v5 = vadd.f32 %v2427_v14, %v2426_v15  ;;  %v2457_v50 = vadd.f32 %v2456_v21, %v2455_v27 }
 0x342   : > { %v2459_v60 = vadd.f32 %v2458_v10, %v2457_v50 }
 0x365   : > { %v2370_v32 = vpop.f32.mrb[4].mxu1 }
 0x366   : > { %v2371_v3 = vadd.f32 %v4657_v34, %v2370_v32  ;;  %v2372_v44 = vpop.f32.mrb[5].mxu1 }
 0x367   : > { %v2373_v0 = vpop.f32.mrb[6].mxu1 }
 0x368   : > { %v2401_v62 = vrot.slane %v2371_v3, 4  ;;  %v2374_v18 = vadd.f32 %v4657_v34, %v2373_v0  ;;  %v2375_v33 = vpop.f32.mrb[7].mxu1  ;;  %v2405_v31 = vrot.slane %v2371_v3, 6 }
 0x36a   : > { %v2402_v57 = vsel %vm911_vm5, %v2400_v16, %v2401_v62  ;;  %v2406_v1 = vrot.slane %v2374_v18, 6 }
 0x36b   : > { %2416 = vst.msk [vmem:[%s4663_s21 + $0x30] sm:$0xff] %vm2409_vm10, %v2402_v57  ;;  %v2429_v28 = vsel %vm2409_vm10, %v2402_v57, 0.0  ;;  %v2447_v58 = vmul.f32 %v2402_v57, %v2402_v57 }
 0x36c   : > { %v2430_v26 = vadd.f32 %v2429_v28, %v2428_v5  ;;  %v2407_v30 = vsel %vm1084_vm7, %v2405_v31, %v2406_v1 }
 0x36d   : > { %v2460_v48 = vsel %vm2409_vm10, %v2447_v58, 0.0  ;;  %2417 = vst.msk [vmem:[%s4663_s21 + $0x38] sm:$0xff] %vm2409_vm10, %v2407_v30  ;;  %v2431_v34 = vsel %vm2409_vm10, %v2407_v30, 0.0  ;;  %v2448_v25 = vmul.f32 %v2407_v30, %v2407_v30 }
 0x36e   : > { %v2461_v56 = vadd.f32 %v2460_v48, %v2459_v60  ;;  %v2432_v35 = vadd.f32 %v2431_v34, %v2430_v26 }
 0x36f   : > { %v2462_v19 = vsel %vm2409_vm10, %v2448_v25, 0.0 }
 0x370   : > { %v2433_v45 = vrot.slane %v2432_v35, 4  ;;  %v2463_v29 = vadd.f32 %v2462_v19, %v2461_v56 }
 0x372   : > { %v2434_v6 = vadd.f32 %v2433_v45, %v2432_v35  ;;  %v2464_v8 = vrot.slane %v2463_v29, 4 }
 0x374   : > { %v2435_v49 = vrot.slane %v2434_v6, 2  ;;  %v2465_v24 = vadd.f32 %v2464_v8, %v2463_v29 }
 0x376   : > { %v2436_v54 = vadd.f32 %v2435_v49, %v2434_v6  ;;  %v2466_v41 = vrot.slane %v2465_v24, 2 }
 0x378   : > { %v2437_v12 = vrot.slane %v2436_v54, 1  ;;  %v2467_v17 = vadd.f32 %v2466_v41, %v2465_v24 }
 0x37a   : > { %v2438_v37 = vadd.f32 %v2437_v12, %v2436_v54  ;;  %v2468_v23 = vrot.slane %v2467_v17, 1 }
 0x37c   : > { %2440 = vst.msk [vmem:[%s444_s12] sm:$0x1] %vm2439_vm3, %v2438_v37  ;;  %v2469_v40 = vadd.f32 %v2468_v23, %v2467_v17 }
 0x37e   : > { %2470 = vst.msk [vmem:[%s444_s12 + $0x1] sm:$0x1] %vm2439_vm3, %v2469_v40 }
 0x37f PF: > { %s19_s9 = sadd.s32 1, %s2923_s9   ;;  %s4905_s27 = smov %s2915_s29 }
 0x380   : > { %p16_p10 = scmp.ge.s32.totalorder %s19_s9, 18   ;;  %s4906_s28 = smov %s2919_s30 }
 0x381   : > { %s4907_s29 = smov %s4910_s10  ;;  %s4908_s30 = smov %s4914_s11 }
 0x382   :  { %18 = sbr.rel (!%p16_p10) target bundleno = 3 (0x3), region = 96 }

</bundles_post_ra>
